<compile_context>
chip_gen: v7x
topology: tpu7x:2x2x1
jax: 0.10.0
libtpu: 0.0.40
codegen_flags: <defaults>
</compile_context>

<pallas_src>
import math

import numpy as np

import jax
import jax.numpy as jnp
from jax import lax
from jax.experimental import pallas as pl
from jax.experimental.pallas import tpu as pltpu

# cv2.xfeatures2d.DAISY_create() defaults
RADIUS = 15.0
Q_RADIUS = 3
Q_THETA = 8
Q_HIST = 8
NLVL = Q_RADIUS + 1                            # cumulative smoothing levels 1..4
DESC_DIM = (Q_RADIUS * Q_THETA + 1) * Q_HIST   # 200

# assumed ImageNet normalization constants for unnormalize()
_MEAN = (0.485, 0.456, 0.406)
_STD = (0.229, 0.224, 0.225)

# geometry: max ring offset 15 px, max cumulative binomial radius 2*NLVL = 8,
# gradients need 1 more px (absorbed by RING_EXT > max ring offset).
RING_EXT = 16              # sample-domain apron (> max ring offset 15)
HALO = 24                  # haloed input window apron = RING_EXT + 2*NLVL


def _ring_locations():
    """Static (level, oy, ox) per ring location (25 entries, 8 bins each)."""
    locs = [(0, 0, 0)]                                  # center (1 smoothing pass)
    for ring in range(1, Q_RADIUS + 1):
        rad = RADIUS * ring / Q_RADIUS
        for a in range(Q_THETA):
            ang = 2.0 * math.pi * a / Q_THETA
            ox = int(round(rad * math.cos(ang)))
            oy = int(round(rad * math.sin(ang)))
            locs.append((ring, oy, ox))
    return tuple(locs)


LOCATIONS = _ring_locations()
CHANNELS = tuple((lvl, t, oy, ox)
                 for (lvl, oy, ox) in LOCATIONS for t in range(Q_HIST))
assert len(CHANNELS) == DESC_DIM
# geometry guards: ring offsets must stay strictly inside the RING_EXT apron
# (the 1 px slack feeds the gradient stencil) and the halo must cover
# ring + cumulative binomial support.  Changing RADIUS / Q_RADIUS without
# revisiting these constants would silently corrupt tile borders.
assert max(max(abs(oy), abs(ox)) for (_, oy, ox) in LOCATIONS) < RING_EXT
assert HALO >= RING_EXT + 2 * NLVL


def _binom_weights(m):
    """m-fold convolution of the [1,4,6,4,1]/16 binomial kernel (length 4m+1)."""
    k = np.array([1.0, 4.0, 6.0, 4.0, 1.0], np.float64) / 16.0
    w = np.array([1.0], np.float64)
    for _ in range(m):
        w = np.convolve(w, k)
    return w


def _smooth_matrix(n_out, n_in, offset, m):
    """A[i, j] = weight of input row j in the m-pass smoothed value at row i+offset."""
    w = _binom_weights(m)
    rad = 2 * m
    a = np.zeros((n_out, n_in), np.float32)
    for i in range(n_out):
        c = i + offset
        lo = max(0, c - rad)
        hi = min(n_in - 1, c + rad)
        for j in range(lo, hi + 1):
            a[i, j] = w[j - c + rad]
    return a


def _unnorm_u8(c, idx):
    # unnormalize (ImageNet stats assumed) + touint8 quantization emulated in f32.
    # TODO(synk): torch touint8 (.mul(255).byte()) wraps out-of-range values; we clip+floor.
    v = c * _STD[idx] + _MEAN[idx]
    return jnp.clip(jnp.floor(v * 255.0), 0.0, 255.0)


def _vmem_capacity_bytes():
    try:
        return int(pltpu.get_tpu_info().vmem_capacity_bytes)
    except Exception:
        return 128 * 1024 * 1024


def _vmem_limit_bytes():
    # 3/4 of physical VMEM (v5e/v6e: 96 MiB, v7x: 48 MiB).  Fallback assumes a
    # 128 MiB part per review guidance (48 MiB was needlessly small on v5e/v6e).
    try:
        return int(pltpu.get_tpu_info().vmem_capacity_bytes) * 3 // 4
    except Exception:
        return 96 * 1024 * 1024


def _default_tile_h():
    # v7x (64 MiB VMEM) needs a half-height tile so the double-buffered
    # (1,200,th,128) output block fits next to the padded image slab.
    return 64 if _vmem_capacity_bytes() <= 64 * 1024 * 1024 else 128


def _make_kernel(th, tw, wh, ww, sh, sw, ht, wt, out_dtype):
    cen = RING_EXT  # sample-domain index of the tile's top-left output pixel

    def kernel(img_ref, a_ref, c_ref, out_ref, row_ref, lvl_ref):
        # img_ref : (1, 3, Hp, Wp)        full replicate-padded image slab (VMEM)
        # a_ref   : (NLVL*sh, wh) bf16    row smoothing matrices, levels stacked on M
        # c_ref   : (NLVL, ww, sw) bf16   column smoothing matrices
        # out_ref : (1, DESC_DIM, th, tw) output tile
        # row_ref : (NLVL, Q_HIST*sh, ww) f32 scratch: row-smoothed maps
        # lvl_ref : (NLVL*Q_HIST, sh, sw) f32 scratch: fully smoothed level maps
        ti = pl.program_id(1)
        tj = pl.program_id(2)
        r0 = 0 if ht == 1 else pl.multiple_of(ti * th, th)
        c0 = 0 if wt == 1 else pl.multiple_of(tj * tw, tw)

        rr = img_ref[0, 0, pl.ds(r0, wh), pl.ds(c0, ww)]
        gg = img_ref[0, 1, pl.ds(r0, wh), pl.ds(c0, ww)]
        bb = img_ref[0, 2, pl.ds(r0, wh), pl.ds(c0, ww)]
        gray = (0.299 * _unnorm_u8(rr, 0)
                + 0.587 * _unnorm_u8(gg, 1)
                + 0.114 * _unnorm_u8(bb, 2))

        # central-difference gradients (window border rows/cols only feed the
        # outermost sample rows/cols, which the HALO apron keeps unread).
        dx = 0.5 * (jnp.roll(gray, -1, axis=1) - jnp.roll(gray, 1, axis=1))
        dy = 0.5 * (jnp.roll(gray, -1, axis=0) - jnp.roll(gray, 1, axis=0))

        a_stack = a_ref[...]   # hoisted: loaded once, stays resident for the row pass

        # --- row pass: one tall bf16 matmul per orientation (levels on M) ---
        for t in range(Q_HIST):
            theta = 2.0 * math.pi * t / Q_HIST
            layer = jnp.maximum(
                math.cos(theta) * dx + math.sin(theta) * dy, 0.0
            ).astype(jnp.bfloat16)
            rt = jnp.dot(a_stack, layer, preferred_element_type=jnp.float32)
            for lvl in range(NLVL):
                row_ref[lvl, pl.ds(t * sh, sh), :] = rt[lvl * sh:(lvl + 1) * sh, :]

        # --- column pass: one tall bf16 matmul per level (orientations on M) ---
        for lvl in range(NLVL):
            m = row_ref[lvl].astype(jnp.bfloat16)            # (Q_HIST*sh, ww)
            s = jnp.dot(m, c_ref[lvl], preferred_element_type=jnp.float32)
            for t in range(Q_HIST):
                lvl_ref[lvl * Q_HIST + t, :, :] = s[t * sh:(t + 1) * sh, :]

        # --- pass 1: sum of squares from lvl_ref only (no out_ref traffic) ---
        ss = jnp.zeros((th, tw), jnp.float32)
        for (lvl, oy, ox) in LOCATIONS:
            v = lvl_ref[pl.ds(lvl * Q_HIST, Q_HIST),
                        pl.ds(cen + oy, th), pl.ds(cen + ox, tw)]
            ss = ss + jnp.sum(v * v, axis=0)

        # matches F.normalize(p=2, dim=1, eps=1e-12): one rsqrt per pixel (EUP).
        inv = lax.rsqrt(jnp.maximum(ss, 1e-24))

        # --- pass 2: single fused write of each 8-bin channel block ---
        for bi, (lvl, oy, ox) in enumerate(LOCATIONS):
            v = lvl_ref[pl.ds(lvl * Q_HIST, Q_HIST),
                        pl.ds(cen + oy, th), pl.ds(cen + ox, tw)]
            out_ref[0, pl.ds(bi * Q_HIST, Q_HIST), :, :] = (v * inv).astype(out_dtype)

    return kernel


def daisy_feature(images, *, tile_h=None, tile_w=None, out_dtype=jnp.float32):
    """images: [N, 3, H, W] f32 normalized images -> [N, 200, H, W] descriptors.

    out_dtype=jnp.bfloat16 halves HBM writeback (the v5e roofline) if the
    consumer tolerates it; default keeps the module's f32 semantics.
    """
    images = jnp.asarray(images, jnp.float32)
    N, C, H, W = images.shape
    assert C == 3

    th = tile_h if tile_h is not None else min(_default_tile_h(), H)
    tw = tile_w if tile_w is not None else min(128, W)
    ht = (H + th - 1) // th
    wt = (W + tw - 1) // tw
    hc, wc = ht * th, wt * tw

    # (8,128) rule: a tiled block dim must be a multiple of 8/128 unless it
    # spans the full (padded) output dim.
    if ht > 1:
        assert th % 8 == 0
    if wt > 1:
        assert tw % 128 == 0

    wh, ww = th + 2 * HALO, tw + 2 * HALO            # haloed input window
    sh, sw = th + 2 * RING_EXT, tw + 2 * RING_EXT    # smoothed sample domain

    # replicate-pad: HALO apron + round spatial dims up to the tile grid.
    padded = jnp.pad(
        images,
        ((0, 0), (0, 0), (HALO, HALO + hc - H), (HALO, HALO + wc - W)),
        mode="edge")
    hp, wp = int(padded.shape[2]), int(padded.shape[3])

    # banded cumulative-binomial smoothing matrices (bf16 for the MXU):
    # row factors stacked along M (levels), column factors stacked on a batch dim.
    off = HALO - RING_EXT
    a_stack = jnp.asarray(
        np.concatenate([_smooth_matrix(sh, wh, off, m) for m in range(1, NLVL + 1)],
                       axis=0),
        jnp.bfloat16)                                            # (NLVL*sh, wh)
    c_all = jnp.asarray(
        np.stack([_smooth_matrix(sw, ww, off, m).T for m in range(1, NLVL + 1)],
                 axis=0),
        jnp.bfloat16)                                            # (NLVL, ww, sw)

    kernel = _make_kernel(th, tw, wh, ww, sh, sw, ht, wt, out_dtype)

    out_itemsize = np.dtype(out_dtype).itemsize
    flops = N * ht * wt * (
        Q_HIST * 2 * (NLVL * sh) * wh * ww          # row pass matmuls
        + NLVL * 2 * (Q_HIST * sh) * ww * sw)       # column pass matmuls
    bytes_acc = (N * 3 * hp * wp * 4
                 + N * DESC_DIM * hc * wc * out_itemsize
                 + NLVL * sh * wh * 2 + NLVL * ww * sw * 2)

    out = pl.pallas_call(
        kernel,
        out_shape=jax.ShapeDtypeStruct((N, DESC_DIM, hc, wc), out_dtype),
        grid=(N, ht, wt),
        in_specs=[
            # full padded image slab: only re-DMA'd when the batch index changes
            pl.BlockSpec((1, 3, hp, wp), lambda n, i, j: (n, 0, 0, 0)),
            pl.BlockSpec((NLVL * sh, wh), lambda n, i, j: (0, 0)),
            pl.BlockSpec((NLVL, ww, sw), lambda n, i, j: (0, 0, 0)),
        ],
        out_specs=pl.BlockSpec((1, DESC_DIM, th, tw),
                               lambda n, i, j: (n, 0, i, j)),
        scratch_shapes=[
            pltpu.VMEM((NLVL, Q_HIST * sh, ww), jnp.float32),
            pltpu.VMEM((NLVL * Q_HIST, sh, sw), jnp.float32),
        ],
        compiler_params=pltpu.CompilerParams(
            dimension_semantics=("parallel", "parallel", "parallel"),
            vmem_limit_bytes=_vmem_limit_bytes(),
        ),
        cost_estimate=pl.CostEstimate(
            flops=int(flops),
            transcendentals=int(N * hc * wc),
            bytes_accessed=int(bytes_acc)),
    )(padded, a_stack, c_all)

    return out[:, :, :H, :W]


def _daisy_reference(images_np):
    """Pure-numpy f32 reference implementing the same approximation."""
    x = np.asarray(images_np, np.float32)
    n_imgs, _, h, w = x.shape
    x = np.pad(x, ((0, 0), (0, 0), (HALO, HALO), (HALO, HALO)), mode="edge")
    w5 = np.array([1, 4, 6, 4, 1], np.float32) / 16.0

    def smooth_once(m):
        y = np.zeros_like(m)
        for k in range(5):
            y += w5[k] * np.roll(m, k - 2, axis=0)
        z = np.zeros_like(y)
        for k in range(5):
            z += w5[k] * np.roll(y, k - 2, axis=1)
        return z

    outs = []
    for n in range(n_imgs):
        rgb = []
        for i in range(3):
            v = x[n, i] * np.float32(_STD[i]) + np.float32(_MEAN[i])
            rgb.append(np.clip(np.floor(v * 255.0), 0.0, 255.0).astype(np.float32))
        gray = 0.299 * rgb[0] + 0.587 * rgb[1] + 0.114 * rgb[2]
        dx = 0.5 * (np.roll(gray, -1, axis=1) - np.roll(gray, 1, axis=1))
        dy = 0.5 * (np.roll(gray, -1, axis=0) - np.roll(gray, 1, axis=0))
        layers = [np.maximum(math.cos(2.0 * math.pi * t / Q_HIST) * dx
                             + math.sin(2.0 * math.pi * t / Q_HIST) * dy, 0.0)
                  for t in range(Q_HIST)]
        levels, cur = [], layers
        for _ in range(NLVL):
            cur = [smooth_once(c) for c in cur]
            levels.append(cur)
        desc = np.stack(
            [levels[lvl][t][HALO + oy:HALO + oy + h, HALO + ox:HALO + ox + w]
             for (lvl, t, oy, ox) in CHANNELS], axis=0)
        nrm = np.sqrt(np.sum(desc * desc, axis=0, keepdims=True))
        outs.append(desc / np.maximum(nrm, 1e-12))
    return np.stack(outs, axis=0).astype(np.float32)


if __name__ == "__main__":
    key = jax.random.PRNGKey(0)
    # small NCHW batch of "normalized" images, consistent with the module input
    x = jax.random.normal(key, (2, 3, 16, 16), dtype=jnp.float32)

    # default (single-tile) path
    d1 = jax.block_until_ready(daisy_feature(x))
    assert d1.shape == (2, DESC_DIM, 16, 16)
    assert d1.dtype == jnp.float32

    # row-tiled path (exercises the haloed-window / dynamic-slice tiling)
    d2 = jax.block_until_ready(daisy_feature(x, tile_h=8))
    assert d2.shape == (2, DESC_DIM, 16, 16)

    # check against a pure-numpy f32 reference of the same math (tolerance
    # covers bf16 MXU smoothing vs sequential separable convolution rounding)
    ref = _daisy_reference(np.asarray(jax.device_get(x)))
    assert float(jnp.max(jnp.abs(d1 - jnp.asarray(ref)))) < 5e-2
    assert float(jnp.max(jnp.abs(d2 - jnp.asarray(ref)))) < 5e-2

    # per-pixel descriptor norms should be <= 1 (==1 where non-zero)
    norms = jnp.sqrt(jnp.sum(d1 * d1, axis=1))
    assert bool(jnp.all(norms <= 1.0 + 1e-2))
    assert bool(jnp.all(jnp.isfinite(d1)))

    print("KERNEL_OK")
</pallas_src>

<mosaic_0001>
module attributes {stable_mosaic.version = 11 : i64} {
  func.func @kernel(%arg0: i32, %arg1: i32, %arg2: i32, %arg3: memref<1x3x64x64xf32, #tpu.memory_space<vmem>>, %arg4: memref<192x64xbf16, #tpu.memory_space<vmem>>, %arg5: memref<4x64x48xbf16, #tpu.memory_space<vmem>>, %arg6: memref<1x200x16x16xf32, #tpu.memory_space<vmem>>, %arg7: memref<4x384x64xf32, #tpu.memory_space<vmem>>, %arg8: memref<32x48x48xf32, #tpu.memory_space<vmem>>) attributes {dimension_semantics = [#tpu.dimension_semantics<parallel>, #tpu.dimension_semantics<parallel>, #tpu.dimension_semantics<parallel>], iteration_bounds = array<i64: 2, 1, 1>, scalar_prefetch = 0 : i64, scratch_operands = 2 : i64, tpu.core_type = #tpu.core_type<tc>, window_params = [{transform_indices = @transform_0, window_bounds = array<i64: 1, 3, 64, 64>}, {pipeline_mode = #tpu.pipeline_mode<synchronous>, transform_indices = @transform_1, window_bounds = array<i64: 192, 64>}, {pipeline_mode = #tpu.pipeline_mode<synchronous>, transform_indices = @transform_2, window_bounds = array<i64: 4, 64, 48>}, {transform_indices = @transform_3, window_bounds = array<i64: 1, 200, 16, 16>}]} {
    %c0 = arith.constant 0 : index
    %c0_0 = arith.constant 0 : index
    %c0_1 = arith.constant 0 : index
    %c0_2 = arith.constant 0 : index
    %0 = vector.load %arg3[%c0, %c0_0, %c0_1, %c0_2] : memref<1x3x64x64xf32, #tpu.memory_space<vmem>>, vector<1x1x64x64xf32>
    %1 = vector.shape_cast %0 : vector<1x1x64x64xf32> to vector<64x64xf32>
    %c0_3 = arith.constant 0 : index
    %c1 = arith.constant 1 : index
    %c0_4 = arith.constant 0 : index
    %c0_5 = arith.constant 0 : index
    %2 = vector.load %arg3[%c0_3, %c1, %c0_4, %c0_5] : memref<1x3x64x64xf32, #tpu.memory_space<vmem>>, vector<1x1x64x64xf32>
    %3 = vector.shape_cast %2 : vector<1x1x64x64xf32> to vector<64x64xf32>
    %c0_6 = arith.constant 0 : index
    %c2 = arith.constant 2 : index
    %c0_7 = arith.constant 0 : index
    %c0_8 = arith.constant 0 : index
    %4 = vector.load %arg3[%c0_6, %c2, %c0_7, %c0_8] : memref<1x3x64x64xf32, #tpu.memory_space<vmem>>, vector<1x1x64x64xf32>
    %5 = vector.shape_cast %4 : vector<1x1x64x64xf32> to vector<64x64xf32>
    %cst = arith.constant 2.290000e-01 : f32
    %6 = vector.broadcast %cst : f32 to vector<64x64xf32>
    %7 = arith.mulf %1, %6 : vector<64x64xf32>
    %cst_9 = arith.constant 4.850000e-01 : f32
    %8 = vector.broadcast %cst_9 : f32 to vector<64x64xf32>
    %9 = arith.addf %7, %8 : vector<64x64xf32>
    %cst_10 = arith.constant 2.550000e+02 : f32
    %10 = vector.broadcast %cst_10 : f32 to vector<64x64xf32>
    %11 = arith.mulf %9, %10 : vector<64x64xf32>
    %12 = math.floor %11 : vector<64x64xf32>
    %cst_11 = arith.constant 0.000000e+00 : f32
    %cst_12 = arith.constant 2.550000e+02 : f32
    %13 = vector.broadcast %cst_11 : f32 to vector<64x64xf32>
    %14 = arith.maximumf %13, %12 : vector<64x64xf32>
    %15 = vector.broadcast %cst_12 : f32 to vector<64x64xf32>
    %16 = arith.minimumf %15, %14 : vector<64x64xf32>
    %cst_13 = arith.constant 2.990000e-01 : f32
    %17 = vector.broadcast %cst_13 : f32 to vector<64x64xf32>
    %18 = arith.mulf %17, %16 : vector<64x64xf32>
    %cst_14 = arith.constant 2.240000e-01 : f32
    %19 = vector.broadcast %cst_14 : f32 to vector<64x64xf32>
    %20 = arith.mulf %3, %19 : vector<64x64xf32>
    %cst_15 = arith.constant 4.560000e-01 : f32
    %21 = vector.broadcast %cst_15 : f32 to vector<64x64xf32>
    %22 = arith.addf %20, %21 : vector<64x64xf32>
    %cst_16 = arith.constant 2.550000e+02 : f32
    %23 = vector.broadcast %cst_16 : f32 to vector<64x64xf32>
    %24 = arith.mulf %22, %23 : vector<64x64xf32>
    %25 = math.floor %24 : vector<64x64xf32>
    %cst_17 = arith.constant 0.000000e+00 : f32
    %cst_18 = arith.constant 2.550000e+02 : f32
    %26 = vector.broadcast %cst_17 : f32 to vector<64x64xf32>
    %27 = arith.maximumf %26, %25 : vector<64x64xf32>
    %28 = vector.broadcast %cst_18 : f32 to vector<64x64xf32>
    %29 = arith.minimumf %28, %27 : vector<64x64xf32>
    %cst_19 = arith.constant 5.870000e-01 : f32
    %30 = vector.broadcast %cst_19 : f32 to vector<64x64xf32>
    %31 = arith.mulf %30, %29 : vector<64x64xf32>
    %32 = arith.addf %18, %31 : vector<64x64xf32>
    %cst_20 = arith.constant 2.250000e-01 : f32
    %33 = vector.broadcast %cst_20 : f32 to vector<64x64xf32>
    %34 = arith.mulf %5, %33 : vector<64x64xf32>
    %cst_21 = arith.constant 4.060000e-01 : f32
    %35 = vector.broadcast %cst_21 : f32 to vector<64x64xf32>
    %36 = arith.addf %34, %35 : vector<64x64xf32>
    %cst_22 = arith.constant 2.550000e+02 : f32
    %37 = vector.broadcast %cst_22 : f32 to vector<64x64xf32>
    %38 = arith.mulf %36, %37 : vector<64x64xf32>
    %39 = math.floor %38 : vector<64x64xf32>
    %cst_23 = arith.constant 0.000000e+00 : f32
    %cst_24 = arith.constant 2.550000e+02 : f32
    %40 = vector.broadcast %cst_23 : f32 to vector<64x64xf32>
    %41 = arith.maximumf %40, %39 : vector<64x64xf32>
    %42 = vector.broadcast %cst_24 : f32 to vector<64x64xf32>
    %43 = arith.minimumf %42, %41 : vector<64x64xf32>
    %cst_25 = arith.constant 1.140000e-01 : f32
    %44 = vector.broadcast %cst_25 : f32 to vector<64x64xf32>
    %45 = arith.mulf %44, %43 : vector<64x64xf32>
    %46 = arith.addf %32, %45 : vector<64x64xf32>
    %47 = vector.extract_strided_slice %46 {offsets = [0, 1], sizes = [64, 63], strides = [1, 1]} : vector<64x64xf32> to vector<64x63xf32>
    %48 = vector.extract_strided_slice %46 {offsets = [0, 0], sizes = [64, 1], strides = [1, 1]} : vector<64x64xf32> to vector<64x1xf32>
    %49 = tpu.concatenate %47, %48 in 1 : vector<64x63xf32>, vector<64x1xf32> -> vector<64x64xf32>
    %50 = vector.extract_strided_slice %46 {offsets = [0, 63], sizes = [64, 1], strides = [1, 1]} : vector<64x64xf32> to vector<64x1xf32>
    %51 = vector.extract_strided_slice %46 {offsets = [0, 0], sizes = [64, 63], strides = [1, 1]} : vector<64x64xf32> to vector<64x63xf32>
    %52 = tpu.concatenate %50, %51 in 1 : vector<64x1xf32>, vector<64x63xf32> -> vector<64x64xf32>
    %53 = arith.subf %49, %52 : vector<64x64xf32>
    %cst_26 = arith.constant 5.000000e-01 : f32
    %54 = vector.broadcast %cst_26 : f32 to vector<64x64xf32>
    %55 = arith.mulf %54, %53 : vector<64x64xf32>
    %56 = vector.extract_strided_slice %46 {offsets = [1, 0], sizes = [63, 64], strides = [1, 1]} : vector<64x64xf32> to vector<63x64xf32>
    %57 = vector.extract_strided_slice %46 {offsets = [0, 0], sizes = [1, 64], strides = [1, 1]} : vector<64x64xf32> to vector<1x64xf32>
    %58 = tpu.concatenate %56, %57 in 0 : vector<63x64xf32>, vector<1x64xf32> -> vector<64x64xf32>
    %59 = vector.extract_strided_slice %46 {offsets = [63, 0], sizes = [1, 64], strides = [1, 1]} : vector<64x64xf32> to vector<1x64xf32>
    %60 = vector.extract_strided_slice %46 {offsets = [0, 0], sizes = [63, 64], strides = [1, 1]} : vector<64x64xf32> to vector<63x64xf32>
    %61 = tpu.concatenate %59, %60 in 0 : vector<1x64xf32>, vector<63x64xf32> -> vector<64x64xf32>
    %62 = arith.subf %58, %61 : vector<64x64xf32>
    %cst_27 = arith.constant 5.000000e-01 : f32
    %63 = vector.broadcast %cst_27 : f32 to vector<64x64xf32>
    %64 = arith.mulf %63, %62 : vector<64x64xf32>
    %c0_28 = arith.constant 0 : index
    %c0_29 = arith.constant 0 : index
    %65 = vector.load %arg4[%c0_28, %c0_29] : memref<192x64xbf16, #tpu.memory_space<vmem>>, vector<192x64xbf16>
    %cst_30 = arith.constant 1.000000e+00 : f32
    %66 = vector.broadcast %cst_30 : f32 to vector<64x64xf32>
    %67 = arith.mulf %66, %55 : vector<64x64xf32>
    %cst_31 = arith.constant 0.000000e+00 : f32
    %68 = vector.broadcast %cst_31 : f32 to vector<64x64xf32>
    %69 = arith.mulf %68, %64 : vector<64x64xf32>
    %70 = arith.addf %67, %69 : vector<64x64xf32>
    %cst_32 = arith.constant 0.000000e+00 : f32
    %71 = vector.broadcast %cst_32 : f32 to vector<64x64xf32>
    %72 = arith.maximumf %70, %71 : vector<64x64xf32>
    %73 = arith.truncf %72 : vector<64x64xf32> to vector<64x64xbf16>
    %cst_33 = arith.constant dense<0.000000e+00> : vector<192x64xf32>
    %74 = tpu.matmul %65, %73, %cst_33 {dimension_numbers = #tpu.dot_dimension_numbers<[1], [0], [0], [1], [0, 0, 1, 1], [], []>} : vector<192x64xbf16>, vector<64x64xbf16>, vector<192x64xf32> -> vector<192x64xf32>
    %75 = vector.extract_strided_slice %74 {offsets = [0, 0], sizes = [48, 64], strides = [1, 1]} : vector<192x64xf32> to vector<48x64xf32>
    %c0_34 = arith.constant 0 : index
    %c0_35 = arith.constant 0 : index
    %c0_36 = arith.constant 0 : index
    %76 = vector.load %arg7[%c0_34, %c0_35, %c0_36] : memref<4x384x64xf32, #tpu.memory_space<vmem>>, vector<1x48x64xf32>
    %77 = vector.shape_cast %76 : vector<1x48x64xf32> to vector<48x64xf32>
    %78 = vector.shape_cast %75 : vector<48x64xf32> to vector<1x48x64xf32>
    tpu.vector_store %arg7[%c0_34, %c0_35, %c0_36], %78 {strides = array<i32>} : memref<4x384x64xf32, #tpu.memory_space<vmem>>, vector<1x48x64xf32>,
    %79 = vector.extract_strided_slice %74 {offsets = [48, 0], sizes = [48, 64], strides = [1, 1]} : vector<192x64xf32> to vector<48x64xf32>
    %c1_37 = arith.constant 1 : index
    %c0_38 = arith.constant 0 : index
    %c0_39 = arith.constant 0 : index
    %80 = vector.load %arg7[%c1_37, %c0_38, %c0_39] : memref<4x384x64xf32, #tpu.memory_space<vmem>>, vector<1x48x64xf32>
    %81 = vector.shape_cast %80 : vector<1x48x64xf32> to vector<48x64xf32>
    %82 = vector.shape_cast %79 : vector<48x64xf32> to vector<1x48x64xf32>
    tpu.vector_store %arg7[%c1_37, %c0_38, %c0_39], %82 {strides = array<i32>} : memref<4x384x64xf32, #tpu.memory_space<vmem>>, vector<1x48x64xf32>,
    %83 = vector.extract_strided_slice %74 {offsets = [96, 0], sizes = [48, 64], strides = [1, 1]} : vector<192x64xf32> to vector<48x64xf32>
    %c2_40 = arith.constant 2 : index
    %c0_41 = arith.constant 0 : index
    %c0_42 = arith.constant 0 : index
    %84 = vector.load %arg7[%c2_40, %c0_41, %c0_42] : memref<4x384x64xf32, #tpu.memory_space<vmem>>, vector<1x48x64xf32>
    %85 = vector.shape_cast %84 : vector<1x48x64xf32> to vector<48x64xf32>
    %86 = vector.shape_cast %83 : vector<48x64xf32> to vector<1x48x64xf32>
    tpu.vector_store %arg7[%c2_40, %c0_41, %c0_42], %86 {strides = array<i32>} : memref<4x384x64xf32, #tpu.memory_space<vmem>>, vector<1x48x64xf32>,
    %87 = vector.extract_strided_slice %74 {offsets = [144, 0], sizes = [48, 64], strides = [1, 1]} : vector<192x64xf32> to vector<48x64xf32>
    %c3 = arith.constant 3 : index
    %c0_43 = arith.constant 0 : index
    %c0_44 = arith.constant 0 : index
    %88 = vector.load %arg7[%c3, %c0_43, %c0_44] : memref<4x384x64xf32, #tpu.memory_space<vmem>>, vector<1x48x64xf32>
    %89 = vector.shape_cast %88 : vector<1x48x64xf32> to vector<48x64xf32>
    %90 = vector.shape_cast %87 : vector<48x64xf32> to vector<1x48x64xf32>
    tpu.vector_store %arg7[%c3, %c0_43, %c0_44], %90 {strides = array<i32>} : memref<4x384x64xf32, #tpu.memory_space<vmem>>, vector<1x48x64xf32>,
    %cst_45 = arith.constant 0.707106769 : f32
    %91 = vector.broadcast %cst_45 : f32 to vector<64x64xf32>
    %92 = arith.mulf %91, %55 : vector<64x64xf32>
    %cst_46 = arith.constant 0.707106769 : f32
    %93 = vector.broadcast %cst_46 : f32 to vector<64x64xf32>
    %94 = arith.mulf %93, %64 : vector<64x64xf32>
    %95 = arith.addf %92, %94 : vector<64x64xf32>
    %cst_47 = arith.constant 0.000000e+00 : f32
    %96 = vector.broadcast %cst_47 : f32 to vector<64x64xf32>
    %97 = arith.maximumf %95, %96 : vector<64x64xf32>
    %98 = arith.truncf %97 : vector<64x64xf32> to vector<64x64xbf16>
    %cst_48 = arith.constant dense<0.000000e+00> : vector<192x64xf32>
    %99 = tpu.matmul %65, %98, %cst_48 {dimension_numbers = #tpu.dot_dimension_numbers<[1], [0], [0], [1], [0, 0, 1, 1], [], []>} : vector<192x64xbf16>, vector<64x64xbf16>, vector<192x64xf32> -> vector<192x64xf32>
    %100 = vector.extract_strided_slice %99 {offsets = [0, 0], sizes = [48, 64], strides = [1, 1]} : vector<192x64xf32> to vector<48x64xf32>
    %c0_49 = arith.constant 0 : index
    %c48 = arith.constant 48 : index
    %c0_50 = arith.constant 0 : index
    %101 = vector.load %arg7[%c0_49, %c48, %c0_50] : memref<4x384x64xf32, #tpu.memory_space<vmem>>, vector<1x48x64xf32>
    %102 = vector.shape_cast %101 : vector<1x48x64xf32> to vector<48x64xf32>
    %103 = vector.shape_cast %100 : vector<48x64xf32> to vector<1x48x64xf32>
    tpu.vector_store %arg7[%c0_49, %c48, %c0_50], %103 {strides = array<i32>} : memref<4x384x64xf32, #tpu.memory_space<vmem>>, vector<1x48x64xf32>,
    %104 = vector.extract_strided_slice %99 {offsets = [48, 0], sizes = [48, 64], strides = [1, 1]} : vector<192x64xf32> to vector<48x64xf32>
    %c1_51 = arith.constant 1 : index
    %c48_52 = arith.constant 48 : index
    %c0_53 = arith.constant 0 : index
    %105 = vector.load %arg7[%c1_51, %c48_52, %c0_53] : memref<4x384x64xf32, #tpu.memory_space<vmem>>, vector<1x48x64xf32>
    %106 = vector.shape_cast %105 : vector<1x48x64xf32> to vector<48x64xf32>
    %107 = vector.shape_cast %104 : vector<48x64xf32> to vector<1x48x64xf32>
    tpu.vector_store %arg7[%c1_51, %c48_52, %c0_53], %107 {strides = array<i32>} : memref<4x384x64xf32, #tpu.memory_space<vmem>>, vector<1x48x64xf32>,
    %108 = vector.extract_strided_slice %99 {offsets = [96, 0], sizes = [48, 64], strides = [1, 1]} : vector<192x64xf32> to vector<48x64xf32>
    %c2_54 = arith.constant 2 : index
    %c48_55 = arith.constant 48 : index
    %c0_56 = arith.constant 0 : index
    %109 = vector.load %arg7[%c2_54, %c48_55, %c0_56] : memref<4x384x64xf32, #tpu.memory_space<vmem>>, vector<1x48x64xf32>
    %110 = vector.shape_cast %109 : vector<1x48x64xf32> to vector<48x64xf32>
    %111 = vector.shape_cast %108 : vector<48x64xf32> to vector<1x48x64xf32>
    tpu.vector_store %arg7[%c2_54, %c48_55, %c0_56], %111 {strides = array<i32>} : memref<4x384x64xf32, #tpu.memory_space<vmem>>, vector<1x48x64xf32>,
    %112 = vector.extract_strided_slice %99 {offsets = [144, 0], sizes = [48, 64], strides = [1, 1]} : vector<192x64xf32> to vector<48x64xf32>
    %c3_57 = arith.constant 3 : index
    %c48_58 = arith.constant 48 : index
    %c0_59 = arith.constant 0 : index
    %113 = vector.load %arg7[%c3_57, %c48_58, %c0_59] : memref<4x384x64xf32, #tpu.memory_space<vmem>>, vector<1x48x64xf32>
    %114 = vector.shape_cast %113 : vector<1x48x64xf32> to vector<48x64xf32>
    %115 = vector.shape_cast %112 : vector<48x64xf32> to vector<1x48x64xf32>
    tpu.vector_store %arg7[%c3_57, %c48_58, %c0_59], %115 {strides = array<i32>} : memref<4x384x64xf32, #tpu.memory_space<vmem>>, vector<1x48x64xf32>,
    %cst_60 = arith.constant 6.12323426E-17 : f32
    %116 = vector.broadcast %cst_60 : f32 to vector<64x64xf32>
    %117 = arith.mulf %116, %55 : vector<64x64xf32>
    %cst_61 = arith.constant 1.000000e+00 : f32
    %118 = vector.broadcast %cst_61 : f32 to vector<64x64xf32>
    %119 = arith.mulf %118, %64 : vector<64x64xf32>
    %120 = arith.addf %117, %119 : vector<64x64xf32>
    %cst_62 = arith.constant 0.000000e+00 : f32
    %121 = vector.broadcast %cst_62 : f32 to vector<64x64xf32>
    %122 = arith.maximumf %120, %121 : vector<64x64xf32>
    %123 = arith.truncf %122 : vector<64x64xf32> to vector<64x64xbf16>
    %cst_63 = arith.constant dense<0.000000e+00> : vector<192x64xf32>
    %124 = tpu.matmul %65, %123, %cst_63 {dimension_numbers = #tpu.dot_dimension_numbers<[1], [0], [0], [1], [0, 0, 1, 1], [], []>} : vector<192x64xbf16>, vector<64x64xbf16>, vector<192x64xf32> -> vector<192x64xf32>
    %125 = vector.extract_strided_slice %124 {offsets = [0, 0], sizes = [48, 64], strides = [1, 1]} : vector<192x64xf32> to vector<48x64xf32>
    %c0_64 = arith.constant 0 : index
    %c96 = arith.constant 96 : index
    %c0_65 = arith.constant 0 : index
    %126 = vector.load %arg7[%c0_64, %c96, %c0_65] : memref<4x384x64xf32, #tpu.memory_space<vmem>>, vector<1x48x64xf32>
    %127 = vector.shape_cast %126 : vector<1x48x64xf32> to vector<48x64xf32>
    %128 = vector.shape_cast %125 : vector<48x64xf32> to vector<1x48x64xf32>
    tpu.vector_store %arg7[%c0_64, %c96, %c0_65], %128 {strides = array<i32>} : memref<4x384x64xf32, #tpu.memory_space<vmem>>, vector<1x48x64xf32>,
    %129 = vector.extract_strided_slice %124 {offsets = [48, 0], sizes = [48, 64], strides = [1, 1]} : vector<192x64xf32> to vector<48x64xf32>
    %c1_66 = arith.constant 1 : index
    %c96_67 = arith.constant 96 : index
    %c0_68 = arith.constant 0 : index
    %130 = vector.load %arg7[%c1_66, %c96_67, %c0_68] : memref<4x384x64xf32, #tpu.memory_space<vmem>>, vector<1x48x64xf32>
    %131 = vector.shape_cast %130 : vector<1x48x64xf32> to vector<48x64xf32>
    %132 = vector.shape_cast %129 : vector<48x64xf32> to vector<1x48x64xf32>
    tpu.vector_store %arg7[%c1_66, %c96_67, %c0_68], %132 {strides = array<i32>} : memref<4x384x64xf32, #tpu.memory_space<vmem>>, vector<1x48x64xf32>,
    %133 = vector.extract_strided_slice %124 {offsets = [96, 0], sizes = [48, 64], strides = [1, 1]} : vector<192x64xf32> to vector<48x64xf32>
    %c2_69 = arith.constant 2 : index
    %c96_70 = arith.constant 96 : index
    %c0_71 = arith.constant 0 : index
    %134 = vector.load %arg7[%c2_69, %c96_70, %c0_71] : memref<4x384x64xf32, #tpu.memory_space<vmem>>, vector<1x48x64xf32>
    %135 = vector.shape_cast %134 : vector<1x48x64xf32> to vector<48x64xf32>
    %136 = vector.shape_cast %133 : vector<48x64xf32> to vector<1x48x64xf32>
    tpu.vector_store %arg7[%c2_69, %c96_70, %c0_71], %136 {strides = array<i32>} : memref<4x384x64xf32, #tpu.memory_space<vmem>>, vector<1x48x64xf32>,
    %137 = vector.extract_strided_slice %124 {offsets = [144, 0], sizes = [48, 64], strides = [1, 1]} : vector<192x64xf32> to vector<48x64xf32>
    %c3_72 = arith.constant 3 : index
    %c96_73 = arith.constant 96 : index
    %c0_74 = arith.constant 0 : index
    %138 = vector.load %arg7[%c3_72, %c96_73, %c0_74] : memref<4x384x64xf32, #tpu.memory_space<vmem>>, vector<1x48x64xf32>
    %139 = vector.shape_cast %138 : vector<1x48x64xf32> to vector<48x64xf32>
    %140 = vector.shape_cast %137 : vector<48x64xf32> to vector<1x48x64xf32>
    tpu.vector_store %arg7[%c3_72, %c96_73, %c0_74], %140 {strides = array<i32>} : memref<4x384x64xf32, #tpu.memory_space<vmem>>, vector<1x48x64xf32>,
    %cst_75 = arith.constant -0.707106769 : f32
    %141 = vector.broadcast %cst_75 : f32 to vector<64x64xf32>
    %142 = arith.mulf %141, %55 : vector<64x64xf32>
    %cst_76 = arith.constant 0.707106769 : f32
    %143 = vector.broadcast %cst_76 : f32 to vector<64x64xf32>
    %144 = arith.mulf %143, %64 : vector<64x64xf32>
    %145 = arith.addf %142, %144 : vector<64x64xf32>
    %cst_77 = arith.constant 0.000000e+00 : f32
    %146 = vector.broadcast %cst_77 : f32 to vector<64x64xf32>
    %147 = arith.maximumf %145, %146 : vector<64x64xf32>
    %148 = arith.truncf %147 : vector<64x64xf32> to vector<64x64xbf16>
    %cst_78 = arith.constant dense<0.000000e+00> : vector<192x64xf32>
    %149 = tpu.matmul %65, %148, %cst_78 {dimension_numbers = #tpu.dot_dimension_numbers<[1], [0], [0], [1], [0, 0, 1, 1], [], []>} : vector<192x64xbf16>, vector<64x64xbf16>, vector<192x64xf32> -> vector<192x64xf32>
    %150 = vector.extract_strided_slice %149 {offsets = [0, 0], sizes = [48, 64], strides = [1, 1]} : vector<192x64xf32> to vector<48x64xf32>
    %c0_79 = arith.constant 0 : index
    %c144 = arith.constant 144 : index
    %c0_80 = arith.constant 0 : index
    %151 = vector.load %arg7[%c0_79, %c144, %c0_80] : memref<4x384x64xf32, #tpu.memory_space<vmem>>, vector<1x48x64xf32>
    %152 = vector.shape_cast %151 : vector<1x48x64xf32> to vector<48x64xf32>
    %153 = vector.shape_cast %150 : vector<48x64xf32> to vector<1x48x64xf32>
    tpu.vector_store %arg7[%c0_79, %c144, %c0_80], %153 {strides = array<i32>} : memref<4x384x64xf32, #tpu.memory_space<vmem>>, vector<1x48x64xf32>,
    %154 = vector.extract_strided_slice %149 {offsets = [48, 0], sizes = [48, 64], strides = [1, 1]} : vector<192x64xf32> to vector<48x64xf32>
    %c1_81 = arith.constant 1 : index
    %c144_82 = arith.constant 144 : index
    %c0_83 = arith.constant 0 : index
    %155 = vector.load %arg7[%c1_81, %c144_82, %c0_83] : memref<4x384x64xf32, #tpu.memory_space<vmem>>, vector<1x48x64xf32>
    %156 = vector.shape_cast %155 : vector<1x48x64xf32> to vector<48x64xf32>
    %157 = vector.shape_cast %154 : vector<48x64xf32> to vector<1x48x64xf32>
    tpu.vector_store %arg7[%c1_81, %c144_82, %c0_83], %157 {strides = array<i32>} : memref<4x384x64xf32, #tpu.memory_space<vmem>>, vector<1x48x64xf32>,
    %158 = vector.extract_strided_slice %149 {offsets = [96, 0], sizes = [48, 64], strides = [1, 1]} : vector<192x64xf32> to vector<48x64xf32>
    %c2_84 = arith.constant 2 : index
    %c144_85 = arith.constant 144 : index
    %c0_86 = arith.constant 0 : index
    %159 = vector.load %arg7[%c2_84, %c144_85, %c0_86] : memref<4x384x64xf32, #tpu.memory_space<vmem>>, vector<1x48x64xf32>
    %160 = vector.shape_cast %159 : vector<1x48x64xf32> to vector<48x64xf32>
    %161 = vector.shape_cast %158 : vector<48x64xf32> to vector<1x48x64xf32>
    tpu.vector_store %arg7[%c2_84, %c144_85, %c0_86], %161 {strides = array<i32>} : memref<4x384x64xf32, #tpu.memory_space<vmem>>, vector<1x48x64xf32>,
    %162 = vector.extract_strided_slice %149 {offsets = [144, 0], sizes = [48, 64], strides = [1, 1]} : vector<192x64xf32> to vector<48x64xf32>
    %c3_87 = arith.constant 3 : index
    %c144_88 = arith.constant 144 : index
    %c0_89 = arith.constant 0 : index
    %163 = vector.load %arg7[%c3_87, %c144_88, %c0_89] : memref<4x384x64xf32, #tpu.memory_space<vmem>>, vector<1x48x64xf32>
    %164 = vector.shape_cast %163 : vector<1x48x64xf32> to vector<48x64xf32>
    %165 = vector.shape_cast %162 : vector<48x64xf32> to vector<1x48x64xf32>
    tpu.vector_store %arg7[%c3_87, %c144_88, %c0_89], %165 {strides = array<i32>} : memref<4x384x64xf32, #tpu.memory_space<vmem>>, vector<1x48x64xf32>,
    %cst_90 = arith.constant -1.000000e+00 : f32
    %166 = vector.broadcast %cst_90 : f32 to vector<64x64xf32>
    %167 = arith.mulf %166, %55 : vector<64x64xf32>
    %cst_91 = arith.constant 1.22464685E-16 : f32
    %168 = vector.broadcast %cst_91 : f32 to vector<64x64xf32>
    %169 = arith.mulf %168, %64 : vector<64x64xf32>
    %170 = arith.addf %167, %169 : vector<64x64xf32>
    %cst_92 = arith.constant 0.000000e+00 : f32
    %171 = vector.broadcast %cst_92 : f32 to vector<64x64xf32>
    %172 = arith.maximumf %170, %171 : vector<64x64xf32>
    %173 = arith.truncf %172 : vector<64x64xf32> to vector<64x64xbf16>
    %cst_93 = arith.constant dense<0.000000e+00> : vector<192x64xf32>
    %174 = tpu.matmul %65, %173, %cst_93 {dimension_numbers = #tpu.dot_dimension_numbers<[1], [0], [0], [1], [0, 0, 1, 1], [], []>} : vector<192x64xbf16>, vector<64x64xbf16>, vector<192x64xf32> -> vector<192x64xf32>
    %175 = vector.extract_strided_slice %174 {offsets = [0, 0], sizes = [48, 64], strides = [1, 1]} : vector<192x64xf32> to vector<48x64xf32>
    %c0_94 = arith.constant 0 : index
    %c192 = arith.constant 192 : index
    %c0_95 = arith.constant 0 : index
    %176 = vector.load %arg7[%c0_94, %c192, %c0_95] : memref<4x384x64xf32, #tpu.memory_space<vmem>>, vector<1x48x64xf32>
    %177 = vector.shape_cast %176 : vector<1x48x64xf32> to vector<48x64xf32>
    %178 = vector.shape_cast %175 : vector<48x64xf32> to vector<1x48x64xf32>
    tpu.vector_store %arg7[%c0_94, %c192, %c0_95], %178 {strides = array<i32>} : memref<4x384x64xf32, #tpu.memory_space<vmem>>, vector<1x48x64xf32>,
    %179 = vector.extract_strided_slice %174 {offsets = [48, 0], sizes = [48, 64], strides = [1, 1]} : vector<192x64xf32> to vector<48x64xf32>
    %c1_96 = arith.constant 1 : index
    %c192_97 = arith.constant 192 : index
    %c0_98 = arith.constant 0 : index
    %180 = vector.load %arg7[%c1_96, %c192_97, %c0_98] : memref<4x384x64xf32, #tpu.memory_space<vmem>>, vector<1x48x64xf32>
    %181 = vector.shape_cast %180 : vector<1x48x64xf32> to vector<48x64xf32>
    %182 = vector.shape_cast %179 : vector<48x64xf32> to vector<1x48x64xf32>
    tpu.vector_store %arg7[%c1_96, %c192_97, %c0_98], %182 {strides = array<i32>} : memref<4x384x64xf32, #tpu.memory_space<vmem>>, vector<1x48x64xf32>,
    %183 = vector.extract_strided_slice %174 {offsets = [96, 0], sizes = [48, 64], strides = [1, 1]} : vector<192x64xf32> to vector<48x64xf32>
    %c2_99 = arith.constant 2 : index
    %c192_100 = arith.constant 192 : index
    %c0_101 = arith.constant 0 : index
    %184 = vector.load %arg7[%c2_99, %c192_100, %c0_101] : memref<4x384x64xf32, #tpu.memory_space<vmem>>, vector<1x48x64xf32>
    %185 = vector.shape_cast %184 : vector<1x48x64xf32> to vector<48x64xf32>
    %186 = vector.shape_cast %183 : vector<48x64xf32> to vector<1x48x64xf32>
    tpu.vector_store %arg7[%c2_99, %c192_100, %c0_101], %186 {strides = array<i32>} : memref<4x384x64xf32, #tpu.memory_space<vmem>>, vector<1x48x64xf32>,
    %187 = vector.extract_strided_slice %174 {offsets = [144, 0], sizes = [48, 64], strides = [1, 1]} : vector<192x64xf32> to vector<48x64xf32>
    %c3_102 = arith.constant 3 : index
    %c192_103 = arith.constant 192 : index
    %c0_104 = arith.constant 0 : index
    %188 = vector.load %arg7[%c3_102, %c192_103, %c0_104] : memref<4x384x64xf32, #tpu.memory_space<vmem>>, vector<1x48x64xf32>
    %189 = vector.shape_cast %188 : vector<1x48x64xf32> to vector<48x64xf32>
    %190 = vector.shape_cast %187 : vector<48x64xf32> to vector<1x48x64xf32>
    tpu.vector_store %arg7[%c3_102, %c192_103, %c0_104], %190 {strides = array<i32>} : memref<4x384x64xf32, #tpu.memory_space<vmem>>, vector<1x48x64xf32>,
    %cst_105 = arith.constant -0.707106769 : f32
    %191 = vector.broadcast %cst_105 : f32 to vector<64x64xf32>
    %192 = arith.mulf %191, %55 : vector<64x64xf32>
    %cst_106 = arith.constant -0.707106769 : f32
    %193 = vector.broadcast %cst_106 : f32 to vector<64x64xf32>
    %194 = arith.mulf %193, %64 : vector<64x64xf32>
    %195 = arith.addf %192, %194 : vector<64x64xf32>
    %cst_107 = arith.constant 0.000000e+00 : f32
    %196 = vector.broadcast %cst_107 : f32 to vector<64x64xf32>
    %197 = arith.maximumf %195, %196 : vector<64x64xf32>
    %198 = arith.truncf %197 : vector<64x64xf32> to vector<64x64xbf16>
    %cst_108 = arith.constant dense<0.000000e+00> : vector<192x64xf32>
    %199 = tpu.matmul %65, %198, %cst_108 {dimension_numbers = #tpu.dot_dimension_numbers<[1], [0], [0], [1], [0, 0, 1, 1], [], []>} : vector<192x64xbf16>, vector<64x64xbf16>, vector<192x64xf32> -> vector<192x64xf32>
    %200 = vector.extract_strided_slice %199 {offsets = [0, 0], sizes = [48, 64], strides = [1, 1]} : vector<192x64xf32> to vector<48x64xf32>
    %c0_109 = arith.constant 0 : index
    %c240 = arith.constant 240 : index
    %c0_110 = arith.constant 0 : index
    %201 = vector.load %arg7[%c0_109, %c240, %c0_110] : memref<4x384x64xf32, #tpu.memory_space<vmem>>, vector<1x48x64xf32>
    %202 = vector.shape_cast %201 : vector<1x48x64xf32> to vector<48x64xf32>
    %203 = vector.shape_cast %200 : vector<48x64xf32> to vector<1x48x64xf32>
    tpu.vector_store %arg7[%c0_109, %c240, %c0_110], %203 {strides = array<i32>} : memref<4x384x64xf32, #tpu.memory_space<vmem>>, vector<1x48x64xf32>,
    %204 = vector.extract_strided_slice %199 {offsets = [48, 0], sizes = [48, 64], strides = [1, 1]} : vector<192x64xf32> to vector<48x64xf32>
    %c1_111 = arith.constant 1 : index
    %c240_112 = arith.constant 240 : index
    %c0_113 = arith.constant 0 : index
    %205 = vector.load %arg7[%c1_111, %c240_112, %c0_113] : memref<4x384x64xf32, #tpu.memory_space<vmem>>, vector<1x48x64xf32>
    %206 = vector.shape_cast %205 : vector<1x48x64xf32> to vector<48x64xf32>
    %207 = vector.shape_cast %204 : vector<48x64xf32> to vector<1x48x64xf32>
    tpu.vector_store %arg7[%c1_111, %c240_112, %c0_113], %207 {strides = array<i32>} : memref<4x384x64xf32, #tpu.memory_space<vmem>>, vector<1x48x64xf32>,
    %208 = vector.extract_strided_slice %199 {offsets = [96, 0], sizes = [48, 64], strides = [1, 1]} : vector<192x64xf32> to vector<48x64xf32>
    %c2_114 = arith.constant 2 : index
    %c240_115 = arith.constant 240 : index
    %c0_116 = arith.constant 0 : index
    %209 = vector.load %arg7[%c2_114, %c240_115, %c0_116] : memref<4x384x64xf32, #tpu.memory_space<vmem>>, vector<1x48x64xf32>
    %210 = vector.shape_cast %209 : vector<1x48x64xf32> to vector<48x64xf32>
    %211 = vector.shape_cast %208 : vector<48x64xf32> to vector<1x48x64xf32>
    tpu.vector_store %arg7[%c2_114, %c240_115, %c0_116], %211 {strides = array<i32>} : memref<4x384x64xf32, #tpu.memory_space<vmem>>, vector<1x48x64xf32>,
    %212 = vector.extract_strided_slice %199 {offsets = [144, 0], sizes = [48, 64], strides = [1, 1]} : vector<192x64xf32> to vector<48x64xf32>
    %c3_117 = arith.constant 3 : index
    %c240_118 = arith.constant 240 : index
    %c0_119 = arith.constant 0 : index
    %213 = vector.load %arg7[%c3_117, %c240_118, %c0_119] : memref<4x384x64xf32, #tpu.memory_space<vmem>>, vector<1x48x64xf32>
    %214 = vector.shape_cast %213 : vector<1x48x64xf32> to vector<48x64xf32>
    %215 = vector.shape_cast %212 : vector<48x64xf32> to vector<1x48x64xf32>
    tpu.vector_store %arg7[%c3_117, %c240_118, %c0_119], %215 {strides = array<i32>} : memref<4x384x64xf32, #tpu.memory_space<vmem>>, vector<1x48x64xf32>,
    %cst_120 = arith.constant -1.83697015E-16 : f32
    %216 = vector.broadcast %cst_120 : f32 to vector<64x64xf32>
    %217 = arith.mulf %216, %55 : vector<64x64xf32>
    %cst_121 = arith.constant -1.000000e+00 : f32
    %218 = vector.broadcast %cst_121 : f32 to vector<64x64xf32>
    %219 = arith.mulf %218, %64 : vector<64x64xf32>
    %220 = arith.addf %217, %219 : vector<64x64xf32>
    %cst_122 = arith.constant 0.000000e+00 : f32
    %221 = vector.broadcast %cst_122 : f32 to vector<64x64xf32>
    %222 = arith.maximumf %220, %221 : vector<64x64xf32>
    %223 = arith.truncf %222 : vector<64x64xf32> to vector<64x64xbf16>
    %cst_123 = arith.constant dense<0.000000e+00> : vector<192x64xf32>
    %224 = tpu.matmul %65, %223, %cst_123 {dimension_numbers = #tpu.dot_dimension_numbers<[1], [0], [0], [1], [0, 0, 1, 1], [], []>} : vector<192x64xbf16>, vector<64x64xbf16>, vector<192x64xf32> -> vector<192x64xf32>
    %225 = vector.extract_strided_slice %224 {offsets = [0, 0], sizes = [48, 64], strides = [1, 1]} : vector<192x64xf32> to vector<48x64xf32>
    %c0_124 = arith.constant 0 : index
    %c288 = arith.constant 288 : index
    %c0_125 = arith.constant 0 : index
    %226 = vector.load %arg7[%c0_124, %c288, %c0_125] : memref<4x384x64xf32, #tpu.memory_space<vmem>>, vector<1x48x64xf32>
    %227 = vector.shape_cast %226 : vector<1x48x64xf32> to vector<48x64xf32>
    %228 = vector.shape_cast %225 : vector<48x64xf32> to vector<1x48x64xf32>
    tpu.vector_store %arg7[%c0_124, %c288, %c0_125], %228 {strides = array<i32>} : memref<4x384x64xf32, #tpu.memory_space<vmem>>, vector<1x48x64xf32>,
    %229 = vector.extract_strided_slice %224 {offsets = [48, 0], sizes = [48, 64], strides = [1, 1]} : vector<192x64xf32> to vector<48x64xf32>
    %c1_126 = arith.constant 1 : index
    %c288_127 = arith.constant 288 : index
    %c0_128 = arith.constant 0 : index
    %230 = vector.load %arg7[%c1_126, %c288_127, %c0_128] : memref<4x384x64xf32, #tpu.memory_space<vmem>>, vector<1x48x64xf32>
    %231 = vector.shape_cast %230 : vector<1x48x64xf32> to vector<48x64xf32>
    %232 = vector.shape_cast %229 : vector<48x64xf32> to vector<1x48x64xf32>
    tpu.vector_store %arg7[%c1_126, %c288_127, %c0_128], %232 {strides = array<i32>} : memref<4x384x64xf32, #tpu.memory_space<vmem>>, vector<1x48x64xf32>,
    %233 = vector.extract_strided_slice %224 {offsets = [96, 0], sizes = [48, 64], strides = [1, 1]} : vector<192x64xf32> to vector<48x64xf32>
    %c2_129 = arith.constant 2 : index
    %c288_130 = arith.constant 288 : index
    %c0_131 = arith.constant 0 : index
    %234 = vector.load %arg7[%c2_129, %c288_130, %c0_131] : memref<4x384x64xf32, #tpu.memory_space<vmem>>, vector<1x48x64xf32>
    %235 = vector.shape_cast %234 : vector<1x48x64xf32> to vector<48x64xf32>
    %236 = vector.shape_cast %233 : vector<48x64xf32> to vector<1x48x64xf32>
    tpu.vector_store %arg7[%c2_129, %c288_130, %c0_131], %236 {strides = array<i32>} : memref<4x384x64xf32, #tpu.memory_space<vmem>>, vector<1x48x64xf32>,
    %237 = vector.extract_strided_slice %224 {offsets = [144, 0], sizes = [48, 64], strides = [1, 1]} : vector<192x64xf32> to vector<48x64xf32>
    %c3_132 = arith.constant 3 : index
    %c288_133 = arith.constant 288 : index
    %c0_134 = arith.constant 0 : index
    %238 = vector.load %arg7[%c3_132, %c288_133, %c0_134] : memref<4x384x64xf32, #tpu.memory_space<vmem>>, vector<1x48x64xf32>
    %239 = vector.shape_cast %238 : vector<1x48x64xf32> to vector<48x64xf32>
    %240 = vector.shape_cast %237 : vector<48x64xf32> to vector<1x48x64xf32>
    tpu.vector_store %arg7[%c3_132, %c288_133, %c0_134], %240 {strides = array<i32>} : memref<4x384x64xf32, #tpu.memory_space<vmem>>, vector<1x48x64xf32>,
    %cst_135 = arith.constant 0.707106769 : f32
    %241 = vector.broadcast %cst_135 : f32 to vector<64x64xf32>
    %242 = arith.mulf %241, %55 : vector<64x64xf32>
    %cst_136 = arith.constant -0.707106769 : f32
    %243 = vector.broadcast %cst_136 : f32 to vector<64x64xf32>
    %244 = arith.mulf %243, %64 : vector<64x64xf32>
    %245 = arith.addf %242, %244 : vector<64x64xf32>
    %cst_137 = arith.constant 0.000000e+00 : f32
    %246 = vector.broadcast %cst_137 : f32 to vector<64x64xf32>
    %247 = arith.maximumf %245, %246 : vector<64x64xf32>
    %248 = arith.truncf %247 : vector<64x64xf32> to vector<64x64xbf16>
    %cst_138 = arith.constant dense<0.000000e+00> : vector<192x64xf32>
    %249 = tpu.matmul %65, %248, %cst_138 {dimension_numbers = #tpu.dot_dimension_numbers<[1], [0], [0], [1], [0, 0, 1, 1], [], []>} : vector<192x64xbf16>, vector<64x64xbf16>, vector<192x64xf32> -> vector<192x64xf32>
    %250 = vector.extract_strided_slice %249 {offsets = [0, 0], sizes = [48, 64], strides = [1, 1]} : vector<192x64xf32> to vector<48x64xf32>
    %c0_139 = arith.constant 0 : index
    %c336 = arith.constant 336 : index
    %c0_140 = arith.constant 0 : index
    %251 = vector.load %arg7[%c0_139, %c336, %c0_140] : memref<4x384x64xf32, #tpu.memory_space<vmem>>, vector<1x48x64xf32>
    %252 = vector.shape_cast %251 : vector<1x48x64xf32> to vector<48x64xf32>
    %253 = vector.shape_cast %250 : vector<48x64xf32> to vector<1x48x64xf32>
    tpu.vector_store %arg7[%c0_139, %c336, %c0_140], %253 {strides = array<i32>} : memref<4x384x64xf32, #tpu.memory_space<vmem>>, vector<1x48x64xf32>,
    %254 = vector.extract_strided_slice %249 {offsets = [48, 0], sizes = [48, 64], strides = [1, 1]} : vector<192x64xf32> to vector<48x64xf32>
    %c1_141 = arith.constant 1 : index
    %c336_142 = arith.constant 336 : index
    %c0_143 = arith.constant 0 : index
    %255 = vector.load %arg7[%c1_141, %c336_142, %c0_143] : memref<4x384x64xf32, #tpu.memory_space<vmem>>, vector<1x48x64xf32>
    %256 = vector.shape_cast %255 : vector<1x48x64xf32> to vector<48x64xf32>
    %257 = vector.shape_cast %254 : vector<48x64xf32> to vector<1x48x64xf32>
    tpu.vector_store %arg7[%c1_141, %c336_142, %c0_143], %257 {strides = array<i32>} : memref<4x384x64xf32, #tpu.memory_space<vmem>>, vector<1x48x64xf32>,
    %258 = vector.extract_strided_slice %249 {offsets = [96, 0], sizes = [48, 64], strides = [1, 1]} : vector<192x64xf32> to vector<48x64xf32>
    %c2_144 = arith.constant 2 : index
    %c336_145 = arith.constant 336 : index
    %c0_146 = arith.constant 0 : index
    %259 = vector.load %arg7[%c2_144, %c336_145, %c0_146] : memref<4x384x64xf32, #tpu.memory_space<vmem>>, vector<1x48x64xf32>
    %260 = vector.shape_cast %259 : vector<1x48x64xf32> to vector<48x64xf32>
    %261 = vector.shape_cast %258 : vector<48x64xf32> to vector<1x48x64xf32>
    tpu.vector_store %arg7[%c2_144, %c336_145, %c0_146], %261 {strides = array<i32>} : memref<4x384x64xf32, #tpu.memory_space<vmem>>, vector<1x48x64xf32>,
    %262 = vector.extract_strided_slice %249 {offsets = [144, 0], sizes = [48, 64], strides = [1, 1]} : vector<192x64xf32> to vector<48x64xf32>
    %c3_147 = arith.constant 3 : index
    %c336_148 = arith.constant 336 : index
    %c0_149 = arith.constant 0 : index
    %263 = vector.load %arg7[%c3_147, %c336_148, %c0_149] : memref<4x384x64xf32, #tpu.memory_space<vmem>>, vector<1x48x64xf32>
    %264 = vector.shape_cast %263 : vector<1x48x64xf32> to vector<48x64xf32>
    %265 = vector.shape_cast %262 : vector<48x64xf32> to vector<1x48x64xf32>
    tpu.vector_store %arg7[%c3_147, %c336_148, %c0_149], %265 {strides = array<i32>} : memref<4x384x64xf32, #tpu.memory_space<vmem>>, vector<1x48x64xf32>,
    %c0_150 = arith.constant 0 : index
    %c0_151 = arith.constant 0 : index
    %c0_152 = arith.constant 0 : index
    %266 = vector.load %arg7[%c0_150, %c0_151, %c0_152] : memref<4x384x64xf32, #tpu.memory_space<vmem>>, vector<1x384x64xf32>
    %267 = vector.shape_cast %266 : vector<1x384x64xf32> to vector<384x64xf32>
    %268 = arith.truncf %267 : vector<384x64xf32> to vector<384x64xbf16>
    %c0_153 = arith.constant 0 : index
    %c0_154 = arith.constant 0 : index
    %c0_155 = arith.constant 0 : index
    %269 = vector.load %arg5[%c0_153, %c0_154, %c0_155] : memref<4x64x48xbf16, #tpu.memory_space<vmem>>, vector<1x64x48xbf16>
    %270 = vector.shape_cast %269 : vector<1x64x48xbf16> to vector<64x48xbf16>
    %cst_156 = arith.constant dense<0.000000e+00> : vector<384x48xf32>
    %271 = tpu.matmul %268, %270, %cst_156 {dimension_numbers = #tpu.dot_dimension_numbers<[1], [0], [0], [1], [0, 0, 1, 1], [], []>} : vector<384x64xbf16>, vector<64x48xbf16>, vector<384x48xf32> -> vector<384x48xf32>
    %272 = vector.extract_strided_slice %271 {offsets = [0, 0], sizes = [48, 48], strides = [1, 1]} : vector<384x48xf32> to vector<48x48xf32>
    %c0_157 = arith.constant 0 : index
    %c0_158 = arith.constant 0 : index
    %c0_159 = arith.constant 0 : index
    %273 = vector.load %arg8[%c0_157, %c0_158, %c0_159] : memref<32x48x48xf32, #tpu.memory_space<vmem>>, vector<1x48x48xf32>
    %274 = vector.shape_cast %273 : vector<1x48x48xf32> to vector<48x48xf32>
    %275 = vector.shape_cast %272 : vector<48x48xf32> to vector<1x48x48xf32>
    tpu.vector_store %arg8[%c0_157, %c0_158, %c0_159], %275 {strides = array<i32>} : memref<32x48x48xf32, #tpu.memory_space<vmem>>, vector<1x48x48xf32>,
    %276 = vector.extract_strided_slice %271 {offsets = [48, 0], sizes = [48, 48], strides = [1, 1]} : vector<384x48xf32> to vector<48x48xf32>
    %c1_160 = arith.constant 1 : index
    %c0_161 = arith.constant 0 : index
    %c0_162 = arith.constant 0 : index
    %277 = vector.load %arg8[%c1_160, %c0_161, %c0_162] : memref<32x48x48xf32, #tpu.memory_space<vmem>>, vector<1x48x48xf32>
    %278 = vector.shape_cast %277 : vector<1x48x48xf32> to vector<48x48xf32>
    %279 = vector.shape_cast %276 : vector<48x48xf32> to vector<1x48x48xf32>
    tpu.vector_store %arg8[%c1_160, %c0_161, %c0_162], %279 {strides = array<i32>} : memref<32x48x48xf32, #tpu.memory_space<vmem>>, vector<1x48x48xf32>,
    %280 = vector.extract_strided_slice %271 {offsets = [96, 0], sizes = [48, 48], strides = [1, 1]} : vector<384x48xf32> to vector<48x48xf32>
    %c2_163 = arith.constant 2 : index
    %c0_164 = arith.constant 0 : index
    %c0_165 = arith.constant 0 : index
    %281 = vector.load %arg8[%c2_163, %c0_164, %c0_165] : memref<32x48x48xf32, #tpu.memory_space<vmem>>, vector<1x48x48xf32>
    %282 = vector.shape_cast %281 : vector<1x48x48xf32> to vector<48x48xf32>
    %283 = vector.shape_cast %280 : vector<48x48xf32> to vector<1x48x48xf32>
    tpu.vector_store %arg8[%c2_163, %c0_164, %c0_165], %283 {strides = array<i32>} : memref<32x48x48xf32, #tpu.memory_space<vmem>>, vector<1x48x48xf32>,
    %284 = vector.extract_strided_slice %271 {offsets = [144, 0], sizes = [48, 48], strides = [1, 1]} : vector<384x48xf32> to vector<48x48xf32>
    %c3_166 = arith.constant 3 : index
    %c0_167 = arith.constant 0 : index
    %c0_168 = arith.constant 0 : index
    %285 = vector.load %arg8[%c3_166, %c0_167, %c0_168] : memref<32x48x48xf32, #tpu.memory_space<vmem>>, vector<1x48x48xf32>
    %286 = vector.shape_cast %285 : vector<1x48x48xf32> to vector<48x48xf32>
    %287 = vector.shape_cast %284 : vector<48x48xf32> to vector<1x48x48xf32>
    tpu.vector_store %arg8[%c3_166, %c0_167, %c0_168], %287 {strides = array<i32>} : memref<32x48x48xf32, #tpu.memory_space<vmem>>, vector<1x48x48xf32>,
    %288 = vector.extract_strided_slice %271 {offsets = [192, 0], sizes = [48, 48], strides = [1, 1]} : vector<384x48xf32> to vector<48x48xf32>
    %c4 = arith.constant 4 : index
    %c0_169 = arith.constant 0 : index
    %c0_170 = arith.constant 0 : index
    %289 = vector.load %arg8[%c4, %c0_169, %c0_170] : memref<32x48x48xf32, #tpu.memory_space<vmem>>, vector<1x48x48xf32>
    %290 = vector.shape_cast %289 : vector<1x48x48xf32> to vector<48x48xf32>
    %291 = vector.shape_cast %288 : vector<48x48xf32> to vector<1x48x48xf32>
    tpu.vector_store %arg8[%c4, %c0_169, %c0_170], %291 {strides = array<i32>} : memref<32x48x48xf32, #tpu.memory_space<vmem>>, vector<1x48x48xf32>,
    %292 = vector.extract_strided_slice %271 {offsets = [240, 0], sizes = [48, 48], strides = [1, 1]} : vector<384x48xf32> to vector<48x48xf32>
    %c5 = arith.constant 5 : index
    %c0_171 = arith.constant 0 : index
    %c0_172 = arith.constant 0 : index
    %293 = vector.load %arg8[%c5, %c0_171, %c0_172] : memref<32x48x48xf32, #tpu.memory_space<vmem>>, vector<1x48x48xf32>
    %294 = vector.shape_cast %293 : vector<1x48x48xf32> to vector<48x48xf32>
    %295 = vector.shape_cast %292 : vector<48x48xf32> to vector<1x48x48xf32>
    tpu.vector_store %arg8[%c5, %c0_171, %c0_172], %295 {strides = array<i32>} : memref<32x48x48xf32, #tpu.memory_space<vmem>>, vector<1x48x48xf32>,
    %296 = vector.extract_strided_slice %271 {offsets = [288, 0], sizes = [48, 48], strides = [1, 1]} : vector<384x48xf32> to vector<48x48xf32>
    %c6 = arith.constant 6 : index
    %c0_173 = arith.constant 0 : index
    %c0_174 = arith.constant 0 : index
    %297 = vector.load %arg8[%c6, %c0_173, %c0_174] : memref<32x48x48xf32, #tpu.memory_space<vmem>>, vector<1x48x48xf32>
    %298 = vector.shape_cast %297 : vector<1x48x48xf32> to vector<48x48xf32>
    %299 = vector.shape_cast %296 : vector<48x48xf32> to vector<1x48x48xf32>
    tpu.vector_store %arg8[%c6, %c0_173, %c0_174], %299 {strides = array<i32>} : memref<32x48x48xf32, #tpu.memory_space<vmem>>, vector<1x48x48xf32>,
    %300 = vector.extract_strided_slice %271 {offsets = [336, 0], sizes = [48, 48], strides = [1, 1]} : vector<384x48xf32> to vector<48x48xf32>
    %c7 = arith.constant 7 : index
    %c0_175 = arith.constant 0 : index
    %c0_176 = arith.constant 0 : index
    %301 = vector.load %arg8[%c7, %c0_175, %c0_176] : memref<32x48x48xf32, #tpu.memory_space<vmem>>, vector<1x48x48xf32>
    %302 = vector.shape_cast %301 : vector<1x48x48xf32> to vector<48x48xf32>
    %303 = vector.shape_cast %300 : vector<48x48xf32> to vector<1x48x48xf32>
    tpu.vector_store %arg8[%c7, %c0_175, %c0_176], %303 {strides = array<i32>} : memref<32x48x48xf32, #tpu.memory_space<vmem>>, vector<1x48x48xf32>,
    %c1_177 = arith.constant 1 : index
    %c0_178 = arith.constant 0 : index
    %c0_179 = arith.constant 0 : index
    %304 = vector.load %arg7[%c1_177, %c0_178, %c0_179] : memref<4x384x64xf32, #tpu.memory_space<vmem>>, vector<1x384x64xf32>
    %305 = vector.shape_cast %304 : vector<1x384x64xf32> to vector<384x64xf32>
    %306 = arith.truncf %305 : vector<384x64xf32> to vector<384x64xbf16>
    %c1_180 = arith.constant 1 : index
    %c0_181 = arith.constant 0 : index
    %c0_182 = arith.constant 0 : index
    %307 = vector.load %arg5[%c1_180, %c0_181, %c0_182] : memref<4x64x48xbf16, #tpu.memory_space<vmem>>, vector<1x64x48xbf16>
    %308 = vector.shape_cast %307 : vector<1x64x48xbf16> to vector<64x48xbf16>
    %cst_183 = arith.constant dense<0.000000e+00> : vector<384x48xf32>
    %309 = tpu.matmul %306, %308, %cst_183 {dimension_numbers = #tpu.dot_dimension_numbers<[1], [0], [0], [1], [0, 0, 1, 1], [], []>} : vector<384x64xbf16>, vector<64x48xbf16>, vector<384x48xf32> -> vector<384x48xf32>
    %310 = vector.extract_strided_slice %309 {offsets = [0, 0], sizes = [48, 48], strides = [1, 1]} : vector<384x48xf32> to vector<48x48xf32>
    %c8 = arith.constant 8 : index
    %c0_184 = arith.constant 0 : index
    %c0_185 = arith.constant 0 : index
    %311 = vector.load %arg8[%c8, %c0_184, %c0_185] : memref<32x48x48xf32, #tpu.memory_space<vmem>>, vector<1x48x48xf32>
    %312 = vector.shape_cast %311 : vector<1x48x48xf32> to vector<48x48xf32>
    %313 = vector.shape_cast %310 : vector<48x48xf32> to vector<1x48x48xf32>
    tpu.vector_store %arg8[%c8, %c0_184, %c0_185], %313 {strides = array<i32>} : memref<32x48x48xf32, #tpu.memory_space<vmem>>, vector<1x48x48xf32>,
    %314 = vector.extract_strided_slice %309 {offsets = [48, 0], sizes = [48, 48], strides = [1, 1]} : vector<384x48xf32> to vector<48x48xf32>
    %c9 = arith.constant 9 : index
    %c0_186 = arith.constant 0 : index
    %c0_187 = arith.constant 0 : index
    %315 = vector.load %arg8[%c9, %c0_186, %c0_187] : memref<32x48x48xf32, #tpu.memory_space<vmem>>, vector<1x48x48xf32>
    %316 = vector.shape_cast %315 : vector<1x48x48xf32> to vector<48x48xf32>
    %317 = vector.shape_cast %314 : vector<48x48xf32> to vector<1x48x48xf32>
    tpu.vector_store %arg8[%c9, %c0_186, %c0_187], %317 {strides = array<i32>} : memref<32x48x48xf32, #tpu.memory_space<vmem>>, vector<1x48x48xf32>,
    %318 = vector.extract_strided_slice %309 {offsets = [96, 0], sizes = [48, 48], strides = [1, 1]} : vector<384x48xf32> to vector<48x48xf32>
    %c10 = arith.constant 10 : index
    %c0_188 = arith.constant 0 : index
    %c0_189 = arith.constant 0 : index
    %319 = vector.load %arg8[%c10, %c0_188, %c0_189] : memref<32x48x48xf32, #tpu.memory_space<vmem>>, vector<1x48x48xf32>
    %320 = vector.shape_cast %319 : vector<1x48x48xf32> to vector<48x48xf32>
    %321 = vector.shape_cast %318 : vector<48x48xf32> to vector<1x48x48xf32>
    tpu.vector_store %arg8[%c10, %c0_188, %c0_189], %321 {strides = array<i32>} : memref<32x48x48xf32, #tpu.memory_space<vmem>>, vector<1x48x48xf32>,
    %322 = vector.extract_strided_slice %309 {offsets = [144, 0], sizes = [48, 48], strides = [1, 1]} : vector<384x48xf32> to vector<48x48xf32>
    %c11 = arith.constant 11 : index
    %c0_190 = arith.constant 0 : index
    %c0_191 = arith.constant 0 : index
    %323 = vector.load %arg8[%c11, %c0_190, %c0_191] : memref<32x48x48xf32, #tpu.memory_space<vmem>>, vector<1x48x48xf32>
    %324 = vector.shape_cast %323 : vector<1x48x48xf32> to vector<48x48xf32>
    %325 = vector.shape_cast %322 : vector<48x48xf32> to vector<1x48x48xf32>
    tpu.vector_store %arg8[%c11, %c0_190, %c0_191], %325 {strides = array<i32>} : memref<32x48x48xf32, #tpu.memory_space<vmem>>, vector<1x48x48xf32>,
    %326 = vector.extract_strided_slice %309 {offsets = [192, 0], sizes = [48, 48], strides = [1, 1]} : vector<384x48xf32> to vector<48x48xf32>
    %c12 = arith.constant 12 : index
    %c0_192 = arith.constant 0 : index
    %c0_193 = arith.constant 0 : index
    %327 = vector.load %arg8[%c12, %c0_192, %c0_193] : memref<32x48x48xf32, #tpu.memory_space<vmem>>, vector<1x48x48xf32>
    %328 = vector.shape_cast %327 : vector<1x48x48xf32> to vector<48x48xf32>
    %329 = vector.shape_cast %326 : vector<48x48xf32> to vector<1x48x48xf32>
    tpu.vector_store %arg8[%c12, %c0_192, %c0_193], %329 {strides = array<i32>} : memref<32x48x48xf32, #tpu.memory_space<vmem>>, vector<1x48x48xf32>,
    %330 = vector.extract_strided_slice %309 {offsets = [240, 0], sizes = [48, 48], strides = [1, 1]} : vector<384x48xf32> to vector<48x48xf32>
    %c13 = arith.constant 13 : index
    %c0_194 = arith.constant 0 : index
    %c0_195 = arith.constant 0 : index
    %331 = vector.load %arg8[%c13, %c0_194, %c0_195] : memref<32x48x48xf32, #tpu.memory_space<vmem>>, vector<1x48x48xf32>
    %332 = vector.shape_cast %331 : vector<1x48x48xf32> to vector<48x48xf32>
    %333 = vector.shape_cast %330 : vector<48x48xf32> to vector<1x48x48xf32>
    tpu.vector_store %arg8[%c13, %c0_194, %c0_195], %333 {strides = array<i32>} : memref<32x48x48xf32, #tpu.memory_space<vmem>>, vector<1x48x48xf32>,
    %334 = vector.extract_strided_slice %309 {offsets = [288, 0], sizes = [48, 48], strides = [1, 1]} : vector<384x48xf32> to vector<48x48xf32>
    %c14 = arith.constant 14 : index
    %c0_196 = arith.constant 0 : index
    %c0_197 = arith.constant 0 : index
    %335 = vector.load %arg8[%c14, %c0_196, %c0_197] : memref<32x48x48xf32, #tpu.memory_space<vmem>>, vector<1x48x48xf32>
    %336 = vector.shape_cast %335 : vector<1x48x48xf32> to vector<48x48xf32>
    %337 = vector.shape_cast %334 : vector<48x48xf32> to vector<1x48x48xf32>
    tpu.vector_store %arg8[%c14, %c0_196, %c0_197], %337 {strides = array<i32>} : memref<32x48x48xf32, #tpu.memory_space<vmem>>, vector<1x48x48xf32>,
    %338 = vector.extract_strided_slice %309 {offsets = [336, 0], sizes = [48, 48], strides = [1, 1]} : vector<384x48xf32> to vector<48x48xf32>
    %c15 = arith.constant 15 : index
    %c0_198 = arith.constant 0 : index
    %c0_199 = arith.constant 0 : index
    %339 = vector.load %arg8[%c15, %c0_198, %c0_199] : memref<32x48x48xf32, #tpu.memory_space<vmem>>, vector<1x48x48xf32>
    %340 = vector.shape_cast %339 : vector<1x48x48xf32> to vector<48x48xf32>
    %341 = vector.shape_cast %338 : vector<48x48xf32> to vector<1x48x48xf32>
    tpu.vector_store %arg8[%c15, %c0_198, %c0_199], %341 {strides = array<i32>} : memref<32x48x48xf32, #tpu.memory_space<vmem>>, vector<1x48x48xf32>,
    %c2_200 = arith.constant 2 : index
    %c0_201 = arith.constant 0 : index
    %c0_202 = arith.constant 0 : index
    %342 = vector.load %arg7[%c2_200, %c0_201, %c0_202] : memref<4x384x64xf32, #tpu.memory_space<vmem>>, vector<1x384x64xf32>
    %343 = vector.shape_cast %342 : vector<1x384x64xf32> to vector<384x64xf32>
    %344 = arith.truncf %343 : vector<384x64xf32> to vector<384x64xbf16>
    %c2_203 = arith.constant 2 : index
    %c0_204 = arith.constant 0 : index
    %c0_205 = arith.constant 0 : index
    %345 = vector.load %arg5[%c2_203, %c0_204, %c0_205] : memref<4x64x48xbf16, #tpu.memory_space<vmem>>, vector<1x64x48xbf16>
    %346 = vector.shape_cast %345 : vector<1x64x48xbf16> to vector<64x48xbf16>
    %cst_206 = arith.constant dense<0.000000e+00> : vector<384x48xf32>
    %347 = tpu.matmul %344, %346, %cst_206 {dimension_numbers = #tpu.dot_dimension_numbers<[1], [0], [0], [1], [0, 0, 1, 1], [], []>} : vector<384x64xbf16>, vector<64x48xbf16>, vector<384x48xf32> -> vector<384x48xf32>
    %348 = vector.extract_strided_slice %347 {offsets = [0, 0], sizes = [48, 48], strides = [1, 1]} : vector<384x48xf32> to vector<48x48xf32>
    %c16 = arith.constant 16 : index
    %c0_207 = arith.constant 0 : index
    %c0_208 = arith.constant 0 : index
    %349 = vector.load %arg8[%c16, %c0_207, %c0_208] : memref<32x48x48xf32, #tpu.memory_space<vmem>>, vector<1x48x48xf32>
    %350 = vector.shape_cast %349 : vector<1x48x48xf32> to vector<48x48xf32>
    %351 = vector.shape_cast %348 : vector<48x48xf32> to vector<1x48x48xf32>
    tpu.vector_store %arg8[%c16, %c0_207, %c0_208], %351 {strides = array<i32>} : memref<32x48x48xf32, #tpu.memory_space<vmem>>, vector<1x48x48xf32>,
    %352 = vector.extract_strided_slice %347 {offsets = [48, 0], sizes = [48, 48], strides = [1, 1]} : vector<384x48xf32> to vector<48x48xf32>
    %c17 = arith.constant 17 : index
    %c0_209 = arith.constant 0 : index
    %c0_210 = arith.constant 0 : index
    %353 = vector.load %arg8[%c17, %c0_209, %c0_210] : memref<32x48x48xf32, #tpu.memory_space<vmem>>, vector<1x48x48xf32>
    %354 = vector.shape_cast %353 : vector<1x48x48xf32> to vector<48x48xf32>
    %355 = vector.shape_cast %352 : vector<48x48xf32> to vector<1x48x48xf32>
    tpu.vector_store %arg8[%c17, %c0_209, %c0_210], %355 {strides = array<i32>} : memref<32x48x48xf32, #tpu.memory_space<vmem>>, vector<1x48x48xf32>,
    %356 = vector.extract_strided_slice %347 {offsets = [96, 0], sizes = [48, 48], strides = [1, 1]} : vector<384x48xf32> to vector<48x48xf32>
    %c18 = arith.constant 18 : index
    %c0_211 = arith.constant 0 : index
    %c0_212 = arith.constant 0 : index
    %357 = vector.load %arg8[%c18, %c0_211, %c0_212] : memref<32x48x48xf32, #tpu.memory_space<vmem>>, vector<1x48x48xf32>
    %358 = vector.shape_cast %357 : vector<1x48x48xf32> to vector<48x48xf32>
    %359 = vector.shape_cast %356 : vector<48x48xf32> to vector<1x48x48xf32>
    tpu.vector_store %arg8[%c18, %c0_211, %c0_212], %359 {strides = array<i32>} : memref<32x48x48xf32, #tpu.memory_space<vmem>>, vector<1x48x48xf32>,
    %360 = vector.extract_strided_slice %347 {offsets = [144, 0], sizes = [48, 48], strides = [1, 1]} : vector<384x48xf32> to vector<48x48xf32>
    %c19 = arith.constant 19 : index
    %c0_213 = arith.constant 0 : index
    %c0_214 = arith.constant 0 : index
    %361 = vector.load %arg8[%c19, %c0_213, %c0_214] : memref<32x48x48xf32, #tpu.memory_space<vmem>>, vector<1x48x48xf32>
    %362 = vector.shape_cast %361 : vector<1x48x48xf32> to vector<48x48xf32>
    %363 = vector.shape_cast %360 : vector<48x48xf32> to vector<1x48x48xf32>
    tpu.vector_store %arg8[%c19, %c0_213, %c0_214], %363 {strides = array<i32>} : memref<32x48x48xf32, #tpu.memory_space<vmem>>, vector<1x48x48xf32>,
    %364 = vector.extract_strided_slice %347 {offsets = [192, 0], sizes = [48, 48], strides = [1, 1]} : vector<384x48xf32> to vector<48x48xf32>
    %c20 = arith.constant 20 : index
    %c0_215 = arith.constant 0 : index
    %c0_216 = arith.constant 0 : index
    %365 = vector.load %arg8[%c20, %c0_215, %c0_216] : memref<32x48x48xf32, #tpu.memory_space<vmem>>, vector<1x48x48xf32>
    %366 = vector.shape_cast %365 : vector<1x48x48xf32> to vector<48x48xf32>
    %367 = vector.shape_cast %364 : vector<48x48xf32> to vector<1x48x48xf32>
    tpu.vector_store %arg8[%c20, %c0_215, %c0_216], %367 {strides = array<i32>} : memref<32x48x48xf32, #tpu.memory_space<vmem>>, vector<1x48x48xf32>,
    %368 = vector.extract_strided_slice %347 {offsets = [240, 0], sizes = [48, 48], strides = [1, 1]} : vector<384x48xf32> to vector<48x48xf32>
    %c21 = arith.constant 21 : index
    %c0_217 = arith.constant 0 : index
    %c0_218 = arith.constant 0 : index
    %369 = vector.load %arg8[%c21, %c0_217, %c0_218] : memref<32x48x48xf32, #tpu.memory_space<vmem>>, vector<1x48x48xf32>
    %370 = vector.shape_cast %369 : vector<1x48x48xf32> to vector<48x48xf32>
    %371 = vector.shape_cast %368 : vector<48x48xf32> to vector<1x48x48xf32>
    tpu.vector_store %arg8[%c21, %c0_217, %c0_218], %371 {strides = array<i32>} : memref<32x48x48xf32, #tpu.memory_space<vmem>>, vector<1x48x48xf32>,
    %372 = vector.extract_strided_slice %347 {offsets = [288, 0], sizes = [48, 48], strides = [1, 1]} : vector<384x48xf32> to vector<48x48xf32>
    %c22 = arith.constant 22 : index
    %c0_219 = arith.constant 0 : index
    %c0_220 = arith.constant 0 : index
    %373 = vector.load %arg8[%c22, %c0_219, %c0_220] : memref<32x48x48xf32, #tpu.memory_space<vmem>>, vector<1x48x48xf32>
    %374 = vector.shape_cast %373 : vector<1x48x48xf32> to vector<48x48xf32>
    %375 = vector.shape_cast %372 : vector<48x48xf32> to vector<1x48x48xf32>
    tpu.vector_store %arg8[%c22, %c0_219, %c0_220], %375 {strides = array<i32>} : memref<32x48x48xf32, #tpu.memory_space<vmem>>, vector<1x48x48xf32>,
    %376 = vector.extract_strided_slice %347 {offsets = [336, 0], sizes = [48, 48], strides = [1, 1]} : vector<384x48xf32> to vector<48x48xf32>
    %c23 = arith.constant 23 : index
    %c0_221 = arith.constant 0 : index
    %c0_222 = arith.constant 0 : index
    %377 = vector.load %arg8[%c23, %c0_221, %c0_222] : memref<32x48x48xf32, #tpu.memory_space<vmem>>, vector<1x48x48xf32>
    %378 = vector.shape_cast %377 : vector<1x48x48xf32> to vector<48x48xf32>
    %379 = vector.shape_cast %376 : vector<48x48xf32> to vector<1x48x48xf32>
    tpu.vector_store %arg8[%c23, %c0_221, %c0_222], %379 {strides = array<i32>} : memref<32x48x48xf32, #tpu.memory_space<vmem>>, vector<1x48x48xf32>,
    %c3_223 = arith.constant 3 : index
    %c0_224 = arith.constant 0 : index
    %c0_225 = arith.constant 0 : index
    %380 = vector.load %arg7[%c3_223, %c0_224, %c0_225] : memref<4x384x64xf32, #tpu.memory_space<vmem>>, vector<1x384x64xf32>
    %381 = vector.shape_cast %380 : vector<1x384x64xf32> to vector<384x64xf32>
    %382 = arith.truncf %381 : vector<384x64xf32> to vector<384x64xbf16>
    %c3_226 = arith.constant 3 : index
    %c0_227 = arith.constant 0 : index
    %c0_228 = arith.constant 0 : index
    %383 = vector.load %arg5[%c3_226, %c0_227, %c0_228] : memref<4x64x48xbf16, #tpu.memory_space<vmem>>, vector<1x64x48xbf16>
    %384 = vector.shape_cast %383 : vector<1x64x48xbf16> to vector<64x48xbf16>
    %cst_229 = arith.constant dense<0.000000e+00> : vector<384x48xf32>
    %385 = tpu.matmul %382, %384, %cst_229 {dimension_numbers = #tpu.dot_dimension_numbers<[1], [0], [0], [1], [0, 0, 1, 1], [], []>} : vector<384x64xbf16>, vector<64x48xbf16>, vector<384x48xf32> -> vector<384x48xf32>
    %386 = vector.extract_strided_slice %385 {offsets = [0, 0], sizes = [48, 48], strides = [1, 1]} : vector<384x48xf32> to vector<48x48xf32>
    %c24 = arith.constant 24 : index
    %c0_230 = arith.constant 0 : index
    %c0_231 = arith.constant 0 : index
    %387 = vector.load %arg8[%c24, %c0_230, %c0_231] : memref<32x48x48xf32, #tpu.memory_space<vmem>>, vector<1x48x48xf32>
    %388 = vector.shape_cast %387 : vector<1x48x48xf32> to vector<48x48xf32>
    %389 = vector.shape_cast %386 : vector<48x48xf32> to vector<1x48x48xf32>
    tpu.vector_store %arg8[%c24, %c0_230, %c0_231], %389 {strides = array<i32>} : memref<32x48x48xf32, #tpu.memory_space<vmem>>, vector<1x48x48xf32>,
    %390 = vector.extract_strided_slice %385 {offsets = [48, 0], sizes = [48, 48], strides = [1, 1]} : vector<384x48xf32> to vector<48x48xf32>
    %c25 = arith.constant 25 : index
    %c0_232 = arith.constant 0 : index
    %c0_233 = arith.constant 0 : index
    %391 = vector.load %arg8[%c25, %c0_232, %c0_233] : memref<32x48x48xf32, #tpu.memory_space<vmem>>, vector<1x48x48xf32>
    %392 = vector.shape_cast %391 : vector<1x48x48xf32> to vector<48x48xf32>
    %393 = vector.shape_cast %390 : vector<48x48xf32> to vector<1x48x48xf32>
    tpu.vector_store %arg8[%c25, %c0_232, %c0_233], %393 {strides = array<i32>} : memref<32x48x48xf32, #tpu.memory_space<vmem>>, vector<1x48x48xf32>,
    %394 = vector.extract_strided_slice %385 {offsets = [96, 0], sizes = [48, 48], strides = [1, 1]} : vector<384x48xf32> to vector<48x48xf32>
    %c26 = arith.constant 26 : index
    %c0_234 = arith.constant 0 : index
    %c0_235 = arith.constant 0 : index
    %395 = vector.load %arg8[%c26, %c0_234, %c0_235] : memref<32x48x48xf32, #tpu.memory_space<vmem>>, vector<1x48x48xf32>
    %396 = vector.shape_cast %395 : vector<1x48x48xf32> to vector<48x48xf32>
    %397 = vector.shape_cast %394 : vector<48x48xf32> to vector<1x48x48xf32>
    tpu.vector_store %arg8[%c26, %c0_234, %c0_235], %397 {strides = array<i32>} : memref<32x48x48xf32, #tpu.memory_space<vmem>>, vector<1x48x48xf32>,
    %398 = vector.extract_strided_slice %385 {offsets = [144, 0], sizes = [48, 48], strides = [1, 1]} : vector<384x48xf32> to vector<48x48xf32>
    %c27 = arith.constant 27 : index
    %c0_236 = arith.constant 0 : index
    %c0_237 = arith.constant 0 : index
    %399 = vector.load %arg8[%c27, %c0_236, %c0_237] : memref<32x48x48xf32, #tpu.memory_space<vmem>>, vector<1x48x48xf32>
    %400 = vector.shape_cast %399 : vector<1x48x48xf32> to vector<48x48xf32>
    %401 = vector.shape_cast %398 : vector<48x48xf32> to vector<1x48x48xf32>
    tpu.vector_store %arg8[%c27, %c0_236, %c0_237], %401 {strides = array<i32>} : memref<32x48x48xf32, #tpu.memory_space<vmem>>, vector<1x48x48xf32>,
    %402 = vector.extract_strided_slice %385 {offsets = [192, 0], sizes = [48, 48], strides = [1, 1]} : vector<384x48xf32> to vector<48x48xf32>
    %c28 = arith.constant 28 : index
    %c0_238 = arith.constant 0 : index
    %c0_239 = arith.constant 0 : index
    %403 = vector.load %arg8[%c28, %c0_238, %c0_239] : memref<32x48x48xf32, #tpu.memory_space<vmem>>, vector<1x48x48xf32>
    %404 = vector.shape_cast %403 : vector<1x48x48xf32> to vector<48x48xf32>
    %405 = vector.shape_cast %402 : vector<48x48xf32> to vector<1x48x48xf32>
    tpu.vector_store %arg8[%c28, %c0_238, %c0_239], %405 {strides = array<i32>} : memref<32x48x48xf32, #tpu.memory_space<vmem>>, vector<1x48x48xf32>,
    %406 = vector.extract_strided_slice %385 {offsets = [240, 0], sizes = [48, 48], strides = [1, 1]} : vector<384x48xf32> to vector<48x48xf32>
    %c29 = arith.constant 29 : index
    %c0_240 = arith.constant 0 : index
    %c0_241 = arith.constant 0 : index
    %407 = vector.load %arg8[%c29, %c0_240, %c0_241] : memref<32x48x48xf32, #tpu.memory_space<vmem>>, vector<1x48x48xf32>
    %408 = vector.shape_cast %407 : vector<1x48x48xf32> to vector<48x48xf32>
    %409 = vector.shape_cast %406 : vector<48x48xf32> to vector<1x48x48xf32>
    tpu.vector_store %arg8[%c29, %c0_240, %c0_241], %409 {strides = array<i32>} : memref<32x48x48xf32, #tpu.memory_space<vmem>>, vector<1x48x48xf32>,
    %410 = vector.extract_strided_slice %385 {offsets = [288, 0], sizes = [48, 48], strides = [1, 1]} : vector<384x48xf32> to vector<48x48xf32>
    %c30 = arith.constant 30 : index
    %c0_242 = arith.constant 0 : index
    %c0_243 = arith.constant 0 : index
    %411 = vector.load %arg8[%c30, %c0_242, %c0_243] : memref<32x48x48xf32, #tpu.memory_space<vmem>>, vector<1x48x48xf32>
    %412 = vector.shape_cast %411 : vector<1x48x48xf32> to vector<48x48xf32>
    %413 = vector.shape_cast %410 : vector<48x48xf32> to vector<1x48x48xf32>
    tpu.vector_store %arg8[%c30, %c0_242, %c0_243], %413 {strides = array<i32>} : memref<32x48x48xf32, #tpu.memory_space<vmem>>, vector<1x48x48xf32>,
    %414 = vector.extract_strided_slice %385 {offsets = [336, 0], sizes = [48, 48], strides = [1, 1]} : vector<384x48xf32> to vector<48x48xf32>
    %c31 = arith.constant 31 : index
    %c0_244 = arith.constant 0 : index
    %c0_245 = arith.constant 0 : index
    %415 = vector.load %arg8[%c31, %c0_244, %c0_245] : memref<32x48x48xf32, #tpu.memory_space<vmem>>, vector<1x48x48xf32>
    %416 = vector.shape_cast %415 : vector<1x48x48xf32> to vector<48x48xf32>
    %417 = vector.shape_cast %414 : vector<48x48xf32> to vector<1x48x48xf32>
    tpu.vector_store %arg8[%c31, %c0_244, %c0_245], %417 {strides = array<i32>} : memref<32x48x48xf32, #tpu.memory_space<vmem>>, vector<1x48x48xf32>,
    %cst_246 = arith.constant 0.000000e+00 : f32
    %418 = vector.broadcast %cst_246 : f32 to vector<16x16xf32>
    %c0_247 = arith.constant 0 : index
    %c16_248 = arith.constant 16 : index
    %c16_249 = arith.constant 16 : index
    %419 = vector.load %arg8[%c0_247, %c16_248, %c16_249] : memref<32x48x48xf32, #tpu.memory_space<vmem>>, vector<8x16x16xf32>
    %420 = arith.mulf %419, %419 : vector<8x16x16xf32>
    %cst_250 = arith.constant dense<0.000000e+00> : vector<16x16xf32>
    %421 = vector.multi_reduction <add>, %420, %cst_250 [0] : vector<8x16x16xf32> to vector<16x16xf32>
    %422 = arith.addf %418, %421 : vector<16x16xf32>
    %c8_251 = arith.constant 8 : index
    %c16_252 = arith.constant 16 : index
    %c21_253 = arith.constant 21 : index
    %423 = vector.load %arg8[%c8_251, %c16_252, %c21_253] : memref<32x48x48xf32, #tpu.memory_space<vmem>>, vector<8x16x16xf32>
    %424 = arith.mulf %423, %423 : vector<8x16x16xf32>
    %cst_254 = arith.constant dense<0.000000e+00> : vector<16x16xf32>
    %425 = vector.multi_reduction <add>, %424, %cst_254 [0] : vector<8x16x16xf32> to vector<16x16xf32>
    %426 = arith.addf %422, %425 : vector<16x16xf32>
    %c8_255 = arith.constant 8 : index
    %c20_256 = arith.constant 20 : index
    %c20_257 = arith.constant 20 : index
    %427 = vector.load %arg8[%c8_255, %c20_256, %c20_257] : memref<32x48x48xf32, #tpu.memory_space<vmem>>, vector<8x16x16xf32>
    %428 = arith.mulf %427, %427 : vector<8x16x16xf32>
    %cst_258 = arith.constant dense<0.000000e+00> : vector<16x16xf32>
    %429 = vector.multi_reduction <add>, %428, %cst_258 [0] : vector<8x16x16xf32> to vector<16x16xf32>
    %430 = arith.addf %426, %429 : vector<16x16xf32>
    %c8_259 = arith.constant 8 : index
    %c21_260 = arith.constant 21 : index
    %c16_261 = arith.constant 16 : index
    %431 = vector.load %arg8[%c8_259, %c21_260, %c16_261] : memref<32x48x48xf32, #tpu.memory_space<vmem>>, vector<8x16x16xf32>
    %432 = arith.mulf %431, %431 : vector<8x16x16xf32>
    %cst_262 = arith.constant dense<0.000000e+00> : vector<16x16xf32>
    %433 = vector.multi_reduction <add>, %432, %cst_262 [0] : vector<8x16x16xf32> to vector<16x16xf32>
    %434 = arith.addf %430, %433 : vector<16x16xf32>
    %c8_263 = arith.constant 8 : index
    %c20_264 = arith.constant 20 : index
    %c12_265 = arith.constant 12 : index
    %435 = vector.load %arg8[%c8_263, %c20_264, %c12_265] : memref<32x48x48xf32, #tpu.memory_space<vmem>>, vector<8x16x16xf32>
    %436 = arith.mulf %435, %435 : vector<8x16x16xf32>
    %cst_266 = arith.constant dense<0.000000e+00> : vector<16x16xf32>
    %437 = vector.multi_reduction <add>, %436, %cst_266 [0] : vector<8x16x16xf32> to vector<16x16xf32>
    %438 = arith.addf %434, %437 : vector<16x16xf32>
    %c8_267 = arith.constant 8 : index
    %c16_268 = arith.constant 16 : index
    %c11_269 = arith.constant 11 : index
    %439 = vector.load %arg8[%c8_267, %c16_268, %c11_269] : memref<32x48x48xf32, #tpu.memory_space<vmem>>, vector<8x16x16xf32>
    %440 = arith.mulf %439, %439 : vector<8x16x16xf32>
    %cst_270 = arith.constant dense<0.000000e+00> : vector<16x16xf32>
    %441 = vector.multi_reduction <add>, %440, %cst_270 [0] : vector<8x16x16xf32> to vector<16x16xf32>
    %442 = arith.addf %438, %441 : vector<16x16xf32>
    %c8_271 = arith.constant 8 : index
    %c12_272 = arith.constant 12 : index
    %c12_273 = arith.constant 12 : index
    %443 = vector.load %arg8[%c8_271, %c12_272, %c12_273] : memref<32x48x48xf32, #tpu.memory_space<vmem>>, vector<8x16x16xf32>
    %444 = arith.mulf %443, %443 : vector<8x16x16xf32>
    %cst_274 = arith.constant dense<0.000000e+00> : vector<16x16xf32>
    %445 = vector.multi_reduction <add>, %444, %cst_274 [0] : vector<8x16x16xf32> to vector<16x16xf32>
    %446 = arith.addf %442, %445 : vector<16x16xf32>
    %c8_275 = arith.constant 8 : index
    %c11_276 = arith.constant 11 : index
    %c16_277 = arith.constant 16 : index
    %447 = vector.load %arg8[%c8_275, %c11_276, %c16_277] : memref<32x48x48xf32, #tpu.memory_space<vmem>>, vector<8x16x16xf32>
    %448 = arith.mulf %447, %447 : vector<8x16x16xf32>
    %cst_278 = arith.constant dense<0.000000e+00> : vector<16x16xf32>
    %449 = vector.multi_reduction <add>, %448, %cst_278 [0] : vector<8x16x16xf32> to vector<16x16xf32>
    %450 = arith.addf %446, %449 : vector<16x16xf32>
    %c8_279 = arith.constant 8 : index
    %c12_280 = arith.constant 12 : index
    %c20_281 = arith.constant 20 : index
    %451 = vector.load %arg8[%c8_279, %c12_280, %c20_281] : memref<32x48x48xf32, #tpu.memory_space<vmem>>, vector<8x16x16xf32>
    %452 = arith.mulf %451, %451 : vector<8x16x16xf32>
    %cst_282 = arith.constant dense<0.000000e+00> : vector<16x16xf32>
    %453 = vector.multi_reduction <add>, %452, %cst_282 [0] : vector<8x16x16xf32> to vector<16x16xf32>
    %454 = arith.addf %450, %453 : vector<16x16xf32>
    %c16_283 = arith.constant 16 : index
    %c16_284 = arith.constant 16 : index
    %c26_285 = arith.constant 26 : index
    %455 = vector.load %arg8[%c16_283, %c16_284, %c26_285] : memref<32x48x48xf32, #tpu.memory_space<vmem>>, vector<8x16x16xf32>
    %456 = arith.mulf %455, %455 : vector<8x16x16xf32>
    %cst_286 = arith.constant dense<0.000000e+00> : vector<16x16xf32>
    %457 = vector.multi_reduction <add>, %456, %cst_286 [0] : vector<8x16x16xf32> to vector<16x16xf32>
    %458 = arith.addf %454, %457 : vector<16x16xf32>
    %c16_287 = arith.constant 16 : index
    %c23_288 = arith.constant 23 : index
    %c23_289 = arith.constant 23 : index
    %459 = vector.load %arg8[%c16_287, %c23_288, %c23_289] : memref<32x48x48xf32, #tpu.memory_space<vmem>>, vector<8x16x16xf32>
    %460 = arith.mulf %459, %459 : vector<8x16x16xf32>
    %cst_290 = arith.constant dense<0.000000e+00> : vector<16x16xf32>
    %461 = vector.multi_reduction <add>, %460, %cst_290 [0] : vector<8x16x16xf32> to vector<16x16xf32>
    %462 = arith.addf %458, %461 : vector<16x16xf32>
    %c16_291 = arith.constant 16 : index
    %c26_292 = arith.constant 26 : index
    %c16_293 = arith.constant 16 : index
    %463 = vector.load %arg8[%c16_291, %c26_292, %c16_293] : memref<32x48x48xf32, #tpu.memory_space<vmem>>, vector<8x16x16xf32>
    %464 = arith.mulf %463, %463 : vector<8x16x16xf32>
    %cst_294 = arith.constant dense<0.000000e+00> : vector<16x16xf32>
    %465 = vector.multi_reduction <add>, %464, %cst_294 [0] : vector<8x16x16xf32> to vector<16x16xf32>
    %466 = arith.addf %462, %465 : vector<16x16xf32>
    %c16_295 = arith.constant 16 : index
    %c23_296 = arith.constant 23 : index
    %c9_297 = arith.constant 9 : index
    %467 = vector.load %arg8[%c16_295, %c23_296, %c9_297] : memref<32x48x48xf32, #tpu.memory_space<vmem>>, vector<8x16x16xf32>
    %468 = arith.mulf %467, %467 : vector<8x16x16xf32>
    %cst_298 = arith.constant dense<0.000000e+00> : vector<16x16xf32>
    %469 = vector.multi_reduction <add>, %468, %cst_298 [0] : vector<8x16x16xf32> to vector<16x16xf32>
    %470 = arith.addf %466, %469 : vector<16x16xf32>
    %c16_299 = arith.constant 16 : index
    %c16_300 = arith.constant 16 : index
    %c6_301 = arith.constant 6 : index
    %471 = vector.load %arg8[%c16_299, %c16_300, %c6_301] : memref<32x48x48xf32, #tpu.memory_space<vmem>>, vector<8x16x16xf32>
    %472 = arith.mulf %471, %471 : vector<8x16x16xf32>
    %cst_302 = arith.constant dense<0.000000e+00> : vector<16x16xf32>
    %473 = vector.multi_reduction <add>, %472, %cst_302 [0] : vector<8x16x16xf32> to vector<16x16xf32>
    %474 = arith.addf %470, %473 : vector<16x16xf32>
    %c16_303 = arith.constant 16 : index
    %c9_304 = arith.constant 9 : index
    %c9_305 = arith.constant 9 : index
    %475 = vector.load %arg8[%c16_303, %c9_304, %c9_305] : memref<32x48x48xf32, #tpu.memory_space<vmem>>, vector<8x16x16xf32>
    %476 = arith.mulf %475, %475 : vector<8x16x16xf32>
    %cst_306 = arith.constant dense<0.000000e+00> : vector<16x16xf32>
    %477 = vector.multi_reduction <add>, %476, %cst_306 [0] : vector<8x16x16xf32> to vector<16x16xf32>
    %478 = arith.addf %474, %477 : vector<16x16xf32>
    %c16_307 = arith.constant 16 : index
    %c6_308 = arith.constant 6 : index
    %c16_309 = arith.constant 16 : index
    %479 = vector.load %arg8[%c16_307, %c6_308, %c16_309] : memref<32x48x48xf32, #tpu.memory_space<vmem>>, vector<8x16x16xf32>
    %480 = arith.mulf %479, %479 : vector<8x16x16xf32>
    %cst_310 = arith.constant dense<0.000000e+00> : vector<16x16xf32>
    %481 = vector.multi_reduction <add>, %480, %cst_310 [0] : vector<8x16x16xf32> to vector<16x16xf32>
    %482 = arith.addf %478, %481 : vector<16x16xf32>
    %c16_311 = arith.constant 16 : index
    %c9_312 = arith.constant 9 : index
    %c23_313 = arith.constant 23 : index
    %483 = vector.load %arg8[%c16_311, %c9_312, %c23_313] : memref<32x48x48xf32, #tpu.memory_space<vmem>>, vector<8x16x16xf32>
    %484 = arith.mulf %483, %483 : vector<8x16x16xf32>
    %cst_314 = arith.constant dense<0.000000e+00> : vector<16x16xf32>
    %485 = vector.multi_reduction <add>, %484, %cst_314 [0] : vector<8x16x16xf32> to vector<16x16xf32>
    %486 = arith.addf %482, %485 : vector<16x16xf32>
    %c24_315 = arith.constant 24 : index
    %c16_316 = arith.constant 16 : index
    %c31_317 = arith.constant 31 : index
    %487 = vector.load %arg8[%c24_315, %c16_316, %c31_317] : memref<32x48x48xf32, #tpu.memory_space<vmem>>, vector<8x16x16xf32>
    %488 = arith.mulf %487, %487 : vector<8x16x16xf32>
    %cst_318 = arith.constant dense<0.000000e+00> : vector<16x16xf32>
    %489 = vector.multi_reduction <add>, %488, %cst_318 [0] : vector<8x16x16xf32> to vector<16x16xf32>
    %490 = arith.addf %486, %489 : vector<16x16xf32>
    %c24_319 = arith.constant 24 : index
    %c27_320 = arith.constant 27 : index
    %c27_321 = arith.constant 27 : index
    %491 = vector.load %arg8[%c24_319, %c27_320, %c27_321] : memref<32x48x48xf32, #tpu.memory_space<vmem>>, vector<8x16x16xf32>
    %492 = arith.mulf %491, %491 : vector<8x16x16xf32>
    %cst_322 = arith.constant dense<0.000000e+00> : vector<16x16xf32>
    %493 = vector.multi_reduction <add>, %492, %cst_322 [0] : vector<8x16x16xf32> to vector<16x16xf32>
    %494 = arith.addf %490, %493 : vector<16x16xf32>
    %c24_323 = arith.constant 24 : index
    %c31_324 = arith.constant 31 : index
    %c16_325 = arith.constant 16 : index
    %495 = vector.load %arg8[%c24_323, %c31_324, %c16_325] : memref<32x48x48xf32, #tpu.memory_space<vmem>>, vector<8x16x16xf32>
    %496 = arith.mulf %495, %495 : vector<8x16x16xf32>
    %cst_326 = arith.constant dense<0.000000e+00> : vector<16x16xf32>
    %497 = vector.multi_reduction <add>, %496, %cst_326 [0] : vector<8x16x16xf32> to vector<16x16xf32>
    %498 = arith.addf %494, %497 : vector<16x16xf32>
    %c24_327 = arith.constant 24 : index
    %c27_328 = arith.constant 27 : index
    %c5_329 = arith.constant 5 : index
    %499 = vector.load %arg8[%c24_327, %c27_328, %c5_329] : memref<32x48x48xf32, #tpu.memory_space<vmem>>, vector<8x16x16xf32>
    %500 = arith.mulf %499, %499 : vector<8x16x16xf32>
    %cst_330 = arith.constant dense<0.000000e+00> : vector<16x16xf32>
    %501 = vector.multi_reduction <add>, %500, %cst_330 [0] : vector<8x16x16xf32> to vector<16x16xf32>
    %502 = arith.addf %498, %501 : vector<16x16xf32>
    %c24_331 = arith.constant 24 : index
    %c16_332 = arith.constant 16 : index
    %c1_333 = arith.constant 1 : index
    %503 = vector.load %arg8[%c24_331, %c16_332, %c1_333] : memref<32x48x48xf32, #tpu.memory_space<vmem>>, vector<8x16x16xf32>
    %504 = arith.mulf %503, %503 : vector<8x16x16xf32>
    %cst_334 = arith.constant dense<0.000000e+00> : vector<16x16xf32>
    %505 = vector.multi_reduction <add>, %504, %cst_334 [0] : vector<8x16x16xf32> to vector<16x16xf32>
    %506 = arith.addf %502, %505 : vector<16x16xf32>
    %c24_335 = arith.constant 24 : index
    %c5_336 = arith.constant 5 : index
    %c5_337 = arith.constant 5 : index
    %507 = vector.load %arg8[%c24_335, %c5_336, %c5_337] : memref<32x48x48xf32, #tpu.memory_space<vmem>>, vector<8x16x16xf32>
    %508 = arith.mulf %507, %507 : vector<8x16x16xf32>
    %cst_338 = arith.constant dense<0.000000e+00> : vector<16x16xf32>
    %509 = vector.multi_reduction <add>, %508, %cst_338 [0] : vector<8x16x16xf32> to vector<16x16xf32>
    %510 = arith.addf %506, %509 : vector<16x16xf32>
    %c24_339 = arith.constant 24 : index
    %c1_340 = arith.constant 1 : index
    %c16_341 = arith.constant 16 : index
    %511 = vector.load %arg8[%c24_339, %c1_340, %c16_341] : memref<32x48x48xf32, #tpu.memory_space<vmem>>, vector<8x16x16xf32>
    %512 = arith.mulf %511, %511 : vector<8x16x16xf32>
    %cst_342 = arith.constant dense<0.000000e+00> : vector<16x16xf32>
    %513 = vector.multi_reduction <add>, %512, %cst_342 [0] : vector<8x16x16xf32> to vector<16x16xf32>
    %514 = arith.addf %510, %513 : vector<16x16xf32>
    %c24_343 = arith.constant 24 : index
    %c5_344 = arith.constant 5 : index
    %c27_345 = arith.constant 27 : index
    %515 = vector.load %arg8[%c24_343, %c5_344, %c27_345] : memref<32x48x48xf32, #tpu.memory_space<vmem>>, vector<8x16x16xf32>
    %516 = arith.mulf %515, %515 : vector<8x16x16xf32>
    %cst_346 = arith.constant dense<0.000000e+00> : vector<16x16xf32>
    %517 = vector.multi_reduction <add>, %516, %cst_346 [0] : vector<8x16x16xf32> to vector<16x16xf32>
    %518 = arith.addf %514, %517 : vector<16x16xf32>
    %cst_347 = arith.constant 1.000000e-24 : f32
    %519 = vector.broadcast %cst_347 : f32 to vector<16x16xf32>
    %520 = arith.maximumf %518, %519 : vector<16x16xf32>
    %521 = math.rsqrt %520 : vector<16x16xf32>
    %c0_348 = arith.constant 0 : index
    %c16_349 = arith.constant 16 : index
    %c16_350 = arith.constant 16 : index
    %522 = vector.load %arg8[%c0_348, %c16_349, %c16_350] : memref<32x48x48xf32, #tpu.memory_space<vmem>>, vector<8x16x16xf32>
    %523 = vector.shape_cast %521 : vector<16x16xf32> to vector<1x16x16xf32>
    %524 = vector.broadcast %523 : vector<1x16x16xf32> to vector<8x16x16xf32>
    %525 = arith.mulf %522, %524 : vector<8x16x16xf32>
    %c0_351 = arith.constant 0 : index
    %c0_352 = arith.constant 0 : index
    %c0_353 = arith.constant 0 : index
    %c0_354 = arith.constant 0 : index
    %526 = vector.load %arg6[%c0_351, %c0_352, %c0_353, %c0_354] : memref<1x200x16x16xf32, #tpu.memory_space<vmem>>, vector<1x8x16x16xf32>
    %527 = vector.shape_cast %526 : vector<1x8x16x16xf32> to vector<8x16x16xf32>
    %528 = vector.shape_cast %525 : vector<8x16x16xf32> to vector<1x8x16x16xf32>
    tpu.vector_store %arg6[%c0_351, %c0_352, %c0_353, %c0_354], %528 {strides = array<i32>} : memref<1x200x16x16xf32, #tpu.memory_space<vmem>>, vector<1x8x16x16xf32>,
    %c8_355 = arith.constant 8 : index
    %c16_356 = arith.constant 16 : index
    %c21_357 = arith.constant 21 : index
    %529 = vector.load %arg8[%c8_355, %c16_356, %c21_357] : memref<32x48x48xf32, #tpu.memory_space<vmem>>, vector<8x16x16xf32>
    %530 = vector.shape_cast %521 : vector<16x16xf32> to vector<1x16x16xf32>
    %531 = vector.broadcast %530 : vector<1x16x16xf32> to vector<8x16x16xf32>
    %532 = arith.mulf %529, %531 : vector<8x16x16xf32>
    %c0_358 = arith.constant 0 : index
    %c8_359 = arith.constant 8 : index
    %c0_360 = arith.constant 0 : index
    %c0_361 = arith.constant 0 : index
    %533 = vector.load %arg6[%c0_358, %c8_359, %c0_360, %c0_361] : memref<1x200x16x16xf32, #tpu.memory_space<vmem>>, vector<1x8x16x16xf32>
    %534 = vector.shape_cast %533 : vector<1x8x16x16xf32> to vector<8x16x16xf32>
    %535 = vector.shape_cast %532 : vector<8x16x16xf32> to vector<1x8x16x16xf32>
    tpu.vector_store %arg6[%c0_358, %c8_359, %c0_360, %c0_361], %535 {strides = array<i32>} : memref<1x200x16x16xf32, #tpu.memory_space<vmem>>, vector<1x8x16x16xf32>,
    %c8_362 = arith.constant 8 : index
    %c20_363 = arith.constant 20 : index
    %c20_364 = arith.constant 20 : index
    %536 = vector.load %arg8[%c8_362, %c20_363, %c20_364] : memref<32x48x48xf32, #tpu.memory_space<vmem>>, vector<8x16x16xf32>
    %537 = vector.shape_cast %521 : vector<16x16xf32> to vector<1x16x16xf32>
    %538 = vector.broadcast %537 : vector<1x16x16xf32> to vector<8x16x16xf32>
    %539 = arith.mulf %536, %538 : vector<8x16x16xf32>
    %c0_365 = arith.constant 0 : index
    %c16_366 = arith.constant 16 : index
    %c0_367 = arith.constant 0 : index
    %c0_368 = arith.constant 0 : index
    %540 = vector.load %arg6[%c0_365, %c16_366, %c0_367, %c0_368] : memref<1x200x16x16xf32, #tpu.memory_space<vmem>>, vector<1x8x16x16xf32>
    %541 = vector.shape_cast %540 : vector<1x8x16x16xf32> to vector<8x16x16xf32>
    %542 = vector.shape_cast %539 : vector<8x16x16xf32> to vector<1x8x16x16xf32>
    tpu.vector_store %arg6[%c0_365, %c16_366, %c0_367, %c0_368], %542 {strides = array<i32>} : memref<1x200x16x16xf32, #tpu.memory_space<vmem>>, vector<1x8x16x16xf32>,
    %c8_369 = arith.constant 8 : index
    %c21_370 = arith.constant 21 : index
    %c16_371 = arith.constant 16 : index
    %543 = vector.load %arg8[%c8_369, %c21_370, %c16_371] : memref<32x48x48xf32, #tpu.memory_space<vmem>>, vector<8x16x16xf32>
    %544 = vector.shape_cast %521 : vector<16x16xf32> to vector<1x16x16xf32>
    %545 = vector.broadcast %544 : vector<1x16x16xf32> to vector<8x16x16xf32>
    %546 = arith.mulf %543, %545 : vector<8x16x16xf32>
    %c0_372 = arith.constant 0 : index
    %c24_373 = arith.constant 24 : index
    %c0_374 = arith.constant 0 : index
    %c0_375 = arith.constant 0 : index
    %547 = vector.load %arg6[%c0_372, %c24_373, %c0_374, %c0_375] : memref<1x200x16x16xf32, #tpu.memory_space<vmem>>, vector<1x8x16x16xf32>
    %548 = vector.shape_cast %547 : vector<1x8x16x16xf32> to vector<8x16x16xf32>
    %549 = vector.shape_cast %546 : vector<8x16x16xf32> to vector<1x8x16x16xf32>
    tpu.vector_store %arg6[%c0_372, %c24_373, %c0_374, %c0_375], %549 {strides = array<i32>} : memref<1x200x16x16xf32, #tpu.memory_space<vmem>>, vector<1x8x16x16xf32>,
    %c8_376 = arith.constant 8 : index
    %c20_377 = arith.constant 20 : index
    %c12_378 = arith.constant 12 : index
    %550 = vector.load %arg8[%c8_376, %c20_377, %c12_378] : memref<32x48x48xf32, #tpu.memory_space<vmem>>, vector<8x16x16xf32>
    %551 = vector.shape_cast %521 : vector<16x16xf32> to vector<1x16x16xf32>
    %552 = vector.broadcast %551 : vector<1x16x16xf32> to vector<8x16x16xf32>
    %553 = arith.mulf %550, %552 : vector<8x16x16xf32>
    %c0_379 = arith.constant 0 : index
    %c32 = arith.constant 32 : index
    %c0_380 = arith.constant 0 : index
    %c0_381 = arith.constant 0 : index
    %554 = vector.load %arg6[%c0_379, %c32, %c0_380, %c0_381] : memref<1x200x16x16xf32, #tpu.memory_space<vmem>>, vector<1x8x16x16xf32>
    %555 = vector.shape_cast %554 : vector<1x8x16x16xf32> to vector<8x16x16xf32>
    %556 = vector.shape_cast %553 : vector<8x16x16xf32> to vector<1x8x16x16xf32>
    tpu.vector_store %arg6[%c0_379, %c32, %c0_380, %c0_381], %556 {strides = array<i32>} : memref<1x200x16x16xf32, #tpu.memory_space<vmem>>, vector<1x8x16x16xf32>,
    %c8_382 = arith.constant 8 : index
    %c16_383 = arith.constant 16 : index
    %c11_384 = arith.constant 11 : index
    %557 = vector.load %arg8[%c8_382, %c16_383, %c11_384] : memref<32x48x48xf32, #tpu.memory_space<vmem>>, vector<8x16x16xf32>
    %558 = vector.shape_cast %521 : vector<16x16xf32> to vector<1x16x16xf32>
    %559 = vector.broadcast %558 : vector<1x16x16xf32> to vector<8x16x16xf32>
    %560 = arith.mulf %557, %559 : vector<8x16x16xf32>
    %c0_385 = arith.constant 0 : index
    %c40 = arith.constant 40 : index
    %c0_386 = arith.constant 0 : index
    %c0_387 = arith.constant 0 : index
    %561 = vector.load %arg6[%c0_385, %c40, %c0_386, %c0_387] : memref<1x200x16x16xf32, #tpu.memory_space<vmem>>, vector<1x8x16x16xf32>
    %562 = vector.shape_cast %561 : vector<1x8x16x16xf32> to vector<8x16x16xf32>
    %563 = vector.shape_cast %560 : vector<8x16x16xf32> to vector<1x8x16x16xf32>
    tpu.vector_store %arg6[%c0_385, %c40, %c0_386, %c0_387], %563 {strides = array<i32>} : memref<1x200x16x16xf32, #tpu.memory_space<vmem>>, vector<1x8x16x16xf32>,
    %c8_388 = arith.constant 8 : index
    %c12_389 = arith.constant 12 : index
    %c12_390 = arith.constant 12 : index
    %564 = vector.load %arg8[%c8_388, %c12_389, %c12_390] : memref<32x48x48xf32, #tpu.memory_space<vmem>>, vector<8x16x16xf32>
    %565 = vector.shape_cast %521 : vector<16x16xf32> to vector<1x16x16xf32>
    %566 = vector.broadcast %565 : vector<1x16x16xf32> to vector<8x16x16xf32>
    %567 = arith.mulf %564, %566 : vector<8x16x16xf32>
    %c0_391 = arith.constant 0 : index
    %c48_392 = arith.constant 48 : index
    %c0_393 = arith.constant 0 : index
    %c0_394 = arith.constant 0 : index
    %568 = vector.load %arg6[%c0_391, %c48_392, %c0_393, %c0_394] : memref<1x200x16x16xf32, #tpu.memory_space<vmem>>, vector<1x8x16x16xf32>
    %569 = vector.shape_cast %568 : vector<1x8x16x16xf32> to vector<8x16x16xf32>
    %570 = vector.shape_cast %567 : vector<8x16x16xf32> to vector<1x8x16x16xf32>
    tpu.vector_store %arg6[%c0_391, %c48_392, %c0_393, %c0_394], %570 {strides = array<i32>} : memref<1x200x16x16xf32, #tpu.memory_space<vmem>>, vector<1x8x16x16xf32>,
    %c8_395 = arith.constant 8 : index
    %c11_396 = arith.constant 11 : index
    %c16_397 = arith.constant 16 : index
    %571 = vector.load %arg8[%c8_395, %c11_396, %c16_397] : memref<32x48x48xf32, #tpu.memory_space<vmem>>, vector<8x16x16xf32>
    %572 = vector.shape_cast %521 : vector<16x16xf32> to vector<1x16x16xf32>
    %573 = vector.broadcast %572 : vector<1x16x16xf32> to vector<8x16x16xf32>
    %574 = arith.mulf %571, %573 : vector<8x16x16xf32>
    %c0_398 = arith.constant 0 : index
    %c56 = arith.constant 56 : index
    %c0_399 = arith.constant 0 : index
    %c0_400 = arith.constant 0 : index
    %575 = vector.load %arg6[%c0_398, %c56, %c0_399, %c0_400] : memref<1x200x16x16xf32, #tpu.memory_space<vmem>>, vector<1x8x16x16xf32>
    %576 = vector.shape_cast %575 : vector<1x8x16x16xf32> to vector<8x16x16xf32>
    %577 = vector.shape_cast %574 : vector<8x16x16xf32> to vector<1x8x16x16xf32>
    tpu.vector_store %arg6[%c0_398, %c56, %c0_399, %c0_400], %577 {strides = array<i32>} : memref<1x200x16x16xf32, #tpu.memory_space<vmem>>, vector<1x8x16x16xf32>,
    %c8_401 = arith.constant 8 : index
    %c12_402 = arith.constant 12 : index
    %c20_403 = arith.constant 20 : index
    %578 = vector.load %arg8[%c8_401, %c12_402, %c20_403] : memref<32x48x48xf32, #tpu.memory_space<vmem>>, vector<8x16x16xf32>
    %579 = vector.shape_cast %521 : vector<16x16xf32> to vector<1x16x16xf32>
    %580 = vector.broadcast %579 : vector<1x16x16xf32> to vector<8x16x16xf32>
    %581 = arith.mulf %578, %580 : vector<8x16x16xf32>
    %c0_404 = arith.constant 0 : index
    %c64 = arith.constant 64 : index
    %c0_405 = arith.constant 0 : index
    %c0_406 = arith.constant 0 : index
    %582 = vector.load %arg6[%c0_404, %c64, %c0_405, %c0_406] : memref<1x200x16x16xf32, #tpu.memory_space<vmem>>, vector<1x8x16x16xf32>
    %583 = vector.shape_cast %582 : vector<1x8x16x16xf32> to vector<8x16x16xf32>
    %584 = vector.shape_cast %581 : vector<8x16x16xf32> to vector<1x8x16x16xf32>
    tpu.vector_store %arg6[%c0_404, %c64, %c0_405, %c0_406], %584 {strides = array<i32>} : memref<1x200x16x16xf32, #tpu.memory_space<vmem>>, vector<1x8x16x16xf32>,
    %c16_407 = arith.constant 16 : index
    %c16_408 = arith.constant 16 : index
    %c26_409 = arith.constant 26 : index
    %585 = vector.load %arg8[%c16_407, %c16_408, %c26_409] : memref<32x48x48xf32, #tpu.memory_space<vmem>>, vector<8x16x16xf32>
    %586 = vector.shape_cast %521 : vector<16x16xf32> to vector<1x16x16xf32>
    %587 = vector.broadcast %586 : vector<1x16x16xf32> to vector<8x16x16xf32>
    %588 = arith.mulf %585, %587 : vector<8x16x16xf32>
    %c0_410 = arith.constant 0 : index
    %c72 = arith.constant 72 : index
    %c0_411 = arith.constant 0 : index
    %c0_412 = arith.constant 0 : index
    %589 = vector.load %arg6[%c0_410, %c72, %c0_411, %c0_412] : memref<1x200x16x16xf32, #tpu.memory_space<vmem>>, vector<1x8x16x16xf32>
    %590 = vector.shape_cast %589 : vector<1x8x16x16xf32> to vector<8x16x16xf32>
    %591 = vector.shape_cast %588 : vector<8x16x16xf32> to vector<1x8x16x16xf32>
    tpu.vector_store %arg6[%c0_410, %c72, %c0_411, %c0_412], %591 {strides = array<i32>} : memref<1x200x16x16xf32, #tpu.memory_space<vmem>>, vector<1x8x16x16xf32>,
    %c16_413 = arith.constant 16 : index
    %c23_414 = arith.constant 23 : index
    %c23_415 = arith.constant 23 : index
    %592 = vector.load %arg8[%c16_413, %c23_414, %c23_415] : memref<32x48x48xf32, #tpu.memory_space<vmem>>, vector<8x16x16xf32>
    %593 = vector.shape_cast %521 : vector<16x16xf32> to vector<1x16x16xf32>
    %594 = vector.broadcast %593 : vector<1x16x16xf32> to vector<8x16x16xf32>
    %595 = arith.mulf %592, %594 : vector<8x16x16xf32>
    %c0_416 = arith.constant 0 : index
    %c80 = arith.constant 80 : index
    %c0_417 = arith.constant 0 : index
    %c0_418 = arith.constant 0 : index
    %596 = vector.load %arg6[%c0_416, %c80, %c0_417, %c0_418] : memref<1x200x16x16xf32, #tpu.memory_space<vmem>>, vector<1x8x16x16xf32>
    %597 = vector.shape_cast %596 : vector<1x8x16x16xf32> to vector<8x16x16xf32>
    %598 = vector.shape_cast %595 : vector<8x16x16xf32> to vector<1x8x16x16xf32>
    tpu.vector_store %arg6[%c0_416, %c80, %c0_417, %c0_418], %598 {strides = array<i32>} : memref<1x200x16x16xf32, #tpu.memory_space<vmem>>, vector<1x8x16x16xf32>,
    %c16_419 = arith.constant 16 : index
    %c26_420 = arith.constant 26 : index
    %c16_421 = arith.constant 16 : index
    %599 = vector.load %arg8[%c16_419, %c26_420, %c16_421] : memref<32x48x48xf32, #tpu.memory_space<vmem>>, vector<8x16x16xf32>
    %600 = vector.shape_cast %521 : vector<16x16xf32> to vector<1x16x16xf32>
    %601 = vector.broadcast %600 : vector<1x16x16xf32> to vector<8x16x16xf32>
    %602 = arith.mulf %599, %601 : vector<8x16x16xf32>
    %c0_422 = arith.constant 0 : index
    %c88 = arith.constant 88 : index
    %c0_423 = arith.constant 0 : index
    %c0_424 = arith.constant 0 : index
    %603 = vector.load %arg6[%c0_422, %c88, %c0_423, %c0_424] : memref<1x200x16x16xf32, #tpu.memory_space<vmem>>, vector<1x8x16x16xf32>
    %604 = vector.shape_cast %603 : vector<1x8x16x16xf32> to vector<8x16x16xf32>
    %605 = vector.shape_cast %602 : vector<8x16x16xf32> to vector<1x8x16x16xf32>
    tpu.vector_store %arg6[%c0_422, %c88, %c0_423, %c0_424], %605 {strides = array<i32>} : memref<1x200x16x16xf32, #tpu.memory_space<vmem>>, vector<1x8x16x16xf32>,
    %c16_425 = arith.constant 16 : index
    %c23_426 = arith.constant 23 : index
    %c9_427 = arith.constant 9 : index
    %606 = vector.load %arg8[%c16_425, %c23_426, %c9_427] : memref<32x48x48xf32, #tpu.memory_space<vmem>>, vector<8x16x16xf32>
    %607 = vector.shape_cast %521 : vector<16x16xf32> to vector<1x16x16xf32>
    %608 = vector.broadcast %607 : vector<1x16x16xf32> to vector<8x16x16xf32>
    %609 = arith.mulf %606, %608 : vector<8x16x16xf32>
    %c0_428 = arith.constant 0 : index
    %c96_429 = arith.constant 96 : index
    %c0_430 = arith.constant 0 : index
    %c0_431 = arith.constant 0 : index
    %610 = vector.load %arg6[%c0_428, %c96_429, %c0_430, %c0_431] : memref<1x200x16x16xf32, #tpu.memory_space<vmem>>, vector<1x8x16x16xf32>
    %611 = vector.shape_cast %610 : vector<1x8x16x16xf32> to vector<8x16x16xf32>
    %612 = vector.shape_cast %609 : vector<8x16x16xf32> to vector<1x8x16x16xf32>
    tpu.vector_store %arg6[%c0_428, %c96_429, %c0_430, %c0_431], %612 {strides = array<i32>} : memref<1x200x16x16xf32, #tpu.memory_space<vmem>>, vector<1x8x16x16xf32>,
    %c16_432 = arith.constant 16 : index
    %c16_433 = arith.constant 16 : index
    %c6_434 = arith.constant 6 : index
    %613 = vector.load %arg8[%c16_432, %c16_433, %c6_434] : memref<32x48x48xf32, #tpu.memory_space<vmem>>, vector<8x16x16xf32>
    %614 = vector.shape_cast %521 : vector<16x16xf32> to vector<1x16x16xf32>
    %615 = vector.broadcast %614 : vector<1x16x16xf32> to vector<8x16x16xf32>
    %616 = arith.mulf %613, %615 : vector<8x16x16xf32>
    %c0_435 = arith.constant 0 : index
    %c104 = arith.constant 104 : index
    %c0_436 = arith.constant 0 : index
    %c0_437 = arith.constant 0 : index
    %617 = vector.load %arg6[%c0_435, %c104, %c0_436, %c0_437] : memref<1x200x16x16xf32, #tpu.memory_space<vmem>>, vector<1x8x16x16xf32>
    %618 = vector.shape_cast %617 : vector<1x8x16x16xf32> to vector<8x16x16xf32>
    %619 = vector.shape_cast %616 : vector<8x16x16xf32> to vector<1x8x16x16xf32>
    tpu.vector_store %arg6[%c0_435, %c104, %c0_436, %c0_437], %619 {strides = array<i32>} : memref<1x200x16x16xf32, #tpu.memory_space<vmem>>, vector<1x8x16x16xf32>,
    %c16_438 = arith.constant 16 : index
    %c9_439 = arith.constant 9 : index
    %c9_440 = arith.constant 9 : index
    %620 = vector.load %arg8[%c16_438, %c9_439, %c9_440] : memref<32x48x48xf32, #tpu.memory_space<vmem>>, vector<8x16x16xf32>
    %621 = vector.shape_cast %521 : vector<16x16xf32> to vector<1x16x16xf32>
    %622 = vector.broadcast %621 : vector<1x16x16xf32> to vector<8x16x16xf32>
    %623 = arith.mulf %620, %622 : vector<8x16x16xf32>
    %c0_441 = arith.constant 0 : index
    %c112 = arith.constant 112 : index
    %c0_442 = arith.constant 0 : index
    %c0_443 = arith.constant 0 : index
    %624 = vector.load %arg6[%c0_441, %c112, %c0_442, %c0_443] : memref<1x200x16x16xf32, #tpu.memory_space<vmem>>, vector<1x8x16x16xf32>
    %625 = vector.shape_cast %624 : vector<1x8x16x16xf32> to vector<8x16x16xf32>
    %626 = vector.shape_cast %623 : vector<8x16x16xf32> to vector<1x8x16x16xf32>
    tpu.vector_store %arg6[%c0_441, %c112, %c0_442, %c0_443], %626 {strides = array<i32>} : memref<1x200x16x16xf32, #tpu.memory_space<vmem>>, vector<1x8x16x16xf32>,
    %c16_444 = arith.constant 16 : index
    %c6_445 = arith.constant 6 : index
    %c16_446 = arith.constant 16 : index
    %627 = vector.load %arg8[%c16_444, %c6_445, %c16_446] : memref<32x48x48xf32, #tpu.memory_space<vmem>>, vector<8x16x16xf32>
    %628 = vector.shape_cast %521 : vector<16x16xf32> to vector<1x16x16xf32>
    %629 = vector.broadcast %628 : vector<1x16x16xf32> to vector<8x16x16xf32>
    %630 = arith.mulf %627, %629 : vector<8x16x16xf32>
    %c0_447 = arith.constant 0 : index
    %c120 = arith.constant 120 : index
    %c0_448 = arith.constant 0 : index
    %c0_449 = arith.constant 0 : index
    %631 = vector.load %arg6[%c0_447, %c120, %c0_448, %c0_449] : memref<1x200x16x16xf32, #tpu.memory_space<vmem>>, vector<1x8x16x16xf32>
    %632 = vector.shape_cast %631 : vector<1x8x16x16xf32> to vector<8x16x16xf32>
    %633 = vector.shape_cast %630 : vector<8x16x16xf32> to vector<1x8x16x16xf32>
    tpu.vector_store %arg6[%c0_447, %c120, %c0_448, %c0_449], %633 {strides = array<i32>} : memref<1x200x16x16xf32, #tpu.memory_space<vmem>>, vector<1x8x16x16xf32>,
    %c16_450 = arith.constant 16 : index
    %c9_451 = arith.constant 9 : index
    %c23_452 = arith.constant 23 : index
    %634 = vector.load %arg8[%c16_450, %c9_451, %c23_452] : memref<32x48x48xf32, #tpu.memory_space<vmem>>, vector<8x16x16xf32>
    %635 = vector.shape_cast %521 : vector<16x16xf32> to vector<1x16x16xf32>
    %636 = vector.broadcast %635 : vector<1x16x16xf32> to vector<8x16x16xf32>
    %637 = arith.mulf %634, %636 : vector<8x16x16xf32>
    %c0_453 = arith.constant 0 : index
    %c128 = arith.constant 128 : index
    %c0_454 = arith.constant 0 : index
    %c0_455 = arith.constant 0 : index
    %638 = vector.load %arg6[%c0_453, %c128, %c0_454, %c0_455] : memref<1x200x16x16xf32, #tpu.memory_space<vmem>>, vector<1x8x16x16xf32>
    %639 = vector.shape_cast %638 : vector<1x8x16x16xf32> to vector<8x16x16xf32>
    %640 = vector.shape_cast %637 : vector<8x16x16xf32> to vector<1x8x16x16xf32>
    tpu.vector_store %arg6[%c0_453, %c128, %c0_454, %c0_455], %640 {strides = array<i32>} : memref<1x200x16x16xf32, #tpu.memory_space<vmem>>, vector<1x8x16x16xf32>,
    %c24_456 = arith.constant 24 : index
    %c16_457 = arith.constant 16 : index
    %c31_458 = arith.constant 31 : index
    %641 = vector.load %arg8[%c24_456, %c16_457, %c31_458] : memref<32x48x48xf32, #tpu.memory_space<vmem>>, vector<8x16x16xf32>
    %642 = vector.shape_cast %521 : vector<16x16xf32> to vector<1x16x16xf32>
    %643 = vector.broadcast %642 : vector<1x16x16xf32> to vector<8x16x16xf32>
    %644 = arith.mulf %641, %643 : vector<8x16x16xf32>
    %c0_459 = arith.constant 0 : index
    %c136 = arith.constant 136 : index
    %c0_460 = arith.constant 0 : index
    %c0_461 = arith.constant 0 : index
    %645 = vector.load %arg6[%c0_459, %c136, %c0_460, %c0_461] : memref<1x200x16x16xf32, #tpu.memory_space<vmem>>, vector<1x8x16x16xf32>
    %646 = vector.shape_cast %645 : vector<1x8x16x16xf32> to vector<8x16x16xf32>
    %647 = vector.shape_cast %644 : vector<8x16x16xf32> to vector<1x8x16x16xf32>
    tpu.vector_store %arg6[%c0_459, %c136, %c0_460, %c0_461], %647 {strides = array<i32>} : memref<1x200x16x16xf32, #tpu.memory_space<vmem>>, vector<1x8x16x16xf32>,
    %c24_462 = arith.constant 24 : index
    %c27_463 = arith.constant 27 : index
    %c27_464 = arith.constant 27 : index
    %648 = vector.load %arg8[%c24_462, %c27_463, %c27_464] : memref<32x48x48xf32, #tpu.memory_space<vmem>>, vector<8x16x16xf32>
    %649 = vector.shape_cast %521 : vector<16x16xf32> to vector<1x16x16xf32>
    %650 = vector.broadcast %649 : vector<1x16x16xf32> to vector<8x16x16xf32>
    %651 = arith.mulf %648, %650 : vector<8x16x16xf32>
    %c0_465 = arith.constant 0 : index
    %c144_466 = arith.constant 144 : index
    %c0_467 = arith.constant 0 : index
    %c0_468 = arith.constant 0 : index
    %652 = vector.load %arg6[%c0_465, %c144_466, %c0_467, %c0_468] : memref<1x200x16x16xf32, #tpu.memory_space<vmem>>, vector<1x8x16x16xf32>
    %653 = vector.shape_cast %652 : vector<1x8x16x16xf32> to vector<8x16x16xf32>
    %654 = vector.shape_cast %651 : vector<8x16x16xf32> to vector<1x8x16x16xf32>
    tpu.vector_store %arg6[%c0_465, %c144_466, %c0_467, %c0_468], %654 {strides = array<i32>} : memref<1x200x16x16xf32, #tpu.memory_space<vmem>>, vector<1x8x16x16xf32>,
    %c24_469 = arith.constant 24 : index
    %c31_470 = arith.constant 31 : index
    %c16_471 = arith.constant 16 : index
    %655 = vector.load %arg8[%c24_469, %c31_470, %c16_471] : memref<32x48x48xf32, #tpu.memory_space<vmem>>, vector<8x16x16xf32>
    %656 = vector.shape_cast %521 : vector<16x16xf32> to vector<1x16x16xf32>
    %657 = vector.broadcast %656 : vector<1x16x16xf32> to vector<8x16x16xf32>
    %658 = arith.mulf %655, %657 : vector<8x16x16xf32>
    %c0_472 = arith.constant 0 : index
    %c152 = arith.constant 152 : index
    %c0_473 = arith.constant 0 : index
    %c0_474 = arith.constant 0 : index
    %659 = vector.load %arg6[%c0_472, %c152, %c0_473, %c0_474] : memref<1x200x16x16xf32, #tpu.memory_space<vmem>>, vector<1x8x16x16xf32>
    %660 = vector.shape_cast %659 : vector<1x8x16x16xf32> to vector<8x16x16xf32>
    %661 = vector.shape_cast %658 : vector<8x16x16xf32> to vector<1x8x16x16xf32>
    tpu.vector_store %arg6[%c0_472, %c152, %c0_473, %c0_474], %661 {strides = array<i32>} : memref<1x200x16x16xf32, #tpu.memory_space<vmem>>, vector<1x8x16x16xf32>,
    %c24_475 = arith.constant 24 : index
    %c27_476 = arith.constant 27 : index
    %c5_477 = arith.constant 5 : index
    %662 = vector.load %arg8[%c24_475, %c27_476, %c5_477] : memref<32x48x48xf32, #tpu.memory_space<vmem>>, vector<8x16x16xf32>
    %663 = vector.shape_cast %521 : vector<16x16xf32> to vector<1x16x16xf32>
    %664 = vector.broadcast %663 : vector<1x16x16xf32> to vector<8x16x16xf32>
    %665 = arith.mulf %662, %664 : vector<8x16x16xf32>
    %c0_478 = arith.constant 0 : index
    %c160 = arith.constant 160 : index
    %c0_479 = arith.constant 0 : index
    %c0_480 = arith.constant 0 : index
    %666 = vector.load %arg6[%c0_478, %c160, %c0_479, %c0_480] : memref<1x200x16x16xf32, #tpu.memory_space<vmem>>, vector<1x8x16x16xf32>
    %667 = vector.shape_cast %666 : vector<1x8x16x16xf32> to vector<8x16x16xf32>
    %668 = vector.shape_cast %665 : vector<8x16x16xf32> to vector<1x8x16x16xf32>
    tpu.vector_store %arg6[%c0_478, %c160, %c0_479, %c0_480], %668 {strides = array<i32>} : memref<1x200x16x16xf32, #tpu.memory_space<vmem>>, vector<1x8x16x16xf32>,
    %c24_481 = arith.constant 24 : index
    %c16_482 = arith.constant 16 : index
    %c1_483 = arith.constant 1 : index
    %669 = vector.load %arg8[%c24_481, %c16_482, %c1_483] : memref<32x48x48xf32, #tpu.memory_space<vmem>>, vector<8x16x16xf32>
    %670 = vector.shape_cast %521 : vector<16x16xf32> to vector<1x16x16xf32>
    %671 = vector.broadcast %670 : vector<1x16x16xf32> to vector<8x16x16xf32>
    %672 = arith.mulf %669, %671 : vector<8x16x16xf32>
    %c0_484 = arith.constant 0 : index
    %c168 = arith.constant 168 : index
    %c0_485 = arith.constant 0 : index
    %c0_486 = arith.constant 0 : index
    %673 = vector.load %arg6[%c0_484, %c168, %c0_485, %c0_486] : memref<1x200x16x16xf32, #tpu.memory_space<vmem>>, vector<1x8x16x16xf32>
    %674 = vector.shape_cast %673 : vector<1x8x16x16xf32> to vector<8x16x16xf32>
    %675 = vector.shape_cast %672 : vector<8x16x16xf32> to vector<1x8x16x16xf32>
    tpu.vector_store %arg6[%c0_484, %c168, %c0_485, %c0_486], %675 {strides = array<i32>} : memref<1x200x16x16xf32, #tpu.memory_space<vmem>>, vector<1x8x16x16xf32>,
    %c24_487 = arith.constant 24 : index
    %c5_488 = arith.constant 5 : index
    %c5_489 = arith.constant 5 : index
    %676 = vector.load %arg8[%c24_487, %c5_488, %c5_489] : memref<32x48x48xf32, #tpu.memory_space<vmem>>, vector<8x16x16xf32>
    %677 = vector.shape_cast %521 : vector<16x16xf32> to vector<1x16x16xf32>
    %678 = vector.broadcast %677 : vector<1x16x16xf32> to vector<8x16x16xf32>
    %679 = arith.mulf %676, %678 : vector<8x16x16xf32>
    %c0_490 = arith.constant 0 : index
    %c176 = arith.constant 176 : index
    %c0_491 = arith.constant 0 : index
    %c0_492 = arith.constant 0 : index
    %680 = vector.load %arg6[%c0_490, %c176, %c0_491, %c0_492] : memref<1x200x16x16xf32, #tpu.memory_space<vmem>>, vector<1x8x16x16xf32>
    %681 = vector.shape_cast %680 : vector<1x8x16x16xf32> to vector<8x16x16xf32>
    %682 = vector.shape_cast %679 : vector<8x16x16xf32> to vector<1x8x16x16xf32>
    tpu.vector_store %arg6[%c0_490, %c176, %c0_491, %c0_492], %682 {strides = array<i32>} : memref<1x200x16x16xf32, #tpu.memory_space<vmem>>, vector<1x8x16x16xf32>,
    %c24_493 = arith.constant 24 : index
    %c1_494 = arith.constant 1 : index
    %c16_495 = arith.constant 16 : index
    %683 = vector.load %arg8[%c24_493, %c1_494, %c16_495] : memref<32x48x48xf32, #tpu.memory_space<vmem>>, vector<8x16x16xf32>
    %684 = vector.shape_cast %521 : vector<16x16xf32> to vector<1x16x16xf32>
    %685 = vector.broadcast %684 : vector<1x16x16xf32> to vector<8x16x16xf32>
    %686 = arith.mulf %683, %685 : vector<8x16x16xf32>
    %c0_496 = arith.constant 0 : index
    %c184 = arith.constant 184 : index
    %c0_497 = arith.constant 0 : index
    %c0_498 = arith.constant 0 : index
    %687 = vector.load %arg6[%c0_496, %c184, %c0_497, %c0_498] : memref<1x200x16x16xf32, #tpu.memory_space<vmem>>, vector<1x8x16x16xf32>
    %688 = vector.shape_cast %687 : vector<1x8x16x16xf32> to vector<8x16x16xf32>
    %689 = vector.shape_cast %686 : vector<8x16x16xf32> to vector<1x8x16x16xf32>
    tpu.vector_store %arg6[%c0_496, %c184, %c0_497, %c0_498], %689 {strides = array<i32>} : memref<1x200x16x16xf32, #tpu.memory_space<vmem>>, vector<1x8x16x16xf32>,
    %c24_499 = arith.constant 24 : index
    %c5_500 = arith.constant 5 : index
    %c27_501 = arith.constant 27 : index
    %690 = vector.load %arg8[%c24_499, %c5_500, %c27_501] : memref<32x48x48xf32, #tpu.memory_space<vmem>>, vector<8x16x16xf32>
    %691 = vector.shape_cast %521 : vector<16x16xf32> to vector<1x16x16xf32>
    %692 = vector.broadcast %691 : vector<1x16x16xf32> to vector<8x16x16xf32>
    %693 = arith.mulf %690, %692 : vector<8x16x16xf32>
    %c0_502 = arith.constant 0 : index
    %c192_503 = arith.constant 192 : index
    %c0_504 = arith.constant 0 : index
    %c0_505 = arith.constant 0 : index
    %694 = vector.load %arg6[%c0_502, %c192_503, %c0_504, %c0_505] : memref<1x200x16x16xf32, #tpu.memory_space<vmem>>, vector<1x8x16x16xf32>
    %695 = vector.shape_cast %694 : vector<1x8x16x16xf32> to vector<8x16x16xf32>
    %696 = vector.shape_cast %693 : vector<8x16x16xf32> to vector<1x8x16x16xf32>
    tpu.vector_store %arg6[%c0_502, %c192_503, %c0_504, %c0_505], %696 {strides = array<i32>} : memref<1x200x16x16xf32, #tpu.memory_space<vmem>>, vector<1x8x16x16xf32>,
    return
  }
  func.func @transform_0(%arg0: i32, %arg1: i32, %arg2: i32) -> (i32, i32, i32, i32) {
    %c0_i32 = arith.constant 0 : i32
    %c0_i32_0 = arith.constant 0 : i32
    %c0_i32_1 = arith.constant 0 : i32
    %c0_i32_2 = arith.constant 0 : i32
    return %arg0, %c0_i32, %c0_i32_0, %c0_i32_1 : i32, i32, i32, i32
  }
  func.func @transform_1(%arg0: i32, %arg1: i32, %arg2: i32) -> (i32, i32) {
    %c0_i32 = arith.constant 0 : i32
    %c0_i32_0 = arith.constant 0 : i32
    %c0_i32_1 = arith.constant 0 : i32
    return %c0_i32, %c0_i32_0 : i32, i32
  }
  func.func @transform_2(%arg0: i32, %arg1: i32, %arg2: i32) -> (i32, i32, i32) {
    %c0_i32 = arith.constant 0 : i32
    %c0_i32_0 = arith.constant 0 : i32
    %c0_i32_1 = arith.constant 0 : i32
    %c0_i32_2 = arith.constant 0 : i32
    return %c0_i32, %c0_i32_0, %c0_i32_1 : i32, i32, i32
  }
  func.func @transform_3(%arg0: i32, %arg1: i32, %arg2: i32) -> (i32, i32, i32, i32) {
    %c0_i32 = arith.constant 0 : i32
    %c0_i32_0 = arith.constant 0 : i32
    return %arg0, %c0_i32, %arg1, %arg2 : i32, i32, i32, i32
  }
}

</mosaic_0001>

<bundles_post_ra>
// kernel: tpu_custom_call.1
= control target key start
LH: loop header
LB: loop body
LE: loop exit
PB: predicated region body
PF: predicated region fallthrough
CT: control target
= control target key end

     0   :  { %8 = vsyncpa [#allocation5], 0  ;;  %s15089_s0 = inlined_call_operand.hbm [shape: f32[2,3,64,64], index: 0, kind: input, shape index: {}]   ;;  %s15090_s1 = inlined_call_operand.hbm [shape: bf16[192,64], index: 1, kind: input, shape index: {}]   ;;  %s15091_s2 = inlined_call_operand.hbm [shape: bf16[4,64,48], index: 2, kind: input, shape index: {}]   ;;  %s15092_s3 = inlined_call_operand.hbm [shape: f32[2,200,16,16], index: 3, kind: output, shape index: {}]  }
   0x1   :  { %10 = vsyncpa [#allocation5 + $0x1], 0 }
   0x2   :  { %11 = vsyncpa [#allocation8], 0 }
   0x3   :  { %12 = vsyncpa [#allocation6], 0 }
   0x4   :  { %14 = vsyncpa [#allocation6 + $0x1], 0  ;;  %s10266_s12 = smov 0   ;;  %s10268_s13 = smov 0  }
   0x5   :  { %s10270_s14 = smov 0   ;;  %s10272_s15 = smov 0  }
   0x6   :  { %s10274_s16 = smov 0   ;;  %s10276_s17 = smov 0  }
   0x7 LB: > { %s8504_s18 = sadd.s32 4294967295, %s10208_s17   ;;  %s8505_s19 = sadd.s32 4294967294, %s10208_s17   ;;  %s10208_s17 = sphi %s10276_s17, %s20_s17   ;;  %s10204_s16 = sphi %s10274_s16, %s15240_s16   ;;  %s10200_s15 = sphi %s10272_s15, %s15239_s15   ;;  %s10196_s14 = sphi %s10270_s14, %s15238_s14   ;;  %s10192_s13 = sphi %s10268_s13, %s15237_s13   ;;  %s10188_s12 = sphi %s10266_s12, %s15236_s12  }
   0x8   : > { %p59_p0 = scmp.ne.s32.totalorder %s10192_s13, %s10188_s12  ;;  %p10300_p1 = scmp.eq.s32.totalorder %s8504_s18, 0 }
   0x9   : > { %p10304_p2 = scmp.eq.s32.totalorder %s8504_s18, 1  ;;  %p135_p3 = scmp.eq.s32.totalorder %s8505_s19, 1 }
   0xa   : > { %s15139_s20 = scalar_select %p10300_p1, 1, 0 }
   0xb   : > { %p10310_p4 = por %p10300_p1, %p59_p0  ;;  %p8506_p5 = scmp.ge.s32.totalorder %s10208_s17, 1 }
   0xc   : > { %p10315_p6 = por %p135_p3, %p59_p0  ;;  %p142_p7 = scmp.lt.s32.totalorder %s10208_s17, 3 }
   0xd   : > { %s15141_s22 = scalar_select %p10310_p4, 1, 0 }
   0xe   : > { %s15142_s23 = scalar_select %p10315_p6, 1, 0 }
   0xf   : > { %p10320_p8 = pnand %p8506_p5, %p142_p7  ;;  %s10210_s25 = smov [#allocation7]  }
  0x10   : > { %s154_s26 = sshll.u32 %s10210_s25, 4  ;;  %s10211_s28 = smov [#allocation9]   ;;  %s10324_s26 = int_to_ptr.vmem [resolvable:$true] %s154_s26 }
  0x11   : > { %p9874_p9 = pneg %p10320_p8  ;;  %s167_s29 = sshll.u32 %s10211_s28, 4  ;;  %s10335_s29 = int_to_ptr.vmem [resolvable:$true] %s167_s29 }
  0x12   : > { %s10036_s5 = scalar_lea.hbm %s15090_s1, 1536 }
  0x13   : > { %p10331_p11 = pnand %p9874_p9, %p10300_p1  ;;  %p10037_p12 = scmp.ne.s32.totalorder %s15090_s1, %s10036_s5 }
  0x14   : > { %p10043_p5 = scmp.lt.u32.totalorder %s10036_s5, %s15090_s1 }
  0x15   : > { %p10038_p13 = pneg %p10331_p11 }
  0x17   : > { %p10039_p0 = pnand %p10038_p13, %p10037_p12 }
  0x19   : > { %p10040_p3 = pneg %p10039_p0 }
  0x1b   : > { %p10045_p7 = pnand %p10043_p5, %p10040_p3 }
  0x1d   : > { %10048 = shalt.err (!%p10045_p7)
}
  0x1e   : > { %s10049_s10 = scalar_lea.vmem %s10324_s26, 1536  ;;  %p10057_p1 = scmp.lt.s32.totalorder %s10324_s26, %s10324_s26 }
  0x1f   : > { %p10050_p9 = scmp.ne.s32.totalorder %s10324_s26, %s10049_s10  ;;  %p10058_p12 = scmp.lt.s32.totalorder %s10049_s10, %s10049_s10 }
  0x21   : > { %p10052_p10 = pnand %p10050_p9, %p10038_p13  ;;  %p10059_p0 = por %p10058_p12, %p10057_p1 }
  0x23   : > { %p10053_p6 = pneg %p10052_p10 }
  0x25   : > { %p10060_p4 = pnand %p10059_p0, %p10053_p6 }
  0x27   : > { %10063 = shalt.err (!%p10060_p4)
}
  0x28   : > { %s10212_s11 = smov 64   ;;  %s10213_s18 = smov 4  }
  0x29   : > { %9877 = dma.hbm_to_vmem [thread:$0]  (!%p10331_p11), %s15090_s1, 1536, %s10324_s26, [#allocation8], %s10212_s11, %s10212_s11, %s10213_s18  }
  0x2a   : > { %s10064_s4 = scalar_lea.hbm %s15091_s2, 2048 }
  0x2b   : > { %p10065_p1 = scmp.ne.s32.totalorder %s15091_s2, %s10064_s4  ;;  %p10071_p10 = scmp.lt.u32.totalorder %s10064_s4, %s15091_s2 }
  0x2d   : > { %p10067_p4 = pnand %p10065_p1, %p10038_p13 }
  0x2f   : > { %p10068_p6 = pneg %p10067_p4 }
  0x31   : > { %p10073_p3 = pnand %p10071_p10, %p10068_p6 }
  0x33   : > { %10076 = shalt.err (!%p10073_p3)
}
  0x34   : > { %s10077_s26 = scalar_lea.vmem %s10335_s29, 2048  ;;  %p10085_p12 = scmp.lt.s32.totalorder %s10335_s29, %s10335_s29 }
  0x35   : > { %p10078_p5 = scmp.ne.s32.totalorder %s10335_s29, %s10077_s26  ;;  %p10086_p0 = scmp.lt.s32.totalorder %s10077_s26, %s10077_s26 }
  0x37   : > { %p10080_p7 = pnand %p10078_p5, %p10038_p13  ;;  %p10087_p1 = por %p10086_p0, %p10085_p12 }
  0x39   : > { %p10081_p9 = pneg %p10080_p7 }
  0x3b   : > { %p10088_p4 = pnand %p10087_p1, %p10081_p9 }
  0x3d   : > { %10091 = shalt.err (!%p10088_p4)
}
  0x3e   : > { %9880 = dma.hbm_to_vmem [thread:$0]  (!%p10331_p11), %s15091_s2, 2048, %s10335_s29, [#allocation8], %s10212_s11, %s10212_s11, %s10213_s18  }
  0x3f   : > { %s39_s19 = sadd.s32 1, %s10204_s16  ;;  %s46_s25 = sadd.s32 1, %s10196_s14 }
  0x40   : > { %p41_p13 = scmp.ge.s32.totalorder %s39_s19, 2  ;;  %p53_p6 = scmp.ne.s32.totalorder %s10196_s14, %s10192_s13 }
  0x41   : > { %p54_p10 = scmp.eq.s32.totalorder %s10208_s17, 0  ;;  %p9891_p3 = scmp.lt.s32.totalorder %s10208_s17, 2 }
  0x42   : > { %s15242_s19 = smov (%p41_p13, %s39_s19), 0  ;;  %p10399_p7 = por %p10304_p2, %p53_p6 }
  0x43   : > { %p55_p5 = por %p54_p10, %p53_p6  ;;  %s43_s28 = ssub.s32 %s10204_s16, %s15242_s19 }
  0x44   : > { %s15145_s27 = scalar_select %p10399_p7, 1, 0 }
  0x45   : > { %s181_s30 = sand.u32 1, %s10196_s14   ;;  %p44_p9 = scmp.eq.s32.totalorder %s43_s28, 0 }
  0x46   : > { %s9857_s29 = smul.u32 192, %s181_s30  ;;  %p10406_p11 = pnand %p9891_p3, %p55_p5 }
  0x47   : > { %s10411_s18 = scalar_select %p44_p9, %s10196_s14, %s46_s25  }
  0x48   : > { %s9858_s4 = smul.u32 3072, %s10204_s16  ;;  %s185_s5 = scalar_lea.vmem [#allocation4], %s9857_s29 }
  0x49   : > { %s192_s6 = sshll.u32 %s185_s5, 4  ;;  %s10421_s26 = scalar_lea.sflag [#allocation5], %s181_s30  ;;  %s10419_s6 = int_to_ptr.vmem [resolvable:$true] %s192_s6 }
  0x4a   : > { %s10417_s8 = scalar_lea.hbm %s15089_s0, %s9858_s4  ;;  %p10094_p12 = pneg %p10406_p11 }
  0x4b   : > { %s10092_s9 = scalar_lea.hbm %s10417_s8, 3072  ;;  %s10097_s28 = scalar_lea.hbm %s15089_s0, 6144 }
  0x4c   : > { %p10093_p2 = scmp.ne.s32.totalorder %s10417_s8, %s10092_s9  ;;  %p10098_p4 = scmp.lt.u32.totalorder %s10417_s8, %s15089_s0 }
  0x4d   : > { %p10099_p13 = scmp.lt.u32.totalorder %s10097_s28, %s10092_s9  ;;  %p10101_p10 = scmp.lt.u32.totalorder %s10092_s9, %s10417_s8 }
  0x4e   : > { %p10095_p0 = pnand %p10094_p12, %p10093_p2 }
  0x4f   : > { %p10100_p6 = por %p10099_p13, %p10098_p4 }
  0x50   : > { %p10096_p1 = pneg %p10095_p0 }
  0x51   : > { %p10102_p3 = por %p10101_p10, %p10100_p6 }
  0x53   : > { %p10103_p5 = pnand %p10102_p3, %p10096_p1 }
  0x55   : > { %10106 = shalt.err (!%p10103_p5)
}
  0x56   : > { %s10107_s30 = scalar_lea.vmem %s10419_s6, 3072  ;;  %s10214_s5 = smov [#allocation4]  }
  0x57   : > { %p10108_p9 = scmp.ne.s32.totalorder %s10419_s6, %s10107_s30  ;;  %s10112_s21 = sshll.u32 %s10214_s5, 4  ;;  %s10113_s21 = int_to_ptr.vmem [resolvable:$false] %s10112_s21 }
  0x58   : > { %s10114_s7 = scalar_lea.vmem %s10113_s21, 6144  ;;  %p10115_p7 = scmp.lt.s32.totalorder %s10419_s6, %s10113_s21 }
  0x59   : > { %p10110_p2 = pnand %p10108_p9, %p10094_p12  ;;  %p10116_p4 = scmp.lt.s32.totalorder %s10114_s7, %s10107_s30 }
  0x5b   : > { %p10111_p0 = pneg %p10110_p2  ;;  %p10117_p13 = por %p10116_p4, %p10115_p7 }
  0x5d   : > { %p10118_p6 = pnand %p10117_p13, %p10111_p0 }
  0x5f   : > { %10121 = shalt.err (!%p10118_p6)
}
  0x60   : > { %s10215_s9 = smov 128   ;;  %s10216_s10 = smov 8  }
  0x61   : > { %9884 = dma.hbm_to_vmem [thread:$0]  (!%p10406_p11), %s10417_s8, 3072, %s10419_s6, %s10421_s26, %s10215_s9, %s10215_s9, %s10216_s10  }
  0x62   : > { %204 = sbr.rel (%p10320_p8) target bundleno = 2191 (0x88f), region = 32 }
  0x69   : > { %s10452_s25 = sand.u32 1, %s10192_s13   ;;  %p15147_p7 = scmp.ne.s32.totalorder %s15141_s22, 0 }
  0x6a   : > { %s9859_s28 = smul.u32 192, %s10452_s25  ;;  %s207_s29 = scalar_lea.sflag [#allocation5], %s10452_s25 }
  0x6c   : > { %s10456_s4 = scalar_lea.vmem [#allocation4], %s9859_s28 }
  0x6d   : > { %10175 = dma.done.wait (%p15147_p7), %s207_s29, 3072  }
  0x6e   : > { %10177 = vsyncadd (%p15147_p7), %s207_s29, 4294964224  ;;  %p15148_p11 = scmp.ne.s32.totalorder %s15139_s20, 0 }
  0x70   : > { %10179 = dma.done.wait (%p15148_p11), [#allocation8], 3584  }
  0x71   : > { %10181 = vsyncadd (%p15148_p11), [#allocation8], 4294963712  ;;  %v243_v0 = vld [vmem:[%s10456_s4] sm:$0xff]  ;;  %v244_v6 = vld [vmem:[%s10456_s4 + $0x8] sm:$0xff]  ;;  %s10217_s20 = smov 63   ;;  %s10218_s22 = smov 127  }
  0x72   : > { %v8514_v1 = vld [vmem:[%s10456_s4 + $0x40] sm:$0xff]  ;;  %v269_v3 = vmul.f32 0.229, %v243_v0  ;;  %v8515_v7 = vld [vmem:[%s10456_s4 + $0x48] sm:$0xff]  ;;  %v270_v12 = vmul.f32 0.229, %v244_v6 }
  0x73   : > { %v8522_v2 = vld [vmem:[%s10456_s4 + $0x80] sm:$0xff]  ;;  %v325_v4 = vmul.f32 0.224, %v8514_v1  ;;  %v8523_v8 = vld [vmem:[%s10456_s4 + $0x88] sm:$0xff]  ;;  %v326_v13 = vmul.f32 0.224, %v8515_v7 }
  0x74   : > { %v389_v5 = vmul.f32 0.225, %v8522_v2  ;;  %v277_v9 = vadd.f32 0.485, %v269_v3  ;;  %v390_v14 = vmul.f32 0.225, %v8523_v8 }
  0x75   : > { %v333_v10 = vadd.f32 0.456, %v325_v4  ;;  %v246_v18 = vld [vmem:[%s10456_s4 + $0x18] sm:$0xff]  ;;  %v278_v20 = vadd.f32 0.485, %v270_v12  ;;  %v245_v48 = vld [vmem:[%s10456_s4 + $0x10] sm:$0xff] }
  0x76   : > { %v397_v11 = vadd.f32 0.406, %v389_v5  ;;  %v285_v15 = vmul.f32 255.0, %v277_v9  ;;  %v8517_v19 = vld [vmem:[%s10456_s4 + $0x58] sm:$0xff]  ;;  %v334_v21 = vadd.f32 0.456, %v326_v13 }
  0x77   : > { %v341_v16 = vmul.f32 255.0, %v333_v10  ;;  %v398_v22 = vadd.f32 0.406, %v390_v14  ;;  %v272_v26 = vmul.f32 0.229, %v246_v18  ;;  %v286_v27 = vmul.f32 255.0, %v278_v20 }
  0x78   : > { %v405_v17 = vmul.f32 255.0, %v397_v11  ;;  %v293_v23 = vfloor.f32 %v285_v15  ;;  %v342_v28 = vmul.f32 255.0, %v334_v21  ;;  %v328_v30 = vmul.f32 0.224, %v8517_v19  ;;  %v8525_v46 = vld [vmem:[%s10456_s4 + $0x98] sm:$0xff]  ;;  %v8516_v57 = vld [vmem:[%s10456_s4 + $0x50] sm:$0xff] }
  0x79   : > { %v349_v24 = vfloor.f32 %v341_v16  ;;  %v406_v29 = vmul.f32 255.0, %v398_v22  ;;  %v280_v34 = vadd.f32 0.485, %v272_v26  ;;  %v294_v35 = vfloor.f32 %v286_v27  ;;  %v8524_v58 = vld [vmem:[%s10456_s4 + $0x90] sm:$0xff]  ;;  %v248_v63 = vld [vmem:[%s10456_s4 + $0x28] sm:$0xff]  ;;  %v247_v21 = vld [vmem:[%s10456_s4 + $0x20] sm:$0xff] }
  0x7a   : > { %v413_v25 = vfloor.f32 %v405_v17  ;;  %v301_v31 = vmax.f32 %v293_v23, 0.0  ;;  %v350_v36 = vfloor.f32 %v342_v28  ;;  %v336_v38 = vadd.f32 0.456, %v328_v30  ;;  %v8519_v3 = vld [vmem:[%s10456_s4 + $0x68] sm:$0xff]  ;;  %s10219_s24 = smov 65   ;;  %s10220_s11 = smov 1  }
  0x7b   : > { %v357_v32 = vmax.f32 %v349_v24, 0.0  ;;  %v414_v37 = vfloor.f32 %v406_v29  ;;  %v288_v42 = vmul.f32 255.0, %v280_v34  ;;  %v302_v43 = vmax.f32 %v294_v35, 0.0  ;;  %v8527_v8 = vld [vmem:[%s10456_s4 + $0xa8] sm:$0xff]  ;;  %s10221_s6 = smov 124   ;;  %s10222_s8 = smov 123  }
  0x7c   : > { %v421_v33 = vmax.f32 %v413_v25, 0.0  ;;  %v309_v39 = vmin.f32 %v301_v31, 255.0  ;;  %v358_v44 = vmax.f32 %v350_v36, 0.0  ;;  %v344_v47 = vmul.f32 255.0, %v336_v38  ;;  %s10223_s26 = smov 5   ;;  %s10224_s30 = smov 4  }
  0x7d   : > { %v365_v40 = vmin.f32 %v357_v32, 255.0  ;;  %v422_v45 = vmax.f32 %v414_v37, 0.0  ;;  %v296_v52 = vfloor.f32 %v288_v42  ;;  %v310_v53 = vmin.f32 %v302_v43, 255.0  ;;  %s10225_s5 = smov 118   ;;  %s10226_s21 = smov 10  }
  0x7e   : > { %v429_v41 = vmin.f32 %v421_v33, 255.0  ;;  %v317_v49 = vmul.f32 0.299, %v309_v39  ;;  %v366_v54 = vmin.f32 %v358_v44, 255.0  ;;  %v352_v56 = vfloor.f32 %v344_v47  ;;  %s10227_s7 = smov 121   ;;  %s10228_s9 = smov 7  }
  0x7f   : > { %v373_v50 = vmul.f32 0.587, %v365_v40  ;;  %v430_v55 = vmin.f32 %v422_v45, 255.0  ;;  %v304_v60 = vmax.f32 %v296_v52, 0.0  ;;  %v392_v61 = vmul.f32 0.225, %v8525_v46 }
  0x80   : > { %v437_v51 = vmul.f32 0.114, %v429_v41  ;;  %v271_v62 = vmul.f32 0.229, %v245_v48  ;;  %v318_v0 = vmul.f32 0.299, %v310_v53 }
  0x81   : > { %v381_v59 = vadd.f32 %v373_v50, %v317_v49  ;;  %v374_v1 = vmul.f32 0.587, %v366_v54  ;;  %v438_v2 = vmul.f32 0.114, %v430_v55  ;;  %v312_v5 = vmin.f32 %v304_v60, 255.0  ;;  %v8518_v46 = vld [vmem:[%s10456_s4 + $0x60] sm:$0xff] }
  0x82   : > { %v360_v6 = vmax.f32 %v352_v56, 0.0  ;;  %v400_v7 = vadd.f32 0.406, %v392_v61  ;;  %v279_v10 = vadd.f32 0.485, %v271_v62  ;;  %v8526_v50 = vld [vmem:[%s10456_s4 + $0xa0] sm:$0xff] }
  0x83   : > { %v10480_v4 = vadd.f32 %v437_v51, %v381_v59  ;;  %v382_v9 = vadd.f32 %v374_v1, %v318_v0  ;;  %v327_v11 = vmul.f32 0.224, %v8516_v57  ;;  %v391_v12 = vmul.f32 0.225, %v8524_v58  ;;  %v250_v59 = vld [vmem:[%s10456_s4 + $0x38] sm:$0xff]  ;;  %s10229_s10 = smov 11  }
  0x84   : > { %v320_v13 = vmul.f32 0.299, %v312_v5  ;;  %v368_v14 = vmin.f32 %v360_v6, 255.0  ;;  %v408_v15 = vmul.f32 255.0, %v400_v7  ;;  %v274_v16 = vmul.f32 0.229, %v248_v63 }
  0x85   : > { %485 = vrot.lane.b32.xlu1 %v10480_v4, %s10217_s20  ;;  %461 = vrot.lane.b32.xlu0 %v10480_v4, %s10218_s22  ;;  %v10487_v17 = vadd.f32 %v438_v2, %v382_v9  ;;  %v287_v18 = vmul.f32 255.0, %v279_v10  ;;  %v335_v19 = vadd.f32 0.456, %v327_v11  ;;  %v399_v20 = vadd.f32 0.406, %v391_v12  ;;  %v8521_v5 = vld [vmem:[%s10456_s4 + $0x78] sm:$0xff] }
  0x86   : > { %v376_v22 = vmul.f32 0.587, %v368_v14  ;;  %v416_v23 = vfloor.f32 %v408_v15  ;;  %v282_v24 = vadd.f32 0.485, %v274_v16  ;;  %v330_v25 = vmul.f32 0.224, %v8519_v3 }
  0x87   : > { %v295_v26 = vfloor.f32 %v287_v18  ;;  %v343_v27 = vmul.f32 255.0, %v335_v19  ;;  %v407_v28 = vmul.f32 255.0, %v399_v20  ;;  %v394_v29 = vmul.f32 0.225, %v8527_v8  ;;  %v8529_v9 = vld [vmem:[%s10456_s4 + $0xb8] sm:$0xff]  ;;  %v249_v14 = vld [vmem:[%s10456_s4 + $0x30] sm:$0xff] }
  0x88   : > { %v384_v30 = vadd.f32 %v376_v22, %v320_v13  ;;  %v424_v31 = vmax.f32 %v416_v23, 0.0  ;;  %v290_v32 = vmul.f32 255.0, %v282_v24  ;;  %v338_v33 = vadd.f32 0.456, %v330_v25  ;;  %v8520_v20 = vld [vmem:[%s10456_s4 + $0x70] sm:$0xff]  ;;  %s10230_s28 = smov 117  }
  0x89   : > { %487 = vrot.lane.b32.xlu1 %v10487_v17, %s10217_s20  ;;  %463 = vrot.lane.b32.xlu0 %v10487_v17, %s10218_s22  ;;  %v303_v34 = vmax.f32 %v295_v26, 0.0  ;;  %v351_v35 = vfloor.f32 %v343_v27  ;;  %v415_v36 = vfloor.f32 %v407_v28  ;;  %v402_v37 = vadd.f32 0.406, %v394_v29  ;;  %s10231_s29 = smov 113   ;;  %p15233_p12 = scmp.ne.s32.totalorder %s15145_s27, 0 }
  0x8a   : > { %v432_v38 = vmin.f32 %v424_v31, 255.0  ;;  %v298_v39 = vfloor.f32 %v290_v32  ;;  %v346_v40 = vmul.f32 255.0, %v338_v33  ;;  %v273_v41 = vmul.f32 0.229, %v247_v21  ;;  %v8528_v21 = vld [vmem:[%s10456_s4 + $0xb0] sm:$0xff]  ;;  %s10232_s4 = smov 15  }
  0x8b   : > { %v311_v42 = vmin.f32 %v303_v34, 255.0  ;;  %v359_v43 = vmax.f32 %v351_v35, 0.0  ;;  %v423_v44 = vmax.f32 %v415_v36, 0.0  ;;  %v410_v45 = vmul.f32 255.0, %v402_v37 }
  0x8c   : > { %v440_v47 = vmul.f32 0.114, %v432_v38  ;;  %v306_v48 = vmax.f32 %v298_v39, 0.0  ;;  %v354_v49 = vfloor.f32 %v346_v40  ;;  %v281_v51 = vadd.f32 0.485, %v273_v41 }
  0x8d   : > { %520 = vrot.lane.b32.xlu1 %v10487_v17, %s10219_s24  ;;  %518 = vrot.lane.b32.xlu0 %v10480_v4, %s10219_s24  ;;  %v319_v52 = vmul.f32 0.299, %v311_v42  ;;  %v367_v53 = vmin.f32 %v359_v43, 255.0  ;;  %v431_v54 = vmin.f32 %v423_v44, 255.0  ;;  %v418_v55 = vfloor.f32 %v410_v45 }
  0x8e   : > { %v314_v56 = vmin.f32 %v306_v48, 255.0  ;;  %v362_v57 = vmax.f32 %v354_v49, 0.0  ;;  %v289_v58 = vmul.f32 255.0, %v281_v51  ;;  %v10501_v60 = vadd.f32 %v440_v47, %v384_v30 }
  0x8f   : > { %v375_v61 = vmul.f32 0.587, %v367_v53  ;;  %v439_v62 = vmul.f32 0.114, %v431_v54  ;;  %v426_v63 = vmax.f32 %v418_v55, 0.0  ;;  %vm591_vm0 = vcmask 1046528  }
  0x90   : > { %v322_v0 = vmul.f32 0.299, %v314_v56  ;;  %v370_v1 = vmin.f32 %v362_v57, 255.0  ;;  %v297_v2 = vfloor.f32 %v289_v58  ;;  %v329_v3 = vmul.f32 0.224, %v8518_v46 }
  0x91   : > { %544 = vrot.lane.b32.xlu1 %v10487_v17, %s10220_s11  ;;  %542 = vrot.lane.b32.xlu0 %v10480_v4, %s10220_s11  ;;  %v383_v6 = vadd.f32 %v375_v61, %v319_v52  ;;  %v434_v7 = vmin.f32 %v426_v63, 255.0  ;;  %v393_v8 = vmul.f32 0.225, %v8526_v50  ;;  %v276_v10 = vmul.f32 0.229, %v250_v59 }
  0x92   : > { %v378_v11 = vmul.f32 0.587, %v370_v1  ;;  %v305_v12 = vmax.f32 %v297_v2, 0.0  ;;  %v337_v13 = vadd.f32 0.456, %v329_v3  ;;  %vm619_vm1 = vcmask 1040384  }
  0x93   : > { %v10510_v15 = vadd.f32 %v439_v62, %v383_v6  ;;  %v442_v16 = vmul.f32 0.114, %v434_v7  ;;  %v401_v18 = vadd.f32 0.406, %v393_v8  ;;  %v284_v19 = vadd.f32 0.485, %v276_v10 }
  0x94   : > { %v386_v22 = vadd.f32 %v378_v11, %v322_v0  ;;  %v313_v23 = vmin.f32 %v305_v12, 255.0  ;;  %v345_v24 = vmul.f32 255.0, %v337_v13  ;;  %v332_v25 = vmul.f32 0.224, %v8521_v5 }
  0x95   : > { %467 = vrot.lane.b32.xlu1 %v10501_v60, %s10218_s22  ;;  %465 = vrot.lane.b32.xlu0 %v10510_v15, %s10218_s22  ;;  %v409_v26 = vmul.f32 255.0, %v401_v18  ;;  %v292_v27 = vmul.f32 255.0, %v284_v19  ;;  %v396_v28 = vmul.f32 0.225, %v8529_v9  ;;  %v275_v29 = vmul.f32 0.229, %v249_v14 }
  0x96   : > { %v10518_v30 = vadd.f32 %v442_v16, %v386_v22  ;;  %v321_v31 = vmul.f32 0.299, %v313_v23  ;;  %v353_v32 = vfloor.f32 %v345_v24  ;;  %v340_v33 = vadd.f32 0.456, %v332_v25 }
  0x97   : > { %v417_v34 = vfloor.f32 %v409_v26  ;;  %v300_v35 = vfloor.f32 %v292_v27  ;;  %v404_v36 = vadd.f32 0.406, %v396_v28  ;;  %v283_v37 = vadd.f32 0.485, %v275_v29 }
  0x98   : > { %v361_v38 = vmax.f32 %v353_v32, 0.0  ;;  %v348_v39 = vmul.f32 255.0, %v340_v33  ;;  %v331_v40 = vmul.f32 0.224, %v8520_v20  ;;  %v395_v41 = vmul.f32 0.225, %v8528_v21 }
  0x99   : > { %491 = vrot.lane.b32.xlu1 %v10501_v60, %s10217_s20  ;;  %489 = vrot.lane.b32.xlu0 %v10510_v15, %s10217_s20  ;;  %v425_v42 = vmax.f32 %v417_v34, 0.0  ;;  %v308_v43 = vmax.f32 %v300_v35, 0.0  ;;  %v412_v44 = vmul.f32 255.0, %v404_v36  ;;  %v291_v45 = vmul.f32 255.0, %v283_v37 }
  0x9a   : > { %v369_v46 = vmin.f32 %v361_v38, 255.0  ;;  %v356_v47 = vfloor.f32 %v348_v39  ;;  %v339_v48 = vadd.f32 0.456, %v331_v40  ;;  %v403_v49 = vadd.f32 0.406, %v395_v41 }
  0x9b   : > { %v433_v50 = vmin.f32 %v425_v42, 255.0  ;;  %v316_v51 = vmin.f32 %v308_v43, 255.0  ;;  %v420_v52 = vfloor.f32 %v412_v44  ;;  %v299_v53 = vfloor.f32 %v291_v45 }
  0x9c   : > { %v377_v54 = vmul.f32 0.587, %v369_v46  ;;  %v364_v55 = vmax.f32 %v356_v47, 0.0  ;;  %v347_v56 = vmul.f32 255.0, %v339_v48  ;;  %v411_v57 = vmul.f32 255.0, %v403_v49 }
  0x9d   : > { %524 = vrot.lane.b32.xlu1 %v10501_v60, %s10219_s24  ;;  %522 = vrot.lane.b32.xlu0 %v10510_v15, %s10219_s24  ;;  %v441_v58 = vmul.f32 0.114, %v433_v50  ;;  %v324_v59 = vmul.f32 0.299, %v316_v51  ;;  %v428_v61 = vmax.f32 %v420_v52, 0.0  ;;  %v307_v62 = vmax.f32 %v299_v53, 0.0 }
  0x9e   : > { %v385_v63 = vadd.f32 %v377_v54, %v321_v31  ;;  %v372_v0 = vmin.f32 %v364_v55, 255.0  ;;  %v355_v1 = vfloor.f32 %v347_v56  ;;  %v419_v2 = vfloor.f32 %v411_v57 }
  0x9f   : > { %v436_v3 = vmin.f32 %v428_v61, 255.0  ;;  %v315_v5 = vmin.f32 %v307_v62, 255.0  ;;  %v592_v6 = vrot.slane %v10480_v4, 1  ;;  %v593_v13 = vrot.slane %v10487_v17, 1 }
  0xa0   : > { %v449_v7 = vadd.f32 %v441_v58, %v385_v63  ;;  %v380_v8 = vmul.f32 0.587, %v372_v0  ;;  %v363_v9 = vmax.f32 %v355_v1, 0.0  ;;  %v427_v10 = vmax.f32 %v419_v2, 0.0  ;;  %v10619_v58 = vld [vmem:[#allocation7] sm:$0xff]  }
  0xa1   : > { %548 = vrot.lane.b32.xlu1 %v10501_v60, %s10220_s11  ;;  %546 = vrot.lane.b32.xlu0 %v10510_v15, %s10220_s11  ;;  %v444_v11 = vmul.f32 0.114, %v436_v3  ;;  %v323_v12 = vmul.f32 0.299, %v315_v5  ;;  %v595_v14 = vrot.slane %v10510_v15, 1  ;;  %v10536_v20 = vsel %vm591_vm0, %v592_v6, %v593_v13 }
  0xa2   : > { %v388_v16 = vadd.f32 %v380_v8, %v324_v59  ;;  %v371_v18 = vmin.f32 %v363_v9, 255.0  ;;  %v435_v19 = vmin.f32 %v427_v10, 255.0  ;;  %v620_v22 = vrot.slane %v10480_v4, 7 }
  0xa3   : > { %v10539_v21 = vsel %vm591_vm0, %v593_v13, %v595_v14  ;;  %v621_v23 = vrot.slane %v10487_v17, 7  ;;  %v597_v27 = vrot.slane %v10501_v60, 1  ;;  %v599_v29 = vrot.slane %v449_v7, 1 }
  0xa4   : > { %v452_v24 = vadd.f32 %v444_v11, %v388_v16  ;;  %v379_v25 = vmul.f32 0.587, %v371_v18  ;;  %v443_v26 = vmul.f32 0.114, %v435_v19  ;;  %v623_v31 = vrot.slane %v10510_v15, 7 }
  0xa5   : > { %471 = vrot.lane.b32.xlu1 %v10518_v30, %s10218_s22  ;;  %469 = vrot.lane.b32.xlu0 %v449_v7, %s10218_s22  ;;  %v622_v28 = vsel %vm619_vm1, %v620_v22, %v621_v23  ;;  %v625_v32 = vrot.slane %v10501_v60, 7  ;;  %v10552_v34 = vsel %vm591_vm0, %v595_v14, %v597_v27  ;;  %v10555_v35 = vsel %vm591_vm0, %v597_v27, %v599_v29 }
  0xa6   : > { %v387_v4 = vadd.f32 %v379_v25, %v323_v12  ;;  %v617_v33 = vrot.slane %v452_v24, 7  ;;  %v644_v17 = vsub.f32 %v10539_v21, %v622_v28  ;;  %v10558_v36 = vsel %vm619_vm1, %v621_v23, %v623_v31 }
  0xa7   : > { %v10561_v37 = vsel %vm619_vm1, %v623_v31, %v625_v32  ;;  %v601_v15 = vrot.slane %v10518_v30, 1  ;;  %v645_v39 = vsub.f32 %v10552_v34, %v10558_v36  ;;  %v627_v43 = vrot.slane %v449_v7, 7 }
  0xa8   : > { %v451_v60 = vadd.f32 %v443_v26, %v387_v4  ;;  %v642_v38 = vsel %vm619_vm1, %v617_v33, %v620_v22  ;;  %v646_v41 = vsub.f32 %v10555_v35, %v10561_v37  ;;  %v629_v46 = vrot.slane %v10518_v30, 7 }
  0xa9   : > { %495 = vrot.lane.b32.xlu1 %v10518_v30, %s10217_s20  ;;  %493 = vrot.lane.b32.xlu0 %v449_v7, %s10217_s20  ;;  %v643_v40 = vsub.f32 %v10536_v20, %v642_v38  ;;  %v10574_v42 = vsel %vm591_vm0, %v599_v29, %v601_v15  ;;  %v10577_v45 = vsel %vm619_vm1, %v625_v32, %v627_v43  ;;  %v605_v51 = vrot.slane %v452_v24, 1 }
  0xaa   : > { %v603_v44 = vrot.slane %v451_v60, 1  ;;  %v647_v48 = vsub.f32 %v10574_v42, %v10577_v45  ;;  %v10589_v49 = vsel %vm619_vm1, %v627_v43, %v629_v46  ;;  %v631_v52 = vrot.slane %v451_v60, 7 }
  0xab   : > { %v10600_v54 = vsel %vm591_vm0, %v605_v51, %v592_v6  ;;  %vm771_vm2 = vcmask 523264   ;;  %vm509_vm3 = vcmask 515072   ;;  %vm566_vm4 = vcmask 7168  }
  0xac   : > { %v10583_v47 = vsel %vm591_vm0, %v601_v15, %v603_v44  ;;  %v10597_v53 = vsel %vm591_vm0, %v603_v44, %v605_v51  ;;  %v10603_v55 = vsel %vm619_vm1, %v629_v46, %v631_v52  ;;  %v10606_v56 = vsel %vm619_vm1, %v631_v52, %v617_v33  ;;  %9385 = vmatprep.mubr.msk.bf16.mxu0 %vm771_vm2, %v10619_v58 }
  0xad   : > { %528 = vrot.lane.b32.xlu1 %v10518_v30, %s10219_s24  ;;  %526 = vrot.lane.b32.xlu0 %v449_v7, %s10219_s24  ;;  %v648_v50 = vsub.f32 %v10583_v47, %v10589_v49  ;;  %v649_v57 = vsub.f32 %v10597_v53, %v10603_v55  ;;  %v10626_v2 = vmul.f32 0.5, %v643_v40  ;;  %v10628_v3 = vmul.f32 0.5, %v644_v17 }
  0xae   : > { %9417 = vmatprep.mubr.msk.bf16.mxu1 %vm771_vm2, %v10619_v58  ;;  %v10657_v40 = vmul.f32 0.5, %v646_v41  ;;  %v10672_v37 = vmul.f32 0.5, %v645_v39  ;;  %vm2648_vm5 = vcmask 392192   ;;  %vm4175_vm6 = vcmask 302248  }
  0xaf   : > { %v683_v13 = vmul.f32 0.0, %v10626_v2  ;;  %v684_v14 = vmul.f32 0.0, %v10628_v3  ;;  %v10641_v20 = vmul.f32 0.70710677, %v10626_v2  ;;  %v10644_v21 = vmul.f32 0.70710677, %v10628_v3 }
  0xb0   : > { %v1523_v33 = vmul.f32 1.2246469e-16, %v10626_v2  ;;  %v1524_v38 = vmul.f32 1.2246469e-16, %v10628_v3  ;;  %v10660_v43 = vmul.f32 -0.70710677, %v10626_v2 }
  0xb1   : > { %552 = vrot.lane.b32.xlu1 %v10518_v30, %s10220_s11  ;;  %550 = vrot.lane.b32.xlu0 %v449_v7, %s10220_s11  ;;  %v650_v30 = vsub.f32 %v10600_v54, %v10606_v56  ;;  %v10663_v44 = vmul.f32 -0.70710677, %v10628_v3  ;;  %v1894_v35 = vmul.f32 -1.0, %v10628_v3  ;;  %v1525_v42 = vmul.f32 1.2246469e-16, %v10672_v37 }
  0xb2   : > { %v10723_v47 = vmul.f32 -0.70710677, %v10672_v37  ;;  %v1895_v49 = vmul.f32 -1.0, %v10672_v37  ;;  %vm4248_vm7 = vcmask 294048   ;;  %vm4394_vm8 = vcmask 220248  }
  0xb3   : > { %vm4353_vm9 = vcmask 228448   ;;  %vm4589_vm10 = vcmask 343248   ;;  %vm4808_vm11 = vcmask 179248   ;;  %vm4767_vm12 = vcmask 203848  }
  0xb4   : > { %15151 = vst [vmem:[#allocation16_spill] sm:$0xff] %v10723_v47  ;;  %vm4662_vm13 = vcmask 318648   ;;  %vm5057_vm14 = vcmask 384248   ;;  %vm5276_vm15 = vcmask 138248   ;;  %vm5235_vm0 = vcmask 171048  }
  0xb5   : > { %475 = vrot.lane.b32.xlu1 %v452_v24, %s10218_s22  ;;  %473 = vrot.lane.b32.xlu0 %v451_v60, %s10218_s22  ;;  %vm5130_vm1 = vcmask 351448  }
  0xb9   : > { %499 = vrot.lane.b32.xlu1 %v452_v24, %s10217_s20  ;;  %497 = vrot.lane.b32.xlu0 %v451_v60, %s10217_s20  ;;  %s10233_s20 = smov 112  }
  0xbd   : > { %532 = vrot.lane.b32.xlu1 %v452_v24, %s10219_s24  ;;  %530 = vrot.lane.b32.xlu0 %v451_v60, %s10219_s24  ;;  %s9860_s24 = smul.u32 3200, %s10452_s25 }
  0xc1   : > { %556 = vrot.lane.b32.xlu1 %v452_v24, %s10220_s11  ;;  %554 = vrot.lane.b32.xlu0 %v451_v60, %s10220_s11  ;;  %s12951_s11 = scalar_lea.vmem [#allocation10], %s9860_s24 }
  0xf7   : > { %v486_v59 = vpop.permute.xlu1 %485  ;;  %v462_v61 = vpop.permute.xlu0 %461 }
  0xf8   : > { %v510_v7 = vsel %vm509_vm3, %v462_v61, %v486_v59  ;;  %v1893_v61 = vmul.f32 -1.0, %v10626_v2 }
  0xfb   : > { %v488_v62 = vpop.permute.xlu1 %487  ;;  %v464_v63 = vpop.permute.xlu0 %463 }
  0xfc   : > { %v511_v8 = vsel %vm509_vm3, %v464_v63, %v488_v62 }
  0xff   : > { %v521_v0 = vpop.permute.xlu1 %520  ;;  %v519_v1 = vpop.permute.xlu0 %518 }
 0x103   : > { %v545_v5 = vpop.permute.xlu1 %544  ;;  %v543_v6 = vpop.permute.xlu0 %542 }
 0x104   : > { %v568_v9 = vsel %vm566_vm4, %v521_v0, %v545_v5  ;;  %v567_v10 = vsel %vm566_vm4, %v519_v1, %v543_v6  ;;  %v686_v5 = vmul.f32 0.0, %v10657_v40 }
 0x105   : > { %v576_v11 = vsub.f32 %v511_v8, %v568_v9  ;;  %v575_v12 = vsub.f32 %v510_v7, %v567_v10 }
 0x107   : > { %v10636_v16 = vmul.f32 0.5, %v576_v11  ;;  %v10638_v18 = vmul.f32 0.5, %v575_v12  ;;  %v468_v19 = vpop.permute.xlu1 %467  ;;  %v466_v22 = vpop.permute.xlu0 %465 }
 0x109   : > { %v691_v23 = vadd.f32 %v683_v13, %v10638_v18  ;;  %v692_v24 = vadd.f32 %v684_v14, %v10636_v16  ;;  %v964_v25 = vmul.f32 0.70710677, %v10638_v18  ;;  %v965_v26 = vmul.f32 0.70710677, %v10636_v16 }
 0x10a   : > { %v1515_v52 = vmul.f32 -1.0, %v10638_v18  ;;  %v1516_v59 = vmul.f32 -1.0, %v10636_v16  ;;  %v1885_v0 = vmul.f32 -1.8369701e-16, %v10638_v18  ;;  %v1886_v6 = vmul.f32 -1.8369701e-16, %v10636_v16 }
 0x10b   : > { %v492_v27 = vpop.permute.xlu1 %491  ;;  %v699_v28 = vmax.f32 %v691_v23, 0.0  ;;  %v700_v29 = vmax.f32 %v692_v24, 0.0  ;;  %v980_v31 = vadd.f32 %v10641_v20, %v964_v25  ;;  %v981_v32 = vadd.f32 %v10644_v21, %v965_v26  ;;  %v490_v4 = vpop.permute.xlu0 %489 }
 0x10c   : > { %v1531_v41 = vadd.f32 %v1523_v33, %v1515_v52  ;;  %v1532_v63 = vadd.f32 %v1524_v38, %v1516_v59  ;;  %v513_v1 = vsel %vm509_vm3, %v468_v19, %v492_v27  ;;  %v2074_v7 = vadd.f32 %v10660_v43, %v964_v25 }
 0x10d   : > { %v707_v17 = vpack.c.bf16 %v700_v29, %v699_v28  ;;  %v988_v15 = vmax.f32 %v980_v31, 0.0  ;;  %v989_v60 = vmax.f32 %v981_v32, 0.0  ;;  %v1901_v11 = vadd.f32 %v1893_v61, %v1885_v0 }
 0x10e   : > { %v1539_v9 = vmax.f32 %v1531_v41, 0.0  ;;  %v1540_v10 = vmax.f32 %v1532_v63, 0.0  ;;  %v2075_v34 = vadd.f32 %v10663_v44, %v965_v26  ;;  %v512_v36 = vsel %vm509_vm3, %v466_v22, %v490_v4 }
 0x10f   : > { %v525_v46 = vpop.permute.xlu1 %524  ;;  %9377 = vmatprep.subr.bf16.mxu0 %v707_v17  ;;  %v996_v51 = vpack.c.bf16 %v989_v60, %v988_v15  ;;  %v523_v62 = vpop.permute.xlu0 %522  ;;  %v1902_v13 = vadd.f32 %v1894_v35, %v1886_v6  ;;  %v2082_v14 = vmax.f32 %v2074_v7, 0.0  ;;  %v1909_v27 = vmax.f32 %v1901_v11, 0.0 }
 0x110   : > { %9378 = vmatpush3.bf16.msra.mxu0 %v707_v17  ;;  %v10683_v24 = vpack.c.bf16 %v1540_v10, %v1539_v9  ;;  %v685_v28 = vmul.f32 0.0, %v10672_v37  ;;  %v2083_v31 = vmax.f32 %v2075_v34, 0.0  ;;  %v10689_v22 = vmul.f32 0.70710677, %v10657_v40 }
 0x111   : > { %9409 = vmatprep.subr.bf16.mxu1 %v996_v51  ;;  %v1910_v29 = vmax.f32 %v1902_v13, 0.0  ;;  %v10694_v17 = vmul.f32 0.70710677, %v10672_v37  ;;  %v10713_v41 = vmul.f32 0.5, %v648_v50  ;;  %v1526_v6 = vmul.f32 1.2246469e-16, %v10657_v40 }
 0x112   : > { %9410 = vmatpush3.bf16.msra.mxu1 %v996_v51  ;;  %v10698_v60 = vpack.c.bf16 %v2083_v31, %v2082_v14  ;;  %v10705_v51 = vmul.f32 0.5, %v647_v48  ;;  %v10730_v34 = vmul.f32 -0.70710677, %v10657_v40  ;;  %v1896_v14 = vmul.f32 -1.0, %v10657_v40 }
 0x113   : > { %v549_v8 = vpop.permute.xlu1 %548  ;;  %v547_v12 = vpop.permute.xlu0 %546  ;;  %v10696_v15 = vpack.c.bf16 %v1910_v29, %v1909_v27  ;;  %v688_v9 = vmul.f32 0.0, %v10713_v41 }
 0x114   : > { %v570_v39 = vsel %vm566_vm4, %v525_v46, %v549_v8  ;;  %v569_v23 = vsel %vm566_vm4, %v523_v62, %v547_v12  ;;  %15150 = vst [vmem:[#allocation15_spill] sm:$0xff] %v10698_v60  ;;  %v687_v48 = vmul.f32 0.0, %v10705_v51  ;;  %15152 = vst [vmem:[#allocation17_spill] sm:$0xff] %v10730_v34  ;;  %v10733_v12 = vmul.f32 0.70710677, %v10713_v41 }
 0x115   : > { %v578_v19 = vsub.f32 %v513_v1, %v570_v39  ;;  %v577_v25 = vsub.f32 %v512_v36, %v569_v23  ;;  %15149 = vst [vmem:[#allocation14_spill] sm:$0xff] %v10696_v15 }
 0x117   : > { %v10686_v32 = vmul.f32 0.5, %v578_v19  ;;  %v472_v26 = vpop.permute.xlu1 %471  ;;  %v10691_v4 = vmul.f32 0.5, %v577_v25  ;;  %v470_v33 = vpop.permute.xlu0 %469  ;;  %v10740_v19 = vmul.f32 0.5, %v649_v57  ;;  %v10743_v25 = vmul.f32 1.2246469e-16, %v10705_v51 }
 0x119   : > { %v694_v38 = vadd.f32 %v686_v5, %v10686_v32  ;;  %v967_v46 = vmul.f32 0.70710677, %v10686_v32  ;;  %v693_v52 = vadd.f32 %v685_v28, %v10691_v4  ;;  %v966_v59 = vmul.f32 0.70710677, %v10691_v4 }
 0x11a   : > { %v10719_v5 = vmul.f32 0.70710677, %v10705_v51  ;;  %v1517_v10 = vmul.f32 -1.0, %v10691_v4  ;;  %v1518_v11 = vmul.f32 -1.0, %v10686_v32  ;;  %v1887_v13 = vmul.f32 -1.8369701e-16, %v10691_v4 }
 0x11b   : > { %v496_v61 = vpop.permute.xlu1 %495  ;;  %v702_v62 = vmax.f32 %v694_v38, 0.0  ;;  %v983_v35 = vadd.f32 %v10689_v22, %v967_v46  ;;  %v494_v63 = vpop.permute.xlu0 %493  ;;  %v701_v0 = vmax.f32 %v693_v52, 0.0  ;;  %v982_v1 = vadd.f32 %v10694_v17, %v966_v59 }
 0x11c   : > { %v1533_v23 = vadd.f32 %v1525_v42, %v1517_v10  ;;  %v1534_v27 = vadd.f32 %v1526_v6, %v1518_v11  ;;  %v10748_v28 = vmul.f32 0.5, %v650_v30  ;;  %v1888_v29 = vmul.f32 -1.8369701e-16, %v10686_v32 }
 0x11d   : > { %v991_v45 = vmax.f32 %v983_v35, 0.0  ;;  %v708_v7 = vpack.c.bf16 %v702_v62, %v701_v0  ;;  %v990_v8 = vmax.f32 %v982_v1, 0.0  ;;  %v1903_v31 = vadd.f32 %v1895_v49, %v1887_v13 }
 0x11e   : > { %v2076_v38 = vadd.f32 %v10723_v47, %v966_v59  ;;  %v515_v53 = vsel %vm509_vm3, %v472_v26, %v496_v61  ;;  %v1541_v57 = vmax.f32 %v1533_v23, 0.0  ;;  %v1542_v52 = vmax.f32 %v1534_v27, 0.0 }
 0x11f   : > { %v529_v50 = vpop.permute.xlu1 %528  ;;  %v527_v36 = vpop.permute.xlu0 %526  ;;  %9379 = vmatprep.subr.bf16.mxu0 %v708_v7  ;;  %v997_v39 = vpack.c.bf16 %v991_v45, %v990_v8  ;;  %v2077_v62 = vadd.f32 %v10730_v34, %v967_v46  ;;  %v514_v35 = vsel %vm509_vm3, %v470_v33, %v494_v63  ;;  %v1904_v56 = vadd.f32 %v1896_v14, %v1888_v29 }
 0x120   : > { %9380 = vmatpush3.bf16.msra.mxu0 %v708_v7  ;;  %v1911_v30 = vmax.f32 %v1903_v31, 0.0  ;;  %v10757_v45 = vpack.c.bf16 %v1542_v52, %v1541_v57  ;;  %v2084_v59 = vmax.f32 %v2076_v38, 0.0  ;;  %v1528_v61 = vmul.f32 1.2246469e-16, %v10713_v41 }
 0x121   : > { %9411 = vmatprep.subr.bf16.mxu1 %v997_v39  ;;  %v1912_v6 = vmax.f32 %v1904_v56, 0.0  ;;  %v2085_v7 = vmax.f32 %v2077_v62, 0.0  ;;  %v10763_v33 = vmul.f32 -0.70710677, %v10705_v51  ;;  %v10766_v63 = vmul.f32 -0.70710677, %v10713_v41 }
 0x122   : > { %9412 = vmatpush3.bf16.msra.mxu1 %v997_v39  ;;  %15153 = vst [vmem:[#allocation18_spill] sm:$0xff] %v10757_v45  ;;  %v10778_v14 = vmul.f32 0.0, %v10740_v19  ;;  %v10781_v23 = vmul.f32 0.0, %v10748_v28  ;;  %v10786_v31 = vmul.f32 0.70710677, %v10740_v19 }
 0x123   : > { %v553_v55 = vpop.permute.xlu1 %552  ;;  %v551_v54 = vpop.permute.xlu0 %550  ;;  %v10770_v10 = vpack.c.bf16 %v1912_v6, %v1911_v30  ;;  %v10772_v11 = vpack.c.bf16 %v2085_v7, %v2084_v59  ;;  %v10789_v38 = vmul.f32 0.70710677, %v10748_v28  ;;  %v1153_v57 = vmul.f32 6.123234e-17, %v10638_v18 }
 0x124   : > { %v572_v0 = vsel %vm566_vm4, %v529_v50, %v553_v55  ;;  %v571_v42 = vsel %vm566_vm4, %v527_v36, %v551_v54  ;;  %v1897_v36 = vmul.f32 -1.0, %v10705_v51  ;;  %v1154_v52 = vmul.f32 6.123234e-17, %v10636_v16 }
 0x125   : > { %v580_v1 = vsub.f32 %v515_v53, %v572_v0  ;;  %v579_v26 = vsub.f32 %v514_v35, %v571_v42  ;;  %15154 = vst [vmem:[#allocation19_spill] sm:$0xff] %v10770_v10  ;;  %15155 = vst [vmem:[#allocation20_spill] sm:$0xff] %v10772_v11  ;;  %v10796_v0 = vmul.f32 -0.70710677, %v10638_v18  ;;  %v10799_v54 = vmul.f32 -0.70710677, %v10636_v16 }
 0x126   : > { %v10802_v30 = vmul.f32 -0.70710677, %v10740_v19  ;;  %v1898_v42 = vmul.f32 -1.0, %v10713_v41  ;;  %v10809_v6 = vmul.f32 -1.0, %v10740_v19  ;;  %v10812_v18 = vmul.f32 -1.0, %v10748_v28 }
 0x127   : > { %v10760_v8 = vmul.f32 0.5, %v580_v1  ;;  %v476_v46 = vpop.permute.xlu1 %475  ;;  %v10768_v49 = vmul.f32 0.5, %v579_v26  ;;  %v474_v50 = vpop.permute.xlu0 %473  ;;  %v10805_v1 = vmul.f32 -0.70710677, %v10748_v28  ;;  %v10815_v16 = vadd.f32 %v1153_v57, %v10626_v2 }
 0x128   : > { %v10831_v57 = vmul.f32 -0.70710677, %v10686_v32 }
 0x129   : > { %v696_v39 = vadd.f32 %v688_v9, %v10760_v8  ;;  %v969_v13 = vmul.f32 0.70710677, %v10760_v8  ;;  %v695_v27 = vadd.f32 %v687_v48, %v10768_v49  ;;  %v968_v29 = vmul.f32 0.70710677, %v10768_v49 }
 0x12a   : > { %v1889_v2 = vmul.f32 -1.8369701e-16, %v10768_v49 }
 0x12b   : > { %v500_v53 = vpop.permute.xlu1 %499  ;;  %v704_v9 = vmax.f32 %v696_v39, 0.0  ;;  %v985_v55 = vadd.f32 %v10733_v12, %v969_v13  ;;  %v498_v62 = vpop.permute.xlu0 %497  ;;  %v703_v35 = vmax.f32 %v695_v27, 0.0  ;;  %v984_v48 = vadd.f32 %v10719_v5, %v968_v29 }
 0x12c   : > { %v10818_v39 = vadd.f32 %v1154_v52, %v10628_v3  ;;  %v1519_v27 = vmul.f32 -1.0, %v10768_v49  ;;  %v1156_v3 = vmul.f32 6.123234e-17, %v10686_v32  ;;  %v2078_v60 = vadd.f32 %v10763_v33, %v968_v29 }
 0x12d   : > { %v993_v56 = vmax.f32 %v985_v55, 0.0  ;;  %v709_v59 = vpack.c.bf16 %v704_v9, %v703_v35  ;;  %v992_v26 = vmax.f32 %v984_v48, 0.0  ;;  %v1520_v55 = vmul.f32 -1.0, %v10760_v8 }
 0x12e   : > { %v10824_v35 = vadd.f32 %v10796_v0, %v10641_v20  ;;  %v1343_v48 = vadd.f32 %v10799_v54, %v10644_v21  ;;  %v1535_v52 = vadd.f32 %v10743_v25, %v1519_v27  ;;  %v1890_v20 = vmul.f32 -1.8369701e-16, %v10760_v8 }
 0x12f   : > { %v533_v7 = vpop.permute.xlu1 %532  ;;  %v531_v11 = vpop.permute.xlu0 %530  ;;  %9381 = vmatprep.subr.bf16.mxu0 %v709_v59  ;;  %v998_v9 = vpack.c.bf16 %v993_v56, %v992_v26  ;;  %v1536_v10 = vadd.f32 %v1528_v61, %v1520_v55  ;;  %v1155_v56 = vmul.f32 6.123234e-17, %v10691_v4  ;;  %v1905_v26 = vadd.f32 %v1897_v36, %v1889_v2 }
 0x130   : > { %9382 = vmatpush3.bf16.msra.mxu0 %v709_v59  ;;  %v517_v21 = vsel %vm509_vm3, %v476_v46, %v500_v53  ;;  %v1543_v15 = vmax.f32 %v1535_v52, 0.0  ;;  %v2079_v32 = vadd.f32 %v10766_v63, %v969_v13  ;;  %v516_v34 = vsel %vm509_vm3, %v474_v50, %v498_v62 }
 0x131   : > { %9413 = vmatprep.subr.bf16.mxu1 %v998_v9  ;;  %v1544_v45 = vmax.f32 %v1536_v10, 0.0  ;;  %v1906_v27 = vadd.f32 %v1898_v42, %v1890_v20  ;;  %v1913_v55 = vmax.f32 %v1905_v26, 0.0  ;;  %v2086_v29 = vmax.f32 %v2078_v60, 0.0 }
 0x132   : > { %9414 = vmatpush3.bf16.msra.mxu1 %v998_v9  ;;  %v1164_v53 = vadd.f32 %v1156_v3, %v10657_v40  ;;  %v2087_v10 = vmax.f32 %v2079_v32, 0.0  ;;  %v1169_v50 = vmax.f32 %v10815_v16, 0.0  ;;  %v1170_v13 = vmax.f32 %v10818_v39, 0.0 }
 0x133   : > { %v557_v59 = vpop.permute.xlu1 %556  ;;  %v555_v61 = vpop.permute.xlu0 %554  ;;  %v10842_v2 = vpack.c.bf16 %v1544_v45, %v1543_v15  ;;  %v1914_v9 = vmax.f32 %v1906_v27, 0.0  ;;  %v10850_v62 = vmul.f32 -0.70710677, %v10691_v4  ;;  %v1163_v15 = vadd.f32 %v1155_v56, %v10672_v37 }
 0x134   : > { %v574_v25 = vsel %vm566_vm4, %v533_v7, %v557_v59  ;;  %v573_v36 = vsel %vm566_vm4, %v531_v11, %v555_v61  ;;  %v10857_v60 = vpack.c.bf16 %v2087_v10, %v2086_v29  ;;  %v1351_v11 = vmax.f32 %v1343_v48, 0.0  ;;  %v10887_v10 = vld [vmem:[#allocation7 + $0x10] sm:$0xff]  }
 0x135   : > { %v582_v47 = vsub.f32 %v517_v21, %v574_v25  ;;  %v581_v46 = vsub.f32 %v516_v34, %v573_v36  ;;  %v10855_v45 = vpack.c.bf16 %v1914_v9, %v1913_v55  ;;  %v1350_v34 = vmax.f32 %v10824_v35, 0.0 }
 0x136   : > { %v1172_v16 = vmax.f32 %v1164_v53, 0.0  ;;  %v1345_v37 = vadd.f32 %v10831_v57, %v10689_v22  ;;  %v1157_v56 = vmul.f32 6.123234e-17, %v10768_v49  ;;  %v1171_v48 = vmax.f32 %v1163_v15, 0.0  ;;  %v10884_v53 = vld [vmem:[#allocation7 + $0x8] sm:$0xff]  }
 0x137   : > { %v10845_v52 = vmul.f32 0.5, %v582_v47  ;;  %v10852_v42 = vmul.f32 0.5, %v581_v46  ;;  %v1177_v21 = vpack.c.bf16 %v1170_v13, %v1169_v50  ;;  %v10875_v59 = vmul.f32 -0.70710677, %v10768_v49 }
 0x138   : > { %v10878_v22 = vmul.f32 -0.70710677, %v10760_v8  ;;  %v1358_v61 = vpack.c.bf16 %v1351_v11, %v1350_v34  ;;  %v1353_v27 = vmax.f32 %v1345_v37, 0.0  ;;  %v1165_v55 = vadd.f32 %v1157_v56, %v10705_v51 }
 0x139   : > { %v698_v40 = vadd.f32 %v10781_v23, %v10845_v52  ;;  %v971_v47 = vmul.f32 0.70710677, %v10845_v52  ;;  %v697_v4 = vadd.f32 %v10778_v14, %v10852_v42  ;;  %v970_v7 = vmul.f32 0.70710677, %v10852_v42 }
 0x13a   : > { %v1158_v23 = vmul.f32 6.123234e-17, %v10760_v8  ;;  %v1344_v14 = vadd.f32 %v10850_v62, %v10694_v17  ;;  %v1159_v29 = vmul.f32 6.123234e-17, %v10852_v42  ;;  %v1160_v17 = vmul.f32 6.123234e-17, %v10845_v52 }
 0x13b   : > { %v706_v39 = vmax.f32 %v698_v40, 0.0  ;;  %v987_v3 = vadd.f32 %v10789_v38, %v971_v47  ;;  %v705_v20 = vmax.f32 %v697_v4, 0.0  ;;  %v986_v35 = vadd.f32 %v10786_v31, %v970_v7 }
 0x13c   : > { %v1166_v36 = vadd.f32 %v1158_v23, %v10713_v41  ;;  %v1178_v49 = vpack.c.bf16 %v1172_v16, %v1171_v48  ;;  %v1352_v9 = vmax.f32 %v1344_v14, 0.0  ;;  %v1891_v8 = vmul.f32 -1.8369701e-16, %v10852_v42  ;;  %v10920_v14 = vld [vmem:[#allocation7 + $0x18] sm:$0xff]  }
 0x13d   : > { %v995_v26 = vmax.f32 %v987_v3, 0.0  ;;  %v710_v32 = vpack.c.bf16 %v706_v39, %v705_v20  ;;  %v994_v25 = vmax.f32 %v986_v35, 0.0  ;;  %v1346_v51 = vadd.f32 %v10875_v59, %v10719_v5 }
 0x13e   : > { %v1347_v41 = vadd.f32 %v10878_v22, %v10733_v12  ;;  %v10894_v50 = vmul.f32 -0.70710677, %v10852_v42  ;;  %v10897_v13 = vmul.f32 -0.70710677, %v10845_v52  ;;  %v1892_v15 = vmul.f32 -1.8369701e-16, %v10845_v52 }
 0x13f   : > { %9383 = vmatprep.subr.bf16.mxu0 %v710_v32  ;;  %v999_v46 = vpack.c.bf16 %v995_v26, %v994_v25  ;;  %v1907_v40 = vadd.f32 %v10809_v6, %v1891_v8  ;;  %v2080_v34 = vadd.f32 %v10802_v30, %v970_v7  ;;  %v2081_v11 = vadd.f32 %v10805_v1, %v971_v47  ;;  %v10965_v8 = vld [vmem:[#allocation7 + $0x50] sm:$0xff]  }
 0x140   : > { %9384 = vmatpush3.bf16.msra.mxu0 %v710_v32  ;;  %v1173_v5 = vmax.f32 %v1165_v55, 0.0  ;;  %v1174_v4 = vmax.f32 %v1166_v36, 0.0  ;;  %v1167_v12 = vadd.f32 %v1159_v29, %v10740_v19  ;;  %v1168_v16 = vadd.f32 %v1160_v17, %v10748_v28 }
 0x141   : > { %9415 = vmatprep.subr.bf16.mxu1 %v999_v46  ;;  %9441 = vmatprep.subr.bf16.mxu0 %v1177_v21  ;;  %v1908_v37 = vadd.f32 %v10812_v18, %v1892_v15  ;;  %v1915_v39 = vmax.f32 %v1907_v40, 0.0  ;;  %v2088_v3 = vmax.f32 %v2080_v34, 0.0  ;;  %v2089_v6 = vmax.f32 %v2081_v11, 0.0  ;;  %v15157_v40 = vld [vmem:[#allocation17_spill] sm:$0xff] }
 0x142   : > { %9416 = vmatpush3.bf16.msra.mxu1 %v999_v46  ;;  %v1359_v7 = vpack.c.bf16 %v1353_v27, %v1352_v9  ;;  %v1354_v47 = vmax.f32 %v1346_v51, 0.0  ;;  %v1355_v56 = vmax.f32 %v1347_v41, 0.0  ;;  %v1348_v23 = vadd.f32 %v10894_v50, %v10786_v31  ;;  %v10924_v31 = vld [vmem:[#allocation7 + $0x20] sm:$0xff]   ;;  %v10951_v46 = vld [vmem:[#allocation7 + $0x38] sm:$0xff]   ;;  %v10963_v9 = vld [vmem:[#allocation7 + $0x48] sm:$0xff]  }
 0x143   : > { %9386 = vmatmul.mubr.msk.bf16.vlgmr.msra.gmra.mrb[0].mxu0 %vm771_vm2, %v10884_v53  ;;  %9473 = vmatprep.subr.bf16.mxu1 %v1358_v61  ;;  %v1349_v18 = vadd.f32 %v10897_v13, %v10789_v38  ;;  %v1916_v20 = vmax.f32 %v1908_v37, 0.0  ;;  %v10916_v35 = vpack.c.bf16 %v2089_v6, %v2088_v3  ;;  %v1179_v48 = vpack.c.bf16 %v1174_v4, %v1173_v5  ;;  %v10975_v51 = vld [vmem:[#allocation7 + $0x58] sm:$0xff]   ;;  %v15156_v41 = vld [vmem:[#allocation16_spill] sm:$0xff] }
 0x144   : > { %9442 = vmatpush3.bf16.msra.mxu0 %v1177_v21  ;;  %9389 = vmatprep.mubr.msk.bf16.mxu0 %vm771_vm2, %v10887_v10  ;;  %v1175_v26 = vmax.f32 %v1167_v12, 0.0  ;;  %v1176_v21 = vmax.f32 %v1168_v16, 0.0  ;;  %v1712_v38 = vadd.f32 %v10660_v43, %v10796_v0  ;;  %v1360_v25 = vpack.c.bf16 %v1355_v56, %v1354_v47  ;;  %v15162_v47 = vld [vmem:[#allocation20_spill] sm:$0xff]  ;;  %v9989_v56 = vld [vmem:[#allocation9] sm:$0xff]  }
 0x145   : > { %9418 = vmatmul.mubr.msk.bf16.vlgmr.msra.gmra.mrb[0].mxu1 %vm771_vm2, %v10884_v53  ;;  %9443 = vmatprep.subr.bf16.mxu0 %v1178_v49  ;;  %v10922_v32 = vpack.c.bf16 %v1916_v20, %v1915_v39  ;;  %v1357_v27 = vmax.f32 %v1349_v18, 0.0  ;;  %v1713_v55 = vadd.f32 %v10663_v44, %v10799_v54  ;;  %v10938_v44 = vld [vmem:[#allocation7 + $0x28] sm:$0xff]   ;;  %v10940_v54 = vld [vmem:[#allocation7 + $0x30] sm:$0xff]   ;;  %v1714_v15 = vadd.f32 %v15156_v41, %v10850_v62  ;;  %v9992_v20 = vld [vmem:[#allocation9 + $0x18] sm:$0xff]  }
 0x146   : > { %9474 = vmatpush3.bf16.msra.mxu1 %v1358_v61  ;;  %9421 = vmatprep.mubr.msk.bf16.mxu1 %vm771_vm2, %v10887_v10  ;;  %v1356_v61 = vmax.f32 %v1348_v23, 0.0  ;;  %v1180_v36 = vpack.c.bf16 %v1176_v21, %v1175_v26  ;;  %v1720_v0 = vmax.f32 %v1712_v38, 0.0  ;;  %v1715_v34 = vadd.f32 %v15157_v40, %v10831_v57  ;;  %v9993_v23 = vld [vmem:[#allocation9 + $0x20] sm:$0xff]   ;;  %v9991_v18 = vld [vmem:[#allocation9 + $0x10] sm:$0xff]  }
 0x147   : > { %9475 = vmatprep.subr.bf16.mxu1 %v1359_v7  ;;  %v1721_v29 = vmax.f32 %v1713_v55, 0.0  ;;  %v1521_v11 = vmul.f32 -1.0, %v10852_v42  ;;  %v1522_v5 = vmul.f32 -1.0, %v10845_v52  ;;  %v1529_v4 = vmul.f32 1.2246469e-16, %v10740_v19  ;;  %v15158_v19 = vld [vmem:[#allocation18_spill] sm:$0xff] }
 0x148   : > { %9444 = vmatpush3.bf16.msra.mxu0 %v1178_v49  ;;  %v1361_v43 = vpack.c.bf16 %v1357_v27, %v1356_v61  ;;  %v10953_v49 = vld [vmem:[#allocation7 + $0x40] sm:$0xff]   ;;  %v1530_v12 = vmul.f32 1.2246469e-16, %v10748_v28  ;;  %v1722_v16 = vmax.f32 %v1714_v15, 0.0  ;;  %v1723_v37 = vmax.f32 %v1715_v34, 0.0 }
 0x149   : > { %9445 = vmatprep.subr.bf16.mxu0 %v1179_v48  ;;  %v1728_v17 = vpack.c.bf16 %v1721_v29, %v1720_v0  ;;  %v1716_v62 = vadd.f32 %v10763_v33, %v10875_v59  ;;  %v1717_v57 = vadd.f32 %v10766_v63, %v10878_v22  ;;  %v1537_v39 = vadd.f32 %v1529_v4, %v1521_v11  ;;  %v10000_v11 = vld [vmem:[#allocation9 + $0x50] sm:$0xff]  }
 0x14a   : > { %9476 = vmatpush3.bf16.msra.mxu1 %v1359_v7  ;;  %v1538_v3 = vadd.f32 %v1530_v12, %v1522_v5  ;;  %v1729_v52 = vpack.c.bf16 %v1723_v37, %v1722_v16  ;;  %v1718_v63 = vadd.f32 %v10802_v30, %v10894_v50  ;;  %v1719_v42 = vadd.f32 %v10805_v1, %v10897_v13  ;;  %v15159_v50 = vld [vmem:[#allocation14_spill] sm:$0xff]  ;;  %v15160_v13 = vld [vmem:[#allocation15_spill] sm:$0xff] }
 0x14b   : > { %9390 = vmatmul.mubr.msk.bf16.gmra.mrb[4].mxu0 %vm771_vm2, %v10920_v14  ;;  %9477 = vmatprep.subr.bf16.mxu1 %v1360_v25  ;;  %v1724_v28 = vmax.f32 %v1716_v62, 0.0  ;;  %v1725_v33 = vmax.f32 %v1717_v57, 0.0  ;;  %vm5577_vm3 = vcmask 130048  }
 0x14c   : > { %9446 = vmatpush3.bf16.msra.mxu0 %v1179_v48  ;;  %9393 = vmatprep.mubr.msk.bf16.mxu0 %vm771_vm2, %v10924_v31  ;;  %v1546_v59 = vmax.f32 %v1538_v3, 0.0  ;;  %v1726_v6 = vmax.f32 %v1718_v63, 0.0  ;;  %v1727_v7 = vmax.f32 %v1719_v42, 0.0 }
 0x14d   : > { %9422 = vmatmul.mubr.msk.bf16.gmra.mrb[4].mxu1 %vm771_vm2, %v10920_v14  ;;  %9447 = vmatprep.subr.bf16.mxu0 %v1180_v36  ;;  %v1730_v22 = vpack.c.bf16 %v1725_v33, %v1724_v28 }
 0x14e   : > { %9478 = vmatpush3.bf16.msra.mxu1 %v1360_v25  ;;  %9425 = vmatprep.mubr.msk.bf16.mxu1 %vm771_vm2, %v10924_v31  ;;  %v1731_v1 = vpack.c.bf16 %v1727_v7, %v1726_v6 }
 0x14f   : > { %9479 = vmatprep.subr.bf16.mxu1 %v1361_v43 }
 0x150   : > { %9448 = vmatpush3.bf16.msra.mxu0 %v1180_v36 }
 0x151   : > { %9505 = vmatprep.subr.bf16.mxu0 %v10683_v24 }
 0x152   : > { %9480 = vmatpush3.bf16.msra.mxu1 %v1361_v43 }
 0x153   : > { %9394 = vmatmul.mubr.msk.bf16.gmra.mrb[8].mxu0 %vm771_vm2, %v10938_v44  ;;  %9537 = vmatprep.subr.bf16.mxu1 %v1728_v17 }
 0x154   : > { %9397 = vmatprep.mubr.msk.bf16.mxu0 %vm771_vm2, %v10940_v54 }
 0x155   : > { %9426 = vmatmul.mubr.msk.bf16.gmra.mrb[8].mxu1 %vm771_vm2, %v10938_v44 }
 0x156   : > { %9429 = vmatprep.mubr.msk.bf16.mxu1 %vm771_vm2, %v10940_v54 }
 0x15b   : > { %9398 = vmatmul.mubr.msk.bf16.gmra.mrb[12].mxu0 %vm771_vm2, %v10951_v46 }
 0x15c   : > { %9401 = vmatprep.mubr.msk.bf16.mxu0 %vm771_vm2, %v10953_v49 }
 0x15d   : > { %9430 = vmatmul.mubr.msk.bf16.gmra.mrb[12].mxu1 %vm771_vm2, %v10951_v46 }
 0x15e   : > { %9433 = vmatprep.mubr.msk.bf16.mxu1 %vm771_vm2, %v10953_v49 }
 0x163   : > { %9402 = vmatmul.mubr.msk.bf16.gmra.mrb[16].mxu0 %vm771_vm2, %v10963_v9 }
 0x164   : > { %9405 = vmatprep.mubr.msk.bf16.mxu0 %vm771_vm2, %v10965_v8 }
 0x165   : > { %9434 = vmatmul.mubr.msk.bf16.gmra.mrb[16].mxu1 %vm771_vm2, %v10963_v9 }
 0x166   : > { %9437 = vmatprep.mubr.msk.bf16.mxu1 %vm771_vm2, %v10965_v8 }
 0x16b   : > { %9406 = vmatmul.mubr.msk.bf16.gmra.mrb[20].mxu0 %vm771_vm2, %v10975_v51 }
 0x16c   : > { %9449 = vmatprep.mubr.msk.bf16.mxu0 %vm771_vm2, %v10619_v58 }
 0x16d   : > { %9438 = vmatmul.mubr.msk.bf16.gmra.mrb[20].mxu1 %vm771_vm2, %v10975_v51 }
 0x16e   : > { %9481 = vmatprep.mubr.msk.bf16.mxu1 %vm771_vm2, %v10619_v58 }
 0x173   : > { %9450 = vmatmul.mubr.msk.bf16.vlgmr.msra.gmra.mrb[24].mxu0 %vm771_vm2, %v10884_v53 }
 0x174   : > { %9506 = vmatpush3.bf16.msra.mxu0 %v10683_v24  ;;  %9453 = vmatprep.mubr.msk.bf16.mxu0 %vm771_vm2, %v10887_v10  ;;  %v1545_v24 = vmax.f32 %v1537_v39, 0.0 }
 0x175   : > { %9507 = vmatprep.subr.bf16.mxu0 %v15158_v19  ;;  %9482 = vmatmul.mubr.msk.bf16.vlgmr.msra.gmra.mrb[24].mxu1 %vm771_vm2, %v10884_v53 }
 0x176   : > { %9538 = vmatpush3.bf16.msra.mxu1 %v1728_v17  ;;  %9485 = vmatprep.mubr.msk.bf16.mxu1 %vm771_vm2, %v10887_v10  ;;  %v1550_v30 = vpack.c.bf16 %v1546_v59, %v1545_v24 }
 0x177   : > { %9539 = vmatprep.subr.bf16.mxu1 %v1729_v52 }
 0x178   : > { %9508 = vmatpush3.bf16.msra.mxu0 %v15158_v19 }
 0x179   : > { %9509 = vmatprep.subr.bf16.mxu0 %v10842_v2 }
 0x17a   : > { %9540 = vmatpush3.bf16.msra.mxu1 %v1729_v52 }
 0x17b   : > { %9541 = vmatprep.subr.bf16.mxu1 %v1730_v22  ;;  %9454 = vmatmul.mubr.msk.bf16.gmra.mrb[28].mxu0 %vm771_vm2, %v10920_v14 }
 0x17c   : > { %9510 = vmatpush3.bf16.msra.mxu0 %v10842_v2  ;;  %9457 = vmatprep.mubr.msk.bf16.mxu0 %vm771_vm2, %v10924_v31  ;;  %v15161_v2 = vld [vmem:[#allocation19_spill] sm:$0xff] }
 0x17d   : > { %9511 = vmatprep.subr.bf16.mxu0 %v1550_v30  ;;  %9486 = vmatmul.mubr.msk.bf16.gmra.mrb[28].mxu1 %vm771_vm2, %v10920_v14 }
 0x17e   : > { %9542 = vmatpush3.bf16.msra.mxu1 %v1730_v22  ;;  %9489 = vmatprep.mubr.msk.bf16.mxu1 %vm771_vm2, %v10924_v31 }
 0x17f   : > { %9543 = vmatprep.subr.bf16.mxu1 %v1731_v1 }
 0x180   : > { %9512 = vmatpush3.bf16.msra.mxu0 %v1550_v30 }
 0x181   : > { %9569 = vmatprep.subr.bf16.mxu0 %v15159_v50 }
 0x182   : > { %9544 = vmatpush3.bf16.msra.mxu1 %v1731_v1 }
 0x183   : > { %9601 = vmatprep.subr.bf16.mxu1 %v15160_v13  ;;  %9458 = vmatmul.mubr.msk.bf16.gmra.mrb[32].mxu0 %vm771_vm2, %v10938_v44 }
 0x184   : > { %9461 = vmatprep.mubr.msk.bf16.mxu0 %vm771_vm2, %v10940_v54 }
 0x185   : > { %9490 = vmatmul.mubr.msk.bf16.gmra.mrb[32].mxu1 %vm771_vm2, %v10938_v44 }
 0x186   : > { %9493 = vmatprep.mubr.msk.bf16.mxu1 %vm771_vm2, %v10940_v54 }
 0x18b   : > { %9462 = vmatmul.mubr.msk.bf16.gmra.mrb[36].mxu0 %vm771_vm2, %v10951_v46 }
 0x18c   : > { %9465 = vmatprep.mubr.msk.bf16.mxu0 %vm771_vm2, %v10953_v49 }
 0x18d   : > { %9494 = vmatmul.mubr.msk.bf16.gmra.mrb[36].mxu1 %vm771_vm2, %v10951_v46 }
 0x18e   : > { %9497 = vmatprep.mubr.msk.bf16.mxu1 %vm771_vm2, %v10953_v49 }
 0x193   : > { %9466 = vmatmul.mubr.msk.bf16.gmra.mrb[40].mxu0 %vm771_vm2, %v10963_v9 }
 0x194   : > { %9469 = vmatprep.mubr.msk.bf16.mxu0 %vm771_vm2, %v10965_v8 }
 0x195   : > { %9498 = vmatmul.mubr.msk.bf16.gmra.mrb[40].mxu1 %vm771_vm2, %v10963_v9 }
 0x196   : > { %9501 = vmatprep.mubr.msk.bf16.mxu1 %vm771_vm2, %v10965_v8 }
 0x19b   : > { %9470 = vmatmul.mubr.msk.bf16.gmra.mrb[44].mxu0 %vm771_vm2, %v10975_v51 }
 0x19c   : > { %9513 = vmatprep.mubr.msk.bf16.mxu0 %vm771_vm2, %v10619_v58 }
 0x19d   : > { %9502 = vmatmul.mubr.msk.bf16.gmra.mrb[44].mxu1 %vm771_vm2, %v10975_v51 }
 0x19e   : > { %9545 = vmatprep.mubr.msk.bf16.mxu1 %vm771_vm2, %v10619_v58 }
 0x1a3   : > { %9514 = vmatmul.mubr.msk.bf16.vlgmr.msra.gmra.mrb[48].mxu0 %vm771_vm2, %v10884_v53 }
 0x1a4   : > { %9570 = vmatpush3.bf16.msra.mxu0 %v15159_v50  ;;  %9517 = vmatprep.mubr.msk.bf16.mxu0 %vm771_vm2, %v10887_v10 }
 0x1a5   : > { %9571 = vmatprep.subr.bf16.mxu0 %v15161_v2  ;;  %9546 = vmatmul.mubr.msk.bf16.vlgmr.msra.gmra.mrb[48].mxu1 %vm771_vm2, %v10884_v53 }
 0x1a6   : > { %9602 = vmatpush3.bf16.msra.mxu1 %v15160_v13  ;;  %9549 = vmatprep.mubr.msk.bf16.mxu1 %vm771_vm2, %v10887_v10 }
 0x1a7   : > { %9603 = vmatprep.subr.bf16.mxu1 %v15162_v47 }
 0x1a8   : > { %9572 = vmatpush3.bf16.msra.mxu0 %v15161_v2 }
 0x1a9   : > { %9573 = vmatprep.subr.bf16.mxu0 %v10855_v45 }
 0x1aa   : > { %9604 = vmatpush3.bf16.msra.mxu1 %v15162_v47 }
 0x1ab   : > { %9605 = vmatprep.subr.bf16.mxu1 %v10857_v60  ;;  %9518 = vmatmul.mubr.msk.bf16.gmra.mrb[52].mxu0 %vm771_vm2, %v10920_v14 }
 0x1ac   : > { %9574 = vmatpush3.bf16.msra.mxu0 %v10855_v45  ;;  %9521 = vmatprep.mubr.msk.bf16.mxu0 %vm771_vm2, %v10924_v31  ;;  %v9990_v45 = vld [vmem:[#allocation9 + $0x8] sm:$0xff]  }
 0x1ad   : > { %9575 = vmatprep.subr.bf16.mxu0 %v10922_v32  ;;  %9550 = vmatmul.mubr.msk.bf16.gmra.mrb[52].mxu1 %vm771_vm2, %v10920_v14 }
 0x1ae   : > { %9606 = vmatpush3.bf16.msra.mxu1 %v10857_v60  ;;  %9553 = vmatprep.mubr.msk.bf16.mxu1 %vm771_vm2, %v10924_v31  ;;  %v9994_v60 = vld [vmem:[#allocation9 + $0x28] sm:$0xff]  }
 0x1af   : > { %9607 = vmatprep.subr.bf16.mxu1 %v10916_v35 }
 0x1b0   : > { %9576 = vmatpush3.bf16.msra.mxu0 %v10922_v32 }
 0x1b1   : > { %9633 = vmatprep.subr.bf16.mxu0 %v9989_v56 }
 0x1b2   : > { %9608 = vmatpush3.bf16.msra.mxu1 %v10916_v35  ;;  %v9996_v35 = vld [vmem:[#allocation9 + $0x38] sm:$0xff]  }
 0x1b3   : > { %9522 = vmatmul.mubr.msk.bf16.gmra.mrb[56].mxu0 %vm771_vm2, %v10938_v44  ;;  %9689 = vmatprep.subr.bf16.mxu1 %v9993_v23 }
 0x1b4   : > { %9525 = vmatprep.mubr.msk.bf16.mxu0 %vm771_vm2, %v10940_v54 }
 0x1b5   : > { %9554 = vmatmul.mubr.msk.bf16.gmra.mrb[56].mxu1 %vm771_vm2, %v10938_v44 }
 0x1b6   : > { %9557 = vmatprep.mubr.msk.bf16.mxu1 %vm771_vm2, %v10940_v54 }
 0x1bb   : > { %9526 = vmatmul.mubr.msk.bf16.gmra.mrb[60].mxu0 %vm771_vm2, %v10951_v46 }
 0x1bc   : > { %9529 = vmatprep.mubr.msk.bf16.mxu0 %vm771_vm2, %v10953_v49 }
 0x1bd   : > { %9558 = vmatmul.mubr.msk.bf16.gmra.mrb[60].mxu1 %vm771_vm2, %v10951_v46 }
 0x1be   : > { %9561 = vmatprep.mubr.msk.bf16.mxu1 %vm771_vm2, %v10953_v49 }
 0x1c3   : > { %9530 = vmatmul.mubr.msk.bf16.gmra.mrb[64].mxu0 %vm771_vm2, %v10963_v9 }
 0x1c4   : > { %9533 = vmatprep.mubr.msk.bf16.mxu0 %vm771_vm2, %v10965_v8 }
 0x1c5   : > { %9562 = vmatmul.mubr.msk.bf16.gmra.mrb[64].mxu1 %vm771_vm2, %v10963_v9 }
 0x1c6   : > { %9565 = vmatprep.mubr.msk.bf16.mxu1 %vm771_vm2, %v10965_v8 }
 0x1cb   : > { %9534 = vmatmul.mubr.msk.bf16.gmra.mrb[68].mxu0 %vm771_vm2, %v10975_v51 }
 0x1cc   : > { %9577 = vmatprep.mubr.msk.bf16.mxu0 %vm771_vm2, %v10619_v58 }
 0x1cd   : > { %9566 = vmatmul.mubr.msk.bf16.gmra.mrb[68].mxu1 %vm771_vm2, %v10975_v51 }
 0x1ce   : > { %9609 = vmatprep.mubr.msk.bf16.mxu1 %vm771_vm2, %v10619_v58  ;;  %v9995_v58 = vld [vmem:[#allocation9 + $0x30] sm:$0xff]  }
 0x1d3   : > { %9578 = vmatmul.mubr.msk.bf16.vlgmr.msra.gmra.mrb[72].mxu0 %vm771_vm2, %v10884_v53 }
 0x1d4   : > { %9581 = vmatprep.mubr.msk.bf16.mxu0 %vm771_vm2, %v10887_v10  ;;  %9634 = vmatpush3.bf16.msra.mxu0 %v9989_v56 }
 0x1d5   : > { %9610 = vmatmul.mubr.msk.bf16.vlgmr.msra.gmra.mrb[72].mxu1 %vm771_vm2, %v10884_v53  ;;  %9635 = vmatprep.subr.bf16.mxu0 %v9990_v45  ;;  %v9997_v53 = vld [vmem:[#allocation9 + $0x40] sm:$0xff]  }
 0x1d6   : > { %9613 = vmatprep.mubr.msk.bf16.mxu1 %vm771_vm2, %v10887_v10  ;;  %9690 = vmatpush3.bf16.msra.mxu1 %v9993_v23  ;;  %v11162_v10 = vld [vmem:[#allocation9 + $0x60] sm:$0xff]  }
 0x1d7   : > { %9691 = vmatprep.subr.bf16.mxu1 %v9994_v60 }
 0x1d8   : > { %9636 = vmatpush3.bf16.msra.mxu0 %v9990_v45 }
 0x1d9   : > { %9637 = vmatprep.subr.bf16.mxu0 %v9991_v18 }
 0x1da   : > { %9692 = vmatpush3.bf16.msra.mxu1 %v9994_v60 }
 0x1db   : > { %9582 = vmatmul.mubr.msk.bf16.gmra.mrb[76].mxu0 %vm771_vm2, %v10920_v14  ;;  %9693 = vmatprep.subr.bf16.mxu1 %v9995_v58 }
 0x1dc   : > { %9585 = vmatprep.mubr.msk.bf16.mxu0 %vm771_vm2, %v10924_v31  ;;  %9638 = vmatpush3.bf16.msra.mxu0 %v9991_v18 }
 0x1dd   : > { %9614 = vmatmul.mubr.msk.bf16.gmra.mrb[76].mxu1 %vm771_vm2, %v10920_v14  ;;  %9639 = vmatprep.subr.bf16.mxu0 %v9992_v20 }
 0x1de   : > { %9617 = vmatprep.mubr.msk.bf16.mxu1 %vm771_vm2, %v10924_v31  ;;  %9694 = vmatpush3.bf16.msra.mxu1 %v9995_v58 }
 0x1df   : > { %9695 = vmatprep.subr.bf16.mxu1 %v9996_v35 }
 0x1e0   : > { %9640 = vmatpush3.bf16.msra.mxu0 %v9992_v20 }
 0x1e1   : > { %9745 = vmatprep.subr.bf16.mxu0 %v9997_v53 }
 0x1e2   : > { %9696 = vmatpush3.bf16.msra.mxu1 %v9996_v35  ;;  %v10001_v35 = vld [vmem:[#allocation9 + $0x68] sm:$0xff]  }
 0x1e3   : > { %9586 = vmatmul.mubr.msk.bf16.gmra.mrb[80].mxu0 %vm771_vm2, %v10938_v44  ;;  %9801 = vmatprep.subr.bf16.mxu1 %v11162_v10 }
 0x1e4   : > { %9589 = vmatprep.mubr.msk.bf16.mxu0 %vm771_vm2, %v10940_v54 }
 0x1e5   : > { %9618 = vmatmul.mubr.msk.bf16.gmra.mrb[80].mxu1 %vm771_vm2, %v10938_v44 }
 0x1e6   : > { %9621 = vmatprep.mubr.msk.bf16.mxu1 %vm771_vm2, %v10940_v54 }
 0x1eb   : > { %9590 = vmatmul.mubr.msk.bf16.gmra.mrb[84].mxu0 %vm771_vm2, %v10951_v46 }
 0x1ec   : > { %9593 = vmatprep.mubr.msk.bf16.mxu0 %vm771_vm2, %v10953_v49 }
 0x1ed   : > { %9622 = vmatmul.mubr.msk.bf16.gmra.mrb[84].mxu1 %vm771_vm2, %v10951_v46 }
 0x1ee   : > { %9625 = vmatprep.mubr.msk.bf16.mxu1 %vm771_vm2, %v10953_v49 }
 0x1f3   : > { %9594 = vmatmul.mubr.msk.bf16.gmra.mrb[88].mxu0 %vm771_vm2, %v10963_v9 }
 0x1f4   : > { %9597 = vmatprep.mubr.msk.bf16.mxu0 %vm771_vm2, %v10965_v8 }
 0x1f5   : > { %9626 = vmatmul.mubr.msk.bf16.gmra.mrb[88].mxu1 %vm771_vm2, %v10963_v9 }
 0x1f6   : > { %9629 = vmatprep.mubr.msk.bf16.mxu1 %vm771_vm2, %v10965_v8 }
 0x1fb   : > { %9598 = vmatmul.mubr.msk.bf16.gmra.mrb[92].mxu0 %vm771_vm2, %v10975_v51 }
 0x1fd   : > { %9630 = vmatmul.mubr.msk.bf16.gmra.mrb[92].mxu1 %vm771_vm2, %v10975_v51  ;;  %v9998_v51 = vld [vmem:[#allocation9 + $0x48] sm:$0xff]  }
 0x216   : > { %v9387_v48 = vpop.f32.mrb[0].mxu0 }
 0x217   : > { %939 = vst.msk [vmem:[#allocation2 + $0x10] sm:$0xff] %vm771_vm2, %v9387_v48  ;;  %v842_v14 = vpop.f32.mrb[1].mxu0 }
 0x218   : > { %937 = vst.msk [vmem:[#allocation2] sm:$0xff] %vm771_vm2, %v842_v14  ;;  %v9388_v26 = vpop.f32.mrb[2].mxu0  ;;  %v9419_v21 = vpop.f32.mrb[0].mxu1 }
 0x219   : > { %940 = vst.msk [vmem:[#allocation2 + $0x18] sm:$0xff] %vm771_vm2, %v9388_v26  ;;  %v845_v32 = vpop.f32.mrb[3].mxu0  ;;  %1131 = vst.msk [vmem:[#allocation2 + $0x40] sm:$0xff] %vm771_vm2, %v9419_v21  ;;  %v1034_v31 = vpop.f32.mrb[1].mxu1 }
 0x21a   : > { %938 = vst.msk [vmem:[#allocation2 + $0x8] sm:$0xff] %vm771_vm2, %v845_v32  ;;  %1129 = vst.msk [vmem:[#allocation2 + $0x30] sm:$0xff] %vm771_vm2, %v1034_v31  ;;  %v9420_v38 = vpop.f32.mrb[2].mxu1 }
 0x21b   : > { %1132 = vst.msk [vmem:[#allocation2 + $0x48] sm:$0xff] %vm771_vm2, %v9420_v38  ;;  %v1037_v25 = vpop.f32.mrb[3].mxu1 }
 0x21c   : > { %1130 = vst.msk [vmem:[#allocation2 + $0x38] sm:$0xff] %vm771_vm2, %v1037_v25 }
 0x21e   : > { %v9391_v61 = vpop.f32.mrb[4].mxu0  ;;  %v2249_v46 = vld [vmem:[#allocation2 + $0x10] sm:$0xff] }
 0x21f   : > { %944 = vst.msk [vmem:[#allocation2 + $0x180] sm:$0xff] %vm771_vm2, %v9391_v61  ;;  %v858_v27 = vpop.f32.mrb[5].mxu0  ;;  %v2247_v29 = vld [vmem:[#allocation2] sm:$0xff]  ;;  %v10003_v61 = vld [vmem:[#allocation9 + $0x70] sm:$0xff]  }
 0x220   : > { %941 = vst.msk [vmem:[#allocation2 + $0x20] sm:$0xff] %vm771_vm2, %v858_v27  ;;  %v9392_v55 = vpop.f32.mrb[6].mxu0  ;;  %v9423_v36 = vpop.f32.mrb[4].mxu1  ;;  %v2250_v43 = vld [vmem:[#allocation2 + $0x18] sm:$0xff]  ;;  %v2255_v34 = vld [vmem:[#allocation2 + $0x40] sm:$0xff] }
 0x221   : > { %945 = vst.msk [vmem:[#allocation2 + $0x188] sm:$0xff] %vm771_vm2, %v9392_v55  ;;  %v861_v0 = vpop.f32.mrb[7].mxu0  ;;  %v2248_v44 = vld [vmem:[#allocation2 + $0x8] sm:$0xff]  ;;  %1135 = vst.msk [vmem:[#allocation2 + $0x1b0] sm:$0xff] %vm771_vm2, %v9423_v36  ;;  %v1050_v54 = vpop.f32.mrb[5].mxu1  ;;  %v2296_v9 = vpack.c.bf16 %v2250_v43, %v2249_v46  ;;  %v2253_v40 = vld [vmem:[#allocation2 + $0x30] sm:$0xff] }
 0x222   : > { %942 = vst.msk [vmem:[#allocation2 + $0x28] sm:$0xff] %vm771_vm2, %v861_v0  ;;  %v2295_v17 = vpack.c.bf16 %v2248_v44, %v2247_v29  ;;  %1133 = vst.msk [vmem:[#allocation2 + $0x50] sm:$0xff] %vm771_vm2, %v1050_v54  ;;  %v9424_v49 = vpop.f32.mrb[6].mxu1  ;;  %v2256_v19 = vld [vmem:[#allocation2 + $0x48] sm:$0xff] }
 0x223   : > { %1136 = vst.msk [vmem:[#allocation2 + $0x1b8] sm:$0xff] %vm771_vm2, %v9424_v49  ;;  %v1053_v8 = vpop.f32.mrb[7].mxu1  ;;  %v2254_v37 = vld [vmem:[#allocation2 + $0x38] sm:$0xff]  ;;  %v2299_v24 = vpack.c.bf16 %v2256_v19, %v2255_v34 }
 0x224   : > { %9641 = vmatprep.mubr.msk.bf16.mxu0 %vm771_vm2, %v2295_v17  ;;  %1134 = vst.msk [vmem:[#allocation2 + $0x58] sm:$0xff] %vm771_vm2, %v1053_v8  ;;  %v2298_v63 = vpack.c.bf16 %v2254_v37, %v2253_v40 }
 0x225   : > { %9642 = vmatmul.mubr.msk.bf16.vlgmr.msra.gmra.mrb[96].mxu0 %vm771_vm2, %v2296_v9 }
 0x226   : > { %v9395_v41 = vpop.f32.mrb[8].mxu0  ;;  %9746 = vmatpush3.bf16.msra.mxu0 %v9997_v53  ;;  %v2704_v4 = vld [vmem:[#allocation2 + $0x180] sm:$0xff]  ;;  %v10002_v53 = vld [vmem:[#allocation9 + $0x58] sm:$0xff]  }
 0x227   : > { %948 = vst.msk [vmem:[#allocation2 + $0x1a0] sm:$0xff] %vm771_vm2, %v9395_v41  ;;  %v874_v15 = vpop.f32.mrb[9].mxu0  ;;  %9747 = vmatprep.subr.bf16.mxu0 %v9998_v51  ;;  %v2251_v39 = vld [vmem:[#allocation2 + $0x20] sm:$0xff] }
 0x228   : > { %946 = vst.msk [vmem:[#allocation2 + $0x190] sm:$0xff] %vm771_vm2, %v874_v15  ;;  %v9396_v5 = vpop.f32.mrb[10].mxu0  ;;  %v2705_v12 = vld [vmem:[#allocation2 + $0x188] sm:$0xff]  ;;  %v9427_v16 = vpop.f32.mrb[8].mxu1  ;;  %v2710_v26 = vld [vmem:[#allocation2 + $0x1b0] sm:$0xff] }
 0x229   : > { %949 = vst.msk [vmem:[#allocation2 + $0x1a8] sm:$0xff] %vm771_vm2, %v9396_v5  ;;  %v877_v62 = vpop.f32.mrb[11].mxu0  ;;  %v2752_v57 = vpack.c.bf16 %v2705_v12, %v2704_v4  ;;  %v2252_v3 = vld [vmem:[#allocation2 + $0x28] sm:$0xff]  ;;  %1139 = vst.msk [vmem:[#allocation2 + $0x1d0] sm:$0xff] %vm771_vm2, %v9427_v16  ;;  %v1066_v52 = vpop.f32.mrb[9].mxu1  ;;  %v2257_v30 = vld [vmem:[#allocation2 + $0x50] sm:$0xff] }
 0x22a   : > { %947 = vst.msk [vmem:[#allocation2 + $0x198] sm:$0xff] %vm771_vm2, %v877_v62  ;;  %v2297_v28 = vpack.c.bf16 %v2252_v3, %v2251_v39  ;;  %1137 = vst.msk [vmem:[#allocation2 + $0x1c0] sm:$0xff] %vm771_vm2, %v1066_v52  ;;  %v9428_v33 = vpop.f32.mrb[10].mxu1  ;;  %9748 = vmatpush3.bf16.msra.mxu0 %v9998_v51  ;;  %v2711_v21 = vld [vmem:[#allocation2 + $0x1b8] sm:$0xff] }
 0x22b   : > { %9697 = vmatprep.mubr.msk.bf16.mxu1 %vm771_vm2, %v2752_v57  ;;  %1140 = vst.msk [vmem:[#allocation2 + $0x1d8] sm:$0xff] %vm771_vm2, %v9428_v33  ;;  %v1069_v42 = vpop.f32.mrb[11].mxu1  ;;  %9749 = vmatprep.subr.bf16.mxu0 %v10000_v11  ;;  %v2258_v1 = vld [vmem:[#allocation2 + $0x58] sm:$0xff]  ;;  %v2755_v55 = vpack.c.bf16 %v2711_v21, %v2710_v26 }
 0x22c   : > { %9645 = vmatprep.mubr.msk.bf16.mxu0 %vm771_vm2, %v2297_v28  ;;  %1138 = vst.msk [vmem:[#allocation2 + $0x1c8] sm:$0xff] %vm771_vm2, %v1069_v42  ;;  %v2300_v18 = vpack.c.bf16 %v2258_v1, %v2257_v30  ;;  %v10004_v57 = vld [vmem:[#allocation9 + $0x78] sm:$0xff]  }
 0x22d   : > { %9646 = vmatmul.mubr.msk.bf16.gmra.mrb[100].mxu0 %vm771_vm2, %v2298_v63 }
 0x22e   : > { %v9399_v59 = vpop.f32.mrb[12].mxu0  ;;  %9649 = vmatprep.mubr.msk.bf16.mxu0 %vm771_vm2, %v2299_v24  ;;  %9750 = vmatpush3.bf16.msra.mxu0 %v10000_v11  ;;  %v2708_v45 = vld [vmem:[#allocation2 + $0x1a0] sm:$0xff] }
 0x22f   : > { %953 = vst.msk [vmem:[#allocation2 + $0x310] sm:$0xff] %vm771_vm2, %v9399_v59  ;;  %v890_v22 = vpop.f32.mrb[13].mxu0  ;;  %v2706_v2 = vld [vmem:[#allocation2 + $0x190] sm:$0xff]  ;;  %9751 = vmatprep.subr.bf16.mxu0 %v10002_v53 }
 0x230   : > { %951 = vst.msk [vmem:[#allocation2 + $0x300] sm:$0xff] %vm771_vm2, %v890_v22  ;;  %v9400_v6 = vpop.f32.mrb[14].mxu0  ;;  %v9431_v7 = vpop.f32.mrb[12].mxu1  ;;  %v2709_v50 = vld [vmem:[#allocation2 + $0x1a8] sm:$0xff]  ;;  %v2714_v54 = vld [vmem:[#allocation2 + $0x1d0] sm:$0xff] }
 0x231   : > { %954 = vst.msk [vmem:[#allocation2 + $0x318] sm:$0xff] %vm771_vm2, %v9400_v6  ;;  %v893_v13 = vpop.f32.mrb[15].mxu0  ;;  %v2707_v47 = vld [vmem:[#allocation2 + $0x198] sm:$0xff]  ;;  %1143 = vst.msk [vmem:[#allocation2 + $0x340] sm:$0xff] %vm771_vm2, %v9431_v7  ;;  %v1082_v56 = vpop.f32.mrb[13].mxu1  ;;  %v2754_v58 = vpack.c.bf16 %v2709_v50, %v2708_v45  ;;  %v2712_v38 = vld [vmem:[#allocation2 + $0x1c0] sm:$0xff] }
 0x232   : > { %952 = vst.msk [vmem:[#allocation2 + $0x308] sm:$0xff] %vm771_vm2, %v893_v13  ;;  %v2753_v23 = vpack.c.bf16 %v2707_v47, %v2706_v2  ;;  %1141 = vst.msk [vmem:[#allocation2 + $0x330] sm:$0xff] %vm771_vm2, %v1082_v56  ;;  %v9432_v60 = vpop.f32.mrb[14].mxu1  ;;  %9752 = vmatpush3.bf16.msra.mxu0 %v10002_v53  ;;  %v2715_v17 = vld [vmem:[#allocation2 + $0x1d8] sm:$0xff] }
 0x233   : > { %1144 = vst.msk [vmem:[#allocation2 + $0x348] sm:$0xff] %vm771_vm2, %v9432_v60  ;;  %v1085_v20 = vpop.f32.mrb[15].mxu1  ;;  %v2713_v25 = vld [vmem:[#allocation2 + $0x1c8] sm:$0xff]  ;;  %v2757_v51 = vpack.c.bf16 %v2715_v17, %v2714_v54 }
 0x234   : > { %9698 = vmatmul.mubr.msk.bf16.vlgmr.msra.gmra.mrb[96].mxu1 %vm771_vm2, %v2753_v23  ;;  %1142 = vst.msk [vmem:[#allocation2 + $0x338] sm:$0xff] %vm771_vm2, %v1085_v20  ;;  %v2756_v43 = vpack.c.bf16 %v2713_v25, %v2712_v38 }
 0x235   : > { %9650 = vmatmul.mubr.msk.bf16.gmra.mrb[104].mxu0 %vm771_vm2, %v2300_v18  ;;  %9701 = vmatprep.mubr.msk.bf16.mxu1 %vm771_vm2, %v2754_v58 }
 0x236   : > { %v9403_v48 = vpop.f32.mrb[16].mxu0  ;;  %9802 = vmatpush3.bf16.msra.mxu1 %v11162_v10 }
 0x237   : > { %958 = vst.msk [vmem:[#allocation2 + $0x480] sm:$0xff] %vm771_vm2, %v9403_v48  ;;  %v906_v14 = vpop.f32.mrb[17].mxu0  ;;  %9803 = vmatprep.subr.bf16.mxu1 %v10001_v35 }
 0x238   : > { %955 = vst.msk [vmem:[#allocation2 + $0x320] sm:$0xff] %vm771_vm2, %v906_v14  ;;  %v9404_v32 = vpop.f32.mrb[18].mxu0  ;;  %v9435_v31 = vpop.f32.mrb[16].mxu1 }
 0x239   : > { %959 = vst.msk [vmem:[#allocation2 + $0x488] sm:$0xff] %vm771_vm2, %v9404_v32  ;;  %v909_v27 = vpop.f32.mrb[19].mxu0  ;;  %1147 = vst.msk [vmem:[#allocation2 + $0x4b0] sm:$0xff] %vm771_vm2, %v9435_v31  ;;  %v1098_v10 = vpop.f32.mrb[17].mxu1 }
 0x23a   : > { %956 = vst.msk [vmem:[#allocation2 + $0x328] sm:$0xff] %vm771_vm2, %v909_v27  ;;  %1145 = vst.msk [vmem:[#allocation2 + $0x350] sm:$0xff] %vm771_vm2, %v1098_v10  ;;  %v9436_v36 = vpop.f32.mrb[18].mxu1  ;;  %9804 = vmatpush3.bf16.msra.mxu1 %v10001_v35 }
 0x23b   : > { %1148 = vst.msk [vmem:[#allocation2 + $0x4b8] sm:$0xff] %vm771_vm2, %v9436_v36  ;;  %v1101_v0 = vpop.f32.mrb[19].mxu1  ;;  %9805 = vmatprep.subr.bf16.mxu1 %v10003_v61 }
 0x23c   : > { %9702 = vmatmul.mubr.msk.bf16.gmra.mrb[100].mxu1 %vm771_vm2, %v2755_v55  ;;  %1146 = vst.msk [vmem:[#allocation2 + $0x358] sm:$0xff] %vm771_vm2, %v1101_v0 }
 0x23d   : > { %9705 = vmatprep.mubr.msk.bf16.mxu1 %vm771_vm2, %v2756_v43 }
 0x23e   : > { %v9407_v29 = vpop.f32.mrb[20].mxu0  ;;  %9806 = vmatpush3.bf16.msra.mxu1 %v10003_v61 }
 0x23f   : > { %962 = vst.msk [vmem:[#allocation2 + $0x4a0] sm:$0xff] %vm771_vm2, %v9407_v29  ;;  %v922_v44 = vpop.f32.mrb[21].mxu0  ;;  %9807 = vmatprep.subr.bf16.mxu1 %v10004_v57 }
 0x240   : > { %960 = vst.msk [vmem:[#allocation2 + $0x490] sm:$0xff] %vm771_vm2, %v922_v44  ;;  %v9408_v46 = vpop.f32.mrb[22].mxu0  ;;  %v9439_v49 = vpop.f32.mrb[20].mxu1 }
 0x241   : > { %963 = vst.msk [vmem:[#allocation2 + $0x4a8] sm:$0xff] %vm771_vm2, %v9408_v46  ;;  %v925_v9 = vpop.f32.mrb[23].mxu0  ;;  %1151 = vst.msk [vmem:[#allocation2 + $0x4d0] sm:$0xff] %vm771_vm2, %v9439_v49  ;;  %v1114_v8 = vpop.f32.mrb[21].mxu1 }
 0x242   : > { %961 = vst.msk [vmem:[#allocation2 + $0x498] sm:$0xff] %vm771_vm2, %v925_v9  ;;  %1149 = vst.msk [vmem:[#allocation2 + $0x4c0] sm:$0xff] %vm771_vm2, %v1114_v8  ;;  %v9440_v41 = vpop.f32.mrb[22].mxu1  ;;  %9808 = vmatpush3.bf16.msra.mxu1 %v10004_v57 }
 0x243   : > { %1152 = vst.msk [vmem:[#allocation2 + $0x4d8] sm:$0xff] %vm771_vm2, %v9440_v41  ;;  %v1117_v15 = vpop.f32.mrb[23].mxu1 }
 0x244   : > { %9706 = vmatmul.mubr.msk.bf16.gmra.mrb[104].mxu1 %vm771_vm2, %v2757_v51  ;;  %1150 = vst.msk [vmem:[#allocation2 + $0x4c8] sm:$0xff] %vm771_vm2, %v1117_v15 }
 0x246   : > { %v9451_v40 = vpop.f32.mrb[24].mxu0 }
 0x247   : > { %1312 = vst.msk [vmem:[#allocation2 + $0x70] sm:$0xff] %vm771_vm2, %v9451_v40  ;;  %v1215_v34 = vpop.f32.mrb[25].mxu0 }
 0x248   : > { %1310 = vst.msk [vmem:[#allocation2 + $0x60] sm:$0xff] %vm771_vm2, %v1215_v34  ;;  %v9452_v11 = vpop.f32.mrb[26].mxu0  ;;  %v9483_v5 = vpop.f32.mrb[24].mxu1 }
 0x249   : > { %1313 = vst.msk [vmem:[#allocation2 + $0x78] sm:$0xff] %vm771_vm2, %v9452_v11  ;;  %v1218_v4 = vpop.f32.mrb[27].mxu0  ;;  %1493 = vst.msk [vmem:[#allocation2 + $0xa0] sm:$0xff] %vm771_vm2, %v9483_v5  ;;  %v1396_v12 = vpop.f32.mrb[25].mxu1 }
 0x24a   : > { %1311 = vst.msk [vmem:[#allocation2 + $0x68] sm:$0xff] %vm771_vm2, %v1218_v4  ;;  %1491 = vst.msk [vmem:[#allocation2 + $0x90] sm:$0xff] %vm771_vm2, %v1396_v12  ;;  %v9484_v16 = vpop.f32.mrb[26].mxu1 }
 0x24b   : > { %1494 = vst.msk [vmem:[#allocation2 + $0xa8] sm:$0xff] %vm771_vm2, %v9484_v16  ;;  %v1399_v37 = vpop.f32.mrb[27].mxu1 }
 0x24c   : > { %1492 = vst.msk [vmem:[#allocation2 + $0x98] sm:$0xff] %vm771_vm2, %v1399_v37 }
 0x24e   : > { %v9455_v62 = vpop.f32.mrb[28].mxu0  ;;  %v2261_v59 = vld [vmem:[#allocation2 + $0x70] sm:$0xff] }
 0x24f   : > { %1316 = vst.msk [vmem:[#allocation2 + $0x1e0] sm:$0xff] %vm771_vm2, %v9455_v62  ;;  %v1231_v39 = vpop.f32.mrb[29].mxu0  ;;  %v2259_v33 = vld [vmem:[#allocation2 + $0x60] sm:$0xff] }
 0x250   : > { %1314 = vst.msk [vmem:[#allocation2 + $0x80] sm:$0xff] %vm771_vm2, %v1231_v39  ;;  %v9456_v3 = vpop.f32.mrb[30].mxu0  ;;  %v9487_v52 = vpop.f32.mrb[28].mxu1  ;;  %v2262_v19 = vld [vmem:[#allocation2 + $0x78] sm:$0xff]  ;;  %v2267_v13 = vld [vmem:[#allocation2 + $0xa0] sm:$0xff] }
 0x251   : > { %1317 = vst.msk [vmem:[#allocation2 + $0x1e8] sm:$0xff] %vm771_vm2, %v9456_v3  ;;  %v1234_v28 = vpop.f32.mrb[31].mxu0  ;;  %v2260_v63 = vld [vmem:[#allocation2 + $0x68] sm:$0xff]  ;;  %1497 = vst.msk [vmem:[#allocation2 + $0x210] sm:$0xff] %vm771_vm2, %v9487_v52  ;;  %v1412_v42 = vpop.f32.mrb[29].mxu1  ;;  %v2302_v6 = vpack.c.bf16 %v2262_v19, %v2261_v59  ;;  %v2265_v50 = vld [vmem:[#allocation2 + $0x90] sm:$0xff] }
 0x252   : > { %1315 = vst.msk [vmem:[#allocation2 + $0x88] sm:$0xff] %vm771_vm2, %v1234_v28  ;;  %v2301_v24 = vpack.c.bf16 %v2260_v63, %v2259_v33  ;;  %1495 = vst.msk [vmem:[#allocation2 + $0xb0] sm:$0xff] %vm771_vm2, %v1412_v42  ;;  %v9488_v22 = vpop.f32.mrb[30].mxu1  ;;  %v2268_v53 = vld [vmem:[#allocation2 + $0xa8] sm:$0xff] }
 0x253   : > { %1498 = vst.msk [vmem:[#allocation2 + $0x218] sm:$0xff] %vm771_vm2, %v9488_v22  ;;  %v1415_v7 = vpop.f32.mrb[31].mxu1  ;;  %v2266_v45 = vld [vmem:[#allocation2 + $0x98] sm:$0xff]  ;;  %v2305_v32 = vpack.c.bf16 %v2268_v53, %v2267_v13 }
 0x254   : > { %9653 = vmatprep.mubr.msk.bf16.mxu0 %vm771_vm2, %v2301_v24  ;;  %1496 = vst.msk [vmem:[#allocation2 + $0xb8] sm:$0xff] %vm771_vm2, %v1415_v7  ;;  %v2304_v26 = vpack.c.bf16 %v2266_v45, %v2265_v50 }
 0x255   : > { %9654 = vmatmul.mubr.msk.bf16.gmra.mrb[108].mxu0 %vm771_vm2, %v2302_v6 }
 0x256   : > { %v9459_v30 = vpop.f32.mrb[32].mxu0  ;;  %v2716_v47 = vld [vmem:[#allocation2 + $0x1e0] sm:$0xff] }
 0x257   : > { %1320 = vst.msk [vmem:[#allocation2 + $0x200] sm:$0xff] %vm771_vm2, %v9459_v30  ;;  %v1247_v1 = vpop.f32.mrb[33].mxu0  ;;  %v2263_v58 = vld [vmem:[#allocation2 + $0x80] sm:$0xff] }
 0x258   : > { %1318 = vst.msk [vmem:[#allocation2 + $0x1f0] sm:$0xff] %vm771_vm2, %v1247_v1  ;;  %v9460_v2 = vpop.f32.mrb[34].mxu0  ;;  %v2717_v56 = vld [vmem:[#allocation2 + $0x1e8] sm:$0xff]  ;;  %v9491_v23 = vpop.f32.mrb[32].mxu1  ;;  %v2722_v41 = vld [vmem:[#allocation2 + $0x210] sm:$0xff] }
 0x259   : > { %1321 = vst.msk [vmem:[#allocation2 + $0x208] sm:$0xff] %vm771_vm2, %v9460_v2  ;;  %v1250_v60 = vpop.f32.mrb[35].mxu0  ;;  %v2758_v18 = vpack.c.bf16 %v2717_v56, %v2716_v47  ;;  %v2264_v20 = vld [vmem:[#allocation2 + $0x88] sm:$0xff]  ;;  %1501 = vst.msk [vmem:[#allocation2 + $0x230] sm:$0xff] %vm771_vm2, %v9491_v23  ;;  %v1428_v35 = vpop.f32.mrb[33].mxu1  ;;  %v2269_v27 = vld [vmem:[#allocation2 + $0xb0] sm:$0xff] }
 0x25a   : > { %1319 = vst.msk [vmem:[#allocation2 + $0x1f8] sm:$0xff] %vm771_vm2, %v1250_v60  ;;  %v2303_v48 = vpack.c.bf16 %v2264_v20, %v2263_v58  ;;  %1499 = vst.msk [vmem:[#allocation2 + $0x220] sm:$0xff] %vm771_vm2, %v1428_v35  ;;  %v9492_v14 = vpop.f32.mrb[34].mxu1  ;;  %v2723_v15 = vld [vmem:[#allocation2 + $0x218] sm:$0xff] }
 0x25b   : > { %9709 = vmatprep.mubr.msk.bf16.mxu1 %vm771_vm2, %v2758_v18  ;;  %1502 = vst.msk [vmem:[#allocation2 + $0x238] sm:$0xff] %vm771_vm2, %v9492_v14  ;;  %v1431_v21 = vpop.f32.mrb[35].mxu1  ;;  %v2270_v10 = vld [vmem:[#allocation2 + $0xb8] sm:$0xff]  ;;  %v2761_v16 = vpack.c.bf16 %v2723_v15, %v2722_v41 }
 0x25c   : > { %9657 = vmatprep.mubr.msk.bf16.mxu0 %vm771_vm2, %v2303_v48  ;;  %1500 = vst.msk [vmem:[#allocation2 + $0x228] sm:$0xff] %vm771_vm2, %v1431_v21  ;;  %v2306_v46 = vpack.c.bf16 %v2270_v10, %v2269_v27 }
 0x25d   : > { %9658 = vmatmul.mubr.msk.bf16.gmra.mrb[112].mxu0 %vm771_vm2, %v2304_v26 }
 0x25e   : > { %v9463_v31 = vpop.f32.mrb[36].mxu0  ;;  %9661 = vmatprep.mubr.msk.bf16.mxu0 %vm771_vm2, %v2305_v32  ;;  %v2720_v54 = vld [vmem:[#allocation2 + $0x200] sm:$0xff] }
 0x25f   : > { %1324 = vst.msk [vmem:[#allocation2 + $0x370] sm:$0xff] %vm771_vm2, %v9463_v31  ;;  %v1263_v38 = vpop.f32.mrb[37].mxu0  ;;  %v2718_v43 = vld [vmem:[#allocation2 + $0x1f0] sm:$0xff] }
 0x260   : > { %1322 = vst.msk [vmem:[#allocation2 + $0x360] sm:$0xff] %vm771_vm2, %v1263_v38  ;;  %v9464_v25 = vpop.f32.mrb[38].mxu0  ;;  %v9495_v61 = vpop.f32.mrb[36].mxu1  ;;  %v2721_v55 = vld [vmem:[#allocation2 + $0x208] sm:$0xff]  ;;  %v2726_v52 = vld [vmem:[#allocation2 + $0x230] sm:$0xff] }
 0x261   : > { %1325 = vst.msk [vmem:[#allocation2 + $0x378] sm:$0xff] %vm771_vm2, %v9464_v25  ;;  %v1266_v36 = vpop.f32.mrb[39].mxu0  ;;  %v2719_v0 = vld [vmem:[#allocation2 + $0x1f8] sm:$0xff]  ;;  %1505 = vst.msk [vmem:[#allocation2 + $0x3a0] sm:$0xff] %vm771_vm2, %v9495_v61  ;;  %v1444_v29 = vpop.f32.mrb[37].mxu1  ;;  %v2760_v49 = vpack.c.bf16 %v2721_v55, %v2720_v54  ;;  %v2724_v11 = vld [vmem:[#allocation2 + $0x220] sm:$0xff] }
 0x262   : > { %1323 = vst.msk [vmem:[#allocation2 + $0x368] sm:$0xff] %vm771_vm2, %v1266_v36  ;;  %v2759_v44 = vpack.c.bf16 %v2719_v0, %v2718_v43  ;;  %1503 = vst.msk [vmem:[#allocation2 + $0x390] sm:$0xff] %vm771_vm2, %v1444_v29  ;;  %v9496_v17 = vpop.f32.mrb[38].mxu1  ;;  %v2727_v19 = vld [vmem:[#allocation2 + $0x238] sm:$0xff] }
 0x263   : > { %1506 = vst.msk [vmem:[#allocation2 + $0x3a8] sm:$0xff] %vm771_vm2, %v9496_v17  ;;  %v1447_v9 = vpop.f32.mrb[39].mxu1  ;;  %v2725_v5 = vld [vmem:[#allocation2 + $0x228] sm:$0xff]  ;;  %v2763_v24 = vpack.c.bf16 %v2727_v19, %v2726_v52 }
 0x264   : > { %9710 = vmatmul.mubr.msk.bf16.gmra.mrb[108].mxu1 %vm771_vm2, %v2759_v44  ;;  %1504 = vst.msk [vmem:[#allocation2 + $0x398] sm:$0xff] %vm771_vm2, %v1447_v9  ;;  %v2762_v62 = vpack.c.bf16 %v2725_v5, %v2724_v11 }
 0x265   : > { %9662 = vmatmul.mubr.msk.bf16.gmra.mrb[116].mxu0 %vm771_vm2, %v2306_v46  ;;  %9713 = vmatprep.mubr.msk.bf16.mxu1 %vm771_vm2, %v2760_v49 }
 0x266   : > { %v9467_v8 = vpop.f32.mrb[40].mxu0 }
 0x267   : > { %1328 = vst.msk [vmem:[#allocation2 + $0x4e0] sm:$0xff] %vm771_vm2, %v9467_v8  ;;  %v1279_v51 = vpop.f32.mrb[41].mxu0 }
 0x268   : > { %1326 = vst.msk [vmem:[#allocation2 + $0x380] sm:$0xff] %vm771_vm2, %v1279_v51  ;;  %v9468_v40 = vpop.f32.mrb[42].mxu0  ;;  %v9499_v34 = vpop.f32.mrb[40].mxu1 }
 0x269   : > { %1329 = vst.msk [vmem:[#allocation2 + $0x4e8] sm:$0xff] %vm771_vm2, %v9468_v40  ;;  %v1282_v4 = vpop.f32.mrb[43].mxu0  ;;  %1509 = vst.msk [vmem:[#allocation2 + $0x510] sm:$0xff] %vm771_vm2, %v9499_v34  ;;  %v1460_v12 = vpop.f32.mrb[41].mxu1 }
 0x26a   : > { %1327 = vst.msk [vmem:[#allocation2 + $0x388] sm:$0xff] %vm771_vm2, %v1282_v4  ;;  %1507 = vst.msk [vmem:[#allocation2 + $0x3b0] sm:$0xff] %vm771_vm2, %v1460_v12  ;;  %v9500_v37 = vpop.f32.mrb[42].mxu1 }
 0x26b   : > { %1510 = vst.msk [vmem:[#allocation2 + $0x518] sm:$0xff] %vm771_vm2, %v9500_v37  ;;  %v1463_v57 = vpop.f32.mrb[43].mxu1 }
 0x26c   : > { %9714 = vmatmul.mubr.msk.bf16.gmra.mrb[112].mxu1 %vm771_vm2, %v2761_v16  ;;  %1508 = vst.msk [vmem:[#allocation2 + $0x3b8] sm:$0xff] %vm771_vm2, %v1463_v57 }
 0x26d   : > { %9717 = vmatprep.mubr.msk.bf16.mxu1 %vm771_vm2, %v2762_v62 }
 0x26e   : > { %v9471_v39 = vpop.f32.mrb[44].mxu0 }
 0x26f   : > { %1332 = vst.msk [vmem:[#allocation2 + $0x500] sm:$0xff] %vm771_vm2, %v9471_v39  ;;  %v1295_v3 = vpop.f32.mrb[45].mxu0 }
 0x270   : > { %1330 = vst.msk [vmem:[#allocation2 + $0x4f0] sm:$0xff] %vm771_vm2, %v1295_v3  ;;  %v9472_v28 = vpop.f32.mrb[46].mxu0  ;;  %v9503_v33 = vpop.f32.mrb[44].mxu1 }
 0x271   : > { %1333 = vst.msk [vmem:[#allocation2 + $0x508] sm:$0xff] %vm771_vm2, %v9472_v28  ;;  %v1298_v63 = vpop.f32.mrb[47].mxu0  ;;  %1513 = vst.msk [vmem:[#allocation2 + $0x530] sm:$0xff] %vm771_vm2, %v9503_v33  ;;  %v1476_v42 = vpop.f32.mrb[45].mxu1 }
 0x272   : > { %1331 = vst.msk [vmem:[#allocation2 + $0x4f8] sm:$0xff] %vm771_vm2, %v1298_v63  ;;  %1511 = vst.msk [vmem:[#allocation2 + $0x520] sm:$0xff] %vm771_vm2, %v1476_v42  ;;  %v9504_v59 = vpop.f32.mrb[46].mxu1 }
 0x273   : > { %1514 = vst.msk [vmem:[#allocation2 + $0x538] sm:$0xff] %vm771_vm2, %v9504_v59  ;;  %v1479_v22 = vpop.f32.mrb[47].mxu1 }
 0x274   : > { %9718 = vmatmul.mubr.msk.bf16.gmra.mrb[116].mxu1 %vm771_vm2, %v2763_v24  ;;  %1512 = vst.msk [vmem:[#allocation2 + $0x528] sm:$0xff] %vm771_vm2, %v1479_v22 }
 0x276   : > { %v9515_v6 = vpop.f32.mrb[48].mxu0 }
 0x277   : > { %1682 = vst.msk [vmem:[#allocation2 + $0xd0] sm:$0xff] %vm771_vm2, %v9515_v6  ;;  %v1585_v7 = vpop.f32.mrb[49].mxu0 }
 0x278   : > { %1680 = vst.msk [vmem:[#allocation2 + $0xc0] sm:$0xff] %vm771_vm2, %v1585_v7  ;;  %v9516_v30 = vpop.f32.mrb[50].mxu0  ;;  %v9547_v1 = vpop.f32.mrb[48].mxu1 }
 0x279   : > { %1683 = vst.msk [vmem:[#allocation2 + $0xd8] sm:$0xff] %vm771_vm2, %v9516_v30  ;;  %v1588_v50 = vpop.f32.mrb[51].mxu0  ;;  %1863 = vst.msk [vmem:[#allocation2 + $0x100] sm:$0xff] %vm771_vm2, %v9547_v1  ;;  %v1766_v13 = vpop.f32.mrb[49].mxu1 }
 0x27a   : > { %1681 = vst.msk [vmem:[#allocation2 + $0xc8] sm:$0xff] %vm771_vm2, %v1588_v50  ;;  %1861 = vst.msk [vmem:[#allocation2 + $0xf0] sm:$0xff] %vm771_vm2, %v1766_v13  ;;  %v9548_v2 = vpop.f32.mrb[50].mxu1 }
 0x27b   : > { %1864 = vst.msk [vmem:[#allocation2 + $0x108] sm:$0xff] %vm771_vm2, %v9548_v2  ;;  %v1769_v47 = vpop.f32.mrb[51].mxu1 }
 0x27c   : > { %1862 = vst.msk [vmem:[#allocation2 + $0xf8] sm:$0xff] %vm771_vm2, %v1769_v47 }
 0x27e   : > { %v9519_v56 = vpop.f32.mrb[52].mxu0  ;;  %v2273_v14 = vld [vmem:[#allocation2 + $0xd0] sm:$0xff] }
 0x27f   : > { %1686 = vst.msk [vmem:[#allocation2 + $0x240] sm:$0xff] %vm771_vm2, %v9519_v56  ;;  %v1601_v23 = vpop.f32.mrb[53].mxu0  ;;  %v2271_v20 = vld [vmem:[#allocation2 + $0xc0] sm:$0xff] }
 0x280   : > { %1684 = vst.msk [vmem:[#allocation2 + $0xe0] sm:$0xff] %vm771_vm2, %v1601_v23  ;;  %v9520_v45 = vpop.f32.mrb[54].mxu0  ;;  %v9551_v60 = vpop.f32.mrb[52].mxu1  ;;  %v2274_v18 = vld [vmem:[#allocation2 + $0xd8] sm:$0xff]  ;;  %v2279_v61 = vld [vmem:[#allocation2 + $0x100] sm:$0xff] }
 0x281   : > { %1687 = vst.msk [vmem:[#allocation2 + $0x248] sm:$0xff] %vm771_vm2, %v9520_v45  ;;  %v1604_v58 = vpop.f32.mrb[55].mxu0  ;;  %v2272_v35 = vld [vmem:[#allocation2 + $0xc8] sm:$0xff]  ;;  %1867 = vst.msk [vmem:[#allocation2 + $0x270] sm:$0xff] %vm771_vm2, %v9551_v60  ;;  %v1782_v53 = vpop.f32.mrb[53].mxu1  ;;  %v2308_v21 = vpack.c.bf16 %v2274_v18, %v2273_v14  ;;  %v2277_v25 = vld [vmem:[#allocation2 + $0xf0] sm:$0xff] }
 0x282   : > { %1685 = vst.msk [vmem:[#allocation2 + $0xe8] sm:$0xff] %vm771_vm2, %v1604_v58  ;;  %v2307_v48 = vpack.c.bf16 %v2272_v35, %v2271_v20  ;;  %1865 = vst.msk [vmem:[#allocation2 + $0x110] sm:$0xff] %vm771_vm2, %v1782_v53  ;;  %v9552_v26 = vpop.f32.mrb[54].mxu1  ;;  %v2280_v46 = vld [vmem:[#allocation2 + $0x108] sm:$0xff] }
 0x283   : > { %1868 = vst.msk [vmem:[#allocation2 + $0x278] sm:$0xff] %vm771_vm2, %v9552_v26  ;;  %v1785_v32 = vpop.f32.mrb[55].mxu1  ;;  %v2278_v43 = vld [vmem:[#allocation2 + $0xf8] sm:$0xff]  ;;  %v2311_v41 = vpack.c.bf16 %v2280_v46, %v2279_v61 }
 0x284   : > { %9665 = vmatprep.mubr.msk.bf16.mxu0 %vm771_vm2, %v2307_v48  ;;  %1866 = vst.msk [vmem:[#allocation2 + $0x118] sm:$0xff] %vm771_vm2, %v1785_v32  ;;  %v2310_v8 = vpack.c.bf16 %v2278_v43, %v2277_v25 }
 0x285   : > { %9666 = vmatmul.mubr.msk.bf16.gmra.mrb[120].mxu0 %vm771_vm2, %v2308_v21 }
 0x286   : > { %v9523_v31 = vpop.f32.mrb[56].mxu0  ;;  %v2728_v10 = vld [vmem:[#allocation2 + $0x240] sm:$0xff] }
 0x287   : > { %1690 = vst.msk [vmem:[#allocation2 + $0x260] sm:$0xff] %vm771_vm2, %v9523_v31  ;;  %v1617_v38 = vpop.f32.mrb[57].mxu0  ;;  %v2275_v44 = vld [vmem:[#allocation2 + $0xe0] sm:$0xff] }
 0x288   : > { %1688 = vst.msk [vmem:[#allocation2 + $0x250] sm:$0xff] %vm771_vm2, %v1617_v38  ;;  %v9524_v27 = vpop.f32.mrb[58].mxu0  ;;  %v2729_v55 = vld [vmem:[#allocation2 + $0x248] sm:$0xff]  ;;  %v9555_v36 = vpop.f32.mrb[56].mxu1  ;;  %v2734_v24 = vld [vmem:[#allocation2 + $0x270] sm:$0xff] }
 0x289   : > { %1691 = vst.msk [vmem:[#allocation2 + $0x268] sm:$0xff] %vm771_vm2, %v9524_v27  ;;  %v1620_v0 = vpop.f32.mrb[59].mxu0  ;;  %v2764_v29 = vpack.c.bf16 %v2729_v55, %v2728_v10  ;;  %v2276_v54 = vld [vmem:[#allocation2 + $0xe8] sm:$0xff]  ;;  %1871 = vst.msk [vmem:[#allocation2 + $0x290] sm:$0xff] %vm771_vm2, %v9555_v36  ;;  %v1798_v17 = vpop.f32.mrb[57].mxu1  ;;  %v2281_v5 = vld [vmem:[#allocation2 + $0x110] sm:$0xff] }
 0x28a   : > { %1689 = vst.msk [vmem:[#allocation2 + $0x258] sm:$0xff] %vm771_vm2, %v1620_v0  ;;  %v2309_v49 = vpack.c.bf16 %v2276_v54, %v2275_v44  ;;  %1869 = vst.msk [vmem:[#allocation2 + $0x280] sm:$0xff] %vm771_vm2, %v1798_v17  ;;  %v9556_v9 = vpop.f32.mrb[58].mxu1  ;;  %v2735_v59 = vld [vmem:[#allocation2 + $0x278] sm:$0xff] }
 0x28b   : > { %9721 = vmatprep.mubr.msk.bf16.mxu1 %vm771_vm2, %v2764_v29  ;;  %1872 = vst.msk [vmem:[#allocation2 + $0x298] sm:$0xff] %vm771_vm2, %v9556_v9  ;;  %v1801_v51 = vpop.f32.mrb[59].mxu1  ;;  %v2282_v4 = vld [vmem:[#allocation2 + $0x118] sm:$0xff]  ;;  %v2767_v13 = vpack.c.bf16 %v2735_v59, %v2734_v24 }
 0x28c   : > { %9669 = vmatprep.mubr.msk.bf16.mxu0 %vm771_vm2, %v2309_v49  ;;  %1870 = vst.msk [vmem:[#allocation2 + $0x288] sm:$0xff] %vm771_vm2, %v1801_v51  ;;  %v2312_v19 = vpack.c.bf16 %v2282_v4, %v2281_v5 }
 0x28d   : > { %9670 = vmatmul.mubr.msk.bf16.gmra.mrb[124].mxu0 %vm771_vm2, %v2310_v8 }
 0x28e   : > { %v9527_v15 = vpop.f32.mrb[60].mxu0  ;;  %9673 = vmatprep.mubr.msk.bf16.mxu0 %vm771_vm2, %v2311_v41  ;;  %v2732_v3 = vld [vmem:[#allocation2 + $0x260] sm:$0xff] }
 0x28f   : > { %1694 = vst.msk [vmem:[#allocation2 + $0x3d0] sm:$0xff] %vm771_vm2, %v9527_v15  ;;  %v1633_v40 = vpop.f32.mrb[61].mxu0  ;;  %v2730_v37 = vld [vmem:[#allocation2 + $0x250] sm:$0xff] }
 0x290   : > { %1692 = vst.msk [vmem:[#allocation2 + $0x3c0] sm:$0xff] %vm771_vm2, %v1633_v40  ;;  %v9528_v34 = vpop.f32.mrb[62].mxu0  ;;  %v9559_v11 = vpop.f32.mrb[60].mxu1  ;;  %v2733_v12 = vld [vmem:[#allocation2 + $0x268] sm:$0xff]  ;;  %v2738_v60 = vld [vmem:[#allocation2 + $0x290] sm:$0xff] }
 0x291   : > { %1695 = vst.msk [vmem:[#allocation2 + $0x3d8] sm:$0xff] %vm771_vm2, %v9528_v34  ;;  %v1636_v16 = vpop.f32.mrb[63].mxu0  ;;  %v2731_v62 = vld [vmem:[#allocation2 + $0x258] sm:$0xff]  ;;  %1875 = vst.msk [vmem:[#allocation2 + $0x400] sm:$0xff] %vm771_vm2, %v9559_v11  ;;  %v1814_v57 = vpop.f32.mrb[61].mxu1  ;;  %v2766_v28 = vpack.c.bf16 %v2733_v12, %v2732_v3  ;;  %v2736_v7 = vld [vmem:[#allocation2 + $0x280] sm:$0xff] }
 0x292   : > { %1693 = vst.msk [vmem:[#allocation2 + $0x3c8] sm:$0xff] %vm771_vm2, %v1636_v16  ;;  %v2765_v39 = vpack.c.bf16 %v2731_v62, %v2730_v37  ;;  %1873 = vst.msk [vmem:[#allocation2 + $0x3f0] sm:$0xff] %vm771_vm2, %v1814_v57  ;;  %v9560_v52 = vpop.f32.mrb[62].mxu1  ;;  %v2739_v18 = vld [vmem:[#allocation2 + $0x298] sm:$0xff] }
 0x293   : > { %1876 = vst.msk [vmem:[#allocation2 + $0x408] sm:$0xff] %vm771_vm2, %v9560_v52  ;;  %v1817_v33 = vpop.f32.mrb[63].mxu1  ;;  %v2737_v30 = vld [vmem:[#allocation2 + $0x288] sm:$0xff]  ;;  %v2769_v48 = vpack.c.bf16 %v2739_v18, %v2738_v60 }
 0x294   : > { %9722 = vmatmul.mubr.msk.bf16.gmra.mrb[120].mxu1 %vm771_vm2, %v2765_v39  ;;  %1874 = vst.msk [vmem:[#allocation2 + $0x3f8] sm:$0xff] %vm771_vm2, %v1817_v33  ;;  %v2768_v47 = vpack.c.bf16 %v2737_v30, %v2736_v7 }
 0x295   : > { %9674 = vmatmul.mubr.msk.bf16.gmra.mrb[128].mxu0 %vm771_vm2, %v2312_v19  ;;  %9725 = vmatprep.mubr.msk.bf16.mxu1 %vm771_vm2, %v2766_v28 }
 0x296   : > { %v9531_v63 = vpop.f32.mrb[64].mxu0 }
 0x297   : > { %1698 = vst.msk [vmem:[#allocation2 + $0x540] sm:$0xff] %vm771_vm2, %v9531_v63  ;;  %v1649_v42 = vpop.f32.mrb[65].mxu0 }
 0x298   : > { %1696 = vst.msk [vmem:[#allocation2 + $0x3e0] sm:$0xff] %vm771_vm2, %v1649_v42  ;;  %v9532_v22 = vpop.f32.mrb[66].mxu0  ;;  %v9563_v6 = vpop.f32.mrb[64].mxu1 }
 0x299   : > { %1699 = vst.msk [vmem:[#allocation2 + $0x548] sm:$0xff] %vm771_vm2, %v9532_v22  ;;  %v1652_v1 = vpop.f32.mrb[67].mxu0  ;;  %1879 = vst.msk [vmem:[#allocation2 + $0x570] sm:$0xff] %vm771_vm2, %v9563_v6  ;;  %v1830_v50 = vpop.f32.mrb[65].mxu1 }
 0x29a   : > { %1697 = vst.msk [vmem:[#allocation2 + $0x3e8] sm:$0xff] %vm771_vm2, %v1652_v1  ;;  %1877 = vst.msk [vmem:[#allocation2 + $0x410] sm:$0xff] %vm771_vm2, %v1830_v50  ;;  %v9564_v2 = vpop.f32.mrb[66].mxu1 }
 0x29b   : > { %1880 = vst.msk [vmem:[#allocation2 + $0x578] sm:$0xff] %vm771_vm2, %v9564_v2  ;;  %v1833_v56 = vpop.f32.mrb[67].mxu1 }
 0x29c   : > { %9726 = vmatmul.mubr.msk.bf16.gmra.mrb[124].mxu1 %vm771_vm2, %v2767_v13  ;;  %1878 = vst.msk [vmem:[#allocation2 + $0x418] sm:$0xff] %vm771_vm2, %v1833_v56  ;;  %v3163_v56 = vld [vmem:[#allocation2 + $0x308] sm:$0xff] }
 0x29d   : > { %9729 = vmatprep.mubr.msk.bf16.mxu1 %vm771_vm2, %v2768_v47 }
 0x29e   : > { %v9535_v23 = vpop.f32.mrb[68].mxu0 }
 0x29f   : > { %1702 = vst.msk [vmem:[#allocation2 + $0x560] sm:$0xff] %vm771_vm2, %v9535_v23  ;;  %v1665_v45 = vpop.f32.mrb[69].mxu0 }
 0x2a0   : > { %1700 = vst.msk [vmem:[#allocation2 + $0x550] sm:$0xff] %vm771_vm2, %v1665_v45  ;;  %v9536_v58 = vpop.f32.mrb[70].mxu0  ;;  %v9567_v20 = vpop.f32.mrb[68].mxu1 }
 0x2a1   : > { %1703 = vst.msk [vmem:[#allocation2 + $0x568] sm:$0xff] %vm771_vm2, %v9536_v58  ;;  %v1668_v35 = vpop.f32.mrb[71].mxu0  ;;  %1883 = vst.msk [vmem:[#allocation2 + $0x590] sm:$0xff] %vm771_vm2, %v9567_v20  ;;  %v1846_v53 = vpop.f32.mrb[69].mxu1 }
 0x2a2   : > { %1701 = vst.msk [vmem:[#allocation2 + $0x558] sm:$0xff] %vm771_vm2, %v1668_v35  ;;  %1881 = vst.msk [vmem:[#allocation2 + $0x580] sm:$0xff] %vm771_vm2, %v1846_v53  ;;  %v9568_v14 = vpop.f32.mrb[70].mxu1  ;;  %v3162_v35 = vld [vmem:[#allocation2 + $0x300] sm:$0xff] }
 0x2a3   : > { %1884 = vst.msk [vmem:[#allocation2 + $0x598] sm:$0xff] %vm771_vm2, %v9568_v14  ;;  %v1849_v26 = vpop.f32.mrb[71].mxu1 }
 0x2a4   : > { %9730 = vmatmul.mubr.msk.bf16.gmra.mrb[128].mxu1 %vm771_vm2, %v2769_v48  ;;  %1882 = vst.msk [vmem:[#allocation2 + $0x588] sm:$0xff] %vm771_vm2, %v1849_v26  ;;  %v3210_v48 = vpack.c.bf16 %v3163_v56, %v3162_v35  ;;  %v3177_v56 = vld [vmem:[#allocation2 + $0x378] sm:$0xff] }
 0x2a6   : > { %v9579_v21 = vpop.f32.mrb[72].mxu0 }
 0x2a7   : > { %2052 = vst.msk [vmem:[#allocation2 + $0x130] sm:$0xff] %vm771_vm2, %v9579_v21  ;;  %v1955_v32 = vpop.f32.mrb[73].mxu0 }
 0x2a8   : > { %2050 = vst.msk [vmem:[#allocation2 + $0x120] sm:$0xff] %vm771_vm2, %v1955_v32  ;;  %v9580_v31 = vpop.f32.mrb[74].mxu0  ;;  %v9611_v38 = vpop.f32.mrb[72].mxu1 }
 0x2a9   : > { %2053 = vst.msk [vmem:[#allocation2 + $0x138] sm:$0xff] %vm771_vm2, %v9580_v31  ;;  %v1958_v25 = vpop.f32.mrb[75].mxu0  ;;  %2225 = vst.msk [vmem:[#allocation2 + $0x160] sm:$0xff] %vm771_vm2, %v9611_v38  ;;  %v2128_v61 = vpop.f32.mrb[73].mxu1 }
 0x2aa   : > { %2051 = vst.msk [vmem:[#allocation2 + $0x128] sm:$0xff] %vm771_vm2, %v1958_v25  ;;  %2223 = vst.msk [vmem:[#allocation2 + $0x150] sm:$0xff] %vm771_vm2, %v2128_v61  ;;  %v9612_v27 = vpop.f32.mrb[74].mxu1  ;;  %v3165_v25 = vld [vmem:[#allocation2 + $0x318] sm:$0xff] }
 0x2ab   : > { %2226 = vst.msk [vmem:[#allocation2 + $0x168] sm:$0xff] %vm771_vm2, %v9612_v27  ;;  %v2131_v10 = vpop.f32.mrb[75].mxu1 }
 0x2ac   : > { %2224 = vst.msk [vmem:[#allocation2 + $0x158] sm:$0xff] %vm771_vm2, %v2131_v10  ;;  %v3167_v10 = vld [vmem:[#allocation2 + $0x328] sm:$0xff] }
 0x2ae   : > { %v9583_v55 = vpop.f32.mrb[76].mxu0  ;;  %v2285_v9 = vld [vmem:[#allocation2 + $0x130] sm:$0xff] }
 0x2af   : > { %2056 = vst.msk [vmem:[#allocation2 + $0x2a0] sm:$0xff] %vm771_vm2, %v9583_v55  ;;  %v1971_v36 = vpop.f32.mrb[77].mxu0  ;;  %v2283_v54 = vld [vmem:[#allocation2 + $0x120] sm:$0xff] }
 0x2b0   : > { %2054 = vst.msk [vmem:[#allocation2 + $0x140] sm:$0xff] %vm771_vm2, %v1971_v36  ;;  %v9584_v43 = vpop.f32.mrb[78].mxu0  ;;  %v9615_v0 = vpop.f32.mrb[76].mxu1  ;;  %v2286_v29 = vld [vmem:[#allocation2 + $0x138] sm:$0xff]  ;;  %v2291_v11 = vld [vmem:[#allocation2 + $0x160] sm:$0xff] }
 0x2b1   : > { %2057 = vst.msk [vmem:[#allocation2 + $0x2a8] sm:$0xff] %vm771_vm2, %v9584_v43  ;;  %v1974_v44 = vpop.f32.mrb[79].mxu0  ;;  %v2284_v17 = vld [vmem:[#allocation2 + $0x128] sm:$0xff]  ;;  %2229 = vst.msk [vmem:[#allocation2 + $0x2d0] sm:$0xff] %vm771_vm2, %v9615_v0  ;;  %v2144_v46 = vpop.f32.mrb[77].mxu1  ;;  %v2314_v51 = vpack.c.bf16 %v2286_v29, %v2285_v9  ;;  %v2289_v34 = vld [vmem:[#allocation2 + $0x150] sm:$0xff] }
 0x2b2   : > { %2055 = vst.msk [vmem:[#allocation2 + $0x148] sm:$0xff] %vm771_vm2, %v1974_v44  ;;  %v2313_v49 = vpack.c.bf16 %v2284_v17, %v2283_v54  ;;  %2227 = vst.msk [vmem:[#allocation2 + $0x170] sm:$0xff] %vm771_vm2, %v2144_v46  ;;  %v9616_v8 = vpop.f32.mrb[78].mxu1  ;;  %v2292_v52 = vld [vmem:[#allocation2 + $0x168] sm:$0xff]  ;;  %v3164_v29 = vld [vmem:[#allocation2 + $0x310] sm:$0xff] }
 0x2b3   : > { %2230 = vst.msk [vmem:[#allocation2 + $0x2d8] sm:$0xff] %vm771_vm2, %v9616_v8  ;;  %v2147_v41 = vpop.f32.mrb[79].mxu1  ;;  %v2290_v16 = vld [vmem:[#allocation2 + $0x158] sm:$0xff]  ;;  %v2317_v24 = vpack.c.bf16 %v2292_v52, %v2291_v11  ;;  %v3211_v54 = vpack.c.bf16 %v3165_v25, %v3164_v29  ;;  %v3166_v17 = vld [vmem:[#allocation2 + $0x320] sm:$0xff]  ;;  %v3621_v11 = vld [vmem:[#allocation2 + $0x488] sm:$0xff] }
 0x2b4   : > { %9677 = vmatprep.mubr.msk.bf16.mxu0 %vm771_vm2, %v2313_v49  ;;  %2228 = vst.msk [vmem:[#allocation2 + $0x178] sm:$0xff] %vm771_vm2, %v2147_v41  ;;  %v2316_v63 = vpack.c.bf16 %v2290_v16, %v2289_v34  ;;  %v3212_v49 = vpack.c.bf16 %v3167_v10, %v3166_v17  ;;  %v3169_v34 = vld [vmem:[#allocation2 + $0x338] sm:$0xff]  ;;  %v3171_v16 = vld [vmem:[#allocation2 + $0x348] sm:$0xff] }
 0x2b5   : > { %9678 = vmatmul.mubr.msk.bf16.gmra.mrb[132].mxu0 %vm771_vm2, %v2314_v51  ;;  %v3183_v25 = vld [vmem:[#allocation2 + $0x3a8] sm:$0xff]  ;;  %v3185_v29 = vld [vmem:[#allocation2 + $0x3b8] sm:$0xff] }
 0x2b6   : > { %v9587_v15 = vpop.f32.mrb[80].mxu0  ;;  %v2740_v4 = vld [vmem:[#allocation2 + $0x2a0] sm:$0xff]  ;;  %v3187_v17 = vld [vmem:[#allocation2 + $0x3c8] sm:$0xff] }
 0x2b7   : > { %2060 = vst.msk [vmem:[#allocation2 + $0x2c0] sm:$0xff] %vm771_vm2, %v9587_v15  ;;  %v1987_v40 = vpop.f32.mrb[81].mxu0  ;;  %v2287_v39 = vld [vmem:[#allocation2 + $0x140] sm:$0xff] }
 0x2b8   : > { %2058 = vst.msk [vmem:[#allocation2 + $0x2b0] sm:$0xff] %vm771_vm2, %v1987_v40  ;;  %v9588_v5 = vpop.f32.mrb[82].mxu0  ;;  %v2741_v12 = vld [vmem:[#allocation2 + $0x2a8] sm:$0xff]  ;;  %v9619_v37 = vpop.f32.mrb[80].mxu1  ;;  %v2746_v32 = vld [vmem:[#allocation2 + $0x2d0] sm:$0xff] }
 0x2b9   : > { %2061 = vst.msk [vmem:[#allocation2 + $0x2c8] sm:$0xff] %vm771_vm2, %v9588_v5  ;;  %v1990_v62 = vpop.f32.mrb[83].mxu0  ;;  %v2770_v57 = vpack.c.bf16 %v2741_v12, %v2740_v4  ;;  %v2288_v3 = vld [vmem:[#allocation2 + $0x148] sm:$0xff]  ;;  %2233 = vst.msk [vmem:[#allocation2 + $0x2f0] sm:$0xff] %vm771_vm2, %v9619_v37  ;;  %v2160_v19 = vpop.f32.mrb[81].mxu1  ;;  %v2293_v30 = vld [vmem:[#allocation2 + $0x170] sm:$0xff] }
 0x2ba   : > { %2059 = vst.msk [vmem:[#allocation2 + $0x2b8] sm:$0xff] %vm771_vm2, %v1990_v62  ;;  %v2315_v28 = vpack.c.bf16 %v2288_v3, %v2287_v39  ;;  %2231 = vst.msk [vmem:[#allocation2 + $0x2e0] sm:$0xff] %vm771_vm2, %v2160_v19  ;;  %v9620_v33 = vpop.f32.mrb[82].mxu1  ;;  %v2747_v31 = vld [vmem:[#allocation2 + $0x2d8] sm:$0xff]  ;;  %v3168_v40 = vld [vmem:[#allocation2 + $0x330] sm:$0xff] }
 0x2bb   : > { %9733 = vmatprep.mubr.msk.bf16.mxu1 %vm771_vm2, %v2770_v57  ;;  %2234 = vst.msk [vmem:[#allocation2 + $0x2f8] sm:$0xff] %vm771_vm2, %v9620_v33  ;;  %v2163_v42 = vpop.f32.mrb[83].mxu1  ;;  %v2294_v1 = vld [vmem:[#allocation2 + $0x178] sm:$0xff]  ;;  %v2773_v0 = vpack.c.bf16 %v2747_v31, %v2746_v32  ;;  %v3170_v12 = vld [vmem:[#allocation2 + $0x340] sm:$0xff]  ;;  %v3213_v3 = vpack.c.bf16 %v3169_v34, %v3168_v40  ;;  %v3633_v31 = vld [vmem:[#allocation2 + $0x4e8] sm:$0xff] }
 0x2bc   : > { %9681 = vmatprep.mubr.msk.bf16.mxu0 %vm771_vm2, %v2315_v28  ;;  %2232 = vst.msk [vmem:[#allocation2 + $0x2e8] sm:$0xff] %vm771_vm2, %v2163_v42  ;;  %v2318_v20 = vpack.c.bf16 %v2294_v1, %v2293_v30  ;;  %v3620_v57 = vld [vmem:[#allocation2 + $0x480] sm:$0xff]  ;;  %v3214_v28 = vpack.c.bf16 %v3171_v16, %v3170_v12  ;;  %v3623_v33 = vld [vmem:[#allocation2 + $0x498] sm:$0xff]  ;;  %v3191_v16 = vld [vmem:[#allocation2 + $0x3e8] sm:$0xff] }
 0x2bd   : > { %9682 = vmatmul.mubr.msk.bf16.gmra.mrb[136].mxu0 %vm771_vm2, %v2316_v63  ;;  %v3668_v52 = vpack.c.bf16 %v3621_v11, %v3620_v57  ;;  %v3172_v63 = vld [vmem:[#allocation2 + $0x350] sm:$0xff]  ;;  %v3173_v42 = vld [vmem:[#allocation2 + $0x358] sm:$0xff] }
 0x2be   : > { %9685 = vmatprep.mubr.msk.bf16.mxu0 %vm771_vm2, %v2317_v24  ;;  %v2744_v59 = vld [vmem:[#allocation2 + $0x2c0] sm:$0xff]  ;;  %v9591_v22 = vpop.f32.mrb[84].mxu0  ;;  %v3625_v24 = vld [vmem:[#allocation2 + $0x4a8] sm:$0xff]  ;;  %v3215_v30 = vpack.c.bf16 %v3173_v42, %v3172_v63  ;;  %v3181_v32 = vld [vmem:[#allocation2 + $0x398] sm:$0xff] }
 0x2bf   : > { %v2742_v6 = vld [vmem:[#allocation2 + $0x2b0] sm:$0xff]  ;;  %2064 = vst.msk [vmem:[#allocation2 + $0x430] sm:$0xff] %vm771_vm2, %v9591_v22  ;;  %v2003_v7 = vpop.f32.mrb[85].mxu0  ;;  %v3175_v22 = vld [vmem:[#allocation2 + $0x368] sm:$0xff]  ;;  %v3639_v40 = vld [vmem:[#allocation2 + $0x518] sm:$0xff] }
 0x2c0   : > { %v2745_v50 = vld [vmem:[#allocation2 + $0x2c8] sm:$0xff]  ;;  %2062 = vst.msk [vmem:[#allocation2 + $0x420] sm:$0xff] %vm771_vm2, %v2003_v7  ;;  %v9592_v13 = vpop.f32.mrb[86].mxu0  ;;  %v9623_v2 = vpop.f32.mrb[84].mxu1  ;;  %v2750_v9 = vld [vmem:[#allocation2 + $0x2f0] sm:$0xff]  ;;  %v3624_v7 = vld [vmem:[#allocation2 + $0x4a0] sm:$0xff] }
 0x2c1   : > { %v2743_v47 = vld [vmem:[#allocation2 + $0x2b8] sm:$0xff]  ;;  %v2772_v23 = vpack.c.bf16 %v2745_v50, %v2744_v59  ;;  %2065 = vst.msk [vmem:[#allocation2 + $0x438] sm:$0xff] %vm771_vm2, %v9592_v13  ;;  %v2006_v45 = vpop.f32.mrb[87].mxu0  ;;  %2237 = vst.msk [vmem:[#allocation2 + $0x460] sm:$0xff] %vm771_vm2, %v9623_v2  ;;  %v2176_v60 = vpop.f32.mrb[85].mxu1  ;;  %v2748_v14 = vld [vmem:[#allocation2 + $0x2e0] sm:$0xff]  ;;  %v3670_v1 = vpack.c.bf16 %v3625_v24, %v3624_v7 }
 0x2c2   : > { %v2771_v18 = vpack.c.bf16 %v2743_v47, %v2742_v6  ;;  %2063 = vst.msk [vmem:[#allocation2 + $0x428] sm:$0xff] %vm771_vm2, %v2006_v45  ;;  %2235 = vst.msk [vmem:[#allocation2 + $0x450] sm:$0xff] %vm771_vm2, %v2176_v60  ;;  %v9624_v58 = vpop.f32.mrb[86].mxu1  ;;  %v2751_v8 = vld [vmem:[#allocation2 + $0x2f8] sm:$0xff]  ;;  %v3622_v59 = vld [vmem:[#allocation2 + $0x490] sm:$0xff] }
 0x2c3   : > { %2238 = vst.msk [vmem:[#allocation2 + $0x468] sm:$0xff] %vm771_vm2, %v9624_v58  ;;  %v2179_v53 = vpop.f32.mrb[87].mxu1  ;;  %v2749_v26 = vld [vmem:[#allocation2 + $0x2e8] sm:$0xff]  ;;  %v2775_v15 = vpack.c.bf16 %v2751_v8, %v2750_v9  ;;  %v3669_v6 = vpack.c.bf16 %v3623_v33, %v3622_v59  ;;  %v3174_v50 = vld [vmem:[#allocation2 + $0x360] sm:$0xff]  ;;  %v3626_v2 = vld [vmem:[#allocation2 + $0x4b0] sm:$0xff] }
 0x2c4   : > { %9734 = vmatmul.mubr.msk.bf16.gmra.mrb[132].mxu1 %vm771_vm2, %v2771_v18  ;;  %2236 = vst.msk [vmem:[#allocation2 + $0x458] sm:$0xff] %vm771_vm2, %v2179_v53  ;;  %v2774_v55 = vpack.c.bf16 %v2749_v26, %v2748_v14  ;;  %v3216_v13 = vpack.c.bf16 %v3175_v22, %v3174_v50  ;;  %v3627_v47 = vld [vmem:[#allocation2 + $0x4b8] sm:$0xff]  ;;  %v3629_v45 = vld [vmem:[#allocation2 + $0x4c8] sm:$0xff]  ;;  %v3176_v58 = vld [vmem:[#allocation2 + $0x370] sm:$0xff] }
 0x2c5   : > { %9686 = vmatmul.mubr.msk.bf16.gmra.mrb[140].mxu0 %vm771_vm2, %v2318_v20  ;;  %9737 = vmatprep.mubr.msk.bf16.mxu1 %vm771_vm2, %v2772_v23  ;;  %v3628_v23 = vld [vmem:[#allocation2 + $0x4c0] sm:$0xff]  ;;  %v3179_v60 = vld [vmem:[#allocation2 + $0x388] sm:$0xff]  ;;  %v3671_v18 = vpack.c.bf16 %v3627_v47, %v3626_v2  ;;  %v3217_v20 = vpack.c.bf16 %v3177_v56, %v3176_v58  ;;  %v3630_v14 = vld [vmem:[#allocation2 + $0x4d0] sm:$0xff] }
 0x2c6   : > { %9753 = vmatprep.mubr.msk.bf16.mxu0 %vm771_vm2, %v3210_v48  ;;  %v9595_v21 = vpop.f32.mrb[88].mxu0  ;;  %v3672_v35 = vpack.c.bf16 %v3629_v45, %v3628_v23  ;;  %v3178_v53 = vld [vmem:[#allocation2 + $0x380] sm:$0xff]  ;;  %v3631_v26 = vld [vmem:[#allocation2 + $0x4d8] sm:$0xff]  ;;  %v3188_v57 = vld [vmem:[#allocation2 + $0x3d0] sm:$0xff] }
 0x2c7   : > { %2068 = vst.msk [vmem:[#allocation2 + $0x5a0] sm:$0xff] %vm771_vm2, %v9595_v21  ;;  %v2019_v38 = vpop.f32.mrb[89].mxu0  ;;  %v3218_v48 = vpack.c.bf16 %v3179_v60, %v3178_v53  ;;  %v3180_v21 = vld [vmem:[#allocation2 + $0x390] sm:$0xff]  ;;  %v3189_v11 = vld [vmem:[#allocation2 + $0x3d8] sm:$0xff]  ;;  %v3645_v22 = vld [vmem:[#allocation2 + $0x548] sm:$0xff] }
 0x2c8   : > { %2066 = vst.msk [vmem:[#allocation2 + $0x440] sm:$0xff] %vm771_vm2, %v2019_v38  ;;  %v9596_v61 = vpop.f32.mrb[90].mxu0  ;;  %v9627_v27 = vpop.f32.mrb[88].mxu1  ;;  %v3182_v38 = vld [vmem:[#allocation2 + $0x3a0] sm:$0xff]  ;;  %v3219_v10 = vpack.c.bf16 %v3181_v32, %v3180_v21  ;;  %v3642_v33 = vld [vmem:[#allocation2 + $0x530] sm:$0xff]  ;;  %v3643_v63 = vld [vmem:[#allocation2 + $0x538] sm:$0xff] }
 0x2c9   : > { %2069 = vst.msk [vmem:[#allocation2 + $0x5a8] sm:$0xff] %vm771_vm2, %v9596_v61  ;;  %v2022_v36 = vpop.f32.mrb[91].mxu0  ;;  %2241 = vst.msk [vmem:[#allocation2 + $0x5d0] sm:$0xff] %vm771_vm2, %v9627_v27  ;;  %v2192_v43 = vpop.f32.mrb[89].mxu1  ;;  %v3673_v61 = vpack.c.bf16 %v3631_v26, %v3630_v14  ;;  %v3632_v27 = vld [vmem:[#allocation2 + $0x4e0] sm:$0xff]  ;;  %v3192_v24 = vld [vmem:[#allocation2 + $0x3f0] sm:$0xff]  ;;  %v3679_v50 = vpack.c.bf16 %v3643_v63, %v3642_v33 }
 0x2ca   : > { %2067 = vst.msk [vmem:[#allocation2 + $0x448] sm:$0xff] %vm771_vm2, %v2022_v36  ;;  %2239 = vst.msk [vmem:[#allocation2 + $0x470] sm:$0xff] %vm771_vm2, %v2192_v43  ;;  %v9628_v44 = vpop.f32.mrb[90].mxu1  ;;  %v3220_v36 = vpack.c.bf16 %v3183_v25, %v3182_v38  ;;  %v3635_v43 = vld [vmem:[#allocation2 + $0x4f8] sm:$0xff]  ;;  %v3194_v7 = vld [vmem:[#allocation2 + $0x400] sm:$0xff] }
 0x2cb   : > { %2242 = vst.msk [vmem:[#allocation2 + $0x5d8] sm:$0xff] %vm771_vm2, %v9628_v44  ;;  %v2195_v46 = vpop.f32.mrb[91].mxu1  ;;  %v3637_v44 = vld [vmem:[#allocation2 + $0x508] sm:$0xff]  ;;  %v3193_v59 = vld [vmem:[#allocation2 + $0x3f8] sm:$0xff]  ;;  %v3196_v53 = vld [vmem:[#allocation2 + $0x410] sm:$0xff] }
 0x2cc   : > { %9738 = vmatmul.mubr.msk.bf16.gmra.mrb[136].mxu1 %vm771_vm2, %v2773_v0  ;;  %2240 = vst.msk [vmem:[#allocation2 + $0x478] sm:$0xff] %vm771_vm2, %v2195_v46  ;;  %v3184_v0 = vld [vmem:[#allocation2 + $0x3b0] sm:$0xff]  ;;  %v3225_v47 = vpack.c.bf16 %v3193_v59, %v3192_v24  ;;  %v3647_v60 = vld [vmem:[#allocation2 + $0x558] sm:$0xff]  ;;  %v3199_v58 = vld [vmem:[#allocation2 + $0x428] sm:$0xff] }
 0x2cd   : > { %9754 = vmatmul.mubr.msk.bf16.vlgmr.msra.gmra.mrb[144].mxu0 %vm771_vm2, %v3211_v54  ;;  %9741 = vmatprep.mubr.msk.bf16.mxu1 %vm771_vm2, %v2774_v55  ;;  %v3674_v55 = vpack.c.bf16 %v3633_v31, %v3632_v27  ;;  %v3634_v54 = vld [vmem:[#allocation2 + $0x4f0] sm:$0xff]  ;;  %v3221_v9 = vpack.c.bf16 %v3185_v29, %v3184_v0  ;;  %v3649_v14 = vld [vmem:[#allocation2 + $0x568] sm:$0xff]  ;;  %v3651_v0 = vld [vmem:[#allocation2 + $0x578] sm:$0xff] }
 0x2ce   : > { %9757 = vmatprep.mubr.msk.bf16.mxu0 %vm771_vm2, %v3212_v49  ;;  %v9599_v51 = vpop.f32.mrb[92].mxu0  ;;  %v3675_v46 = vpack.c.bf16 %v3635_v43, %v3634_v54  ;;  %v3636_v49 = vld [vmem:[#allocation2 + $0x500] sm:$0xff]  ;;  %v3646_v32 = vld [vmem:[#allocation2 + $0x550] sm:$0xff] }
 0x2cf   : > { %2072 = vst.msk [vmem:[#allocation2 + $0x5c0] sm:$0xff] %vm771_vm2, %v9599_v51  ;;  %v2035_v41 = vpop.f32.mrb[93].mxu0  ;;  %v3676_v8 = vpack.c.bf16 %v3637_v44, %v3636_v49  ;;  %v3186_v51 = vld [vmem:[#allocation2 + $0x3c0] sm:$0xff]  ;;  %v3681_v25 = vpack.c.bf16 %v3647_v60, %v3646_v32  ;;  %v3650_v43 = vld [vmem:[#allocation2 + $0x570] sm:$0xff] }
 0x2d0   : > { %2070 = vst.msk [vmem:[#allocation2 + $0x5b0] sm:$0xff] %vm771_vm2, %v2035_v41  ;;  %v9600_v5 = vpop.f32.mrb[94].mxu0  ;;  %v9631_v4 = vpop.f32.mrb[92].mxu1  ;;  %v3222_v41 = vpack.c.bf16 %v3187_v17, %v3186_v51  ;;  %v3652_v44 = vld [vmem:[#allocation2 + $0x580] sm:$0xff]  ;;  %v3200_v49 = vld [vmem:[#allocation2 + $0x430] sm:$0xff] }
 0x2d1   : > { %2073 = vst.msk [vmem:[#allocation2 + $0x5c8] sm:$0xff] %vm771_vm2, %v9600_v5  ;;  %v2038_v37 = vpop.f32.mrb[95].mxu0  ;;  %2245 = vst.msk [vmem:[#allocation2 + $0x5f0] sm:$0xff] %vm771_vm2, %v9631_v4  ;;  %v2208_v62 = vpop.f32.mrb[93].mxu1  ;;  %v3640_v5 = vld [vmem:[#allocation2 + $0x520] sm:$0xff]  ;;  %v3641_v4 = vld [vmem:[#allocation2 + $0x528] sm:$0xff] }
 0x2d2   : > { %2071 = vst.msk [vmem:[#allocation2 + $0x5b8] sm:$0xff] %vm771_vm2, %v2038_v37  ;;  %2243 = vst.msk [vmem:[#allocation2 + $0x5e0] sm:$0xff] %vm771_vm2, %v2208_v62  ;;  %v9632_v39 = vpop.f32.mrb[94].mxu1  ;;  %v3202_v54 = vld [vmem:[#allocation2 + $0x440] sm:$0xff]  ;;  %v3203_v17 = vld [vmem:[#allocation2 + $0x448] sm:$0xff] }
 0x2d3   : > { %2246 = vst.msk [vmem:[#allocation2 + $0x5f8] sm:$0xff] %vm771_vm2, %v9632_v39  ;;  %v2211_v19 = vpop.f32.mrb[95].mxu1 }
 0x2d4   : > { %9742 = vmatmul.mubr.msk.bf16.gmra.mrb[140].mxu1 %vm771_vm2, %v2775_v15  ;;  %2244 = vst.msk [vmem:[#allocation2 + $0x5e8] sm:$0xff] %vm771_vm2, %v2211_v19  ;;  %v3638_v15 = vld [vmem:[#allocation2 + $0x510] sm:$0xff]  ;;  %v3190_v19 = vld [vmem:[#allocation2 + $0x3e0] sm:$0xff] }
 0x2d5   : > { %9758 = vmatmul.mubr.msk.bf16.gmra.mrb[148].mxu0 %vm771_vm2, %v3213_v3  ;;  %9809 = vmatprep.mubr.msk.bf16.mxu1 %vm771_vm2, %v3668_v52  ;;  %v3677_v62 = vpack.c.bf16 %v3639_v40, %v3638_v15  ;;  %v3223_v3 = vpack.c.bf16 %v3189_v11, %v3188_v57  ;;  %v3678_v52 = vpack.c.bf16 %v3641_v4, %v3640_v5  ;;  %v3654_v4 = vld [vmem:[#allocation2 + $0x590] sm:$0xff]  ;;  %v3656_v57 = vld [vmem:[#allocation2 + $0x5a0] sm:$0xff] }
 0x2d6   : > { %9761 = vmatprep.mubr.msk.bf16.mxu0 %vm771_vm2, %v3214_v28  ;;  %v3224_v28 = vpack.c.bf16 %v3191_v16, %v3190_v19  ;;  %v3683_v15 = vpack.c.bf16 %v3651_v0, %v3650_v43  ;;  %v3230_v40 = vpack.c.bf16 %v3203_v17, %v3202_v54  ;;  %v3204_v16 = vld [vmem:[#allocation2 + $0x450] sm:$0xff]  ;;  %v3207_v19 = vld [vmem:[#allocation2 + $0x468] sm:$0xff] }
 0x2d7   : > { %v3658_v59 = vld [vmem:[#allocation2 + $0x5b0] sm:$0xff] }
 0x2dc   : > { %9810 = vmatmul.mubr.msk.bf16.vlgmr.msra.gmra.mrb[144].mxu1 %vm771_vm2, %v3669_v6 }
 0x2dd   : > { %9762 = vmatmul.mubr.msk.bf16.gmra.mrb[152].mxu0 %vm771_vm2, %v3215_v30  ;;  %9813 = vmatprep.mubr.msk.bf16.mxu1 %vm771_vm2, %v3670_v1  ;;  %v3195_v30 = vld [vmem:[#allocation2 + $0x408] sm:$0xff] }
 0x2de   : > { %9765 = vmatprep.mubr.msk.bf16.mxu0 %vm771_vm2, %v3216_v13  ;;  %v3644_v13 = vld [vmem:[#allocation2 + $0x540] sm:$0xff]  ;;  %v3226_v23 = vpack.c.bf16 %v3195_v30, %v3194_v7  ;;  %v3661_v7 = vld [vmem:[#allocation2 + $0x5c8] sm:$0xff] }
 0x2df   : > { %v3680_v56 = vpack.c.bf16 %v3645_v22, %v3644_v13  ;;  %v3659_v22 = vld [vmem:[#allocation2 + $0x5b8] sm:$0xff] }
 0x2e0   : > { %v3687_v30 = vpack.c.bf16 %v3659_v22, %v3658_v59 }
 0x2e4   : > { %9814 = vmatmul.mubr.msk.bf16.gmra.mrb[148].mxu1 %vm771_vm2, %v3671_v18  ;;  %v3198_v18 = vld [vmem:[#allocation2 + $0x420] sm:$0xff] }
 0x2e5   : > { %9766 = vmatmul.mubr.msk.bf16.gmra.mrb[156].mxu0 %vm771_vm2, %v3217_v20  ;;  %9817 = vmatprep.mubr.msk.bf16.mxu1 %vm771_vm2, %v3672_v35  ;;  %v3228_v27 = vpack.c.bf16 %v3199_v58, %v3198_v18 }
 0x2e6   : > { %9769 = vmatprep.mubr.msk.bf16.mxu0 %vm771_vm2, %v3218_v48  ;;  %v3197_v48 = vld [vmem:[#allocation2 + $0x418] sm:$0xff] }
 0x2ec   : > { %9818 = vmatmul.mubr.msk.bf16.gmra.mrb[152].mxu1 %vm771_vm2, %v3673_v61  ;;  %v3648_v61 = vld [vmem:[#allocation2 + $0x560] sm:$0xff] }
 0x2ed   : > { %9770 = vmatmul.mubr.msk.bf16.gmra.mrb[160].mxu0 %vm771_vm2, %v3219_v10  ;;  %9821 = vmatprep.mubr.msk.bf16.mxu1 %vm771_vm2, %v3674_v55  ;;  %v3227_v55 = vpack.c.bf16 %v3197_v48, %v3196_v53  ;;  %v3666_v48 = vld [vmem:[#allocation2 + $0x5f0] sm:$0xff] }
 0x2ee   : > { %9773 = vmatprep.mubr.msk.bf16.mxu0 %vm771_vm2, %v3220_v36  ;;  %v3682_v36 = vpack.c.bf16 %v3649_v14, %v3648_v61  ;;  %v3667_v14 = vld [vmem:[#allocation2 + $0x5f8] sm:$0xff] }
 0x2f4   : > { %9822 = vmatmul.mubr.msk.bf16.gmra.mrb[156].mxu1 %vm771_vm2, %v3675_v46 }
 0x2f5   : > { %9774 = vmatmul.mubr.msk.bf16.gmra.mrb[164].mxu0 %vm771_vm2, %v3221_v9  ;;  %9825 = vmatprep.mubr.msk.bf16.mxu1 %vm771_vm2, %v3676_v8  ;;  %v3201_v9 = vld [vmem:[#allocation2 + $0x438] sm:$0xff]  ;;  %v3653_v8 = vld [vmem:[#allocation2 + $0x588] sm:$0xff] }
 0x2f6   : > { %9777 = vmatprep.mubr.msk.bf16.mxu0 %vm771_vm2, %v3222_v41  ;;  %v3684_v11 = vpack.c.bf16 %v3653_v8, %v3652_v44 }
 0x2f8   : > { %v9643_v34 = vpop.f32.mrb[96].mxu0 }
 0x2f9   : > { %2651 = vst.msk [vmem:[#allocation3 + $0x10] sm:$0xff] %vm2648_vm5, %v9643_v34  ;;  %v2457_v12 = vpop.f32.mrb[97].mxu0  ;;  %v3229_v34 = vpack.c.bf16 %v3201_v9, %v3200_v49 }
 0x2fa   : > { %v9644_v37 = vpop.f32.mrb[98].mxu0  ;;  %v3655_v12 = vld [vmem:[#allocation2 + $0x598] sm:$0xff] }
 0x2fb   : > { %2652 = vst.msk [vmem:[#allocation3 + $0x18] sm:$0xff] %vm2648_vm5, %v9644_v37  ;;  %v2460_v39 = vpop.f32.mrb[99].mxu0  ;;  %v3685_v33 = vpack.c.bf16 %v3655_v12, %v3654_v4 }
 0x2fc   : > { %9826 = vmatmul.mubr.msk.bf16.gmra.mrb[160].mxu1 %vm771_vm2, %v3677_v62  ;;  %v3205_v62 = vld [vmem:[#allocation2 + $0x458] sm:$0xff]  ;;  %v3657_v39 = vld [vmem:[#allocation2 + $0x5a8] sm:$0xff] }
 0x2fd   : > { %9778 = vmatmul.mubr.msk.bf16.gmra.mrb[168].mxu0 %vm771_vm2, %v3223_v3  ;;  %9829 = vmatprep.mubr.msk.bf16.mxu1 %vm771_vm2, %v3678_v52  ;;  %v3206_v52 = vld [vmem:[#allocation2 + $0x460] sm:$0xff]  ;;  %v3231_v63 = vpack.c.bf16 %v3205_v62, %v3204_v16 }
 0x2fe   : > { %9781 = vmatprep.mubr.msk.bf16.mxu0 %vm771_vm2, %v3224_v28  ;;  %v3232_v24 = vpack.c.bf16 %v3207_v19, %v3206_v52 }
 0x300   : > { %v9647_v42 = vpop.f32.mrb[100].mxu0 }
 0x301   : > { %v2473_v6 = vpop.f32.mrb[101].mxu0  ;;  %v3686_v42 = vpack.c.bf16 %v3657_v39, %v3656_v57 }
 0x302   : > { %v9648_v1 = vpop.f32.mrb[102].mxu0  ;;  %v3660_v6 = vld [vmem:[#allocation2 + $0x5c0] sm:$0xff] }
 0x303   : > { %v2476_v2 = vpop.f32.mrb[103].mxu0  ;;  %v3208_v1 = vld [vmem:[#allocation2 + $0x470] sm:$0xff]  ;;  %v3688_v13 = vpack.c.bf16 %v3661_v7, %v3660_v6 }
 0x304   : > { %9830 = vmatmul.mubr.msk.bf16.gmra.mrb[164].mxu1 %vm771_vm2, %v3679_v50  ;;  %v3209_v50 = vld [vmem:[#allocation2 + $0x478] sm:$0xff] }
 0x305   : > { %9782 = vmatmul.mubr.msk.bf16.gmra.mrb[172].mxu0 %vm771_vm2, %v3225_v47  ;;  %9833 = vmatprep.mubr.msk.bf16.mxu1 %vm771_vm2, %v3680_v56  ;;  %v3233_v2 = vpack.c.bf16 %v3209_v50, %v3208_v1  ;;  %v3664_v47 = vld [vmem:[#allocation2 + $0x5e0] sm:$0xff]  ;;  %v3665_v56 = vld [vmem:[#allocation2 + $0x5e8] sm:$0xff] }
 0x306   : > { %9785 = vmatprep.mubr.msk.bf16.mxu0 %vm771_vm2, %v3226_v23  ;;  %v3662_v23 = vld [vmem:[#allocation2 + $0x5d0] sm:$0xff]  ;;  %v3690_v58 = vpack.c.bf16 %v3665_v56, %v3664_v47 }
 0x307   : > { %v9699_v45 = vpop.f32.mrb[96].mxu1 }
 0x308   : > { %3109 = vst.msk [vmem:[#allocation3 + $0x190] sm:$0xff] %vm2648_vm5, %v9699_v45  ;;  %v9651_v20 = vpop.f32.mrb[104].mxu0  ;;  %v2915_v35 = vpop.f32.mrb[97].mxu1  ;;  %v3663_v45 = vld [vmem:[#allocation2 + $0x5d8] sm:$0xff] }
 0x309   : > { %v2489_v26 = vpop.f32.mrb[105].mxu0  ;;  %v9700_v21 = vpop.f32.mrb[98].mxu1  ;;  %v3689_v35 = vpack.c.bf16 %v3663_v45, %v3662_v23 }
 0x30a   : > { %2658 = vst.msk [vmem:[#allocation3 + $0x40] sm:$0xff] %vm2648_vm5, %v2489_v26  ;;  %3110 = vst.msk [vmem:[#allocation3 + $0x198] sm:$0xff] %vm2648_vm5, %v9700_v21  ;;  %v9652_v31 = vpop.f32.mrb[106].mxu0  ;;  %v2918_v38 = vpop.f32.mrb[99].mxu1  ;;  %v3691_v21 = vpack.c.bf16 %v3667_v14, %v3666_v48 }
 0x30b   : > { %3108 = vst.msk [vmem:[#allocation3 + $0x188] sm:$0xff] %vm2648_vm5, %v2918_v38  ;;  %v2492_v10 = vpop.f32.mrb[107].mxu0 }
 0x30c   : > { %2659 = vst.msk [vmem:[#allocation3 + $0x48] sm:$0xff] %vm2648_vm5, %v2492_v10  ;;  %9834 = vmatmul.mubr.msk.bf16.gmra.mrb[168].mxu1 %vm771_vm2, %v3681_v25 }
 0x30d   : > { %9786 = vmatmul.mubr.msk.bf16.gmra.mrb[176].mxu0 %vm771_vm2, %v3227_v55  ;;  %9837 = vmatprep.mubr.msk.bf16.mxu1 %vm771_vm2, %v3682_v36 }
 0x30e   : > { %9789 = vmatprep.mubr.msk.bf16.mxu0 %vm771_vm2, %v3228_v27 }
 0x30f   : > { %v9703_v29 = vpop.f32.mrb[100].mxu1  ;;  %v4143_v7 = vld [vmem:[#allocation3 + $0x190] sm:$0xff] }
 0x310   : > { %v2931_v46 = vpop.f32.mrb[101].mxu1  ;;  %v4159_v45 = vmul.f32 %v4143_v7, %v4143_v7 }
 0x311   : > { %3111 = vst.msk [vmem:[#allocation3 + $0x1a0] sm:$0xff] %vm2648_vm5, %v2931_v46  ;;  %v9704_v51 = vpop.f32.mrb[102].mxu1  ;;  %v4144_v1 = vld [vmem:[#allocation3 + $0x198] sm:$0xff] }
 0x312   : > { %3115 = vst.msk [vmem:[#allocation3 + $0x1b8] sm:$0xff] %vm2648_vm5, %v9704_v51  ;;  %v2934_v41 = vpop.f32.mrb[103].mxu1  ;;  %v4216_v50 = vld [vmem:[#allocation3 + $0x194] sm:$0xff]  ;;  %v4435_v23 = vld [vmem:[#allocation3 + $0x18c] sm:$0xff] }
 0x313   : > { %v4443_v48 = vmul.f32 %v4435_v23, %v4435_v23 }
 0x314   : > { %9838 = vmatmul.mubr.msk.bf16.gmra.mrb[172].mxu1 %vm771_vm2, %v3683_v15 }
 0x315   : > { %9790 = vmatmul.mubr.msk.bf16.gmra.mrb[180].mxu0 %vm771_vm2, %v3229_v34  ;;  %9841 = vmatprep.mubr.msk.bf16.mxu1 %vm771_vm2, %v3684_v11 }
 0x316   : > { %9793 = vmatprep.mubr.msk.bf16.mxu0 %vm771_vm2, %v3230_v40 }
 0x317   : > { %v9707_v5 = vpop.f32.mrb[104].mxu1 }
 0x318   : > { %3118 = vst.msk [vmem:[#allocation3 + $0x1d0] sm:$0xff] %vm2648_vm5, %v9707_v5  ;;  %v2947_v37 = vpop.f32.mrb[105].mxu1 }
 0x319   : > { %3116 = vst.msk [vmem:[#allocation3 + $0x1c0] sm:$0xff] %vm2648_vm5, %v2947_v37  ;;  %v9708_v3 = vpop.f32.mrb[106].mxu1 }
 0x31a   : > { %v2950_v28 = vpop.f32.mrb[107].mxu1 }
 0x31b   : > { %3117 = vst.msk [vmem:[#allocation3 + $0x1c8] sm:$0xff] %vm2648_vm5, %v2950_v28 }
 0x31c   : > { %9842 = vmatmul.mubr.msk.bf16.gmra.mrb[176].mxu1 %vm771_vm2, %v3685_v33 }
 0x31d   : > { %9794 = vmatmul.mubr.msk.bf16.gmra.mrb[184].mxu0 %vm771_vm2, %v3231_v63  ;;  %9845 = vmatprep.mubr.msk.bf16.mxu1 %vm771_vm2, %v3686_v42 }
 0x31e   : > { %9797 = vmatprep.mubr.msk.bf16.mxu0 %vm771_vm2, %v3232_v24 }
 0x320   : > { %v4145_v47 = vld [vmem:[#allocation3 + $0x1c0] sm:$0xff] }
 0x322   : > { %v4219_v14 = vld [vmem:[#allocation3 + $0x1cc] sm:$0xff] }
 0x324   : > { %9846 = vmatmul.mubr.msk.bf16.gmra.mrb[180].mxu1 %vm771_vm2, %v3687_v30 }
 0x325   : > { %9798 = vmatmul.mubr.msk.bf16.gmra.mrb[188].mxu0 %vm771_vm2, %v3233_v2  ;;  %9849 = vmatprep.mubr.msk.bf16.mxu1 %vm771_vm2, %v3688_v13  ;;  %v4436_v2 = vld [vmem:[#allocation3 + $0x1bc] sm:$0xff] }
 0x328   : > { %v9655_v60 = vpop.f32.mrb[108].mxu0 }
 0x329   : > { %2665 = vst.msk [vmem:[#allocation3 + $0x70] sm:$0xff] %vm2648_vm5, %v9655_v60  ;;  %v2505_v18 = vpop.f32.mrb[109].mxu0  ;;  %v4160_v60 = vmul.f32 %v4144_v1, %v4144_v1 }
 0x32a   : > { %v9656_v20 = vpop.f32.mrb[110].mxu0  ;;  %v4217_v18 = vld [vmem:[#allocation3 + $0x19c] sm:$0xff] }
 0x32b   : > { %2666 = vst.msk [vmem:[#allocation3 + $0x78] sm:$0xff] %vm2648_vm5, %v9656_v20  ;;  %v2508_v53 = vpop.f32.mrb[111].mxu0  ;;  %v4444_v20 = vmul.f32 %v4436_v2, %v4436_v2 }
 0x32c   : > { %9850 = vmatmul.mubr.msk.bf16.gmra.mrb[184].mxu1 %vm771_vm2, %v3689_v35  ;;  %v4161_v35 = vmul.f32 %v4145_v47, %v4145_v47  ;;  %v4146_v53 = vld [vmem:[#allocation3 + $0x1c8] sm:$0xff] }
 0x32d   : > { %9853 = vmatprep.mubr.msk.bf16.mxu1 %vm771_vm2, %v3690_v58  ;;  %v4232_v58 = vmul.f32 %v4216_v50, %v4216_v50 }
 0x330   : > { %v9659_v26 = vpop.f32.mrb[112].mxu0 }
 0x331   : > { %v2521_v32 = vpop.f32.mrb[113].mxu0  ;;  %v4218_v26 = vld [vmem:[#allocation3 + $0x1c4] sm:$0xff] }
 0x332   : > { %v9660_v31 = vpop.f32.mrb[114].mxu0  ;;  %v4233_v32 = vmul.f32 %v4217_v18, %v4217_v18 }
 0x333   : > { %v2524_v38 = vpop.f32.mrb[115].mxu0 }
 0x334   : > { %9854 = vmatmul.mubr.msk.bf16.gmra.mrb[188].mxu1 %vm771_vm2, %v3691_v21  ;;  %v4176_v21 = vsel %vm4175_vm6, %v4159_v45, 0.0  ;;  %vm4110_vm2 = vcmask 261248  }
 0x337   : > { %v9711_v25 = vpop.f32.mrb[108].mxu1 }
 0x338   : > { %3123 = vst.msk [vmem:[#allocation3 + $0x1f0] sm:$0xff] %vm2648_vm5, %v9711_v25  ;;  %v9663_v61 = vpop.f32.mrb[116].mxu0  ;;  %v2963_v27 = vpop.f32.mrb[109].mxu1  ;;  %v4395_v25 = vsel %vm4394_vm8, %v4159_v45, 0.0 }
 0x339   : > { %v2537_v10 = vpop.f32.mrb[117].mxu0  ;;  %v9712_v55 = vpop.f32.mrb[110].mxu1  ;;  %v4162_v61 = vmul.f32 %v4146_v53, %v4146_v53  ;;  %v4191_v27 = vsel %vm4175_vm6, %v4160_v60, 0.0 }
 0x33a   : > { %2672 = vst.msk [vmem:[#allocation3 + $0xa0] sm:$0xff] %vm2648_vm5, %v2537_v10  ;;  %3124 = vst.msk [vmem:[#allocation3 + $0x1f8] sm:$0xff] %vm2648_vm5, %v9712_v55  ;;  %v9664_v36 = vpop.f32.mrb[118].mxu0  ;;  %v2966_v43 = vpop.f32.mrb[111].mxu1  ;;  %v4249_v10 = vsel %vm4248_vm7, %v4232_v58, 0.0 }
 0x33b   : > { %3122 = vst.msk [vmem:[#allocation3 + $0x1e8] sm:$0xff] %vm2648_vm5, %v2966_v43  ;;  %v2540_v0 = vpop.f32.mrb[119].mxu0  ;;  %v4537_v36 = vsel %vm4248_vm7, %v4444_v20, 0.0  ;;  %v4177_v43 = vsel %vm4175_vm6, %v4161_v35, 0.0 }
 0x33c   : > { %2673 = vst.msk [vmem:[#allocation3 + $0xa8] sm:$0xff] %vm2648_vm5, %v2540_v0  ;;  %v4235_v0 = vmul.f32 %v4219_v14, %v4219_v14 }
 0x33f   : > { %v9715_v29 = vpop.f32.mrb[112].mxu1  ;;  %v4147_v38 = vld [vmem:[#allocation3 + $0x1f0] sm:$0xff] }
 0x340   : > { %v2979_v44 = vpop.f32.mrb[113].mxu1  ;;  %v4234_v29 = vmul.f32 %v4218_v26, %v4218_v26 }
 0x341   : > { %3125 = vst.msk [vmem:[#allocation3 + $0x200] sm:$0xff] %vm2648_vm5, %v2979_v44  ;;  %v9716_v54 = vpop.f32.mrb[114].mxu1 }
 0x342   : > { %3129 = vst.msk [vmem:[#allocation3 + $0x218] sm:$0xff] %vm2648_vm5, %v9716_v54  ;;  %v2982_v17 = vpop.f32.mrb[115].mxu1  ;;  %v4536_v54 = vsel %vm4248_vm7, %v4443_v48, 0.0 }
 0x343   : > { %v4148_v17 = vld [vmem:[#allocation3 + $0x1f8] sm:$0xff] }
 0x347   : > { %v9719_v46 = vpop.f32.mrb[116].mxu1 }
 0x348   : > { %3132 = vst.msk [vmem:[#allocation3 + $0x230] sm:$0xff] %vm2648_vm5, %v9719_v46  ;;  %v2995_v49 = vpop.f32.mrb[117].mxu1  ;;  %v4451_v46 = vsel %vm4353_vm9, %v4443_v48, 0.0 }
 0x349   : > { %3130 = vst.msk [vmem:[#allocation3 + $0x220] sm:$0xff] %vm2648_vm5, %v2995_v49  ;;  %v9720_v9 = vpop.f32.mrb[118].mxu1  ;;  %v4354_v49 = vsel %vm4353_vm9, %v4232_v58, 0.0 }
 0x34a   : > { %v2998_v8 = vpop.f32.mrb[119].mxu1  ;;  %v4410_v9 = vsel %vm4394_vm8, %v4160_v60, 0.0 }
 0x34b   : > { %3131 = vst.msk [vmem:[#allocation3 + $0x228] sm:$0xff] %vm2648_vm5, %v2998_v8 }
 0x350   : > { %v4149_v1 = vld [vmem:[#allocation3 + $0x220] sm:$0xff] }
 0x352   : > { %v4150_v60 = vld [vmem:[#allocation3 + $0x228] sm:$0xff] }
 0x353   : > { %v4223_v58 = vld [vmem:[#allocation3 + $0x22c] sm:$0xff]  ;;  %v4222_v26 = vld [vmem:[#allocation3 + $0x224] sm:$0xff] }
 0x358   : > { %v9667_v51 = vpop.f32.mrb[120].mxu0 }
 0x359   : > { %2679 = vst.msk [vmem:[#allocation3 + $0xd0] sm:$0xff] %vm2648_vm5, %v9667_v51  ;;  %v2553_v41 = vpop.f32.mrb[121].mxu0  ;;  %v4163_v51 = vmul.f32 %v4147_v38, %v4147_v38 }
 0x35a   : > { %v9668_v15 = vpop.f32.mrb[122].mxu0  ;;  %v4396_v41 = vsel %vm4394_vm8, %v4161_v35, 0.0 }
 0x35b   : > { %2680 = vst.msk [vmem:[#allocation3 + $0xd8] sm:$0xff] %vm2648_vm5, %v9668_v15  ;;  %v2556_v40 = vpop.f32.mrb[123].mxu0  ;;  %v4264_v15 = vsel %vm4248_vm7, %v4233_v32, 0.0  ;;  %v4398_v45 = vsel %vm4394_vm8, %v4163_v51, 0.0 }
 0x35c   : > { %v4220_v40 = vld [vmem:[#allocation3 + $0x1f4] sm:$0xff] }
 0x360   : > { %v9671_v34 = vpop.f32.mrb[124].mxu0 }
 0x361   : > { %v2569_v11 = vpop.f32.mrb[125].mxu0  ;;  %v4369_v34 = vsel %vm4353_vm9, %v4233_v32, 0.0 }
 0x362   : > { %v9672_v5 = vpop.f32.mrb[126].mxu0  ;;  %v4437_v11 = vld [vmem:[#allocation3 + $0x1ec] sm:$0xff] }
 0x363   : > { %v2572_v4 = vpop.f32.mrb[127].mxu0  ;;  %v4538_v5 = vadd.f32 %v4537_v36, %v4536_v54  ;;  %v4166_v36 = vmul.f32 %v4150_v60, %v4150_v60 }
 0x364   : > { %v4178_v4 = vadd.f32 %v4177_v43, %v4176_v21  ;;  %v4239_v43 = vmul.f32 %v4223_v58, %v4223_v58 }
 0x367   : > { %v9723_v12 = vpop.f32.mrb[120].mxu1 }
 0x368   : > { %3137 = vst.msk [vmem:[#allocation3 + $0x250] sm:$0xff] %vm2648_vm5, %v9723_v12  ;;  %v9675_v16 = vpop.f32.mrb[128].mxu0  ;;  %v3011_v37 = vpop.f32.mrb[121].mxu1  ;;  %v4192_v12 = vsel %vm4175_vm6, %v4162_v61, 0.0 }
 0x369   : > { %v2585_v62 = vpop.f32.mrb[129].mxu0  ;;  %v9724_v57 = vpop.f32.mrb[122].mxu1  ;;  %v4452_v16 = vsel %vm4353_vm9, %v4444_v20, 0.0  ;;  %v4164_v37 = vmul.f32 %v4148_v17, %v4148_v17 }
 0x36a   : > { %2686 = vst.msk [vmem:[#allocation3 + $0x100] sm:$0xff] %vm2648_vm5, %v2585_v62  ;;  %3138 = vst.msk [vmem:[#allocation3 + $0x258] sm:$0xff] %vm2648_vm5, %v9724_v57  ;;  %v9676_v39 = vpop.f32.mrb[130].mxu0  ;;  %v3014_v3 = vpop.f32.mrb[123].mxu1  ;;  %v4221_v62 = vld [vmem:[#allocation3 + $0x1fc] sm:$0xff]  ;;  %v4265_v57 = vsel %vm4248_vm7, %v4235_v0, 0.0 }
 0x36b   : > { %3136 = vst.msk [vmem:[#allocation3 + $0x248] sm:$0xff] %vm2648_vm5, %v3014_v3  ;;  %v2588_v52 = vpop.f32.mrb[131].mxu0  ;;  %v4250_v39 = vsel %vm4248_vm7, %v4234_v29, 0.0  ;;  %v4370_v3 = vsel %vm4353_vm9, %v4235_v0, 0.0  ;;  %v4237_v50 = vmul.f32 %v4221_v62, %v4221_v62  ;;  %v4194_v18 = vsel %vm4175_vm6, %v4164_v37, 0.0 }
 0x36c   : > { %2687 = vst.msk [vmem:[#allocation3 + $0x108] sm:$0xff] %vm2648_vm5, %v2588_v52  ;;  %v4397_v52 = vadd.f32 %v4396_v41, %v4395_v25  ;;  %v4251_v2 = vadd.f32 %v4250_v39, %v4249_v10  ;;  %v4371_v47 = vadd.f32 %v4370_v3, %v4369_v34  ;;  %v4269_v39 = vsel %vm4248_vm7, %v4239_v43, 0.0 }
 0x36d   : > { %v4267_v0 = vsel %vm4248_vm7, %v4237_v50, 0.0  ;;  %v4372_v17 = vsel %vm4353_vm9, %v4237_v50, 0.0 }
 0x36e   : > { %v4373_v3 = vadd.f32 %v4372_v17, %v4371_v47 }
 0x36f   : > { %v9727_v19 = vpop.f32.mrb[124].mxu1 }
 0x370   : > { %v3027_v28 = vpop.f32.mrb[125].mxu1  ;;  %v4236_v19 = vmul.f32 %v4220_v40, %v4220_v40 }
 0x371   : > { %3139 = vst.msk [vmem:[#allocation3 + $0x260] sm:$0xff] %vm2648_vm5, %v3027_v28  ;;  %v9728_v33 = vpop.f32.mrb[126].mxu1  ;;  %v4355_v28 = vsel %vm4353_vm9, %v4234_v29, 0.0 }
 0x372   : > { %3143 = vst.msk [vmem:[#allocation3 + $0x278] sm:$0xff] %vm2648_vm5, %v9728_v33  ;;  %v3030_v63 = vpop.f32.mrb[127].mxu1  ;;  %v4411_v33 = vsel %vm4394_vm8, %v4162_v61, 0.0  ;;  %v4356_v20 = vadd.f32 %v4355_v28, %v4354_v49  ;;  %v4252_v21 = vsel %vm4248_vm7, %v4236_v19, 0.0  ;;  %v4357_v32 = vsel %vm4353_vm9, %v4236_v19, 0.0  ;;  %v4151_v49 = vld [vmem:[#allocation3 + $0x250] sm:$0xff] }
 0x373   : > { %v4412_v35 = vadd.f32 %v4411_v33, %v4410_v9  ;;  %v4253_v54 = vadd.f32 %v4252_v21, %v4251_v2  ;;  %v4152_v9 = vld [vmem:[#allocation3 + $0x258] sm:$0xff]  ;;  %v4439_v62 = vld [vmem:[#allocation3 + $0x24c] sm:$0xff]  ;;  %v4167_v28 = vmul.f32 %v4151_v49, %v4151_v49 }
 0x374   : > { %v4168_v33 = vmul.f32 %v4152_v9, %v4152_v9  ;;  %v4447_v2 = vmul.f32 %v4439_v62, %v4439_v62 }
 0x376   : > { %v4417_v9 = vsel %vm4394_vm8, %v4168_v33, 0.0 }
 0x377   : > { %v9731_v42 = vpop.f32.mrb[128].mxu1 }
 0x378   : > { %3146 = vst.msk [vmem:[#allocation3 + $0x290] sm:$0xff] %vm2648_vm5, %v9731_v42  ;;  %v3043_v24 = vpop.f32.mrb[129].mxu1  ;;  %v4445_v42 = vmul.f32 %v4437_v11, %v4437_v11 }
 0x379   : > { %3144 = vst.msk [vmem:[#allocation3 + $0x280] sm:$0xff] %vm2648_vm5, %v3043_v24  ;;  %v9732_v59 = vpop.f32.mrb[130].mxu1  ;;  %v4179_v24 = vsel %vm4175_vm6, %v4163_v51, 0.0  ;;  %v4358_v51 = vadd.f32 %v4357_v32, %v4356_v20 }
 0x37a   : > { %v3046_v22 = vpop.f32.mrb[131].mxu1  ;;  %v4193_v59 = vadd.f32 %v4192_v12, %v4191_v27  ;;  %v4180_v14 = vadd.f32 %v4179_v24, %v4178_v4  ;;  %v4539_v61 = vsel %vm4248_vm7, %v4445_v42, 0.0  ;;  %v4165_v27 = vmul.f32 %v4149_v1, %v4149_v1  ;;  %v4224_v12 = vld [vmem:[#allocation3 + $0x254] sm:$0xff] }
 0x37b   : > { %3145 = vst.msk [vmem:[#allocation3 + $0x288] sm:$0xff] %vm2648_vm5, %v3046_v22  ;;  %v4453_v22 = vadd.f32 %v4452_v16, %v4451_v46  ;;  %v4454_v10 = vsel %vm4353_vm9, %v4445_v42, 0.0  ;;  %v4540_v46 = vadd.f32 %v4539_v61, %v4538_v5  ;;  %v4374_v42 = vsel %vm4353_vm9, %v4239_v43, 0.0 }
 0x37c   : > { %v4195_v29 = vadd.f32 %v4194_v18, %v4193_v59  ;;  %v4181_v34 = vsel %vm4175_vm6, %v4165_v27, 0.0  ;;  %v4400_v11 = vsel %vm4394_vm8, %v4165_v27, 0.0  ;;  %v4240_v1 = vmul.f32 %v4224_v12, %v4224_v12 }
 0x37d   : > { %v4375_v20 = vadd.f32 %v4374_v42, %v4373_v3  ;;  %v4543_v61 = vsel %vm4248_vm7, %v4447_v2, 0.0 }
 0x37e   : > { %v4256_v32 = vsel %vm4248_vm7, %v4240_v1, 0.0 }
 0x382   : > { %v4154_v21 = vld [vmem:[#allocation3 + $0x288] sm:$0xff] }
 0x383   : > { %v4226_v49 = vld [vmem:[#allocation3 + $0x284] sm:$0xff] }
 0x388   : > { %v9679_v6 = vpop.f32.mrb[132].mxu0 }
 0x389   : > { %2693 = vst.msk [vmem:[#allocation3 + $0x130] sm:$0xff] %vm2648_vm5, %v9679_v6  ;;  %v2601_v30 = vpop.f32.mrb[133].mxu0 }
 0x38a   : > { %v9680_v13 = vpop.f32.mrb[134].mxu0  ;;  %v4438_v30 = vld [vmem:[#allocation3 + $0x21c] sm:$0xff] }
 0x38b   : > { %2694 = vst.msk [vmem:[#allocation3 + $0x138] sm:$0xff] %vm2648_vm5, %v9680_v13  ;;  %v2604_v56 = vpop.f32.mrb[135].mxu0  ;;  %v4266_v13 = vadd.f32 %v4265_v57, %v4264_v15  ;;  %v4446_v25 = vmul.f32 %v4438_v30, %v4438_v30  ;;  %v4196_v57 = vsel %vm4175_vm6, %v4166_v36, 0.0  ;;  %v4225_v30 = vld [vmem:[#allocation3 + $0x25c] sm:$0xff] }
 0x38c   : > { %v4197_v60 = vadd.f32 %v4196_v57, %v4195_v29 }
 0x38d   : > { %v4541_v40 = vsel %vm4248_vm7, %v4446_v25, 0.0  ;;  %v4268_v4 = vadd.f32 %v4267_v0, %v4266_v13  ;;  %v4456_v5 = vsel %vm4353_vm9, %v4446_v25, 0.0  ;;  %v4440_v13 = vld [vmem:[#allocation3 + $0x27c] sm:$0xff] }
 0x38f   : > { %v4270_v18 = vadd.f32 %v4269_v39, %v4268_v4 }
 0x390   : > { %v9683_v31 = vpop.f32.mrb[136].mxu0 }
 0x391   : > { %v2617_v55 = vpop.f32.mrb[137].mxu0  ;;  %v4413_v31 = vsel %vm4394_vm8, %v4164_v37, 0.0 }
 0x392   : > { %v9684_v44 = vpop.f32.mrb[138].mxu0  ;;  %v4399_v55 = vadd.f32 %v4398_v45, %v4397_v52  ;;  %v4414_v41 = vadd.f32 %v4413_v31, %v4412_v35  ;;  %v4153_v45 = vld [vmem:[#allocation3 + $0x280] sm:$0xff]  ;;  %v4183_v35 = vsel %vm4175_vm6, %v4167_v28, 0.0 }
 0x393   : > { %v2620_v8 = vpop.f32.mrb[139].mxu0  ;;  %v4238_v44 = vmul.f32 %v4222_v26, %v4222_v26  ;;  %v4448_v26 = vmul.f32 %v4440_v13, %v4440_v13  ;;  %v4169_v27 = vmul.f32 %v4153_v45, %v4153_v45 }
 0x394   : > { %v4455_v8 = vadd.f32 %v4454_v10, %v4453_v22  ;;  %v4542_v22 = vadd.f32 %v4541_v40, %v4540_v46  ;;  %v4458_v10 = vsel %vm4353_vm9, %v4447_v2, 0.0 }
 0x395   : > { %v4185_v3 = vsel %vm4175_vm6, %v4169_v27, 0.0 }
 0x396   : > { %v4457_v47 = vadd.f32 %v4456_v5, %v4455_v8  ;;  %v4544_v12 = vadd.f32 %v4543_v61, %v4542_v22 }
 0x397   : > { %v9735_v63 = vpop.f32.mrb[132].mxu1 }
 0x398   : > { %3151 = vst.msk [vmem:[#allocation3 + $0x2b0] sm:$0xff] %vm2648_vm5, %v9735_v63  ;;  %v9687_v6 = vpop.f32.mrb[140].mxu0  ;;  %v3059_v7 = vpop.f32.mrb[133].mxu1  ;;  %v4254_v63 = vsel %vm4248_vm7, %v4238_v44, 0.0 }
 0x399   : > { %v2633_v56 = vpop.f32.mrb[141].mxu0  ;;  %v9736_v23 = vpop.f32.mrb[134].mxu1  ;;  %v4182_v6 = vadd.f32 %v4181_v34, %v4180_v14  ;;  %v4401_v7 = vadd.f32 %v4400_v11, %v4399_v55  ;;  %v4255_v58 = vadd.f32 %v4254_v63, %v4253_v54  ;;  %v4241_v14 = vmul.f32 %v4225_v30, %v4225_v30  ;;  %v4227_v55 = vld [vmem:[#allocation3 + $0x28c] sm:$0xff] }
 0x39a   : > { %2700 = vst.msk [vmem:[#allocation3 + $0x160] sm:$0xff] %vm2648_vm5, %v2633_v56  ;;  %3152 = vst.msk [vmem:[#allocation3 + $0x2b8] sm:$0xff] %vm2648_vm5, %v9736_v23  ;;  %v9688_v53 = vpop.f32.mrb[142].mxu0  ;;  %v3062_v48 = vpop.f32.mrb[135].mxu1  ;;  %v4359_v56 = vsel %vm4353_vm9, %v4238_v44, 0.0  ;;  %v4415_v23 = vsel %vm4394_vm8, %v4166_v36, 0.0  ;;  %v4243_v62 = vmul.f32 %v4227_v55, %v4227_v55 }
 0x39b   : > { %3150 = vst.msk [vmem:[#allocation3 + $0x2a8] sm:$0xff] %vm2648_vm5, %v3062_v48  ;;  %v2636_v38 = vpop.f32.mrb[143].mxu0  ;;  %v4402_v53 = vsel %vm4394_vm8, %v4167_v28, 0.0  ;;  %v4198_v48 = vsel %vm4175_vm6, %v4168_v33, 0.0  ;;  %v4360_v31 = vadd.f32 %v4359_v56, %v4358_v51  ;;  %v4361_v36 = vsel %vm4353_vm9, %v4240_v1, 0.0 }
 0x39c   : > { %2701 = vst.msk [vmem:[#allocation3 + $0x168] sm:$0xff] %vm2648_vm5, %v2636_v38  ;;  %v4416_v38 = vadd.f32 %v4415_v23, %v4414_v41  ;;  %v4184_v54 = vadd.f32 %v4183_v35, %v4182_v6  ;;  %v4403_v17 = vadd.f32 %v4402_v53, %v4401_v7  ;;  %v4199_v46 = vadd.f32 %v4198_v48, %v4197_v60 }
 0x39d   : > { %v4170_v41 = vmul.f32 %v4154_v21, %v4154_v21  ;;  %v11555_v40 = vadd.f32 %v4256_v32, %v4255_v58  ;;  %v4376_v34 = vsel %vm4353_vm9, %v4241_v14, 0.0  ;;  %v11566_v63 = vadd.f32 %v4361_v36, %v4360_v31 }
 0x39e   : > { %v4377_v33 = vadd.f32 %v4376_v34, %v4375_v20  ;;  %v11568_v42 = vadd.f32 %v4417_v9, %v4416_v38  ;;  %v4460_v6 = vsel %vm4353_vm9, %v4448_v26, 0.0  ;;  %v4186_v7 = vadd.f32 %v4185_v3, %v4184_v54 }
 0x39f   : > { %v9739_v15 = vpop.f32.mrb[136].mxu1  ;;  %v4155_v44 = vld [vmem:[#allocation3 + $0x2b0] sm:$0xff]  ;;  %v4200_v22 = vsel %vm4175_vm6, %v4170_v41, 0.0  ;;  %v4273_v1 = vsel %vm4248_vm7, %v4243_v62, 0.0  ;;  %v4378_v45 = vsel %vm4353_vm9, %v4243_v62, 0.0 }
 0x3a0   : > { %v3075_v16 = vpop.f32.mrb[137].mxu1  ;;  %v9755_v37 = vpop.f32.mrb[144].mxu0  ;;  %v4271_v15 = vsel %vm4248_vm7, %v4241_v14, 0.0  ;;  %v4171_v39 = vmul.f32 %v4155_v44, %v4155_v44  ;;  %v4201_v53 = vadd.f32 %v4200_v22, %v4199_v46 }
 0x3a1   : > { %3153 = vst.msk [vmem:[#allocation3 + $0x2c0] sm:$0xff] %vm2648_vm5, %v3075_v16  ;;  %3567 = vst.msk [vmem:[#allocation3 + $0x310] sm:$0xff] %vm2648_vm5, %v9755_v37  ;;  %v9740_v52 = vpop.f32.mrb[138].mxu1  ;;  %v3373_v19 = vpop.f32.mrb[145].mxu0  ;;  %v4545_v16 = vsel %vm4248_vm7, %v4448_v26, 0.0  ;;  %v4459_v37 = vadd.f32 %v4458_v10, %v4457_v47  ;;  %v4272_v28 = vadd.f32 %v4271_v15, %v4270_v18  ;;  %v4228_v56 = vld [vmem:[#allocation3 + $0x2b4] sm:$0xff]  ;;  %v11608_v15 = vadd.f32 %v4378_v45, %v4377_v33 }
 0x3a2   : > { %3157 = vst.msk [vmem:[#allocation3 + $0x2d8] sm:$0xff] %vm2648_vm5, %v9740_v52  ;;  %3565 = vst.msk [vmem:[#allocation3 + $0x300] sm:$0xff] %vm2648_vm5, %v3373_v19  ;;  %v3078_v24 = vpop.f32.mrb[139].mxu1  ;;  %v9756_v59 = vpop.f32.mrb[146].mxu0  ;;  %v4441_v29 = vld [vmem:[#allocation3 + $0x2ac] sm:$0xff]  ;;  %v4156_v52 = vld [vmem:[#allocation3 + $0x2b8] sm:$0xff]  ;;  %v4242_v19 = vmul.f32 %v4226_v49, %v4226_v49  ;;  %v4244_v44 = vmul.f32 %v4228_v56, %v4228_v56 }
 0x3a3   : > { %3568 = vst.msk [vmem:[#allocation3 + $0x318] sm:$0xff] %vm2648_vm5, %v9756_v59  ;;  %v3376_v50 = vpop.f32.mrb[147].mxu0  ;;  %v11562_v5 = vmul.f32 %v4441_v29, %v4441_v29  ;;  %v4546_v24 = vadd.f32 %v4545_v16, %v4544_v12  ;;  %v4404_v59 = vsel %vm4394_vm8, %v4169_v27, 0.0  ;;  %v11573_v30 = vmul.f32 %v4156_v52, %v4156_v52 }
 0x3a4   : > { %3566 = vst.msk [vmem:[#allocation3 + $0x308] sm:$0xff] %vm2648_vm5, %v3376_v50  ;;  %v11577_v50 = vsel %vm4394_vm8, %v4170_v41, 0.0  ;;  %v4187_v47 = vsel %vm4175_vm6, %v4171_v39, 0.0  ;;  %v4258_v23 = vsel %vm4248_vm7, %v4242_v19, 0.0  ;;  %v4405_v35 = vadd.f32 %v4404_v59, %v4403_v17 }
 0x3a5   : > { %v4547_v2 = vsel %vm4248_vm7, %v11562_v5, 0.0  ;;  %v11585_v48 = vadd.f32 %v4460_v6, %v4459_v37  ;;  %v4363_v26 = vsel %vm4353_vm9, %v4242_v19, 0.0  ;;  %v11593_v61 = vadd.f32 %v4273_v1, %v4272_v28 }
 0x3a6   : > { %v4548_v55 = vadd.f32 %v4547_v2, %v4546_v24  ;;  %v4188_v36 = vadd.f32 %v4187_v47, %v4186_v7  ;;  %v4259_v41 = vadd.f32 %v4258_v23, %v11555_v40  ;;  %v4420_v19 = vadd.f32 %v11577_v50, %v11568_v42 }
 0x3a7   : > { %v9743_v25 = vpop.f32.mrb[140].mxu1  ;;  %v4421_v28 = vsel %vm4394_vm8, %v11573_v30, 0.0 }
 0x3a8   : > { %3160 = vst.msk [vmem:[#allocation3 + $0x2f0] sm:$0xff] %vm2648_vm5, %v9743_v25  ;;  %v3091_v43 = vpop.f32.mrb[141].mxu1  ;;  %v9759_v0 = vpop.f32.mrb[148].mxu0  ;;  %v4229_v14 = vld [vmem:[#allocation3 + $0x2bc] sm:$0xff]  ;;  %v4406_v25 = vsel %vm4394_vm8, %v4171_v39, 0.0  ;;  %v4557_v16 = vld [vmem:[#allocation3 + $0x310] sm:$0xff]  ;;  %v4364_v39 = vadd.f32 %v4363_v26, %v11566_v63 }
 0x3a9   : > { %3158 = vst.msk [vmem:[#allocation3 + $0x2e0] sm:$0xff] %vm2648_vm5, %v3091_v43  ;;  %3572 = vst.msk [vmem:[#allocation3 + $0x330] sm:$0xff] %vm2648_vm5, %v9759_v0  ;;  %v9744_v8 = vpop.f32.mrb[142].mxu1  ;;  %v3389_v51 = vpop.f32.mrb[149].mxu0  ;;  %v4202_v0 = vsel %vm4175_vm6, %v11573_v30, 0.0  ;;  %v4245_v9 = vmul.f32 %v4229_v14, %v4229_v14  ;;  %v4407_v40 = vadd.f32 %v4406_v25, %v4405_v35  ;;  %v4573_v1 = vmul.f32 %v4557_v16, %v4557_v16 }
 0x3aa   : > { %3569 = vst.msk [vmem:[#allocation3 + $0x320] sm:$0xff] %vm2648_vm5, %v3389_v51  ;;  %v3094_v11 = vpop.f32.mrb[143].mxu1  ;;  %v9760_v4 = vpop.f32.mrb[150].mxu0  ;;  %v4203_v37 = vadd.f32 %v4202_v0, %v4201_v53  ;;  %v4558_v33 = vld [vmem:[#allocation3 + $0x318] sm:$0xff]  ;;  %v11642_v14 = vadd.f32 %v4421_v28, %v4420_v19 }
 0x3ab   : > { %3159 = vst.msk [vmem:[#allocation3 + $0x2e8] sm:$0xff] %vm2648_vm5, %v3094_v11  ;;  %3573 = vst.msk [vmem:[#allocation3 + $0x338] sm:$0xff] %vm2648_vm5, %v9760_v4  ;;  %v3392_v57 = vpop.f32.mrb[151].mxu0  ;;  %v4462_v4 = vsel %vm4353_vm9, %v11562_v5, 0.0  ;;  %v4275_v52 = vsel %vm4248_vm7, %v4245_v9, 0.0  ;;  %v4365_v5 = vsel %vm4353_vm9, %v4244_v44, 0.0 }
 0x3ac   : > { %3570 = vst.msk [vmem:[#allocation3 + $0x328] sm:$0xff] %vm2648_vm5, %v3392_v57  ;;  %v4260_v57 = vsel %vm4248_vm7, %v4244_v44, 0.0  ;;  %v4849_v24 = vld [vmem:[#allocation3 + $0x309] sm:$0xff]  ;;  %v4463_v63 = vadd.f32 %v4462_v4, %v11585_v48  ;;  %v4380_v56 = vsel %vm4353_vm9, %v4245_v9, 0.0  ;;  %v11640_v48 = vadd.f32 %v4365_v5, %v4364_v39 }
 0x3ad   : > { %v4261_v53 = vadd.f32 %v4260_v57, %v4259_v41  ;;  %v11647_v25 = vsel %vm4589_vm10, %v4573_v1, 0.0 }
 0x3af   : > { %v9811_v13 = vpop.f32.mrb[144].mxu1 }
 0x3b0   : > { %4025 = vst.msk [vmem:[#allocation3 + $0x490] sm:$0xff] %vm2648_vm5, %v9811_v13  ;;  %v9763_v60 = vpop.f32.mrb[152].mxu0  ;;  %v3831_v18 = vpop.f32.mrb[145].mxu1  ;;  %v4442_v58 = vld [vmem:[#allocation3 + $0x2dc] sm:$0xff] }
 0x3b1   : > { %v4157_v20 = vld [vmem:[#allocation3 + $0x2e0] sm:$0xff]  ;;  %3576 = vst.msk [vmem:[#allocation3 + $0x350] sm:$0xff] %vm2648_vm5, %v9763_v60  ;;  %4023 = vst.msk [vmem:[#allocation3 + $0x480] sm:$0xff] %vm2648_vm5, %v3831_v18  ;;  %v3405_v21 = vpop.f32.mrb[153].mxu0  ;;  %v9812_v32 = vpop.f32.mrb[146].mxu1  ;;  %v11590_v31 = vmul.f32 %v4442_v58, %v4442_v58  ;;  %v4630_v13 = vld [vmem:[#allocation3 + $0x317] sm:$0xff]  ;;  %v4276_v60 = vadd.f32 %v4275_v52, %v11593_v61  ;;  %v4574_v18 = vmul.f32 %v4558_v33, %v4558_v33 }
 0x3b2   : > { %v4173_v38 = vmul.f32 %v4157_v20, %v4157_v20  ;;  %3574 = vst.msk [vmem:[#allocation3 + $0x340] sm:$0xff] %vm2648_vm5, %v3405_v21  ;;  %4026 = vst.msk [vmem:[#allocation3 + $0x498] sm:$0xff] %vm2648_vm5, %v9812_v32  ;;  %v9764_v27 = vpop.f32.mrb[154].mxu0  ;;  %v3834_v10 = vpop.f32.mrb[147].mxu1  ;;  %v4158_v43 = vld [vmem:[#allocation3 + $0x2e8] sm:$0xff]  ;;  %v4865_v58 = vmul.f32 %v4849_v24, %v4849_v24  ;;  %v4850_v20 = vld [vmem:[#allocation3 + $0x311] sm:$0xff]  ;;  %v4646_v21 = vmul.f32 %v4630_v13, %v4630_v13 }
 0x3b3   : > { %v4231_v29 = vld [vmem:[#allocation3 + $0x2ec] sm:$0xff]  ;;  %3577 = vst.msk [vmem:[#allocation3 + $0x358] sm:$0xff] %vm2648_vm5, %v9764_v27  ;;  %4024 = vst.msk [vmem:[#allocation3 + $0x488] sm:$0xff] %vm2648_vm5, %v3834_v10  ;;  %v3408_v54 = vpop.f32.mrb[155].mxu0  ;;  %v4549_v17 = vsel %vm4248_vm7, %v11590_v31, 0.0  ;;  %v11604_v49 = vmul.f32 %v4158_v43, %v4158_v43  ;;  %v4230_v62 = vld [vmem:[#allocation3 + $0x2e4] sm:$0xff]  ;;  %v4866_v43 = vmul.f32 %v4850_v20, %v4850_v20 }
 0x3b4   : > { %v4189_v46 = vsel %vm4175_vm6, %v4173_v38, 0.0  ;;  %3575 = vst.msk [vmem:[#allocation3 + $0x348] sm:$0xff] %vm2648_vm5, %v3408_v54  ;;  %v4550_v8 = vadd.f32 %v4549_v17, %v4548_v55  ;;  %v4408_v34 = vsel %vm4394_vm8, %v4173_v38, 0.0  ;;  %v4247_v12 = vmul.f32 %v4231_v29, %v4231_v29  ;;  %v4631_v26 = vld [vmem:[#allocation3 + $0x31f] sm:$0xff] }
 0x3b5   : > { %v4190_v51 = vadd.f32 %v4189_v46, %v4188_v36  ;;  %v4204_v11 = vsel %vm4175_vm6, %v11604_v49, 0.0  ;;  %v4409_v6 = vadd.f32 %v4408_v34, %v4407_v40  ;;  %v4464_v30 = vsel %vm4353_vm9, %v11590_v31, 0.0 }
 0x3b6   : > { %4552 = vrot.lane.b32.xlu1 %v4550_v8, %s10221_s6  ;;  %v4205_v7 = vadd.f32 %v4204_v11, %v4203_v37  ;;  %v4277_v2 = vsel %vm4248_vm7, %v4247_v12, 0.0  ;;  %v4246_v47 = vmul.f32 %v4230_v62, %v4230_v62  ;;  %v4465_v32 = vadd.f32 %v4464_v30, %v4463_v63 }
 0x3b7   : > { %4208 = vrot.lane.b32.xlu0 %v4190_v51, %s10222_s8  ;;  %v9815_v3 = vpop.f32.mrb[148].mxu1  ;;  %v4278_v31 = vadd.f32 %v4277_v2, %v4276_v60  ;;  %v4381_v38 = vadd.f32 %v4380_v56, %v11608_v15  ;;  %v4382_v27 = vsel %vm4353_vm9, %v4247_v12, 0.0  ;;  %v11652_v55 = vsel %vm4808_vm11, %v4573_v1, 0.0  ;;  %v5025_v9 = vld [vmem:[#allocation3 + $0x490] sm:$0xff] }
 0x3b8   : > { %4030 = vst.msk [vmem:[#allocation3 + $0x4b0] sm:$0xff] %vm2648_vm5, %v9815_v3  ;;  %v9767_v59 = vpop.f32.mrb[156].mxu0  ;;  %v3847_v22 = vpop.f32.mrb[149].mxu1  ;;  %v4262_v61 = vsel %vm4248_vm7, %v4246_v47, 0.0  ;;  %v11657_v29 = vsel %vm4589_vm10, %v4574_v18, 0.0  ;;  %v4647_v54 = vmul.f32 %v4631_v26, %v4631_v26  ;;  %v11660_v17 = vsel %vm4767_vm12, %v4865_v58, 0.0 }
 0x3b9   : > { %3581 = vst.msk [vmem:[#allocation3 + $0x370] sm:$0xff] %vm2648_vm5, %v9767_v59  ;;  %4027 = vst.msk [vmem:[#allocation3 + $0x4a0] sm:$0xff] %vm2648_vm5, %v3847_v22  ;;  %v3421_v42 = vpop.f32.mrb[157].mxu0  ;;  %v9816_v50 = vpop.f32.mrb[150].mxu1  ;;  %v4559_v10 = vld [vmem:[#allocation3 + $0x340] sm:$0xff]  ;;  %v11663_v46 = vsel %vm4808_vm11, %v4574_v18, 0.0  ;;  %v4263_v12 = vadd.f32 %v4262_v61, %v4261_v53  ;;  %v4383_v16 = vadd.f32 %v4382_v27, %v4381_v38  ;;  %v5041_v19 = vmul.f32 %v5025_v9, %v5025_v9 }
 0x3ba   : > { %3579 = vst.msk [vmem:[#allocation3 + $0x360] sm:$0xff] %vm2648_vm5, %v3421_v42  ;;  %4031 = vst.msk [vmem:[#allocation3 + $0x4b8] sm:$0xff] %vm2648_vm5, %v9816_v50  ;;  %4210 = vrot.lane.b32.xlu1 %v4205_v7, %s10222_s8  ;;  %v9768_v23 = vpop.f32.mrb[158].mxu0  ;;  %v3850_v45 = vpop.f32.mrb[151].mxu1  ;;  %v4851_v36 = vld [vmem:[#allocation3 + $0x339] sm:$0xff]  ;;  %v4367_v51 = vsel %vm4353_vm9, %v4246_v47, 0.0  ;;  %v4575_v40 = vmul.f32 %v4559_v10, %v4559_v10 }
 0x3bb   : > { %4427 = vrot.lane.b32.xlu0 %v4409_v6, %s10223_s26  ;;  %3582 = vst.msk [vmem:[#allocation3 + $0x378] sm:$0xff] %vm2648_vm5, %v9768_v23  ;;  %4028 = vst.msk [vmem:[#allocation3 + $0x4a8] sm:$0xff] %vm2648_vm5, %v3850_v45  ;;  %v3424_v35 = vpop.f32.mrb[159].mxu0  ;;  %v4560_v0 = vld [vmem:[#allocation3 + $0x348] sm:$0xff]  ;;  %v4423_v41 = vsel %vm4394_vm8, %v11604_v49, 0.0  ;;  %v11669_v15 = vsel %vm4662_vm13, %v4865_v58, 0.0  ;;  %v4867_v37 = vmul.f32 %v4851_v36, %v4851_v36  ;;  %v4368_v63 = vadd.f32 %v4367_v51, %v11640_v48 }
 0x3bc   : > { %3580 = vst.msk [vmem:[#allocation3 + $0x368] sm:$0xff] %vm2648_vm5, %v3424_v35  ;;  %v4633_v44 = vld [vmem:[#allocation3 + $0x34f] sm:$0xff]  ;;  %v11672_v34 = vsel %vm4662_vm13, %v4646_v21, 0.0  ;;  %v5026_v62 = vld [vmem:[#allocation3 + $0x498] sm:$0xff]  ;;  %v4576_v39 = vmul.f32 %v4560_v0, %v4560_v0  ;;  %v11678_v52 = vsel %vm4767_vm12, %v4866_v43, 0.0  ;;  %v5317_v5 = vld [vmem:[#allocation3 + $0x485] sm:$0xff]  ;;  %v4424_v1 = vadd.f32 %v4423_v41, %v11642_v14 }
 0x3bd   : > { %v4649_v3 = vmul.f32 %v4633_v44, %v4633_v44  ;;  %v4678_v24 = vsel %vm4662_vm13, %v4647_v54, 0.0  ;;  %v11686_v59 = vsel %vm4767_vm12, %v4646_v21, 0.0  ;;  %v11689_v22 = vsel %vm4662_vm13, %v4866_v43, 0.0  ;;  %v5318_v6 = vld [vmem:[#allocation3 + $0x48d] sm:$0xff]  ;;  %v4852_v26 = vld [vmem:[#allocation3 + $0x341] sm:$0xff] }
 0x3be   : > { %4283 = vrot.lane.b32.xlu1 %v4278_v31, %s10221_s6  ;;  %v4783_v42 = vsel %vm4767_vm12, %v4647_v54, 0.0  ;;  %v11696_v50 = vmul.f32 %v5026_v62, %v5026_v62  ;;  %v4591_v30 = vsel %vm4589_vm10, %v4575_v40, 0.0  ;;  %v4810_v2 = vsel %vm4808_vm11, %v4575_v40, 0.0  ;;  %v4632_v56 = vld [vmem:[#allocation3 + $0x347] sm:$0xff] }
 0x3bf   : > { %4467 = vrot.lane.b32.xlu0 %v4465_v32, %s10224_s30  ;;  %v9819_v8 = vpop.f32.mrb[152].mxu1  ;;  %v4882_v47 = vsel %vm4767_vm12, %v4867_v37, 0.0  ;;  %v5333_v23 = vmul.f32 %v5317_v5, %v5317_v5  ;;  %v4606_v60 = vsel %vm4589_vm10, %v4576_v39, 0.0  ;;  %v4679_v18 = vsel %vm4662_vm13, %v4649_v3, 0.0 }
 0x3c0   : > { %4034 = vst.msk [vmem:[#allocation3 + $0x4d0] sm:$0xff] %vm2648_vm5, %v9819_v8  ;;  %v9771_v11 = vpop.f32.mrb[160].mxu0  ;;  %v3863_v4 = vpop.f32.mrb[153].mxu1  ;;  %v4561_v13 = vld [vmem:[#allocation3 + $0x370] sm:$0xff]  ;;  %v11704_v58 = vmul.f32 %v5318_v6, %v5318_v6  ;;  %v11707_v20 = vsel %vm5057_vm14, %v5041_v19, 0.0  ;;  %v4784_v48 = vsel %vm4767_vm12, %v4649_v3, 0.0  ;;  %v4592_v31 = vadd.f32 %v4591_v30, %v11647_v25 }
 0x3c1   : > { %3586 = vst.msk [vmem:[#allocation3 + $0x390] sm:$0xff] %vm2648_vm5, %v9771_v11  ;;  %4032 = vst.msk [vmem:[#allocation3 + $0x4c0] sm:$0xff] %vm2648_vm5, %v3863_v4  ;;  %v3437_v49 = vpop.f32.mrb[161].mxu0  ;;  %v9820_v57 = vpop.f32.mrb[154].mxu1  ;;  %v4577_v35 = vmul.f32 %v4561_v13, %v4561_v13  ;;  %v4986_v14 = vsel %vm4662_vm13, %v4867_v37, 0.0  ;;  %v11714_v21 = vsel %vm5276_vm15, %v5041_v19, 0.0  ;;  %v4811_v38 = vadd.f32 %v4810_v2, %v11652_v55 }
 0x3c2   : > { %3583 = vst.msk [vmem:[#allocation3 + $0x380] sm:$0xff] %vm2648_vm5, %v3437_v49  ;;  %4035 = vst.msk [vmem:[#allocation3 + $0x4d8] sm:$0xff] %vm2648_vm5, %v9820_v57  ;;  %4388 = vrot.lane.b32.xlu1 %v4383_v16, %s10224_s30  ;;  %v9772_v28 = vpop.f32.mrb[162].mxu0  ;;  %v3866_v33 = vpop.f32.mrb[155].mxu1  ;;  %v4562_v45 = vld [vmem:[#allocation3 + $0x378] sm:$0xff]  ;;  %v4883_v61 = vadd.f32 %v4882_v47, %v11660_v17  ;;  %v4648_v10 = vmul.f32 %v4632_v56, %v4632_v56  ;;  %v4607_v44 = vadd.f32 %v4606_v60, %v11657_v29 }
 0x3c3   : > { %4281 = vrot.lane.b32.xlu0 %v4263_v12, %s10221_s6  ;;  %3587 = vst.msk [vmem:[#allocation3 + $0x398] sm:$0xff] %vm2648_vm5, %v9772_v28  ;;  %4033 = vst.msk [vmem:[#allocation3 + $0x4c8] sm:$0xff] %vm2648_vm5, %v3866_v33  ;;  %v3440_v7 = vpop.f32.mrb[163].mxu0  ;;  %v4853_v53 = vld [vmem:[#allocation3 + $0x369] sm:$0xff]  ;;  %v4634_v27 = vld [vmem:[#allocation3 + $0x377] sm:$0xff]  ;;  %v4578_v0 = vmul.f32 %v4562_v45, %v4562_v45  ;;  %v11721_v54 = vadd.f32 %v4679_v18, %v4678_v24  ;;  %v4825_v9 = vsel %vm4808_vm11, %v4576_v39, 0.0 }
 0x3c4   : > { %3584 = vst.msk [vmem:[#allocation3 + $0x388] sm:$0xff] %vm2648_vm5, %v3440_v7  ;;  %v4869_v17 = vmul.f32 %v4853_v53, %v4853_v53  ;;  %v11726_v8 = vadd.f32 %v4784_v48, %v4783_v42  ;;  %v4987_v51 = vadd.f32 %v4986_v14, %v11669_v15  ;;  %v4854_v41 = vld [vmem:[#allocation3 + $0x371] sm:$0xff]  ;;  %v4868_v11 = vmul.f32 %v4852_v26, %v4852_v26  ;;  %v5098_v49 = vld [vmem:[#allocation3 + $0x49b] sm:$0xff] }
 0x3c5   : > { %v5319_v4 = vld [vmem:[#allocation3 + $0x4b5] sm:$0xff]  ;;  %v4593_v16 = vsel %vm4589_vm10, %v4577_v35, 0.0  ;;  %v4812_v40 = vsel %vm4808_vm11, %v4577_v35, 0.0  ;;  %v4650_v37 = vmul.f32 %v4634_v27, %v4634_v27  ;;  %v11734_v62 = vsel %vm5235_vm0, %v5333_v23, 0.0 }
 0x3c6   : > { %4429 = vrot.lane.b32.xlu1 %v4424_v1, %s10223_s26  ;;  %v4826_v57 = vadd.f32 %v4825_v9, %v11663_v46  ;;  %v4664_v39 = vsel %vm4662_vm13, %v4648_v10, 0.0  ;;  %v11742_v3 = vsel %vm5235_vm0, %v11704_v58, 0.0  ;;  %v11745_v5 = vsel %vm5130_vm1, %v5333_v23, 0.0 }
 0x3c7   : > { %4386 = vrot.lane.b32.xlu0 %v4368_v63, %s10224_s30  ;;  %v9823_v32 = vpop.f32.mrb[156].mxu1  ;;  %v4608_v19 = vsel %vm4589_vm10, %v4578_v0, 0.0  ;;  %v4827_v33 = vsel %vm4808_vm11, %v4578_v0, 0.0  ;;  %v4870_v24 = vmul.f32 %v4854_v41, %v4854_v41  ;;  %v5335_v6 = vmul.f32 %v5319_v4, %v5319_v4 }
 0x3c8   : > { %4039 = vst.msk [vmem:[#allocation3 + $0x4f0] sm:$0xff] %vm2648_vm5, %v9823_v32  ;;  %v9775_v36 = vpop.f32.mrb[164].mxu0  ;;  %v3879_v43 = vpop.f32.mrb[157].mxu1  ;;  %v11750_v7 = vadd.f32 %v4593_v16, %v4592_v31  ;;  %v11752_v46 = vadd.f32 %v4812_v40, %v4811_v38  ;;  %v4884_v63 = vsel %vm4767_vm12, %v4869_v17, 0.0  ;;  %v5320_v1 = vld [vmem:[#allocation3 + $0x4bd] sm:$0xff]  ;;  %v11755_v13 = vmul.f32 %v5098_v49, %v5098_v49 }
 0x3c9   : > { %3590 = vst.msk [vmem:[#allocation3 + $0x3b0] sm:$0xff] %vm2648_vm5, %v9775_v36  ;;  %4037 = vst.msk [vmem:[#allocation3 + $0x4e0] sm:$0xff] %vm2648_vm5, %v3879_v43  ;;  %v3453_v25 = vpop.f32.mrb[165].mxu0  ;;  %v9824_v55 = vpop.f32.mrb[158].mxu1  ;;  %v4635_v28 = vld [vmem:[#allocation3 + $0x37f] sm:$0xff]  ;;  %v4988_v42 = vsel %vm4662_vm13, %v4869_v17, 0.0  ;;  %v4665_v30 = vadd.f32 %v4664_v39, %v11672_v34  ;;  %v11761_v23 = vadd.f32 %v4608_v19, %v4607_v44  ;;  %v11763_v60 = vadd.f32 %v4827_v33, %v4826_v57 }
 0x3ca   : > { %3588 = vst.msk [vmem:[#allocation3 + $0x3a0] sm:$0xff] %vm2648_vm5, %v3453_v25  ;;  %4040 = vst.msk [vmem:[#allocation3 + $0x4f8] sm:$0xff] %vm2648_vm5, %v9824_v55  ;;  %v9776_v29 = vpop.f32.mrb[166].mxu0  ;;  %v3882_v12 = vpop.f32.mrb[159].mxu1  ;;  %v4666_v2 = vsel %vm4662_vm13, %v4650_v37, 0.0  ;;  %v4897_v47 = vsel %vm4767_vm12, %v4868_v11, 0.0  ;;  %v4651_v45 = vmul.f32 %v4635_v28, %v4635_v28  ;;  %v11767_v48 = vadd.f32 %v4884_v63, %v4883_v61 }
 0x3cb   : > { %3591 = vst.msk [vmem:[#allocation3 + $0x3b8] sm:$0xff] %vm2648_vm5, %v9776_v29  ;;  %4038 = vst.msk [vmem:[#allocation3 + $0x4e8] sm:$0xff] %vm2648_vm5, %v3882_v12  ;;  %v3456_v15 = vpop.f32.mrb[167].mxu0  ;;  %v4769_v18 = vsel %vm4767_vm12, %v4648_v10, 0.0  ;;  %v4899_v34 = vsel %vm4767_vm12, %v4870_v24, 0.0  ;;  %v5001_v14 = vsel %vm4662_vm13, %v4868_v11, 0.0  ;;  %v5336_v26 = vmul.f32 %v5320_v1, %v5320_v1 }
 0x3cc   : > { %3589 = vst.msk [vmem:[#allocation3 + $0x3a8] sm:$0xff] %vm2648_vm5, %v3456_v15  ;;  %v5027_v32 = vld [vmem:[#allocation3 + $0x4c0] sm:$0xff]  ;;  %v11773_v27 = vadd.f32 %v4988_v42, %v4987_v51  ;;  %v11775_v10 = vadd.f32 %v4666_v2, %v4665_v30  ;;  %v4898_v36 = vadd.f32 %v4897_v47, %v11678_v52  ;;  %v5350_v61 = vsel %vm5235_vm0, %v5335_v6, 0.0  ;;  %v5101_v43 = vld [vmem:[#allocation3 + $0x4d3] sm:$0xff]  ;;  %v5100_v1 = vld [vmem:[#allocation3 + $0x4cb] sm:$0xff] }
 0x3cd   : > { %v4770_v9 = vadd.f32 %v4769_v18, %v11686_v59  ;;  %v4771_v25 = vsel %vm4767_vm12, %v4650_v37, 0.0  ;;  %v5003_v55 = vsel %vm4662_vm13, %v4870_v24, 0.0  ;;  %v5454_v17 = vsel %vm5130_vm1, %v5335_v6, 0.0  ;;  %v5099_v59 = vld [vmem:[#allocation3 + $0x4a3] sm:$0xff] }
 0x3ce   : > { %v4681_v51 = vsel %vm4662_vm13, %v4651_v45, 0.0  ;;  %v11788_v41 = vadd.f32 %v4899_v34, %v4898_v36  ;;  %v5002_v11 = vadd.f32 %v5001_v14, %v11689_v22  ;;  %v5043_v29 = vmul.f32 %v5027_v32, %v5027_v32 }
 0x3cf   : > { %v9827_v56 = vpop.f32.mrb[160].mxu1  ;;  %v5029_v4 = vld [vmem:[#allocation3 + $0x4f0] sm:$0xff]  ;;  %v4786_v16 = vsel %vm4767_vm12, %v4651_v45, 0.0  ;;  %v11794_v40 = vadd.f32 %v5350_v61, %v11734_v62  ;;  %v5365_v37 = vsel %vm5235_vm0, %v5336_v26, 0.0  ;;  %v11797_v49 = vmul.f32 %v5101_v43, %v5101_v43 }
 0x3d0   : > { %4044 = vst.msk [vmem:[#allocation3 + $0x510] sm:$0xff] %vm2648_vm5, %v9827_v56  ;;  %v9779_v35 = vpop.f32.mrb[168].mxu0  ;;  %v3895_v53 = vpop.f32.mrb[161].mxu1  ;;  %v11799_v39 = vadd.f32 %v4771_v25, %v4770_v9  ;;  %v11801_v22 = vadd.f32 %v5003_v55, %v5002_v11  ;;  %v11804_v19 = vadd.f32 %v5454_v17, %v11745_v5  ;;  %v5468_v28 = vsel %vm5130_vm1, %v11704_v58, 0.0  ;;  %v5028_v58 = vld [vmem:[#allocation3 + $0x4c8] sm:$0xff] }
 0x3d1   : > { %3595 = vst.msk [vmem:[#allocation3 + $0x3d0] sm:$0xff] %vm2648_vm5, %v9779_v35  ;;  %4041 = vst.msk [vmem:[#allocation3 + $0x500] sm:$0xff] %vm2648_vm5, %v3895_v53  ;;  %v3469_v31 = vpop.f32.mrb[169].mxu0  ;;  %v9828_v38 = vpop.f32.mrb[162].mxu1  ;;  %v4563_v12 = vld [vmem:[#allocation3 + $0x3a0] sm:$0xff]  ;;  %v11809_v62 = vadd.f32 %v4681_v51, %v11721_v54  ;;  %v5469_v24 = vsel %vm5130_vm1, %v5336_v26, 0.0  ;;  %v5045_v6 = vmul.f32 %v5029_v4, %v5029_v4  ;;  %v5115_v63 = vmul.f32 %v5099_v59, %v5099_v59 }
 0x3d2   : > { %3593 = vst.msk [vmem:[#allocation3 + $0x3c0] sm:$0xff] %vm2648_vm5, %v3469_v31  ;;  %4045 = vst.msk [vmem:[#allocation3 + $0x518] sm:$0xff] %vm2648_vm5, %v9828_v38  ;;  %v9780_v0 = vpop.f32.mrb[170].mxu0  ;;  %v3898_v44 = vpop.f32.mrb[163].mxu1  ;;  %v4855_v57 = vld [vmem:[#allocation3 + $0x399] sm:$0xff]  ;;  %v4579_v30 = vmul.f32 %v4563_v12, %v4563_v12  ;;  %v11813_v2 = vadd.f32 %v4786_v16, %v11726_v8  ;;  %v11816_v5 = vadd.f32 %v5365_v37, %v11742_v3  ;;  %v5059_v47 = vsel %vm5057_vm14, %v5043_v29, 0.0 }
 0x3d3   : > { %3596 = vst.msk [vmem:[#allocation3 + $0x3d8] sm:$0xff] %vm2648_vm5, %v9780_v0  ;;  %4042 = vst.msk [vmem:[#allocation3 + $0x508] sm:$0xff] %vm2648_vm5, %v3898_v44  ;;  %v3472_v52 = vpop.f32.mrb[171].mxu0  ;;  %v4564_v15 = vld [vmem:[#allocation3 + $0x3a8] sm:$0xff]  ;;  %v4871_v18 = vmul.f32 %v4855_v57, %v4855_v57  ;;  %v5147_v35 = vsel %vm5130_vm1, %v11797_v49, 0.0  ;;  %v5278_v53 = vsel %vm5276_vm15, %v5043_v29, 0.0  ;;  %v11825_v26 = vadd.f32 %v5469_v24, %v5468_v28 }
 0x3d4   : > { %3594 = vst.msk [vmem:[#allocation3 + $0x3c8] sm:$0xff] %vm2648_vm5, %v3472_v52  ;;  %v4637_v33 = vld [vmem:[#allocation3 + $0x3af] sm:$0xff]  ;;  %v4580_v45 = vmul.f32 %v4564_v15, %v4564_v15  ;;  %v5321_v14 = vld [vmem:[#allocation3 + $0x4e5] sm:$0xff]  ;;  %v11827_v32 = vmul.f32 %v5100_v1, %v5100_v1  ;;  %v11831_v31 = vsel %vm5130_vm1, %v11755_v13, 0.0  ;;  %v5060_v0 = vadd.f32 %v5059_v47, %v11707_v20 }
 0x3d5   : > { %v4653_v34 = vmul.f32 %v4637_v33, %v4637_v33  ;;  %v4636_v61 = vld [vmem:[#allocation3 + $0x3a7] sm:$0xff]  ;;  %v5061_v44 = vsel %vm5057_vm14, %v5045_v6, 0.0  ;;  %v5146_v9 = vsel %vm5130_vm1, %v5115_v63, 0.0  ;;  %v11838_v25 = vmul.f32 %v5028_v58, %v5028_v58 }
 0x3d6   : > { %v5322_v43 = vld [vmem:[#allocation3 + $0x4ed] sm:$0xff]  ;;  %v4595_v52 = vsel %vm4589_vm10, %v4579_v30, 0.0  ;;  %v11843_v51 = vadd.f32 %v5147_v35, %v5146_v9  ;;  %v11846_v11 = vadd.f32 %v5278_v53, %v11714_v21  ;;  %v11849_v20 = vsel %vm5235_vm0, %v5115_v63, 0.0  ;;  %v4856_v63 = vld [vmem:[#allocation3 + $0x3a1] sm:$0xff] }
 0x3d7   : > { %v9831_v42 = vpop.f32.mrb[164].mxu1  ;;  %v4610_v4 = vsel %vm4589_vm10, %v4580_v45, 0.0  ;;  %v4814_v29 = vsel %vm4808_vm11, %v4579_v30, 0.0  ;;  %v4886_v59 = vsel %vm4767_vm12, %v4871_v18, 0.0  ;;  %v11855_v12 = vmul.f32 %v5321_v14, %v5321_v14 }
 0x3d8   : > { %4048 = vst.msk [vmem:[#allocation3 + $0x530] sm:$0xff] %vm2648_vm5, %v9831_v42  ;;  %v9783_v54 = vpop.f32.mrb[172].mxu0  ;;  %v3911_v56 = vpop.f32.mrb[165].mxu1  ;;  %v4565_v17 = vld [vmem:[#allocation3 + $0x3d0] sm:$0xff]  ;;  %v4683_v37 = vsel %vm4662_vm13, %v4653_v34, 0.0  ;;  %v4652_v15 = vmul.f32 %v4636_v61, %v4636_v61  ;;  %v11858_v57 = vmul.f32 %v5322_v43, %v5322_v43  ;;  %v11860_v21 = vadd.f32 %v5061_v44, %v5060_v0 }
 0x3d9   : > { %3600 = vst.msk [vmem:[#allocation3 + $0x3f0] sm:$0xff] %vm2648_vm5, %v9783_v54  ;;  %4046 = vst.msk [vmem:[#allocation3 + $0x520] sm:$0xff] %vm2648_vm5, %v3911_v56  ;;  %v3485_v8 = vpop.f32.mrb[173].mxu0  ;;  %v9832_v3 = vpop.f32.mrb[166].mxu1  ;;  %v4581_v28 = vmul.f32 %v4565_v17, %v4565_v17  ;;  %v4596_v33 = vadd.f32 %v4595_v52, %v11750_v7  ;;  %v4788_v24 = vsel %vm4767_vm12, %v4653_v34, 0.0  ;;  %v5280_v1 = vsel %vm5276_vm15, %v5045_v6, 0.0 }
 0x3da   : > { %3597 = vst.msk [vmem:[#allocation3 + $0x3e0] sm:$0xff] %vm2648_vm5, %v3485_v8  ;;  %4049 = vst.msk [vmem:[#allocation3 + $0x538] sm:$0xff] %vm2648_vm5, %v9832_v3  ;;  %v9784_v38 = vpop.f32.mrb[174].mxu0  ;;  %v3914_v36 = vpop.f32.mrb[167].mxu1  ;;  %v4566_v16 = vld [vmem:[#allocation3 + $0x3d8] sm:$0xff]  ;;  %v4611_v30 = vadd.f32 %v4610_v4, %v11761_v23  ;;  %v4815_v47 = vadd.f32 %v4814_v29, %v11752_v46  ;;  %v11868_v54 = vadd.f32 %v4886_v59, %v11767_v48  ;;  %v4990_v56 = vsel %vm4662_vm13, %v4871_v18, 0.0 }
 0x3db   : > { %3601 = vst.msk [vmem:[#allocation3 + $0x3f8] sm:$0xff] %vm2648_vm5, %v9784_v38  ;;  %4047 = vst.msk [vmem:[#allocation3 + $0x528] sm:$0xff] %vm2648_vm5, %v3914_v36  ;;  %v3488_v55 = vpop.f32.mrb[175].mxu0  ;;  %v4857_v58 = vld [vmem:[#allocation3 + $0x3c9] sm:$0xff]  ;;  %v4638_v35 = vld [vmem:[#allocation3 + $0x3d7] sm:$0xff]  ;;  %v4582_v8 = vmul.f32 %v4566_v16, %v4566_v16  ;;  %v11873_v3 = vadd.f32 %v4683_v37, %v11809_v62  ;;  %v4829_v6 = vsel %vm4808_vm11, %v4580_v45, 0.0  ;;  %v11881_v34 = vadd.f32 %v4788_v24, %v11813_v2 }
 0x3dc   : > { %3598 = vst.msk [vmem:[#allocation3 + $0x3e8] sm:$0xff] %vm2648_vm5, %v3488_v55  ;;  %v4858_v23 = vld [vmem:[#allocation3 + $0x3d1] sm:$0xff]  ;;  %v5352_v46 = vsel %vm5235_vm0, %v11855_v12, 0.0  ;;  %v4668_v14 = vsel %vm4662_vm13, %v4652_v15, 0.0  ;;  %v4872_v38 = vmul.f32 %v4856_v63, %v4856_v63  ;;  %v5367_v45 = vsel %vm5235_vm0, %v11858_v57, 0.0 }
 0x3dd   : > { %v5323_v62 = vld [vmem:[#allocation3 + $0x515] sm:$0xff]  ;;  %v4597_v43 = vsel %vm4589_vm10, %v4581_v28, 0.0  ;;  %v4816_v0 = vsel %vm4808_vm11, %v4581_v28, 0.0  ;;  %v4873_v44 = vmul.f32 %v4857_v58, %v4857_v58  ;;  %v4654_v2 = vmul.f32 %v4638_v35, %v4638_v35 }
 0x3de   : > { %v4991_v55 = vadd.f32 %v4990_v56, %v11773_v27  ;;  %v4830_v17 = vadd.f32 %v4829_v6, %v11763_v60  ;;  %v4874_v52 = vmul.f32 %v4858_v23, %v4858_v23  ;;  %v5353_v4 = vadd.f32 %v5352_v46, %v11794_v40 }
 0x3df   : > { %v9835_v42 = vpop.f32.mrb[168].mxu1  ;;  %v4612_v29 = vsel %vm4589_vm10, %v4582_v8, 0.0  ;;  %v4831_v59 = vsel %vm4808_vm11, %v4582_v8, 0.0  ;;  %v5339_v16 = vmul.f32 %v5323_v62, %v5323_v62  ;;  %v11899_v37 = vadd.f32 %v5367_v45, %v11816_v5 }
 0x3e0   : > { %4053 = vst.msk [vmem:[#allocation3 + $0x550] sm:$0xff] %vm2648_vm5, %v9835_v42  ;;  %v9787_v7 = vpop.f32.mrb[176].mxu0  ;;  %v3927_v53 = vpop.f32.mrb[169].mxu1  ;;  %v11901_v28 = vadd.f32 %v4597_v43, %v4596_v33  ;;  %v11903_v24 = vadd.f32 %v4816_v0, %v4815_v47  ;;  %v4669_v60 = vadd.f32 %v4668_v14, %v11775_v10  ;;  %v11907_v63 = vadd.f32 %v5280_v1, %v11846_v11  ;;  %v5324_v5 = vld [vmem:[#allocation3 + $0x51d] sm:$0xff] }
 0x3e1   : > { %3604 = vst.msk [vmem:[#allocation3 + $0x410] sm:$0xff] %vm2648_vm5, %v9787_v7  ;;  %4051 = vst.msk [vmem:[#allocation3 + $0x540] sm:$0xff] %vm2648_vm5, %v3927_v53  ;;  %v3501_v48 = vpop.f32.mrb[177].mxu0  ;;  %v9836_v18 = vpop.f32.mrb[170].mxu1  ;;  %v4639_v27 = vld [vmem:[#allocation3 + $0x3df] sm:$0xff]  ;;  %v4888_v40 = vsel %vm4767_vm12, %v4873_v44, 0.0  ;;  %v11913_v33 = vadd.f32 %v4612_v29, %v4611_v30  ;;  %v11916_v7 = vadd.f32 %v4831_v59, %v4830_v17  ;;  %v5340_v14 = vmul.f32 %v5324_v5, %v5324_v5 }
 0x3e2   : > { %3602 = vst.msk [vmem:[#allocation3 + $0x400] sm:$0xff] %vm2648_vm5, %v3501_v48  ;;  %4054 = vst.msk [vmem:[#allocation3 + $0x558] sm:$0xff] %vm2648_vm5, %v9836_v18  ;;  %v9788_v36 = vpop.f32.mrb[178].mxu0  ;;  %v3930_v61 = vpop.f32.mrb[171].mxu1  ;;  %v4670_v42 = vsel %vm4662_vm13, %v4654_v2, 0.0  ;;  %v4901_v58 = vsel %vm4767_vm12, %v4872_v38, 0.0  ;;  %v4655_v53 = vmul.f32 %v4639_v27, %v4639_v27  ;;  %v11926_v46 = vadd.f32 %v4888_v40, %v11868_v54 }
 0x3e3   : > { %3605 = vst.msk [vmem:[#allocation3 + $0x418] sm:$0xff] %vm2648_vm5, %v9788_v36  ;;  %4052 = vst.msk [vmem:[#allocation3 + $0x548] sm:$0xff] %vm2648_vm5, %v3930_v61  ;;  %v3504_v9 = vpop.f32.mrb[179].mxu0  ;;  %v4773_v56 = vsel %vm4767_vm12, %v4652_v15, 0.0  ;;  %v4992_v47 = vsel %vm4662_vm13, %v4873_v44, 0.0  ;;  %v4903_v10 = vsel %vm4767_vm12, %v4874_v52, 0.0  ;;  %v4902_v48 = vadd.f32 %v4901_v58, %v11788_v41 }
 0x3e4   : > { %3603 = vst.msk [vmem:[#allocation3 + $0x408] sm:$0xff] %vm2648_vm5, %v3504_v9  ;;  %v4775_v8 = vsel %vm4767_vm12, %v4654_v2, 0.0  ;;  %v5005_v6 = vsel %vm4662_vm13, %v4872_v38, 0.0  ;;  %v5354_v15 = vsel %vm5235_vm0, %v5339_v16, 0.0  ;;  %v4774_v18 = vadd.f32 %v4773_v56, %v11799_v39  ;;  %v5031_v62 = vld [vmem:[#allocation3 + $0x520] sm:$0xff]  ;;  %v5105_v5 = vld [vmem:[#allocation3 + $0x533] sm:$0xff] }
 0x3e5   : > { %v11932_v36 = vadd.f32 %v4992_v47, %v4991_v55  ;;  %v11934_v61 = vadd.f32 %v4670_v42, %v4669_v60  ;;  %v5007_v43 = vsel %vm4662_vm13, %v4874_v52, 0.0  ;;  %v5456_v54 = vsel %vm5130_vm1, %v11855_v12, 0.0  ;;  %v5103_v55 = vld [vmem:[#allocation3 + $0x503] sm:$0xff] }
 0x3e6   : > { %v11941_v0 = vadd.f32 %v4903_v10, %v4902_v48  ;;  %v11943_v44 = vadd.f32 %v4775_v8, %v4774_v18  ;;  %v5006_v2 = vadd.f32 %v5005_v6, %v11801_v22  ;;  %v11946_v9 = vadd.f32 %v5354_v15, %v5353_v4 }
 0x3e7   : > { %v9839_v35 = vpop.f32.mrb[172].mxu1  ;;  %v4685_v17 = vsel %vm4662_vm13, %v4655_v53, 0.0  ;;  %v4790_v12 = vsel %vm4767_vm12, %v4655_v53, 0.0  ;;  %v5471_v52 = vsel %vm5130_vm1, %v11858_v57, 0.0  ;;  %v5033_v29 = vld [vmem:[#allocation3 + $0x550] sm:$0xff]  ;;  %v11953_v59 = vmul.f32 %v5031_v62, %v5031_v62  ;;  %v5102_v53 = vld [vmem:[#allocation3 + $0x4fb] sm:$0xff] }
 0x3e8   : > { %4058 = vst.msk [vmem:[#allocation3 + $0x570] sm:$0xff] %vm2648_vm5, %v9839_v35  ;;  %v9791_v11 = vpop.f32.mrb[180].mxu0  ;;  %v3943_v1 = vpop.f32.mrb[173].mxu1  ;;  %v11955_v60 = vadd.f32 %v5007_v43, %v5006_v2  ;;  %v5369_v22 = vsel %vm5235_vm0, %v5340_v14, 0.0  ;;  %v5457_v4 = vadd.f32 %v5456_v54, %v11804_v19  ;;  %v5458_v40 = vsel %vm5130_vm1, %v5339_v16, 0.0 }
 0x3e9   : > { %3609 = vst.msk [vmem:[#allocation3 + $0x430] sm:$0xff] %vm2648_vm5, %v9791_v11  ;;  %4055 = vst.msk [vmem:[#allocation3 + $0x560] sm:$0xff] %vm2648_vm5, %v3943_v1  ;;  %v3517_v30 = vpop.f32.mrb[181].mxu0  ;;  %v9840_v23 = vpop.f32.mrb[174].mxu1  ;;  %v4567_v39 = vld [vmem:[#allocation3 + $0x400] sm:$0xff]  ;;  %v5473_v56 = vsel %vm5130_vm1, %v5340_v14, 0.0  ;;  %v11961_v35 = vmul.f32 %v5103_v55, %v5103_v55  ;;  %v11966_v11 = vadd.f32 %v4685_v17, %v11873_v3  ;;  %v11969_v1 = vadd.f32 %v4790_v12, %v11881_v34 }
 0x3ea   : > { %3607 = vst.msk [vmem:[#allocation3 + $0x420] sm:$0xff] %vm2648_vm5, %v3517_v30  ;;  %4059 = vst.msk [vmem:[#allocation3 + $0x578] sm:$0xff] %vm2648_vm5, %v9840_v23  ;;  %v9792_v38 = vpop.f32.mrb[182].mxu0  ;;  %v3946_v45 = vpop.f32.mrb[175].mxu1  ;;  %v4859_v27 = vld [vmem:[#allocation3 + $0x3f9] sm:$0xff]  ;;  %v4583_v42 = vmul.f32 %v4567_v39, %v4567_v39  ;;  %v5252_v57 = vsel %vm5235_vm0, %v11797_v49, 0.0  ;;  %v5472_v19 = vadd.f32 %v5471_v52, %v11825_v26  ;;  %v11972_v16 = vmul.f32 %v5033_v29, %v5033_v29 }
 0x3eb   : > { %3610 = vst.msk [vmem:[#allocation3 + $0x438] sm:$0xff] %vm2648_vm5, %v9792_v38  ;;  %4056 = vst.msk [vmem:[#allocation3 + $0x568] sm:$0xff] %vm2648_vm5, %v3946_v45  ;;  %v3520_v41 = vpop.f32.mrb[183].mxu0  ;;  %v4568_v58 = vld [vmem:[#allocation3 + $0x408] sm:$0xff]  ;;  %v4875_v15 = vmul.f32 %v4859_v27, %v4859_v27  ;;  %v11976_v49 = vadd.f32 %v5369_v22, %v11899_v37  ;;  %v11978_v30 = vadd.f32 %v5458_v40, %v5457_v4  ;;  %v5063_v3 = vsel %vm5057_vm14, %v11953_v59, 0.0  ;;  %v5030_v23 = vld [vmem:[#allocation3 + $0x4f8] sm:$0xff] }
 0x3ec   : > { %3608 = vst.msk [vmem:[#allocation3 + $0x428] sm:$0xff] %vm2648_vm5, %v3520_v41  ;;  %v4641_v10 = vld [vmem:[#allocation3 + $0x40f] sm:$0xff]  ;;  %v4584_v18 = vmul.f32 %v4568_v58, %v4568_v58  ;;  %v5325_v14 = vld [vmem:[#allocation3 + $0x545] sm:$0xff]  ;;  %v11984_v38 = vadd.f32 %v5473_v56, %v5472_v19  ;;  %v11986_v37 = vmul.f32 %v5105_v5, %v5105_v5  ;;  %v11989_v45 = vadd.f32 %v5252_v57, %v11849_v20 }
 0x3ed   : > { %v5104_v34 = vld [vmem:[#allocation3 + $0x52b] sm:$0xff]  ;;  %v4599_v41 = vsel %vm4589_vm10, %v4583_v42, 0.0  ;;  %v4657_v39 = vmul.f32 %v4641_v10, %v4641_v10  ;;  %v5149_v2 = vsel %vm5130_vm1, %v11961_v35, 0.0  ;;  %v11996_v55 = vmul.f32 %v5102_v53, %v5102_v53 }
 0x3ee   : > { %v5326_v62 = vld [vmem:[#allocation3 + $0x54d] sm:$0xff]  ;;  %v12001_v12 = vadd.f32 %v5063_v3, %v11860_v21  ;;  %v12005_v52 = vsel %vm5057_vm14, %v11972_v16, 0.0  ;;  %v12007_v29 = vmul.f32 %v5104_v34, %v5104_v34  ;;  %v12009_v27 = vmul.f32 %v5030_v23, %v5030_v23  ;;  %v4860_v3 = vld [vmem:[#allocation3 + $0x401] sm:$0xff] }
 0x3ef   : > { %v9843_v47 = vpop.f32.mrb[176].mxu1  ;;  %v4818_v22 = vsel %vm4808_vm11, %v4583_v42, 0.0  ;;  %v4890_v4 = vsel %vm4767_vm12, %v4875_v15, 0.0  ;;  %v4640_v40 = vld [vmem:[#allocation3 + $0x407] sm:$0xff]  ;;  %v12014_v58 = vmul.f32 %v5325_v14, %v5325_v14  ;;  %v12016_v56 = vmul.f32 %v5326_v62, %v5326_v62 }
 0x3f0   : > { %4062 = vst.msk [vmem:[#allocation3 + $0x590] sm:$0xff] %vm2648_vm5, %v9843_v47  ;;  %v9795_v8 = vpop.f32.mrb[184].mxu0  ;;  %v3959_v6 = vpop.f32.mrb[177].mxu1  ;;  %v4569_v17 = vld [vmem:[#allocation3 + $0x430] sm:$0xff]  ;;  %v4600_v21 = vadd.f32 %v4599_v41, %v11901_v28  ;;  %v4614_v57 = vsel %vm4589_vm10, %v4584_v18, 0.0  ;;  %v12021_v10 = vadd.f32 %v5149_v2, %v11843_v51  ;;  %v12025_v19 = vsel %vm5130_vm1, %v11986_v37, 0.0 }
 0x3f1   : > { %3614 = vst.msk [vmem:[#allocation3 + $0x450] sm:$0xff] %vm2648_vm5, %v9795_v8  ;;  %4060 = vst.msk [vmem:[#allocation3 + $0x580] sm:$0xff] %vm2648_vm5, %v3959_v6  ;;  %v3533_v26 = vpop.f32.mrb[185].mxu0  ;;  %v9844_v48 = vpop.f32.mrb[178].mxu1  ;;  %v4585_v42 = vmul.f32 %v4569_v17, %v4569_v17  ;;  %v4687_v53 = vsel %vm4662_vm13, %v4657_v39, 0.0  ;;  %v4792_v8 = vsel %vm4767_vm12, %v4657_v39, 0.0  ;;  %v4819_v34 = vadd.f32 %v4818_v22, %v11903_v24 }
 0x3f2   : > { %3611 = vst.msk [vmem:[#allocation3 + $0x440] sm:$0xff] %vm2648_vm5, %v3533_v26  ;;  %4063 = vst.msk [vmem:[#allocation3 + $0x598] sm:$0xff] %vm2648_vm5, %v9844_v48  ;;  %v9796_v43 = vpop.f32.mrb[186].mxu0  ;;  %v3962_v54 = vpop.f32.mrb[179].mxu1  ;;  %v4570_v5 = vld [vmem:[#allocation3 + $0x438] sm:$0xff]  ;;  %v4994_v6 = vsel %vm4662_vm13, %v4875_v15, 0.0  ;;  %v4891_v23 = vadd.f32 %v4890_v4, %v11926_v46  ;;  %v4656_v48 = vmul.f32 %v4640_v40, %v4640_v40  ;;  %v12043_v2 = vadd.f32 %v4792_v8, %v11969_v1 }
 0x3f3   : > { %3615 = vst.msk [vmem:[#allocation3 + $0x458] sm:$0xff] %vm2648_vm5, %v9796_v43  ;;  %4061 = vst.msk [vmem:[#allocation3 + $0x588] sm:$0xff] %vm2648_vm5, %v3962_v54  ;;  %v3536_v20 = vpop.f32.mrb[187].mxu0  ;;  %v4861_v47 = vld [vmem:[#allocation3 + $0x429] sm:$0xff]  ;;  %v4833_v51 = vsel %vm4808_vm11, %v4584_v18, 0.0  ;;  %v4642_v26 = vld [vmem:[#allocation3 + $0x437] sm:$0xff]  ;;  %v4586_v43 = vmul.f32 %v4570_v5, %v4570_v5  ;;  %v4615_v54 = vadd.f32 %v4614_v57, %v11913_v33  ;;  %v12040_v18 = vadd.f32 %v4687_v53, %v11966_v11 }
 0x3f4   : > { %3612 = vst.msk [vmem:[#allocation3 + $0x448] sm:$0xff] %vm2648_vm5, %v3536_v20  ;;  %v4877_v41 = vmul.f32 %v4861_v47, %v4861_v47  ;;  %v5327_v39 = vld [vmem:[#allocation3 + $0x575] sm:$0xff]  ;;  %v5356_v15 = vsel %vm5235_vm0, %v12014_v58, 0.0  ;;  %v4995_v20 = vadd.f32 %v4994_v6, %v11932_v36  ;;  %v4876_v17 = vmul.f32 %v4860_v3, %v4860_v3 }
 0x3f5   : > { %v4862_v33 = vld [vmem:[#allocation3 + $0x431] sm:$0xff]  ;;  %v4601_v40 = vsel %vm4589_vm10, %v4585_v42, 0.0  ;;  %v4834_v5 = vadd.f32 %v4833_v51, %v11916_v7  ;;  %v4658_v57 = vmul.f32 %v4642_v26, %v4642_v26  ;;  %v5371_v11 = vsel %vm5235_vm0, %v12016_v56, 0.0 }
 0x3f6   : > { %v4820_v1 = vsel %vm4808_vm11, %v4585_v42, 0.0  ;;  %v4672_v47 = vsel %vm4662_vm13, %v4656_v48, 0.0  ;;  %v5343_v53 = vmul.f32 %v5327_v39, %v5327_v39  ;;  %v5357_v8 = vadd.f32 %v5356_v15, %v11946_v9 }
 0x3f7   : > { %v9847_v28 = vpop.f32.mrb[180].mxu1  ;;  %v4616_v7 = vsel %vm4589_vm10, %v4586_v43, 0.0  ;;  %v4892_v6 = vsel %vm4767_vm12, %v4877_v41, 0.0  ;;  %v4835_v3 = vsel %vm4808_vm11, %v4586_v43, 0.0  ;;  %v4602_v51 = vadd.f32 %v4601_v40, %v4600_v21 }
 0x3f8   : > { %4067 = vst.msk [vmem:[#allocation3 + $0x5b0] sm:$0xff] %vm2648_vm5, %v9847_v28  ;;  %v9799_v14 = vpop.f32.mrb[188].mxu0  ;;  %v3975_v62 = vpop.f32.mrb[181].mxu1  ;;  %v4878_v28 = vmul.f32 %v4862_v33, %v4862_v33  ;;  %v4996_v26 = vsel %vm4662_vm13, %v4877_v41, 0.0  ;;  %v12067_v42 = vadd.f32 %v12005_v52, %v12001_v12  ;;  %v12069_v9 = vadd.f32 %v4820_v1, %v4819_v34 }
 0x3f9   : > { %3618 = vst.msk [vmem:[#allocation3 + $0x470] sm:$0xff] %vm2648_vm5, %v9799_v14  ;;  %4065 = vst.msk [vmem:[#allocation3 + $0x5a0] sm:$0xff] %vm2648_vm5, %v3975_v62  ;;  %v3549_v24 = vpop.f32.mrb[189].mxu0  ;;  %v9848_v46 = vpop.f32.mrb[182].mxu1  ;;  %v12063_v14 = vadd.f32 %v5371_v11, %v11976_v49  ;;  %v4643_v62 = vld [vmem:[#allocation3 + $0x43f] sm:$0xff]  ;;  %v4673_v39 = vadd.f32 %v4672_v47, %v11934_v61  ;;  %v4674_v15 = vsel %vm4662_vm13, %v4658_v57, 0.0  ;;  %v12074_v41 = vadd.f32 %v4892_v6, %v4891_v23 }
 0x3fa   : > { %3616 = vst.msk [vmem:[#allocation3 + $0x460] sm:$0xff] %vm2648_vm5, %v3549_v24  ;;  %4068 = vst.msk [vmem:[#allocation3 + $0x5b8] sm:$0xff] %vm2648_vm5, %v9848_v46  ;;  %v9800_v22 = vpop.f32.mrb[190].mxu0  ;;  %v3978_v4 = vpop.f32.mrb[183].mxu1  ;;  %v4905_v43 = vsel %vm4767_vm12, %v4876_v17, 0.0  ;;  %v5328_v24 = vld [vmem:[#allocation3 + $0x57d] sm:$0xff]  ;;  %v4617_v46 = vadd.f32 %v4616_v7, %v4615_v54  ;;  %v12076_v49 = vadd.f32 %v4835_v3, %v4834_v5  ;;  %v12080_v52 = vadd.f32 %v4996_v26, %v4995_v20 }
 0x3fb   : > { %3619 = vst.msk [vmem:[#allocation3 + $0x478] sm:$0xff] %vm2648_vm5, %v9800_v22  ;;  %4066 = vst.msk [vmem:[#allocation3 + $0x5a8] sm:$0xff] %vm2648_vm5, %v3978_v4  ;;  %v3552_v36 = vpop.f32.mrb[191].mxu0  ;;  %v4777_v33 = vsel %vm4767_vm12, %v4656_v48, 0.0  ;;  %v4907_v61 = vsel %vm4767_vm12, %v4878_v28, 0.0  ;;  %v5009_v34 = vsel %vm4662_vm13, %v4876_v17, 0.0  ;;  %v4659_v4 = vmul.f32 %v4643_v62, %v4643_v62 }
 0x3fc   : > { %3617 = vst.msk [vmem:[#allocation3 + $0x468] sm:$0xff] %vm2648_vm5, %v3552_v36  ;;  %v5358_v22 = vsel %vm5235_vm0, %v5343_v53, 0.0  ;;  %v12086_v40 = vadd.f32 %v4674_v15, %v4673_v39  ;;  %v4906_v48 = vadd.f32 %v4905_v43, %v11941_v0  ;;  %v5344_v5 = vmul.f32 %v5328_v24, %v5328_v24  ;;  %v5035_v15 = vld [vmem:[#allocation3 + $0x580] sm:$0xff] }
 0x3fd   : > { %v4778_v36 = vadd.f32 %v4777_v33, %v11943_v44  ;;  %v4779_v17 = vsel %vm4767_vm12, %v4658_v57, 0.0  ;;  %v5011_v1 = vsel %vm4662_vm13, %v4878_v28, 0.0  ;;  %v5010_v0 = vadd.f32 %v5009_v34, %v11955_v60 }
 0x3fe   : > { %v12094_v3 = vadd.f32 %v4907_v61, %v4906_v48  ;;  %v12097_v26 = vadd.f32 %v5358_v22, %v5357_v8  ;;  %v5460_v62 = vsel %vm5130_vm1, %v12014_v58, 0.0  ;;  %v5462_v28 = vsel %vm5130_vm1, %v5343_v53, 0.0 }
 0x3ff   : > { %v9851_v21 = vpop.f32.mrb[184].mxu1  ;;  %v4689_v24 = vsel %vm4662_vm13, %v4659_v4, 0.0  ;;  %v5373_v60 = vsel %vm5235_vm0, %v5344_v5, 0.0  ;;  %v12114_v61 = vadd.f32 %v4779_v17, %v4778_v36  ;;  %v5461_v34 = vadd.f32 %v5460_v62, %v11978_v30 }
 0x400   : > { %4072 = vst.msk [vmem:[#allocation3 + $0x5d0] sm:$0xff] %vm2648_vm5, %v9851_v21  ;;  %v3991_v12 = vpop.f32.mrb[185].mxu1  ;;  %v4794_v21 = vsel %vm4767_vm12, %v4659_v4, 0.0  ;;  %v12117_v22 = vmul.f32 %v5035_v15, %v5035_v15  ;;  %v4690_v48 = vadd.f32 %v4689_v24, %v12040_v18  ;;  %v5477_v62 = vsel %vm5130_vm1, %v5344_v5, 0.0 }
 0x401   : > { %4069 = vst.msk [vmem:[#allocation3 + $0x5c0] sm:$0xff] %vm2648_vm5, %v3991_v12  ;;  %v9852_v54 = vpop.f32.mrb[186].mxu1  ;;  %v4571_v23 = vld [vmem:[#allocation3 + $0x460] sm:$0xff]  ;;  %v5475_v12 = vsel %vm5130_vm1, %v12016_v56, 0.0 }
 0x402   : > { %4073 = vst.msk [vmem:[#allocation3 + $0x5d8] sm:$0xff] %vm2648_vm5, %v9852_v54  ;;  %v3994_v20 = vpop.f32.mrb[187].mxu1  ;;  %v4587_v11 = vmul.f32 %v4571_v23, %v4571_v23  ;;  %v4863_v6 = vld [vmem:[#allocation3 + $0x459] sm:$0xff]  ;;  %v5107_v54 = vld [vmem:[#allocation3 + $0x563] sm:$0xff]  ;;  %v5476_v18 = vadd.f32 %v5475_v12, %v11984_v38  ;;  %v5037_v38 = vld [vmem:[#allocation3 + $0x5b0] sm:$0xff] }
 0x403   : > { %4070 = vst.msk [vmem:[#allocation3 + $0x5c8] sm:$0xff] %vm2648_vm5, %v3994_v20  ;;  %v4572_v47 = vld [vmem:[#allocation3 + $0x468] sm:$0xff]  ;;  %v4879_v33 = vmul.f32 %v4863_v6, %v4863_v6  ;;  %v5109_v23 = vld [vmem:[#allocation3 + $0x593] sm:$0xff]  ;;  %v4795_v20 = vadd.f32 %v4794_v21, %v12043_v2  ;;  %v12129_v6 = vadd.f32 %v5462_v28, %v5461_v34  ;;  %v5067_v28 = vsel %vm5057_vm14, %v12117_v22, 0.0 }
 0x404   : > { %v4645_v7 = vld [vmem:[#allocation3 + $0x46f] sm:$0xff]  ;;  %v4603_v44 = vsel %vm4589_vm10, %v4587_v11, 0.0  ;;  %v12102_v39 = vmul.f32 %v4572_v47, %v4572_v47  ;;  %v4822_v58 = vsel %vm4808_vm11, %v4587_v11, 0.0  ;;  %v12123_v11 = vadd.f32 %v5011_v1, %v5010_v0  ;;  %v4644_v17 = vld [vmem:[#allocation3 + $0x467] sm:$0xff] }
 0x405   : > { %v4661_v57 = vmul.f32 %v4645_v7, %v4645_v7  ;;  %v4604_v43 = vadd.f32 %v4603_v44, %v4602_v51  ;;  %v4823_v36 = vadd.f32 %v4822_v58, %v12069_v9  ;;  %v5330_v47 = vld [vmem:[#allocation3 + $0x5ad] sm:$0xff]  ;;  %v5374_v7 = vadd.f32 %v5373_v60, %v12063_v14  ;;  %v4864_v0 = vld [vmem:[#allocation3 + $0x461] sm:$0xff] }
 0x406   : > { %v4618_v8 = vsel %vm4589_vm10, %v12102_v39, 0.0  ;;  %v4894_v1 = vsel %vm4767_vm12, %v4879_v33, 0.0  ;;  %v12135_v44 = vmul.f32 %v5107_v54, %v5107_v54  ;;  %v12137_v15 = vmul.f32 %v5109_v23, %v5109_v23 }
 0x407   : > { %4622 = vrot.lane.b32.xlu0 %v4604_v43, %s10225_s5  ;;  %v9855_v53 = vpop.f32.mrb[188].mxu1  ;;  %v4619_v51 = vadd.f32 %v4618_v8, %v4617_v46  ;;  %v4691_v56 = vsel %vm4662_vm13, %v4661_v57, 0.0  ;;  %v5329_v46 = vld [vmem:[#allocation3 + $0x5a5] sm:$0xff]  ;;  %v5282_v43 = vsel %vm5276_vm15, %v11953_v59, 0.0  ;;  %v4796_v5 = vsel %vm4767_vm12, %v4661_v57, 0.0 }
 0x408   : > { %4076 = vst.msk [vmem:[#allocation3 + $0x5f0] sm:$0xff] %vm2648_vm5, %v9855_v53  ;;  %v4007_v4 = vpop.f32.mrb[189].mxu1  ;;  %v4692_v14 = vadd.f32 %v4691_v56, %v4690_v48  ;;  %v5345_v9 = vmul.f32 %v5329_v46, %v5329_v46  ;;  %v4998_v24 = vsel %vm4662_vm13, %v4879_v33, 0.0  ;;  %v4660_v21 = vmul.f32 %v4644_v17, %v4644_v17 }
 0x409   : > { %4074 = vst.msk [vmem:[#allocation3 + $0x5e0] sm:$0xff] %vm2648_vm5, %v4007_v4  ;;  %4624 = vrot.lane.b32.xlu1 %v4619_v51, %s10225_s5  ;;  %v9856_v30 = vpop.f32.mrb[190].mxu1  ;;  %v5346_v60 = vmul.f32 %v5330_v47, %v5330_v47  ;;  %v4895_v8 = vadd.f32 %v4894_v1, %v12074_v41  ;;  %v4880_v58 = vmul.f32 %v4864_v0, %v4864_v0  ;;  %v5331_v51 = vld [vmem:[#allocation3 + $0x5d5] sm:$0xff]  ;;  %v5153_v59 = vsel %vm5130_vm1, %v12135_v44, 0.0 }
 0x40a   : > { %4077 = vst.msk [vmem:[#allocation3 + $0x5f8] sm:$0xff] %vm2648_vm5, %v9856_v30  ;;  %v4010_v2 = vpop.f32.mrb[191].mxu1  ;;  %v5478_v12 = vadd.f32 %v5477_v62, %v5476_v18  ;;  %v5152_v53 = vadd.f32 %v12025_v19, %v12021_v10  ;;  %v5053_v34 = vmul.f32 %v5037_v38, %v5037_v38  ;;  %v5155_v57 = vsel %vm5130_vm1, %v12137_v15, 0.0  ;;  %v5111_v10 = vld [vmem:[#allocation3 + $0x5c3] sm:$0xff] }
 0x40b   : > { %4075 = vst.msk [vmem:[#allocation3 + $0x5e8] sm:$0xff] %vm2648_vm5, %v4010_v2  ;;  %4841 = vrot.lane.b32.xlu0 %v4823_v36, %s10226_s21  ;;  %v5284_v33 = vsel %vm5276_vm15, %v11972_v16, 0.0  ;;  %v4797_v41 = vadd.f32 %v4796_v5, %v4795_v20  ;;  %v4999_v54 = vadd.f32 %v4998_v24, %v12080_v52  ;;  %v5068_v23 = vadd.f32 %v5067_v28, %v12067_v42 }
 0x40c   : > { %v5283_v19 = vadd.f32 %v5282_v43, %v11907_v63  ;;  %v4837_v4 = vsel %vm4808_vm11, %v12102_v39, 0.0  ;;  %v4676_v48 = vsel %vm4662_vm13, %v4660_v21, 0.0  ;;  %v5360_v56 = vsel %vm5235_vm0, %v5345_v9, 0.0 }
 0x40d   : > { %4697 = vrot.lane.b32.xlu1 %v4692_v14, %s10227_s7  ;;  %v5375_v16 = vsel %vm5235_vm0, %v5346_v60, 0.0  ;;  %v4909_v20 = vsel %vm4767_vm12, %v4880_v58, 0.0  ;;  %v4781_v52 = vsel %vm4767_vm12, %v4660_v21, 0.0  ;;  %v5013_v42 = vsel %vm4662_vm13, %v4880_v58, 0.0 }
 0x40e   : > { %v5347_v46 = vmul.f32 %v5331_v51, %v5331_v51  ;;  %v5069_v63 = vsel %vm5057_vm14, %v5053_v34, 0.0  ;;  %v5127_v36 = vmul.f32 %v5111_v10, %v5111_v10  ;;  %v5154_v39 = vadd.f32 %v5153_v59, %v5152_v53 }
 0x40f   : > { %4913 = vrot.lane.b32.xlu0 %v4895_v8, %s10228_s9  ;;  %v5285_v17 = vadd.f32 %v5284_v33, %v5283_v19  ;;  %v4838_v47 = vadd.f32 %v4837_v4, %v12076_v49  ;;  %v4677_v18 = vadd.f32 %v4676_v48, %v12086_v40  ;;  %v5361_v2 = vadd.f32 %v5360_v56, %v12097_v26  ;;  %v5106_v33 = vld [vmem:[#allocation3 + $0x55b] sm:$0xff] }
 0x410   : > { %v5332_v30 = vld [vmem:[#allocation3 + $0x5dd] sm:$0xff]  ;;  %v5464_v1 = vsel %vm5130_vm1, %v5345_v9, 0.0  ;;  %v4910_v0 = vadd.f32 %v4909_v20, %v12094_v3  ;;  %v4782_v62 = vadd.f32 %v4781_v52, %v12114_v61  ;;  %v5014_v14 = vadd.f32 %v5013_v42, %v12123_v11 }
 0x411   : > { %4802 = vrot.lane.b32.xlu1 %v4797_v41, %s10228_s9  ;;  %v5376_v38 = vadd.f32 %v5375_v16, %v5374_v7  ;;  %v5039_v28 = vld [vmem:[#allocation3 + $0x5e0] sm:$0xff]  ;;  %v5113_v43 = vld [vmem:[#allocation3 + $0x5f3] sm:$0xff]  ;;  %v5362_v5 = vsel %vm5235_vm0, %v5347_v46, 0.0  ;;  %v5348_v49 = vmul.f32 %v5332_v30, %v5332_v30  ;;  %v5479_v40 = vsel %vm5130_vm1, %v5346_v60, 0.0 }
 0x412   : > { %v5286_v26 = vsel %vm5276_vm15, %v12117_v22, 0.0  ;;  %v5465_v9 = vadd.f32 %v5464_v1, %v12129_v6  ;;  %v5466_v3 = vsel %vm5130_vm1, %v5347_v46, 0.0  ;;  %v5156_v61 = vadd.f32 %v5155_v57, %v5154_v39  ;;  %v5112_v10 = vld [vmem:[#allocation3 + $0x5eb] sm:$0xff]  ;;  %v5034_v1 = vld [vmem:[#allocation3 + $0x558] sm:$0xff] }
 0x413   : > { %5017 = vrot.lane.b32.xlu0 %v4999_v54, %s10227_s7  ;;  %v5157_v11 = vsel %vm5130_vm1, %v5127_v36, 0.0  ;;  %v5055_v7 = vmul.f32 %v5039_v28, %v5039_v28  ;;  %v5129_v24 = vmul.f32 %v5113_v43, %v5113_v43  ;;  %v5288_v21 = vsel %vm5276_vm15, %v5053_v34, 0.0  ;;  %v5108_v54 = vld [vmem:[#allocation3 + $0x58b] sm:$0xff] }
 0x414   : > { %v5254_v8 = vsel %vm5235_vm0, %v11961_v35, 0.0  ;;  %v5363_v60 = vadd.f32 %v5362_v5, %v5361_v2  ;;  %v5480_v58 = vadd.f32 %v5479_v40, %v5478_v12  ;;  %v5070_v53 = vadd.f32 %v5069_v63, %v5068_v23  ;;  %v5110_v23 = vld [vmem:[#allocation3 + $0x5bb] sm:$0xff]  ;;  %v5032_v46 = vld [vmem:[#allocation3 + $0x528] sm:$0xff] }
 0x415   : > { %4843 = vrot.lane.b32.xlu1 %v4838_v47, %s10226_s21  ;;  %v5287_v22 = vadd.f32 %v5286_v26, %v5285_v17  ;;  %v5377_v6 = vsel %vm5235_vm0, %v5348_v49, 0.0  ;;  %v5467_v51 = vadd.f32 %v5466_v3, %v5465_v9  ;;  %v5158_v59 = vadd.f32 %v5157_v11, %v5156_v61  ;;  %v5040_v26 = vld [vmem:[#allocation3 + $0x5e8] sm:$0xff] }
 0x416   : > { %v5256_v57 = vsel %vm5235_vm0, %v11986_v37, 0.0  ;;  %v5255_v34 = vadd.f32 %v5254_v8, %v11989_v45  ;;  %v5258_v35 = vsel %vm5235_vm0, %v12135_v44, 0.0  ;;  %v5260_v12 = vsel %vm5235_vm0, %v12137_v15, 0.0 }
 0x417   : > { %4695 = vrot.lane.b32.xlu0 %v4677_v18, %s10227_s7  ;;  %v5289_v41 = vadd.f32 %v5288_v21, %v5287_v22  ;;  %v5481_v19 = vsel %vm5130_vm1, %v5348_v49, 0.0  ;;  %v5071_v4 = vsel %vm5057_vm14, %v5055_v7, 0.0  ;;  %v5159_v37 = vsel %vm5130_vm1, %v5129_v24, 0.0 }
 0x418   : > { %v5290_v48 = vsel %vm5276_vm15, %v5055_v7, 0.0  ;;  %v5378_v45 = vadd.f32 %v5377_v6, %v5376_v38  ;;  %v5262_v56 = vsel %vm5235_vm0, %v5127_v36, 0.0  ;;  %v5122_v44 = vmul.f32 %v5106_v33, %v5106_v33  ;;  %v5038_v38 = vld [vmem:[#allocation3 + $0x5b8] sm:$0xff] }
 0x419   : > { %4915 = vrot.lane.b32.xlu1 %v4910_v0, %s10228_s9  ;;  %v5132_v15 = vsel %vm5130_vm1, %v11827_v32, 0.0  ;;  %v5257_v16 = vadd.f32 %v5256_v57, %v5255_v34  ;;  %v12209_v20 = vmul.f32 %v5108_v54, %v5108_v54  ;;  %v12211_v52 = vmul.f32 %v5110_v23, %v5110_v23 }
 0x41a   : > { %v12213_v42 = vmul.f32 %v5112_v10, %v5112_v10  ;;  %v5482_v30 = vadd.f32 %v5481_v19, %v5480_v58  ;;  %v5072_v63 = vadd.f32 %v5071_v4, %v5070_v53  ;;  %v5160_v39 = vadd.f32 %v5159_v37, %v5158_v59 }
 0x41b   : > { %4800 = vrot.lane.b32.xlu0 %v4782_v62, %s10228_s9  ;;  %v5291_v17 = vadd.f32 %v5290_v48, %v5289_v41  ;;  %v5259_v36 = vadd.f32 %v5258_v35, %v5257_v16  ;;  %v5264_v47 = vsel %vm5235_vm0, %v5129_v24, 0.0  ;;  %v5133_v18 = vadd.f32 %v5132_v15, %v11831_v31 }
 0x41c   : > { %v5134_v2 = vsel %vm5130_vm1, %v11996_v55, 0.0  ;;  %v5136_v0 = vsel %vm5130_vm1, %v12007_v29, 0.0  ;;  %v5138_v62 = vsel %vm5130_vm1, %v5122_v44, 0.0  ;;  %v5048_v28 = vmul.f32 %v5032_v46, %v5032_v46 }
 0x41d   : > { %5019 = vrot.lane.b32.xlu1 %v5014_v14, %s10227_s7  ;;  %v5036_v14 = vld [vmem:[#allocation3 + $0x588] sm:$0xff]  ;;  %v5074_v43 = vsel %vm5057_vm14, %v11838_v25, 0.0  ;;  %v5261_v5 = vadd.f32 %v5260_v12, %v5259_v36  ;;  %v5140_v31 = vsel %vm5130_vm1, %v12209_v20, 0.0  ;;  %v5142_v49 = vsel %vm5130_vm1, %v12211_v52, 0.0 }
 0x41e   : > { %v5144_v40 = vsel %vm5130_vm1, %v12213_v42, 0.0  ;;  %v5050_v9 = vmul.f32 %v5034_v1, %v5034_v1  ;;  %v5073_v3 = vsel %vm5057_vm14, %v11696_v50, 0.0  ;;  %v5076_v61 = vsel %vm5057_vm14, %v12009_v27, 0.0 }
 0x41f   : > { %5381 = vrot.lane.b32.xlu0 %v5363_v60, %s10229_s10  ;;  %v5237_v11 = vsel %vm5235_vm0, %v11827_v32, 0.0  ;;  %v5135_v7 = vadd.f32 %v5134_v2, %v5133_v18  ;;  %v5052_v24 = vmul.f32 %v5036_v14, %v5036_v14  ;;  %v5054_v21 = vmul.f32 %v5038_v38, %v5038_v38 }
 0x420   : > { %v5075_v8 = vadd.f32 %v5074_v43, %v5073_v3  ;;  %v5078_v60 = vsel %vm5057_vm14, %v5048_v28, 0.0  ;;  %v5236_v58 = vsel %vm5235_vm0, %v11755_v13, 0.0  ;;  %v5239_v53 = vsel %vm5235_vm0, %v11996_v55, 0.0  ;;  %v4291_v3 = vld [vmem:[#allocation3 + $0x1c5] sm:$0xff] }
 0x421   : > { %5383 = vrot.lane.b32.xlu1 %v5378_v45, %s10229_s10  ;;  %v5293_v22 = vsel %vm5276_vm15, %v11838_v25, 0.0  ;;  %v5137_v32 = vadd.f32 %v5136_v0, %v5135_v7  ;;  %v5056_v6 = vmul.f32 %v5040_v26, %v5040_v26  ;;  %v5238_v59 = vadd.f32 %v5237_v11, %v5236_v58 }
 0x422   : > { %v5080_v57 = vsel %vm5057_vm14, %v5050_v9, 0.0  ;;  %v5241_v33 = vsel %vm5235_vm0, %v12007_v29, 0.0  ;;  %v5292_v13 = vsel %vm5276_vm15, %v11696_v50, 0.0  ;;  %v5295_v55 = vsel %vm5276_vm15, %v12009_v27, 0.0 }
 0x423   : > { %5485 = vrot.lane.b32.xlu0 %v5467_v51, %s10230_s28  ;;  %v5077_v51 = vadd.f32 %v5076_v61, %v5075_v8  ;;  %v5139_v25 = vadd.f32 %v5138_v62, %v5137_v32  ;;  %v5240_v34 = vadd.f32 %v5239_v53, %v5238_v59  ;;  %v5294_v35 = vadd.f32 %v5293_v22, %v5292_v13  ;;  %v4472_v61 = vld [vmem:[#allocation3 + $0x18b] sm:$0xff]  ;;  %v4473_v53 = vld [vmem:[#allocation3 + $0x193] sm:$0xff] }
 0x424   : > { %v5263_v12 = vadd.f32 %v5262_v56, %v5261_v5  ;;  %v5082_v54 = vsel %vm5057_vm14, %v5052_v24, 0.0  ;;  %v5243_v23 = vsel %vm5235_vm0, %v5122_v44, 0.0  ;;  %v5297_v29 = vsel %vm5276_vm15, %v5048_v28, 0.0  ;;  %v4080_v28 = vld [vmem:[#allocation3 + $0x40] sm:$0xff]  ;;  %v4079_v5 = vld [vmem:[#allocation3 + $0x18] sm:$0xff]  ;;  %v4082_v22 = vld [vmem:[#allocation3 + $0x70] sm:$0xff] }
 0x425   : > { %5487 = vrot.lane.b32.xlu1 %v5482_v30, %s10230_s28  ;;  %v5079_v41 = vadd.f32 %v5078_v60, %v5077_v51  ;;  %v5141_v50 = vadd.f32 %v5140_v31, %v5139_v25  ;;  %v5242_v19 = vadd.f32 %v5241_v33, %v5240_v34  ;;  %v5296_v27 = vadd.f32 %v5295_v55, %v5294_v35  ;;  %v4289_v31 = vld [vmem:[#allocation3 + $0x195] sm:$0xff] }
 0x426   : > { %v5265_v4 = vadd.f32 %v5264_v47, %v5263_v12  ;;  %v5084_v37 = vsel %vm5057_vm14, %v5054_v21, 0.0  ;;  %v5245_v48 = vsel %vm5235_vm0, %v12209_v20, 0.0  ;;  %v5299_v45 = vsel %vm5276_vm15, %v5050_v9, 0.0  ;;  %v4290_v9 = vld [vmem:[#allocation3 + $0x19d] sm:$0xff]  ;;  %v4293_v35 = vld [vmem:[#allocation3 + $0x1f5] sm:$0xff] }
 0x427   : > { %5090 = vrot.lane.b32.xlu0 %v5072_v63, %s10231_s29  ;;  %v5081_v10 = vadd.f32 %v5080_v57, %v5079_v41  ;;  %v5143_v56 = vadd.f32 %v5142_v49, %v5141_v50  ;;  %v5244_v15 = vadd.f32 %v5243_v23, %v5242_v19  ;;  %v5298_v16 = vadd.f32 %v5297_v29, %v5296_v27  ;;  %v4081_v49 = vld [vmem:[#allocation3 + $0x48] sm:$0xff]  ;;  %v4083_v32 = vld [vmem:[#allocation3 + $0x78] sm:$0xff]  ;;  %v4084_v57 = vld [vmem:[#allocation3 + $0xa0] sm:$0xff] }
 0x428   : > { %v5086_v46 = vsel %vm5057_vm14, %v5056_v6, 0.0  ;;  %v5247_v30 = vsel %vm5235_vm0, %v12211_v52, 0.0  ;;  %v5301_v63 = vsel %vm5276_vm15, %v5052_v24, 0.0  ;;  %v5303_v18 = vsel %vm5276_vm15, %v5054_v21, 0.0  ;;  %v4474_v24 = vld [vmem:[#allocation3 + $0x1bb] sm:$0xff]  ;;  %v4475_v21 = vld [vmem:[#allocation3 + $0x1c3] sm:$0xff] }
 0x429   : > { %5165 = vrot.lane.b32.xlu1 %v5160_v39, %s10230_s28  ;;  %v5083_v44 = vadd.f32 %v5082_v54, %v5081_v10  ;;  %v5145_v39 = vadd.f32 %v5144_v40, %v5143_v56  ;;  %v5246_v36 = vadd.f32 %v5245_v48, %v5244_v15  ;;  %v5300_v47 = vadd.f32 %v5299_v45, %v5298_v16  ;;  %v4292_v40 = vld [vmem:[#allocation3 + $0x1cd] sm:$0xff] }
 0x42a   : > { %v5305_v52 = vsel %vm5276_vm15, %v5056_v6, 0.0  ;;  %v4096_v43 = vmul.f32 %v4080_v28, %v4080_v28  ;;  %v4095_v11 = vmul.f32 %v4079_v5, %v4079_v5  ;;  %v4305_v7 = vmul.f32 %v4289_v31, %v4289_v31  ;;  %v4085_v41 = vld [vmem:[#allocation3 + $0xa8] sm:$0xff]  ;;  %v4477_v56 = vld [vmem:[#allocation3 + $0x1f3] sm:$0xff] }
 0x42b   : > { %5309 = vrot.lane.b32.xlu0 %v5291_v17, %s10232_s4  ;;  %v5085_v20 = vadd.f32 %v5084_v37, %v5083_v44  ;;  %v5249_v17 = vsel %vm5235_vm0, %v12213_v42, 0.0  ;;  %v5248_v1 = vadd.f32 %v5247_v30, %v5246_v36  ;;  %v5302_v0 = vadd.f32 %v5301_v63, %v5300_v47  ;;  %v4078_v42 = vld [vmem:[#allocation3 + $0x10] sm:$0xff] }
 0x42c   : > { %v4094_v26 = vmul.f32 %v4078_v42, %v4078_v42  ;;  %v4112_v8 = vsel %vm4110_vm2, %v4096_v43, 0.0  ;;  %v4097_v60 = vmul.f32 %v4081_v49, %v4081_v49  ;;  %v4308_v58 = vmul.f32 %v4292_v40, %v4292_v40  ;;  %v4476_v19 = vld [vmem:[#allocation3 + $0x1eb] sm:$0xff] }
 0x42d   : > { %5270 = vrot.lane.b32.xlu1 %v5265_v4, %s10229_s10  ;;  %v5087_v2 = vadd.f32 %v5086_v46, %v5085_v20  ;;  %v5250_v62 = vadd.f32 %v5249_v17, %v5248_v1  ;;  %v5304_v14 = vadd.f32 %v5303_v18, %v5302_v0  ;;  %v4306_v6 = vmul.f32 %v4290_v9, %v4290_v9  ;;  %v4294_v4 = vld [vmem:[#allocation3 + $0x1fd] sm:$0xff]  ;;  %v4296_v63 = vld [vmem:[#allocation3 + $0x22d] sm:$0xff]  ;;  %v4295_v1 = vld [vmem:[#allocation3 + $0x225] sm:$0xff] }
 0x42e   : > { %v4307_v51 = vmul.f32 %v4291_v3, %v4291_v3  ;;  %v4488_v59 = vmul.f32 %v4472_v61, %v4472_v61  ;;  %v4111_v33 = vsel %vm4110_vm2, %v4094_v26, 0.0  ;;  %v4490_v13 = vmul.f32 %v4474_v24, %v4474_v24  ;;  %v4478_v20 = vld [vmem:[#allocation3 + $0x21b] sm:$0xff]  ;;  %v4479_v26 = vld [vmem:[#allocation3 + $0x223] sm:$0xff] }
 0x42f   : > { %5163 = vrot.lane.b32.xlu0 %v5145_v39, %s10230_s28  ;;  %v5306_v38 = vadd.f32 %v5305_v52, %v5304_v14  ;;  %v4491_v55 = vmul.f32 %v4475_v21, %v4475_v21  ;;  %v4113_v25 = vadd.f32 %v4112_v8, %v4111_v33  ;;  %v4126_v34 = vsel %vm4110_vm2, %v4095_v11, 0.0  ;;  %v12291_v52 = vpop.permute.xlu0 %4208  ;;  %v12300_v9 = vld [vmem:[#allocation3 + $0x100] sm:$0xff]  ;;  %v12302_v61 = vld [vmem:[#allocation3 + $0x108] sm:$0xff] }
 0x430   : > { %v4321_v12 = vsel %vm4110_vm2, %v4305_v7, 0.0  ;;  %v4489_v54 = vmul.f32 %v4473_v53, %v4473_v53  ;;  %v4098_v23 = vmul.f32 %v4082_v22, %v4082_v22  ;;  %v4099_v29 = vmul.f32 %v4083_v32, %v4083_v32  ;;  %v4297_v32 = vld [vmem:[#allocation3 + $0x255] sm:$0xff] }
 0x431   : > { %5092 = vrot.lane.b32.xlu1 %v5087_v2, %s10231_s29  ;;  %v4127_v50 = vsel %vm4110_vm2, %v4097_v60, 0.0  ;;  %v4337_v10 = vsel %vm4110_vm2, %v4308_v58, 0.0  ;;  %v4100_v27 = vmul.f32 %v4084_v57, %v4084_v57  ;;  %v4336_v37 = vsel %vm4110_vm2, %v4306_v6, 0.0  ;;  %v12311_v57 = vld [vmem:[#allocation3 + $0x130] sm:$0xff] }
 0x432   : > { %v4322_v48 = vsel %vm4110_vm2, %v4307_v51, 0.0  ;;  %v4504_v45 = vsel %vm4110_vm2, %v4488_v59, 0.0  ;;  %v4101_v44 = vmul.f32 %v4085_v41, %v4085_v41  ;;  %v4309_v15 = vmul.f32 %v4293_v35, %v4293_v35  ;;  %v4480_v51 = vld [vmem:[#allocation3 + $0x24b] sm:$0xff]  ;;  %v12319_v41 = vpop.permute.xlu1 %4552  ;;  %v4298_v35 = vld [vmem:[#allocation3 + $0x25d] sm:$0xff] }
 0x433   : > { %5268 = vrot.lane.b32.xlu0 %v5250_v62, %s10229_s10  ;;  %v4505_v16 = vsel %vm4110_vm2, %v4490_v13, 0.0  ;;  %v4520_v46 = vsel %vm4110_vm2, %v4491_v55, 0.0  ;;  %v4128_v30 = vadd.f32 %v4127_v50, %v4126_v34  ;;  %v4338_v39 = vadd.f32 %v4337_v10, %v4336_v37  ;;  %v12293_v62 = vld [vmem:[#allocation3 + $0xd0] sm:$0xff]  ;;  %v12321_v34 = vpop.permute.xlu0 %4427  ;;  %v12324_v10 = vld [vmem:[#allocation3 + $0x160] sm:$0xff] }
 0x434   : > { %v4492_v36 = vmul.f32 %v4476_v19, %v4476_v19  ;;  %v4519_v47 = vsel %vm4110_vm2, %v4489_v54, 0.0  ;;  %v4114_v17 = vsel %vm4110_vm2, %v4098_v23, 0.0  ;;  %v4129_v18 = vsel %vm4110_vm2, %v4099_v29, 0.0  ;;  %v4481_v29 = vld [vmem:[#allocation3 + $0x253] sm:$0xff] }
 0x435   : > { %5311 = vrot.lane.b32.xlu1 %v5306_v38, %s10232_s4  ;;  %v4310_v2 = vmul.f32 %v4294_v4, %v4294_v4  ;;  %v4493_v0 = vmul.f32 %v4477_v56, %v4477_v56  ;;  %v4116_v14 = vsel %vm4110_vm2, %v4100_v27, 0.0  ;;  %v12296_v38 = vld [vmem:[#allocation3 + $0xd8] sm:$0xff]  ;;  %v4323_v28 = vadd.f32 %v4322_v48, %v4321_v12  ;;  %v12330_v56 = vld [vmem:[#allocation3 + $0x285] sm:$0xff] }
 0x436   : > { %v4506_v42 = vadd.f32 %v4505_v16, %v4504_v45  ;;  %v4521_v43 = vadd.f32 %v4520_v46, %v4519_v47  ;;  %v4131_v5 = vsel %vm4110_vm2, %v4101_v44, 0.0  ;;  %v4312_v31 = vmul.f32 %v4296_v63, %v4296_v63  ;;  %v12334_v46 = vld [vmem:[#allocation3 + $0x138] sm:$0xff] }
 0x437   : > { %v4324_v49 = vsel %vm4110_vm2, %v4309_v15, 0.0  ;;  %v4494_v40 = vmul.f32 %v4478_v20, %v4478_v20  ;;  %v4115_v3 = vadd.f32 %v4114_v17, %v4113_v25  ;;  %v4130_v11 = vadd.f32 %v4129_v18, %v4128_v30  ;;  %v4300_v17 = vld [vmem:[#allocation3 + $0x28d] sm:$0xff]  ;;  %v12339_v18 = vld [vmem:[#allocation3 + $0x2b5] sm:$0xff] }
 0x438   : > { %v4311_v7 = vmul.f32 %v4295_v1, %v4295_v1  ;;  %v4507_v24 = vsel %vm4110_vm2, %v4492_v36, 0.0  ;;  %v4102_v21 = vmul.f32 %v12293_v62, %v12293_v62  ;;  %v4103_v8 = vmul.f32 %v12296_v38, %v12296_v38  ;;  %v12341_v1 = vld [vmem:[#allocation3 + $0x168] sm:$0xff] }
 0x439   : > { %v4339_v60 = vsel %vm4110_vm2, %v4310_v2, 0.0  ;;  %v4522_v58 = vsel %vm4110_vm2, %v4493_v0, 0.0  ;;  %v4117_v53 = vadd.f32 %v4116_v14, %v4115_v3  ;;  %v4132_v22 = vadd.f32 %v4131_v5, %v4130_v11  ;;  %v12352_v3 = vld [vmem:[#allocation3 + $0x2e5] sm:$0xff]  ;;  %v4482_v11 = vld [vmem:[#allocation3 + $0x27b] sm:$0xff] }
 0x43a   : > { %v4325_v6 = vadd.f32 %v4324_v49, %v4323_v28  ;;  %v4495_v59 = vmul.f32 %v4479_v26, %v4479_v26  ;;  %v4104_v33 = vmul.f32 %v12300_v9, %v12300_v9  ;;  %v4105_v13 = vmul.f32 %v12302_v61, %v12302_v61  ;;  %v12350_v26 = vpop.permute.xlu0 %4467 }
 0x43b   : > { %v4341_v55 = vsel %vm4110_vm2, %v4312_v31, 0.0  ;;  %v4509_v25 = vsel %vm4110_vm2, %v4494_v40, 0.0  ;;  %v4340_v12 = vadd.f32 %v4339_v60, %v4338_v39  ;;  %v4326_v54 = vsel %vm4110_vm2, %v4311_v7, 0.0  ;;  %v4211_v31 = vpop.permute.xlu1 %4210 }
 0x43c   : > { %v4508_v23 = vadd.f32 %v4507_v24, %v4506_v42  ;;  %v4523_v50 = vadd.f32 %v4522_v58, %v4521_v43  ;;  %v4118_v19 = vsel %vm4110_vm2, %v4102_v21, 0.0  ;;  %v4133_v27 = vsel %vm4110_vm2, %v4103_v8, 0.0  ;;  %v4483_v8 = vld [vmem:[#allocation3 + $0x283] sm:$0xff] }
 0x43d   : > { %v4313_v4 = vmul.f32 %v4297_v32, %v4297_v32  ;;  %v4496_v37 = vmul.f32 %v4480_v51, %v4480_v51  ;;  %v4106_v48 = vmul.f32 %v12311_v57, %v12311_v57  ;;  %v4342_v45 = vadd.f32 %v4341_v55, %v4340_v12  ;;  %v4484_v55 = vld [vmem:[#allocation3 + $0x2ab] sm:$0xff] }
 0x43e   : > { %v4510_v44 = vadd.f32 %v4509_v25, %v4508_v23  ;;  %v4524_v15 = vsel %vm4110_vm2, %v4495_v59, 0.0  ;;  %v4120_v16 = vsel %vm4110_vm2, %v4104_v33, 0.0  ;;  %v4135_v30 = vsel %vm4110_vm2, %v4105_v13, 0.0  ;;  %v4304_v59 = vld [vmem:[#allocation3 + $0x2ed] sm:$0xff] }
 0x43f   : > { %v4314_v63 = vmul.f32 %v4298_v35, %v4298_v35  ;;  %v4497_v39 = vmul.f32 %v4481_v29, %v4481_v29  ;;  %v4108_v20 = vmul.f32 %v12324_v10, %v12324_v10  ;;  %v4119_v36 = vadd.f32 %v4118_v19, %v4117_v53 }
 0x440   : > { %v4134_v47 = vadd.f32 %v4133_v27, %v4132_v22  ;;  %v4327_v2 = vadd.f32 %v4326_v54, %v4325_v6  ;;  %v4315_v0 = vmul.f32 %v12330_v56, %v12330_v56  ;;  %v4328_v14 = vsel %vm4110_vm2, %v4313_v4, 0.0  ;;  %v4302_v22 = vld [vmem:[#allocation3 + $0x2bd] sm:$0xff]  ;;  %v12367_v4 = vld [vmem:[#allocation3 + $0x2b3] sm:$0xff] }
 0x441   : > { %v4511_v28 = vsel %vm4110_vm2, %v4496_v37, 0.0  ;;  %v4525_v42 = vadd.f32 %v4524_v15, %v4523_v50  ;;  %v4121_v43 = vadd.f32 %v4120_v16, %v4119_v36  ;;  %v4122_v5 = vsel %vm4110_vm2, %v4106_v48, 0.0  ;;  %v4284_v48 = vpop.permute.xlu1 %4283  ;;  %v4486_v36 = vld [vmem:[#allocation3 + $0x2db] sm:$0xff] }
 0x442   : > { %v4107_v49 = vmul.f32 %v12334_v46, %v12334_v46  ;;  %v4136_v40 = vadd.f32 %v4135_v30, %v4134_v47  ;;  %v4316_v7 = vmul.f32 %v4300_v17, %v4300_v17  ;;  %v4343_v24 = vsel %vm4110_vm2, %v4314_v63, 0.0  ;;  %v4706_v63 = vld [vmem:[#allocation3 + $0x352] sm:$0xff] }
 0x443   : > { %v4317_v21 = vmul.f32 %v12339_v18, %v12339_v18  ;;  %v4526_v60 = vsel %vm4110_vm2, %v4497_v39, 0.0  ;;  %v4124_v58 = vsel %vm4110_vm2, %v4108_v20, 0.0  ;;  %v4109_v53 = vmul.f32 %v12341_v1, %v12341_v1 }
 0x444   : > { %v4329_v32 = vadd.f32 %v4328_v14, %v4327_v2  ;;  %v4512_v6 = vadd.f32 %v4511_v28, %v4510_v44  ;;  %v4123_v51 = vadd.f32 %v4122_v5, %v4121_v43  ;;  %v4319_v33 = vmul.f32 %v12352_v3, %v12352_v3  ;;  %v12370_v44 = vpop.permute.xlu0 %4281  ;;  %v12382_v43 = vld [vmem:[#allocation3 + $0x382] sm:$0xff] }
 0x445   : > { %v4330_v13 = vsel %vm4110_vm2, %v4315_v0, 0.0  ;;  %v4498_v25 = vmul.f32 %v4482_v11, %v4482_v11  ;;  %v4137_v35 = vsel %vm4110_vm2, %v4107_v49, 0.0  ;;  %v4344_v12 = vadd.f32 %v4343_v24, %v4342_v45  ;;  %v12375_v0 = vld [vmem:[#allocation3 + $0x2e3] sm:$0xff] }
 0x446   : > { %v4499_v54 = vmul.f32 %v4483_v8, %v4483_v8  ;;  %v4527_v23 = vadd.f32 %v4526_v60, %v4525_v42  ;;  %v4125_v29 = vadd.f32 %v4124_v58, %v4123_v51  ;;  %v4318_v50 = vmul.f32 %v4302_v22, %v4302_v22  ;;  %v12380_v42 = vld [vmem:[#allocation3 + $0x322] sm:$0xff] }
 0x447   : > { %v4345_v19 = vsel %vm4110_vm2, %v4316_v7, 0.0  ;;  %v4332_v27 = vsel %vm4110_vm2, %v4317_v21, 0.0  ;;  %v4139_v37 = vsel %vm4110_vm2, %v4109_v53, 0.0  ;;  %v4320_v15 = vmul.f32 %v4304_v59, %v4304_v59  ;;  %v4389_v59 = vpop.permute.xlu1 %4388 }
 0x448   : > { %v4331_v16 = vadd.f32 %v4330_v13, %v4329_v32  ;;  %v4500_v30 = vmul.f32 %v4484_v55, %v4484_v55  ;;  %v4214_v45 = vadd.f32 %v12291_v52, %v4125_v29  ;;  %v4138_v39 = vadd.f32 %v4137_v35, %v4136_v40  ;;  %v12386_v40 = vld [vmem:[#allocation3 + $0x3b2] sm:$0xff] }
 0x449   : > { %v4334_v20 = vsel %vm4110_vm2, %v4319_v33, 0.0  ;;  %v4513_v47 = vsel %vm4110_vm2, %v4498_v25, 0.0  ;;  %v4346_v17 = vadd.f32 %v4345_v19, %v4344_v12  ;;  %v4501_v14 = vmul.f32 %v12367_v4, %v12367_v4  ;;  %15163 = vst [vmem:[#allocation16_spill] sm:$0xff] %v12386_v40  ;;  %v4922_v32 = vld [vmem:[#allocation3 + $0x30e] sm:$0xff]  ;;  %v12404_v19 = vpop.permute.xlu0 %4386 }
 0x44a   : > { %v4333_v2 = vadd.f32 %v4332_v27, %v4331_v16  ;;  %v4528_v28 = vsel %vm4110_vm2, %v4499_v54, 0.0  ;;  %v4140_v52 = vadd.f32 %v4139_v37, %v4138_v39  ;;  %v4287_v5 = vadd.f32 %v12370_v44, %v4214_v45  ;;  %v12398_v25 = vld [vmem:[#allocation3 + $0x34a] sm:$0xff]  ;;  %v12401_v54 = vld [vmem:[#allocation3 + $0x3e2] sm:$0xff]  ;;  %v12409_v37 = vld [vmem:[#allocation3 + $0x37a] sm:$0xff] }
 0x44b   : > { %v4347_v49 = vsel %vm4110_vm2, %v4318_v50, 0.0  ;;  %v4722_v11 = vmul.f32 %v4706_v63, %v4706_v63  ;;  %v4349_v7 = vsel %vm4110_vm2, %v4320_v15, 0.0  ;;  %v4502_v21 = vmul.f32 %v4486_v36, %v4486_v36  ;;  %15164 = vst [vmem:[#allocation17_spill] sm:$0xff] %v12401_v54  ;;  %v4714_v16 = vld [vmem:[#allocation3 + $0x412] sm:$0xff] }
 0x44c   : > { %v4335_v24 = vadd.f32 %v4334_v20, %v4333_v2  ;;  %v4515_v8 = vsel %vm4110_vm2, %v4500_v30, 0.0  ;;  %v4215_v60 = vadd.f32 %v4211_v31, %v4140_v52  ;;  %v4503_v58 = vmul.f32 %v12375_v0, %v12375_v0  ;;  %v4716_v20 = vld [vmem:[#allocation3 + $0x442] sm:$0xff]  ;;  %v4718_v36 = vld [vmem:[#allocation3 + $0x472] sm:$0xff] }
 0x44d   : > { %v4720_v53 = vmul.f32 %v12380_v42, %v12380_v42  ;;  %v4724_v22 = vmul.f32 %v12382_v43, %v12382_v43  ;;  %v4348_v51 = vadd.f32 %v4347_v49, %v4346_v17  ;;  %v4514_v33 = vadd.f32 %v4513_v47, %v4512_v6  ;;  %v12426_v49 = vld [vmem:[#allocation3 + $0x40a] sm:$0xff] }
 0x44e   : > { %v4529_v13 = vadd.f32 %v4528_v28, %v4527_v23  ;;  %v4726_v55 = vmul.f32 %v12386_v40, %v12386_v40  ;;  %v4288_v31 = vadd.f32 %v4284_v48, %v4215_v60  ;;  %v4351_v35 = vadd.f32 %v4335_v24, %v4287_v5  ;;  %v12407_v23 = vld [vmem:[#allocation3 + $0x31a] sm:$0xff]  ;;  %15166 = vst [vmem:[#allocation14_spill] sm:$0xff] %v12426_v49  ;;  %v4430_v24 = vpop.permute.xlu1 %4429 }
 0x44f   : > { %v4530_v12 = vsel %vm4110_vm2, %v4501_v14, 0.0  ;;  %v4751_v29 = vsel %vm4110_vm2, %v4722_v11, 0.0  ;;  %v4350_v50 = vadd.f32 %v4349_v7, %v4348_v51  ;;  %v4516_v27 = vadd.f32 %v4515_v8, %v4514_v33  ;;  %v12421_v14 = vld [vmem:[#allocation3 + $0x3aa] sm:$0xff]  ;;  %v12424_v5 = vld [vmem:[#allocation3 + $0x3da] sm:$0xff] }
 0x450   : > { %v4517_v6 = vsel %vm4110_vm2, %v4502_v21, 0.0  ;;  %v12411_v15 = vmul.f32 %v4922_v32, %v4922_v32  ;;  %v4532_v48 = vsel %vm4110_vm2, %v4503_v58, 0.0  ;;  %v4750_v30 = vsel %vm4110_vm2, %v4720_v53, 0.0  ;;  %15165 = vst [vmem:[#allocation18_spill] sm:$0xff] %v12424_v5  ;;  %v12434_v32 = vld [vmem:[#allocation3 + $0x43a] sm:$0xff] }
 0x451   : > { %v4753_v63 = vsel %vm4110_vm2, %v4724_v22, 0.0  ;;  %v4721_v45 = vmul.f32 %v12398_v25, %v12398_v25  ;;  %v4531_v39 = vadd.f32 %v4530_v12, %v4529_v13  ;;  %v4728_v47 = vmul.f32 %v12401_v54, %v12401_v54  ;;  %15167 = vst [vmem:[#allocation15_spill] sm:$0xff] %v12434_v32  ;;  %v12439_v13 = vld [vmem:[#allocation3 + $0x33e] sm:$0xff] }
 0x452   : > { %v4752_v17 = vadd.f32 %v4751_v29, %v4750_v30  ;;  %v4755_v2 = vsel %vm4110_vm2, %v4726_v55, 0.0  ;;  %v4352_v28 = vadd.f32 %v4350_v50, %v4288_v31  ;;  %v4392_v52 = vadd.f32 %v12404_v19, %v4351_v35  ;;  %15168 = vst [vmem:[#allocation19_spill] sm:$0xff] %v12439_v13  ;;  %v12453_v30 = vld [vmem:[#allocation3 + $0x36e] sm:$0xff] }
 0x453   : > { %v4719_v11 = vmul.f32 %v12407_v23, %v12407_v23  ;;  %v4723_v7 = vmul.f32 %v12409_v37, %v12409_v37  ;;  %v4518_v21 = vadd.f32 %v4517_v6, %v4516_v27  ;;  %v12432_v8 = vadd.f32 %v4532_v48, %v4531_v39  ;;  %v12449_v6 = vld [vmem:[#allocation3 + $0x46a] sm:$0xff]  ;;  %15170 = vst [vmem:[#allocation21_spill] sm:$0xff] %v12453_v30 }
 0x454   : > { %v4730_v60 = vmul.f32 %v4714_v16, %v4714_v16  ;;  %v4754_v58 = vadd.f32 %v4753_v63, %v4752_v17  ;;  %v4732_v53 = vmul.f32 %v4716_v20, %v4716_v20  ;;  %v4734_v22 = vmul.f32 %v4718_v36, %v4718_v36  ;;  %15169 = vst [vmem:[#allocation20_spill] sm:$0xff] %v12449_v6 }
 0x455   : > { %v4725_v51 = vmul.f32 %v12421_v14, %v12421_v14  ;;  %v4736_v33 = vsel %vm4110_vm2, %v4721_v45, 0.0  ;;  %v4757_v35 = vsel %vm4110_vm2, %v4728_v47, 0.0  ;;  %v4727_v12 = vmul.f32 %v12424_v5, %v12424_v5 }
 0x456   : > { %v4756_v31 = vadd.f32 %v4755_v2, %v4754_v58  ;;  %v4729_v29 = vmul.f32 %v12426_v49, %v12426_v49  ;;  %v4393_v50 = vadd.f32 %v4389_v59, %v4352_v28  ;;  %v4433_v27 = vadd.f32 %v12321_v34, %v4392_v52  ;;  %v12464_v2 = vld [vmem:[#allocation3 + $0x39e] sm:$0xff] }
 0x457   : > { %v4735_v48 = vsel %vm4110_vm2, %v4719_v11, 0.0  ;;  %v4738_v16 = vsel %vm4110_vm2, %v4723_v7, 0.0  ;;  %v4759_v45 = vsel %vm4110_vm2, %v4730_v60, 0.0  ;;  %v4731_v39 = vmul.f32 %v12434_v32, %v12434_v32  ;;  %15171 = vst [vmem:[#allocation22_spill] sm:$0xff] %v12464_v2  ;;  %v12471_v60 = vld [vmem:[#allocation3 + $0x3ce] sm:$0xff]  ;;  %v4932_v58 = vld [vmem:[#allocation3 + $0x3fe] sm:$0xff] }
 0x458   : > { %v4737_v20 = vadd.f32 %v4736_v33, %v4735_v48  ;;  %v4940_v59 = vmul.f32 %v12439_v13, %v12439_v13  ;;  %v4434_v34 = vadd.f32 %v4430_v24, %v4393_v50  ;;  %v4758_v36 = vadd.f32 %v4757_v35, %v4756_v31  ;;  %15172 = vst [vmem:[#allocation23_spill] sm:$0xff] %v12471_v60  ;;  %v4934_v35 = vld [vmem:[#allocation3 + $0x42e] sm:$0xff] }
 0x459   : > { %v4761_v47 = vsel %vm4110_vm2, %v4732_v53, 0.0  ;;  %v4740_v17 = vsel %vm4110_vm2, %v4725_v51, 0.0  ;;  %v4763_v52 = vsel %vm4110_vm2, %v4734_v22, 0.0  ;;  %v4733_v11 = vmul.f32 %v12449_v6, %v12449_v6  ;;  %v5185_v6 = vld [vmem:[#allocation3 + $0x5ef] sm:$0xff] }
 0x45a   : > { %v4739_v7 = vadd.f32 %v4738_v16, %v4737_v20  ;;  %v4942_v24 = vmul.f32 %v12453_v30, %v12453_v30  ;;  %v4470_v53 = vadd.f32 %v12350_v26, %v4433_v27  ;;  %v4760_v33 = vadd.f32 %v4759_v45, %v4758_v36  ;;  %v4936_v16 = vld [vmem:[#allocation3 + $0x45e] sm:$0xff] }
 0x45b   : > { %v4742_v51 = vsel %vm4110_vm2, %v4727_v12, 0.0  ;;  %v4744_v31 = vsel %vm4110_vm2, %v4729_v29, 0.0  ;;  %v4746_v48 = vsel %vm4110_vm2, %v4731_v39, 0.0  ;;  %v4944_v20 = vmul.f32 %v12464_v2, %v12464_v2  ;;  %v12487_v29 = vld [vmem:[#allocation3 + $0x336] sm:$0xff] }
 0x45c   : > { %v4741_v22 = vadd.f32 %v4740_v17, %v4739_v7  ;;  %v4969_v13 = vsel %vm4110_vm2, %v4940_v59, 0.0  ;;  %v4471_v30 = vadd.f32 %v4434_v34, %v12404_v19  ;;  %v4762_v26 = vadd.f32 %v4761_v47, %v4760_v33  ;;  %15173 = vst [vmem:[#allocation24_spill] sm:$0xff] %v12487_v29  ;;  %v12495_v47 = vld [vmem:[#allocation3 + $0x306] sm:$0xff] }
 0x45d   : > { %v4946_v12 = vmul.f32 %v12471_v60, %v12471_v60  ;;  %v4948_v27 = vmul.f32 %v4932_v58, %v4932_v58  ;;  %v4950_v17 = vmul.f32 %v4934_v35, %v4934_v35  ;;  %v4968_v39 = vsel %vm4110_vm2, %v12411_v15, 0.0  ;;  %15174 = vst [vmem:[#allocation25_spill] sm:$0xff] %v12495_v47  ;;  %v12497_v33 = vld [vmem:[#allocation3 + $0x366] sm:$0xff] }
 0x45e   : > { %v4743_v36 = vadd.f32 %v4742_v51, %v4741_v22  ;;  %v4971_v7 = vsel %vm4110_vm2, %v4942_v24, 0.0  ;;  %v4534_v2 = vadd.f32 %v4518_v21, %v4470_v53  ;;  %v4748_v59 = vsel %vm4110_vm2, %v4733_v11, 0.0  ;;  %15175 = vst [vmem:[#allocation26_spill] sm:$0xff] %v12497_v33  ;;  %v12504_v22 = vld [vmem:[#allocation3 + $0x396] sm:$0xff]  ;;  %v12511_v53 = vld [vmem:[#allocation3 + $0x3c6] sm:$0xff] }
 0x45f   : > { %v4952_v19 = vmul.f32 %v4936_v16, %v4936_v16  ;;  %v4970_v34 = vadd.f32 %v4969_v13, %v4968_v39  ;;  %v12499_v58 = vadd.f32 %v4763_v52, %v4762_v26  ;;  %v4973_v35 = vsel %vm4110_vm2, %v4944_v20, 0.0  ;;  %15176 = vst [vmem:[#allocation27_spill] sm:$0xff] %v12504_v22  ;;  %15177 = vst [vmem:[#allocation28_spill] sm:$0xff] %v12511_v53  ;;  %v12513_v52 = vld [vmem:[#allocation3 + $0x3f6] sm:$0xff]  ;;  %v12518_v26 = vld [vmem:[#allocation3 + $0x426] sm:$0xff] }
 0x460   : > { %v4745_v51 = vadd.f32 %v4744_v31, %v4743_v36  ;;  %v4939_v15 = vmul.f32 %v12487_v29, %v12487_v29  ;;  %v4535_v21 = vadd.f32 %v12432_v8, %v4471_v30  ;;  %v4975_v13 = vsel %vm4110_vm2, %v4946_v12, 0.0  ;;  %15178 = vst [vmem:[#allocation29_spill] sm:$0xff] %v12513_v52  ;;  %15179 = vst [vmem:[#allocation30_spill] sm:$0xff] %v12518_v26  ;;  %v12526_v39 = vld [vmem:[#allocation3 + $0x456] sm:$0xff]  ;;  %v12545_v29 = vld [vmem:[#allocation3 + $0x4ff] sm:$0xff] }
 0x461   : > { %v4972_v11 = vadd.f32 %v4971_v7, %v4970_v34  ;;  %v4977_v24 = vsel %vm4110_vm2, %v4948_v27, 0.0  ;;  %v4979_v20 = vsel %vm4110_vm2, %v4950_v17, 0.0  ;;  %v4937_v36 = vmul.f32 %v12495_v47, %v12495_v47  ;;  %15180 = vst [vmem:[#allocation31_spill] sm:$0xff] %v12526_v39  ;;  %v12530_v7 = vld [vmem:[#allocation3 + $0x4cf] sm:$0xff]  ;;  %15183 = vst [vmem:[#allocation34_spill] sm:$0xff] %v12545_v29  ;;  %v5183_v47 = vld [vmem:[#allocation3 + $0x5bf] sm:$0xff] }
 0x462   : > { %v4747_v31 = vadd.f32 %v4746_v48, %v4745_v51  ;;  %v4941_v8 = vmul.f32 %v12497_v33, %v12497_v33  ;;  %v4555_v30 = vadd.f32 %v12319_v41, %v4534_v2  ;;  %v4981_v27 = vsel %vm4110_vm2, %v4952_v19, 0.0  ;;  %15181 = vst [vmem:[#allocation32_spill] sm:$0xff] %v12530_v7 }
 0x463   : > { %v4974_v12 = vadd.f32 %v4973_v35, %v4972_v11  ;;  %v4943_v48 = vmul.f32 %v12504_v22, %v12504_v22  ;;  %v4945_v51 = vmul.f32 %v12511_v53, %v12511_v53  ;;  %v4947_v33 = vmul.f32 %v12513_v52, %v12513_v52  ;;  %v12543_v22 = vld [vmem:[#allocation3 + $0x49f] sm:$0xff]  ;;  %v12551_v53 = vld [vmem:[#allocation3 + $0x52f] sm:$0xff] }
 0x464   : > { %v4749_v34 = vadd.f32 %v4748_v59, %v4747_v31  ;;  %v4954_v41 = vsel %vm4110_vm2, %v4939_v15, 0.0  ;;  %v4556_v19 = vadd.f32 %v4535_v21, %v12370_v44  ;;  %v4949_v11 = vmul.f32 %v12518_v26, %v12518_v26  ;;  %15182 = vst [vmem:[#allocation33_spill] sm:$0xff] %v12543_v22  ;;  %15184 = vst [vmem:[#allocation35_spill] sm:$0xff] %v12551_v53  ;;  %v12558_v26 = vld [vmem:[#allocation3 + $0x58f] sm:$0xff] }
 0x465   : > { %v4976_v35 = vadd.f32 %v4975_v13, %v4974_v12  ;;  %v4951_v31 = vmul.f32 %v12526_v39, %v12526_v39  ;;  %v4953_v52 = vsel %vm4110_vm2, %v4937_v36, 0.0  ;;  %v4956_v15 = vsel %vm4110_vm2, %v4941_v8, 0.0  ;;  %v12556_v12 = vld [vmem:[#allocation3 + $0x55f] sm:$0xff]  ;;  %15186 = vst [vmem:[#allocation37_spill] sm:$0xff] %v12558_v26 }
 0x466   : > { %v5189_v44 = vmul.f32 %v12530_v7, %v12530_v7  ;;  %v4955_v13 = vadd.f32 %v4954_v41, %v4953_v52  ;;  %15185 = vst [vmem:[#allocation36_spill] sm:$0xff] %v12556_v12  ;;  %v4960_v36 = vsel %vm4110_vm2, %v4945_v51, 0.0  ;;  %v4962_v8 = vsel %vm4110_vm2, %v4947_v33, 0.0 }
 0x467   : > { %v4978_v21 = vadd.f32 %v4977_v24, %v4976_v35  ;;  %v5187_v7 = vmul.f32 %v12543_v22, %v12543_v22  ;;  %v5191_v24 = vmul.f32 %v12545_v29, %v12545_v29  ;;  %v5195_v51 = vmul.f32 %v12556_v12, %v12556_v12  ;;  %v12582_v12 = vld [vmem:[#allocation3 + $0x481] sm:$0xff] }
 0x468   : > { %v4957_v41 = vadd.f32 %v4956_v15, %v4955_v13  ;;  %v5197_v33 = vmul.f32 %v12558_v26, %v12558_v26  ;;  %v5204_v22 = vsel %vm4110_vm2, %v5189_v44, 0.0  ;;  %v4964_v15 = vsel %vm4110_vm2, %v4949_v11, 0.0  ;;  %15187 = vst [vmem:[#allocation38_spill] sm:$0xff] %v12582_v12 }
 0x469   : > { %v4980_v54 = vadd.f32 %v4979_v20, %v4978_v21  ;;  %v5206_v13 = vsel %vm4110_vm2, %v5191_v24, 0.0  ;;  %v5391_v20 = vld [vmem:[#allocation3 + $0x4b1] sm:$0xff] }
 0x46a   : > { %v12588_v21 = vld [vmem:[#allocation3 + $0x4d7] sm:$0xff]  ;;  %v5212_v24 = vsel %vm4110_vm2, %v5197_v33, 0.0 }
 0x46b   : > { %v12584_v26 = vadd.f32 %v4981_v27, %v4980_v54  ;;  %15188 = vst [vmem:[#allocation39_spill] sm:$0xff] %v12588_v21  ;;  %v5395_v54 = vld [vmem:[#allocation3 + $0x511] sm:$0xff]  ;;  %v5397_v27 = vld [vmem:[#allocation3 + $0x541] sm:$0xff] }
 0x479   : > { %v12441_v55 = vpop.permute.xlu0 %4622 }
 0x47a   : > { %v4628_v2 = vadd.f32 %v12441_v55, %v4555_v30  ;;  %v4958_v30 = vsel %vm4110_vm2, %v4943_v48, 0.0 }
 0x47b   : > { %v12455_v63 = vpop.permute.xlu1 %4624 }
 0x47c   : > { %v4629_v52 = vadd.f32 %v12455_v63, %v4556_v19  ;;  %v5201_v63 = vmul.f32 %v5185_v6, %v5185_v6  ;;  %v4959_v19 = vadd.f32 %v4958_v30, %v4957_v41  ;;  %v5393_v6 = vld [vmem:[#allocation3 + $0x4e1] sm:$0xff] }
 0x47d   : > { %v12466_v28 = vpop.permute.xlu0 %4841 }
 0x47e   : > { %v4961_v11 = vadd.f32 %v4960_v36, %v4959_v19  ;;  %v12602_v36 = vld [vmem:[#allocation3 + $0x4a7] sm:$0xff]  ;;  %v5405_v19 = vmul.f32 %v12582_v12, %v12582_v12 }
 0x47f   : > { %v12478_v50 = vpop.permute.xlu1 %4697  ;;  %v5188_v5 = vmul.f32 %v12602_v36, %v12602_v36 }
 0x480   : > { %v4702_v32 = vadd.f32 %v12478_v50, %v4629_v52 }
 0x481   : > { %v12489_v45 = vpop.permute.xlu0 %4913 }
 0x483   : > { %v12501_v60 = vpop.permute.xlu1 %4802 }
 0x485   : > { %v12515_v16 = vpop.permute.xlu0 %5017 }
 0x487   : > { %v12532_v17 = vpop.permute.xlu1 %4843 }
 0x489   : > { %v4696_v59 = vpop.permute.xlu0 %4695 }
 0x48a   : > { %v4701_v55 = vadd.f32 %v4696_v59, %v4628_v2  ;;  %v5193_v2 = vmul.f32 %v12551_v53, %v12551_v53  ;;  %v5199_v59 = vmul.f32 %v5183_v47, %v5183_v47  ;;  %v4966_v47 = vsel %vm4110_vm2, %v4951_v31, 0.0  ;;  %v5399_v31 = vld [vmem:[#allocation3 + $0x571] sm:$0xff] }
 0x48b   : > { %v12560_v39 = vpop.permute.xlu1 %4915  ;;  %v5409_v53 = vmul.f32 %v5393_v6, %v5393_v6 }
 0x48c   : > { %v4765_v48 = vadd.f32 %v4749_v34, %v4701_v55  ;;  %v5203_v55 = vsel %vm4110_vm2, %v5187_v7, 0.0  ;;  %v5208_v50 = vsel %vm4110_vm2, %v5193_v2, 0.0  ;;  %v5210_v7 = vsel %vm4110_vm2, %v5195_v51, 0.0  ;;  %v12604_v51 = vld [vmem:[#allocation3 + $0x507] sm:$0xff] }
 0x48d   : > { %v4801_v35 = vpop.permute.xlu0 %4800  ;;  %v5205_v44 = vadd.f32 %v5204_v22, %v5203_v55  ;;  %v12595_v52 = vsel %vm4110_vm2, %v5199_v59, 0.0  ;;  %v4766_v22 = vadd.f32 %v12499_v58, %v4702_v32  ;;  %v12600_v2 = vsel %vm4110_vm2, %v5201_v63, 0.0  ;;  %15189 = vst [vmem:[#allocation40_spill] sm:$0xff] %v12604_v51  ;;  %v5403_v59 = vld [vmem:[#allocation3 + $0x5d1] sm:$0xff] }
 0x48e   : > { %v4806_v29 = vadd.f32 %v4801_v35, %v4765_v48  ;;  %v5401_v35 = vld [vmem:[#allocation3 + $0x5a1] sm:$0xff]  ;;  %v5407_v55 = vmul.f32 %v5391_v20, %v5391_v20  ;;  %v5190_v32 = vmul.f32 %v12588_v21, %v12588_v21  ;;  %v5413_v58 = vmul.f32 %v5397_v27, %v5397_v27 }
 0x48f   : > { %v12577_v34 = vpop.permute.xlu1 %5019  ;;  %v5207_v41 = vadd.f32 %v5206_v13, %v5205_v44  ;;  %v5415_v63 = vmul.f32 %v5399_v31, %v5399_v31  ;;  %v12612_v13 = vld [vmem:[#allocation3 + $0x537] sm:$0xff]  ;;  %v12616_v40 = vmul.f32 %v5401_v35, %v5401_v35  ;;  %v5192_v20 = vmul.f32 %v12604_v51, %v12604_v51  ;;  %v12626_v27 = vld [vmem:[#allocation3 + $0x567] sm:$0xff] }
 0x490   : > { %v4847_v48 = vadd.f32 %v12466_v28, %v4806_v29  ;;  %v4963_v28 = vadd.f32 %v4962_v8, %v4961_v11  ;;  %v5411_v29 = vmul.f32 %v5395_v54, %v5395_v54  ;;  %15190 = vst [vmem:[#allocation41_spill] sm:$0xff] %v12612_v13  ;;  %v4807_v6 = vadd.f32 %v12501_v60, %v4766_v22  ;;  %v12651_v51 = vld [vmem:[#allocation3 + $0x4e9] sm:$0xff] }
 0x491   : > { %v12590_v30 = vpop.permute.xlu0 %5381  ;;  %v5209_v49 = vadd.f32 %v5208_v50, %v5207_v41  ;;  %v12624_v54 = vmul.f32 %v5403_v59, %v5403_v59  ;;  %v5421_v50 = vsel %vm4110_vm2, %v5405_v19, 0.0  ;;  %v5422_v41 = vsel %vm4110_vm2, %v5407_v55, 0.0  ;;  %v12640_v59 = vld [vmem:[#allocation3 + $0x4b9] sm:$0xff]  ;;  %15194 = vst [vmem:[#allocation45_spill] sm:$0xff] %v12651_v51 }
 0x492   : > { %v4919_v8 = vadd.f32 %v12489_v45, %v4847_v48  ;;  %v4965_v11 = vadd.f32 %v4964_v15, %v4963_v28  ;;  %v5194_v35 = vmul.f32 %v12612_v13, %v12612_v13  ;;  %v5219_v12 = vsel %vm4110_vm2, %v5190_v32, 0.0  ;;  %v12638_v48 = vld [vmem:[#allocation3 + $0x597] sm:$0xff]  ;;  %15191 = vst [vmem:[#allocation42_spill] sm:$0xff] %v12640_v59 }
 0x493   : > { %v12606_v33 = vpop.permute.xlu1 %5383  ;;  %v4848_v60 = vadd.f32 %v12532_v17, %v4807_v6  ;;  %v5424_v45 = vsel %vm4110_vm2, %v5409_v53, 0.0  ;;  %v5426_v15 = vsel %vm4110_vm2, %v5411_v29, 0.0  ;;  %v5211_v19 = vadd.f32 %v5210_v7, %v5209_v49  ;;  %v12647_v53 = vld [vmem:[#allocation3 + $0x5c7] sm:$0xff] }
 0x494   : > { %v4967_v22 = vadd.f32 %v4966_v47, %v4965_v11  ;;  %v5196_v55 = vmul.f32 %v12626_v27, %v12626_v27  ;;  %v5218_v13 = vsel %vm4110_vm2, %v5188_v5, 0.0  ;;  %v5221_v32 = vsel %vm4110_vm2, %v5192_v20, 0.0  ;;  %15192 = vst [vmem:[#allocation43_spill] sm:$0xff] %v12647_v53  ;;  %v12649_v11 = vld [vmem:[#allocation3 + $0x489] sm:$0xff] }
 0x495   : > { %v12614_v44 = vpop.permute.xlu0 %5485  ;;  %v4920_v17 = vadd.f32 %v12560_v39, %v4848_v60  ;;  %v5423_v6 = vadd.f32 %v5422_v41, %v5421_v50  ;;  %v5220_v29 = vadd.f32 %v5219_v12, %v5218_v13  ;;  %15193 = vst [vmem:[#allocation44_spill] sm:$0xff] %v12649_v11  ;;  %v5428_v49 = vsel %vm4110_vm2, %v5413_v58, 0.0  ;;  %v12660_v12 = vld [vmem:[#allocation3 + $0x5f7] sm:$0xff] }
 0x496   : > { %v4983_v47 = vadd.f32 %v4967_v22, %v4919_v8  ;;  %v5198_v7 = vmul.f32 %v12638_v48, %v12638_v48  ;;  %v5223_v5 = vsel %vm4110_vm2, %v5194_v35, 0.0  ;;  %v5408_v39 = vmul.f32 %v12640_v59, %v12640_v59  ;;  %15195 = vst [vmem:[#allocation46_spill] sm:$0xff] %v12660_v12  ;;  %v12662_v41 = vld [vmem:[#allocation3 + $0x519] sm:$0xff] }
 0x497   : > { %v12628_v31 = vpop.permute.xlu1 %5487  ;;  %v5213_v20 = vadd.f32 %v5212_v24, %v5211_v19  ;;  %v5425_v8 = vadd.f32 %v5424_v45, %v5423_v6  ;;  %v5430_v50 = vsel %vm4110_vm2, %v5415_v63, 0.0  ;;  %v5222_v13 = vadd.f32 %v5221_v32, %v5220_v29  ;;  %15196 = vst [vmem:[#allocation47_spill] sm:$0xff] %v12662_v41  ;;  %v12674_v6 = vld [vmem:[#allocation3 + $0x549] sm:$0xff] }
 0x498   : > { %v5200_v58 = vmul.f32 %v12647_v53, %v12647_v53  ;;  %v5225_v22 = vsel %vm4110_vm2, %v5196_v55, 0.0  ;;  %v5406_v35 = vmul.f32 %v12649_v11, %v12649_v11  ;;  %v5410_v24 = vmul.f32 %v12651_v51, %v12651_v51  ;;  %15197 = vst [vmem:[#allocation48_spill] sm:$0xff] %v12674_v6 }
 0x499   : > { %v5091_v28 = vpop.permute.xlu0 %5090  ;;  %v4984_v45 = vadd.f32 %v12584_v26, %v4920_v17  ;;  %v5023_v63 = vadd.f32 %v12515_v16, %v4983_v47  ;;  %v5215_v19 = vadd.f32 %v12595_v52, %v5213_v20  ;;  %v5224_v32 = vadd.f32 %v5223_v5, %v5222_v13  ;;  %v12683_v52 = vld [vmem:[#allocation3 + $0x579] sm:$0xff] }
 0x49a   : > { %v5202_v59 = vmul.f32 %v12660_v12, %v12660_v12  ;;  %v5227_v55 = vsel %vm4110_vm2, %v5198_v7, 0.0  ;;  %v5412_v11 = vmul.f32 %v12662_v41, %v12662_v41  ;;  %v5437_v51 = vsel %vm4110_vm2, %v5408_v39, 0.0 }
 0x49b   : > { %v5166_v21 = vpop.permute.xlu1 %5165  ;;  %v5096_v53 = vadd.f32 %v5091_v28, %v5023_v63  ;;  %v5217_v26 = vadd.f32 %v12600_v2, %v5215_v19  ;;  %v5427_v16 = vadd.f32 %v5426_v15, %v5425_v8  ;;  %v5226_v17 = vadd.f32 %v5225_v22, %v5224_v32  ;;  %v12691_v63 = vld [vmem:[#allocation3 + $0x5a9] sm:$0xff] }
 0x49c   : > { %v5229_v5 = vsel %vm4110_vm2, %v5200_v58, 0.0  ;;  %v5414_v20 = vmul.f32 %v12674_v6, %v12674_v6  ;;  %v5436_v7 = vsel %vm4110_vm2, %v5406_v35, 0.0  ;;  %v5439_v13 = vsel %vm4110_vm2, %v5410_v24, 0.0  ;;  %v5404_v24 = vld [vmem:[#allocation3 + $0x5d9] sm:$0xff] }
 0x49d   : > { %v5310_v60 = vpop.permute.xlu0 %5309  ;;  %v5024_v41 = vadd.f32 %v12577_v34, %v4984_v45  ;;  %v5228_v28 = vadd.f32 %v5227_v55, %v5226_v17  ;;  %v5438_v2 = vadd.f32 %v5437_v51, %v5436_v7  ;;  %v5429_v8 = vadd.f32 %v5428_v49, %v5427_v16 }
 0x49e   : > { %v5231_v22 = vsel %vm4110_vm2, %v5202_v59, 0.0  ;;  %v5416_v58 = vmul.f32 %v12683_v52, %v12683_v52  ;;  %v5441_v19 = vsel %vm4110_vm2, %v5412_v11, 0.0  ;;  %v5418_v51 = vmul.f32 %v12691_v63, %v12691_v63 }
 0x49f   : > { %v5271_v29 = vpop.permute.xlu1 %5270  ;;  %v5230_v6 = vadd.f32 %v5229_v5, %v5228_v28  ;;  %v5440_v12 = vadd.f32 %v5439_v13, %v5438_v2  ;;  %v5431_v34 = vadd.f32 %v5430_v50, %v5429_v8  ;;  %v5443_v59 = vsel %vm4110_vm2, %v5414_v20, 0.0 }
 0x4a0   : > { %v5434_v11 = vsel %vm4110_vm2, %v12624_v54, 0.0  ;;  %v5447_v7 = vsel %vm4110_vm2, %v5418_v51, 0.0  ;;  %v10013_v51 = vld [vmem:[#allocation3 + $0x48] sm:$0xff] }
 0x4a1   : > { %v5164_v47 = vpop.permute.xlu0 %5163  ;;  %v5232_v16 = vadd.f32 %v5231_v22, %v5230_v6  ;;  %v5442_v17 = vadd.f32 %v5441_v19, %v5440_v12 }
 0x4a2   : > { %v5169_v39 = vadd.f32 %v5164_v47, %v5096_v53  ;;  %v5432_v53 = vsel %vm4110_vm2, %v12616_v40, 0.0 }
 0x4a3   : > { %v5093_v15 = vpop.permute.xlu1 %5092  ;;  %v5433_v50 = vadd.f32 %v5432_v53, %v5431_v34  ;;  %v5444_v40 = vadd.f32 %v5443_v59, %v5442_v17  ;;  %v10012_v53 = vld [vmem:[#allocation3 + $0x70] sm:$0xff] }
 0x4a4   : > { %v5097_v32 = vadd.f32 %v5093_v15, %v5024_v41  ;;  %v5233_v35 = vadd.f32 %v5217_v26, %v5169_v39  ;;  %v5420_v41 = vmul.f32 %v5404_v24, %v5404_v24  ;;  %v5445_v26 = vsel %vm4110_vm2, %v5416_v58, 0.0  ;;  %v10011_v24 = vld [vmem:[#allocation3 + $0x18] sm:$0xff] }
 0x4a5   : > { %v5269_v45 = vpop.permute.xlu0 %5268  ;;  %v5435_v13 = vadd.f32 %v5434_v11, %v5433_v50 }
 0x4a6   : > { %v5170_v49 = vadd.f32 %v5166_v21, %v5097_v32  ;;  %v5274_v55 = vadd.f32 %v5269_v45, %v5233_v35  ;;  %v5446_v21 = vadd.f32 %v5445_v26, %v5444_v40  ;;  %v5449_v6 = vsel %vm4110_vm2, %v5420_v41, 0.0  ;;  %v10016_v41 = vld [vmem:[#allocation3 + $0xa8] sm:$0xff]  ;;  %v10017_v40 = vld [vmem:[#allocation3 + $0x195] sm:$0xff] }
 0x4a7   : > { %v5312_v12 = vpop.permute.xlu1 %5311 }
 0x4a8   : > { %v5315_v47 = vadd.f32 %v5310_v60, %v5274_v55  ;;  %v5234_v5 = vadd.f32 %v5232_v16, %v5170_v49  ;;  %v5448_v2 = vadd.f32 %v5447_v7, %v5446_v21  ;;  %v10014_v49 = vld [vmem:[#allocation3 + $0xa0] sm:$0xff]  ;;  %v10015_v16 = vld [vmem:[#allocation3 + $0x78] sm:$0xff] }
 0x4a9   : > { %v5835_v7 = vld [vmem:[#allocation3 + $0x19d] sm:$0xff] }
 0x4aa   : > { %v5387_v39 = vadd.f32 %v12590_v30, %v5315_v47  ;;  %v5275_v20 = vadd.f32 %v5271_v29, %v5234_v5  ;;  %v5450_v8 = vadd.f32 %v5449_v6, %v5448_v2  ;;  %v5839_v6 = vld [vmem:[#allocation3 + $0x1fd] sm:$0xff] }
 0x4ac   : > { %v5451_v28 = vadd.f32 %v5435_v13, %v5387_v39  ;;  %v5316_v54 = vadd.f32 %v5312_v12, %v5275_v20  ;;  %v10018_v13 = vld [vmem:[#allocation3 + $0x1c5] sm:$0xff]  ;;  %v5837_v39 = vld [vmem:[#allocation3 + $0x1cd] sm:$0xff]  ;;  %v10019_v20 = vld [vmem:[#allocation3 + $0x1f5] sm:$0xff] }
 0x4ad   : > { %v10020_v12 = vld [vmem:[#allocation3 + $0x225] sm:$0xff] }
 0x4ae   : > { %v5491_v15 = vadd.f32 %v12614_v44, %v5451_v28  ;;  %v5388_v60 = vadd.f32 %v12606_v33, %v5316_v54  ;;  %v10009_v33 = vld [vmem:[#allocation3 + $0x10] sm:$0xff] }
 0x4af   : > { %v5841_v54 = vld [vmem:[#allocation3 + $0x22d] sm:$0xff] }
 0x4b0   : > { %v5493_v22 = vmax.f32 %v5491_v15, 1e-24  ;;  %v5452_v58 = vadd.f32 %v5450_v8, %v5388_v60  ;;  %v10021_v15 = vld [vmem:[#allocation3 + $0x255] sm:$0xff] }
 0x4b2   : > { %10005 = vrsqrt.f32 %v5493_v22  ;;  %v5492_v19 = vadd.f32 %v12628_v31, %v5452_v58  ;;  %v10010_v31 = vld [vmem:[#allocation3 + $0x40] sm:$0xff] }
 0x4b3   : > { %v5843_v22 = vld [vmem:[#allocation3 + $0x25d] sm:$0xff] }
 0x4b4   : > { %v5494_v32 = vmax.f32 %v5492_v19, 1e-24 }
 0x4b6   : > { %10007 = vrsqrt.f32 %v5494_v32  ;;  %v5845_v32 = vld [vmem:[#allocation3 + $0x28d] sm:$0xff] }
 0x4bc   : > { %v12711_v30 = vpop.eup %10005 }
 0x4bd   : > { %5612 = vrot.lane.b32.xlu0 %v12711_v30, %s10223_s26  ;;  %v5497_v44 = vmul.f32 %v10009_v33, %v12711_v30  ;;  %v5499_v35 = vmul.f32 %v10010_v31, %v12711_v30  ;;  %v5501_v45 = vmul.f32 %v10012_v53, %v12711_v30  ;;  %v5503_v55 = vmul.f32 %v10014_v49, %v12711_v30  ;;  %v5847_v31 = vld [vmem:[#allocation3 + $0x2bd] sm:$0xff] }
 0x4be   : > { %v5505_v11 = vmul.f32 %v12711_v30, %v12293_v62  ;;  %v5507_v50 = vmul.f32 %v12711_v30, %v12300_v9  ;;  %v5509_v62 = vmul.f32 %v12711_v30, %v12311_v57  ;;  %v5511_v9 = vmul.f32 %v12711_v30, %v12324_v10 }
 0x4bf   : > { %v5850_v57 = vmul.f32 %v10017_v40, %v12711_v30  ;;  %v5852_v10 = vmul.f32 %v10018_v13, %v12711_v30  ;;  %v5854_v21 = vmul.f32 %v10019_v20, %v12711_v30  ;;  %v5856_v28 = vmul.f32 %v10020_v12, %v12711_v30  ;;  %v10030_v13 = vld [vmem:[#allocation3 + $0x223] sm:$0xff]  ;;  %v10031_v20 = vld [vmem:[#allocation3 + $0x27b] sm:$0xff]  ;;  %v6310_v12 = vld [vmem:[#allocation3 + $0x2ab] sm:$0xff] }
 0x4c0   : > { %v12715_v29 = vpop.eup %10007  ;;  %v5858_v8 = vmul.f32 %v10021_v15, %v12711_v30  ;;  %v5860_v58 = vmul.f32 %v12711_v30, %v12330_v56  ;;  %v5862_v33 = vmul.f32 %v12711_v30, %v12339_v18  ;;  %v5864_v56 = vmul.f32 %v12711_v30, %v12352_v3  ;;  %v10033_v15 = vld [vmem:[#allocation3 + $0x283] sm:$0xff] }
 0x4c1   : > { %5731 = vrot.lane.b32.xlu0 %v12711_v30, %s10224_s30  ;;  %5614 = vrot.lane.b32.xlu1 %v12715_v29, %s10223_s26  ;;  %v5498_v34 = vmul.f32 %v10011_v24, %v12715_v29  ;;  %v5500_v59 = vmul.f32 %v10013_v51, %v12715_v29  ;;  %v5502_v17 = vmul.f32 %v10015_v16, %v12715_v29  ;;  %v5849_v24 = vld [vmem:[#allocation3 + $0x2ed] sm:$0xff]  ;;  %v10023_v51 = vld [vmem:[#allocation3 + $0x1bb] sm:$0xff]  ;;  %s10235_s26 = smov 108  }
 0x4c2   : > { %v5504_v26 = vmul.f32 %v10016_v41, %v12715_v29  ;;  %v5506_v47 = vmul.f32 %v12715_v29, %v12296_v38  ;;  %v5508_v5 = vmul.f32 %v12715_v29, %v12302_v61  ;;  %v5510_v38 = vmul.f32 %v12715_v29, %v12334_v46  ;;  %v10026_v41 = vld [vmem:[#allocation3 + $0x1c3] sm:$0xff] }
 0x4c3   : > { %v5512_v61 = vmul.f32 %v12715_v29, %v12341_v1  ;;  %v5851_v46 = vmul.f32 %v12715_v29, %v5835_v7  ;;  %v5853_v1 = vmul.f32 %v12715_v29, %v5837_v39  ;;  %v5855_v2 = vmul.f32 %v12715_v29, %v5839_v6 }
 0x4c4   : > { %v5857_v60 = vmul.f32 %v12715_v29, %v5841_v54  ;;  %v5859_v19 = vmul.f32 %v12715_v29, %v5843_v22  ;;  %v5865_v53 = vmul.f32 %v12715_v29, %v5849_v24  ;;  %v6316_v3 = vmul.f32 %v10023_v51, %v12711_v30 }
 0x4c5   : > { %5963 = vrot.lane.b32.xlu0 %v12711_v30, %s10221_s6  ;;  %5733 = vrot.lane.b32.xlu1 %v12715_v29, %s10224_s30  ;;  %v6326_v54 = vmul.f32 %v12711_v30, %v6310_v12  ;;  %v6780_v24 = vmul.f32 %v12711_v30, %v12398_v25  ;;  %s10236_s30 = smov 116  }
 0x4c9   : > { %6082 = vrot.lane.b32.xlu0 %v12711_v30, %s10222_s8  ;;  %5965 = vrot.lane.b32.xlu1 %v12715_v29, %s10221_s6  ;;  %s10234_s6 = smov 107  }
 0x4cd   : > { %6540 = vrot.lane.b32.xlu0 %v12711_v30, %s10226_s21  ;;  %6084 = vrot.lane.b32.xlu1 %v12715_v29, %s10222_s8 }
 0x4d1   : > { %6659 = vrot.lane.b32.xlu0 %v12711_v30, %s10228_s9  ;;  %6542 = vrot.lane.b32.xlu1 %v12715_v29, %s10226_s21  ;;  %s10238_s21 = smov 105  }
 0x4d5   : > { %6891 = vrot.lane.b32.xlu0 %v12711_v30, %s10227_s7  ;;  %6661 = vrot.lane.b32.xlu1 %v12715_v29, %s10228_s9  ;;  %s10240_s9 = smov 122  }
 0x4d9   : > { %7010 = vrot.lane.b32.xlu0 %v12711_v30, %s10225_s5  ;;  %6893 = vrot.lane.b32.xlu1 %v12715_v29, %s10227_s7  ;;  %s10239_s7 = smov 119  }
 0x4dd   : > { %7468 = vrot.lane.b32.xlu0 %v12711_v30, %s10232_s4  ;;  %7012 = vrot.lane.b32.xlu1 %v12715_v29, %s10225_s5  ;;  %s10237_s5 = smov 102  }
 0x4e1   : > { %7587 = vrot.lane.b32.xlu0 %v12711_v30, %s10229_s10  ;;  %7470 = vrot.lane.b32.xlu1 %v12715_v29, %s10232_s4 }
 0x4e5   : > { %7819 = vrot.lane.b32.xlu0 %v12711_v30, %s10230_s28  ;;  %7589 = vrot.lane.b32.xlu1 %v12715_v29, %s10229_s10  ;;  %s10241_s10 = smov 97  }
 0x4e9   : > { %7938 = vrot.lane.b32.xlu0 %v12711_v30, %s10231_s29  ;;  %7821 = vrot.lane.b32.xlu1 %v12715_v29, %s10230_s28 }
 0x4ed   : > { %5529 = vrot.lane.b32.xlu0 %v5497_v44, %s10233_s20  ;;  %7940 = vrot.lane.b32.xlu1 %v12715_v29, %s10231_s29  ;;  %v5861_v44 = vmul.f32 %v12715_v29, %v5845_v32  ;;  %v6327_v32 = vmul.f32 %v12715_v29, %v12367_v4 }
 0x4f1   : > { %5533 = vrot.lane.b32.xlu0 %v5499_v35, %s10233_s20  ;;  %5531 = vrot.lane.b32.xlu1 %v5498_v34, %s10233_s20  ;;  %v5863_v35 = vmul.f32 %v12715_v29, %v5847_v31  ;;  %v10022_v34 = vld [vmem:[#allocation3 + $0x18b] sm:$0xff]  ;;  %v6778_v31 = vmul.f32 %v12711_v30, %v12407_v23 }
 0x4f2   : > { %v6314_v18 = vmul.f32 %v10022_v34, %v12711_v30  ;;  %v6779_v34 = vmul.f32 %v12715_v29, %v12380_v42 }
 0x4f5   : > { %5537 = vrot.lane.b32.xlu0 %v5501_v45, %s10233_s20  ;;  %5535 = vrot.lane.b32.xlu1 %v5500_v59, %s10233_s20  ;;  %v10024_v59 = vld [vmem:[#allocation3 + $0x193] sm:$0xff] }
 0x4f6   : > { %v6315_v49 = vmul.f32 %v10024_v59, %v12715_v29  ;;  %v6783_v59 = vmul.f32 %v12715_v29, %v12382_v43 }
 0x4f9   : > { %5541 = vrot.lane.b32.xlu0 %v5503_v55, %s10233_s20  ;;  %5539 = vrot.lane.b32.xlu1 %v5502_v17, %s10233_s20  ;;  %v10025_v17 = vld [vmem:[#allocation3 + $0x1eb] sm:$0xff] }
 0x4fd   : > { %5545 = vrot.lane.b32.xlu0 %v5505_v11, %s10233_s20  ;;  %5543 = vrot.lane.b32.xlu1 %v5504_v26, %s10233_s20  ;;  %v6318_v11 = vmul.f32 %v10025_v17, %v12711_v30  ;;  %v6317_v26 = vmul.f32 %v10026_v41, %v12715_v29  ;;  %v15198_v17 = vld [vmem:[#allocation18_spill] sm:$0xff]  ;;  %v15199_v41 = vld [vmem:[#allocation16_spill] sm:$0xff] }
 0x501   : > { %5549 = vrot.lane.b32.xlu0 %v5507_v50, %s10233_s20  ;;  %5547 = vrot.lane.b32.xlu1 %v5506_v47, %s10233_s20 }
 0x505   : > { %5553 = vrot.lane.b32.xlu0 %v5509_v62, %s10233_s20  ;;  %5551 = vrot.lane.b32.xlu1 %v5508_v5, %s10233_s20  ;;  %v10027_v62 = vld [vmem:[#allocation3 + $0x21b] sm:$0xff] }
 0x506   : > { %v6320_v5 = vmul.f32 %v10027_v62, %v12711_v30  ;;  %v15200_v62 = vld [vmem:[#allocation14_spill] sm:$0xff] }
 0x509   : > { %5557 = vrot.lane.b32.xlu0 %v5511_v9, %s10233_s20  ;;  %5555 = vrot.lane.b32.xlu1 %v5510_v38, %s10233_s20  ;;  %v10028_v9 = vld [vmem:[#allocation3 + $0x1f3] sm:$0xff] }
 0x50a   : > { %v6319_v38 = vmul.f32 %v10028_v9, %v12715_v29  ;;  %v15201_v9 = vld [vmem:[#allocation17_spill] sm:$0xff] }
 0x50d   : > { %5882 = vrot.lane.b32.xlu0 %v5850_v57, %s10233_s20  ;;  %5559 = vrot.lane.b32.xlu1 %v5512_v61, %s10233_s20  ;;  %v10029_v61 = vld [vmem:[#allocation3 + $0x24b] sm:$0xff] }
 0x50e   : > { %v6322_v7 = vmul.f32 %v10029_v61, %v12711_v30  ;;  %v6773_v61 = vld [vmem:[#allocation3 + $0x412] sm:$0xff] }
 0x511   : > { %5886 = vrot.lane.b32.xlu0 %v5852_v10, %s10233_s20  ;;  %5884 = vrot.lane.b32.xlu1 %v5851_v46, %s10233_s20  ;;  %v6321_v10 = vmul.f32 %v10030_v13, %v12715_v29 }
 0x515   : > { %5890 = vrot.lane.b32.xlu0 %v5854_v21, %s10233_s20  ;;  %5888 = vrot.lane.b32.xlu1 %v5853_v1, %s10233_s20  ;;  %v6324_v21 = vmul.f32 %v10031_v20, %v12711_v30  ;;  %v10032_v1 = vld [vmem:[#allocation3 + $0x253] sm:$0xff] }
 0x516   : > { %v6323_v6 = vmul.f32 %v10032_v1, %v12715_v29  ;;  %v6775_v1 = vld [vmem:[#allocation3 + $0x442] sm:$0xff] }
 0x519   : > { %5894 = vrot.lane.b32.xlu0 %v5856_v28, %s10233_s20  ;;  %5892 = vrot.lane.b32.xlu1 %v5855_v2, %s10233_s20 }
 0x51d   : > { %5898 = vrot.lane.b32.xlu0 %v5858_v8, %s10233_s20  ;;  %5896 = vrot.lane.b32.xlu1 %v5857_v60, %s10233_s20  ;;  %v6325_v8 = vmul.f32 %v10033_v15, %v12715_v29  ;;  %v6312_v60 = vld [vmem:[#allocation3 + $0x2db] sm:$0xff] }
 0x521   : > { %5902 = vrot.lane.b32.xlu0 %v5860_v58, %s10233_s20  ;;  %5900 = vrot.lane.b32.xlu1 %v5859_v19, %s10233_s20  ;;  %v6328_v19 = vmul.f32 %v12711_v30, %v6312_v60  ;;  %v6777_v60 = vld [vmem:[#allocation3 + $0x472] sm:$0xff] }
 0x525   : > { %5906 = vrot.lane.b32.xlu0 %v5862_v33, %s10233_s20  ;;  %5904 = vrot.lane.b32.xlu1 %v5861_v44, %s10233_s20 }
 0x529   : > { %5910 = vrot.lane.b32.xlu0 %v5864_v56, %s10233_s20  ;;  %5908 = vrot.lane.b32.xlu1 %v5863_v35, %s10233_s20  ;;  %v6329_v56 = vmul.f32 %v12715_v29, %v12375_v0 }
 0x52d   : > { %6346 = vrot.lane.b32.xlu0 %v6314_v18, %s10233_s20  ;;  %5912 = vrot.lane.b32.xlu1 %v5865_v53, %s10233_s20  ;;  %v6782_v18 = vmul.f32 %v12711_v30, %v12409_v37  ;;  %v10034_v53 = vld [vmem:[#allocation3 + $0x352] sm:$0xff] }
 0x52e   : > { %v6781_v51 = vmul.f32 %v10034_v53, %v12715_v29  ;;  %v15205_v53 = vld [vmem:[#allocation24_spill] sm:$0xff] }
 0x52f   : > { %v12840_v45 = vpop.permute.xlu0 %5612 }
 0x531   : > { %6350 = vrot.lane.b32.xlu0 %v6316_v3, %s10233_s20  ;;  %6348 = vrot.lane.b32.xlu1 %v6315_v49, %s10233_s20  ;;  %v6784_v3 = vmul.f32 %v12711_v30, %v12421_v14 }
 0x533   : > { %v12846_v55 = vpop.permute.xlu0 %5731  ;;  %v12848_v16 = vpop.permute.xlu1 %5614 }
 0x535   : > { %6354 = vrot.lane.b32.xlu0 %v6318_v11, %s10233_s20  ;;  %6352 = vrot.lane.b32.xlu1 %v6317_v26, %s10233_s20  ;;  %v6786_v11 = vmul.f32 %v12711_v30, %v15198_v17  ;;  %v6785_v26 = vmul.f32 %v12715_v29, %v15199_v41  ;;  %v15206_v41 = vld [vmem:[#allocation26_spill] sm:$0xff] }
 0x537   : > { %v12854_v50 = vpop.permute.xlu0 %5963  ;;  %v12856_v47 = vpop.permute.xlu1 %5733 }
 0x539   : > { %6358 = vrot.lane.b32.xlu0 %v6320_v5, %s10233_s20  ;;  %6356 = vrot.lane.b32.xlu1 %v6319_v38, %s10233_s20  ;;  %v6788_v5 = vmul.f32 %v12711_v30, %v15200_v62  ;;  %v6787_v38 = vmul.f32 %v12715_v29, %v15201_v9 }
 0x53b   : > { %v12862_v40 = vpop.permute.xlu0 %6082  ;;  %v12864_v57 = vpop.permute.xlu1 %5965 }
 0x53d   : > { %6362 = vrot.lane.b32.xlu0 %v6322_v7, %s10233_s20  ;;  %6360 = vrot.lane.b32.xlu1 %v6321_v10, %s10233_s20  ;;  %v15202_v10 = vld [vmem:[#allocation15_spill] sm:$0xff] }
 0x53e   : > { %v6790_v20 = vmul.f32 %v12711_v30, %v15202_v10 }
 0x53f   : > { %v12870_v46 = vpop.permute.xlu0 %6540  ;;  %v12872_v39 = vpop.permute.xlu1 %6084 }
 0x541   : > { %6366 = vrot.lane.b32.xlu0 %v6324_v21, %s10233_s20  ;;  %6364 = vrot.lane.b32.xlu1 %v6323_v6, %s10233_s20  ;;  %v6789_v21 = vmul.f32 %v12715_v29, %v6773_v61 }
 0x543   : > { %v12878_v28 = vpop.permute.xlu0 %6659  ;;  %v12880_v2 = vpop.permute.xlu1 %6542 }
 0x545   : > { %6370 = vrot.lane.b32.xlu0 %v6326_v54, %s10233_s20  ;;  %6368 = vrot.lane.b32.xlu1 %v6325_v8, %s10233_s20  ;;  %v15203_v54 = vld [vmem:[#allocation20_spill] sm:$0xff]  ;;  %v6791_v8 = vmul.f32 %v12715_v29, %v6775_v1 }
 0x546   : > { %v6792_v15 = vmul.f32 %v12711_v30, %v15203_v54 }
 0x547   : > { %v12886_v22 = vpop.permute.xlu0 %6891  ;;  %v12888_v58 = vpop.permute.xlu1 %6661 }
 0x549   : > { %6374 = vrot.lane.b32.xlu0 %v6328_v19, %s10233_s20  ;;  %6372 = vrot.lane.b32.xlu1 %v6327_v32, %s10233_s20 }
 0x54b   : > { %v12895_v33 = vpop.permute.xlu0 %7010  ;;  %v12897_v44 = vpop.permute.xlu1 %6893 }
 0x54d   : > { %6810 = vrot.lane.b32.xlu0 %v6778_v31, %s10233_s20  ;;  %6376 = vrot.lane.b32.xlu1 %v6329_v56, %s10233_s20  ;;  %v15204_v31 = vld [vmem:[#allocation25_spill] sm:$0xff] }
 0x54e   : > { %v7242_v56 = vmul.f32 %v12711_v30, %v15204_v31  ;;  %v7237_v31 = vld [vmem:[#allocation3 + $0x3fe] sm:$0xff] }
 0x54f   : > { %v12905_v35 = vpop.permute.xlu0 %7468  ;;  %v12907_v4 = vpop.permute.xlu1 %7012 }
 0x551   : > { %6814 = vrot.lane.b32.xlu0 %v6780_v24, %s10233_s20  ;;  %6812 = vrot.lane.b32.xlu1 %v6779_v34, %s10233_s20  ;;  %v6793_v24 = vmul.f32 %v12715_v29, %v6777_v60 }
 0x553   : > { %v12915_v0 = vpop.permute.xlu0 %7587  ;;  %v12917_v23 = vpop.permute.xlu1 %7470 }
 0x555   : > { %6818 = vrot.lane.b32.xlu0 %v6782_v18, %s10233_s20  ;;  %6816 = vrot.lane.b32.xlu1 %v6781_v51, %s10233_s20  ;;  %v7244_v51 = vmul.f32 %v12711_v30, %v15205_v53  ;;  %v7253_v53 = vmul.f32 %v12715_v29, %v7237_v31 }
 0x557   : > { %v12924_v42 = vpop.permute.xlu0 %7819  ;;  %v12926_v25 = vpop.permute.xlu1 %7589 }
 0x559   : > { %6822 = vrot.lane.b32.xlu0 %v6784_v3, %s10233_s20  ;;  %6820 = vrot.lane.b32.xlu1 %v6783_v59, %s10233_s20  ;;  %v10035_v3 = vld [vmem:[#allocation3 + $0x30e] sm:$0xff] }
 0x55a   : > { %v7243_v59 = vmul.f32 %v10035_v3, %v12715_v29 }
 0x55b   : > { %v12935_v37 = vpop.permute.xlu0 %7938  ;;  %v12937_v49 = vpop.permute.xlu1 %7821 }
 0x55d   : > { %6826 = vrot.lane.b32.xlu0 %v6786_v11, %s10233_s20  ;;  %6824 = vrot.lane.b32.xlu1 %v6785_v26, %s10233_s20  ;;  %v7246_v26 = vmul.f32 %v12711_v30, %v15206_v41 }
 0x55f   : > { %v5530_v43 = vpop.permute.xlu0 %5529  ;;  %v12945_v14 = vpop.permute.xlu1 %7940 }
 0x560   : > { %5578 = vst.msk [vmem:[%s12951_s11] sm:$0xff] %vm5577_vm3, %v5530_v43  ;;  %v15207_v43 = vld [vmem:[#allocation19_spill] sm:$0xff] }
 0x561   : > { %6830 = vrot.lane.b32.xlu0 %v6788_v5, %s10233_s20  ;;  %6828 = vrot.lane.b32.xlu1 %v6787_v38, %s10233_s20  ;;  %v7245_v62 = vmul.f32 %v12715_v29, %v15207_v43  ;;  %v15208_v38 = vld [vmem:[#allocation27_spill] sm:$0xff] }
 0x562   : > { %v7248_v61 = vmul.f32 %v12711_v30, %v15208_v38 }
 0x563   : > { %v5534_v7 = vpop.permute.xlu0 %5533  ;;  %v5532_v13 = vpop.permute.xlu1 %5531 }
 0x564   : > { %5580 = vst.msk [vmem:[%s12951_s11 + $0x10] sm:$0xff] %vm5577_vm3, %v5534_v7  ;;  %5579 = vst.msk [vmem:[%s12951_s11 + $0x8] sm:$0xff] %vm5577_vm3, %v5532_v13  ;;  %v15209_v7 = vld [vmem:[#allocation21_spill] sm:$0xff] }
 0x565   : > { %6834 = vrot.lane.b32.xlu0 %v6790_v20, %s10233_s20  ;;  %6832 = vrot.lane.b32.xlu1 %v6789_v21, %s10233_s20  ;;  %v7247_v13 = vmul.f32 %v12715_v29, %v15209_v7  ;;  %v15210_v21 = vld [vmem:[#allocation28_spill] sm:$0xff] }
 0x566   : > { %v7250_v1 = vmul.f32 %v12711_v30, %v15210_v21 }
 0x567   : > { %v5538_v6 = vpop.permute.xlu0 %5537  ;;  %v5536_v12 = vpop.permute.xlu1 %5535 }
 0x568   : > { %5582 = vst.msk [vmem:[%s12951_s11 + $0x20] sm:$0xff] %vm5577_vm3, %v5538_v6  ;;  %5581 = vst.msk [vmem:[%s12951_s11 + $0x18] sm:$0xff] %vm5577_vm3, %v5536_v12  ;;  %v15211_v6 = vld [vmem:[#allocation22_spill] sm:$0xff] }
 0x569   : > { %6838 = vrot.lane.b32.xlu0 %v6792_v15, %s10233_s20  ;;  %6836 = vrot.lane.b32.xlu1 %v6791_v8, %s10233_s20  ;;  %v7249_v12 = vmul.f32 %v12715_v29, %v15211_v6  ;;  %v15212_v8 = vld [vmem:[#allocation29_spill] sm:$0xff]  ;;  %v15218_v6 = vld [vmem:[#allocation34_spill] sm:$0xff] }
 0x56a   : > { %v7252_v60 = vmul.f32 %v12711_v30, %v15212_v8 }
 0x56b   : > { %v5542_v19 = vpop.permute.xlu0 %5541  ;;  %v5540_v32 = vpop.permute.xlu1 %5539 }
 0x56c   : > { %5584 = vst.msk [vmem:[%s12951_s11 + $0x30] sm:$0xff] %vm5577_vm3, %v5542_v19  ;;  %5583 = vst.msk [vmem:[%s12951_s11 + $0x28] sm:$0xff] %vm5577_vm3, %v5540_v32  ;;  %v15213_v19 = vld [vmem:[#allocation23_spill] sm:$0xff] }
 0x56d   : > { %7274 = vrot.lane.b32.xlu0 %v7242_v56, %s10233_s20  ;;  %6840 = vrot.lane.b32.xlu1 %v6793_v24, %s10233_s20  ;;  %v7251_v32 = vmul.f32 %v12715_v29, %v15213_v19 }
 0x56f   : > { %v5546_v34 = vpop.permute.xlu0 %5545  ;;  %v5544_v18 = vpop.permute.xlu1 %5543 }
 0x570   : > { %5586 = vst.msk [vmem:[%s12951_s11 + $0x40] sm:$0xff] %vm5577_vm3, %v5546_v34  ;;  %5585 = vst.msk [vmem:[%s12951_s11 + $0x38] sm:$0xff] %vm5577_vm3, %v5544_v18  ;;  %v15214_v34 = vld [vmem:[#allocation30_spill] sm:$0xff] }
 0x571   : > { %7278 = vrot.lane.b32.xlu0 %v7244_v51, %s10233_s20  ;;  %7276 = vrot.lane.b32.xlu1 %v7243_v59, %s10233_s20  ;;  %v7254_v18 = vmul.f32 %v12711_v30, %v15214_v34  ;;  %v7239_v51 = vld [vmem:[#allocation3 + $0x42e] sm:$0xff] }
 0x572   : > { %v7255_v41 = vmul.f32 %v12715_v29, %v7239_v51  ;;  %v15222_v34 = vld [vmem:[#allocation36_spill] sm:$0xff] }
 0x573   : > { %v5550_v17 = vpop.permute.xlu0 %5549  ;;  %v5548_v11 = vpop.permute.xlu1 %5547 }
 0x574   : > { %5588 = vst.msk [vmem:[%s12951_s11 + $0x50] sm:$0xff] %vm5577_vm3, %v5550_v17  ;;  %5587 = vst.msk [vmem:[%s12951_s11 + $0x48] sm:$0xff] %vm5577_vm3, %v5548_v11  ;;  %v15215_v17 = vld [vmem:[#allocation31_spill] sm:$0xff] }
 0x575   : > { %7282 = vrot.lane.b32.xlu0 %v7246_v26, %s10233_s20  ;;  %7280 = vrot.lane.b32.xlu1 %v7245_v62, %s10233_s20  ;;  %v7256_v11 = vmul.f32 %v12711_v30, %v15215_v17  ;;  %v7241_v26 = vld [vmem:[#allocation3 + $0x45e] sm:$0xff] }
 0x576   : > { %v7257_v38 = vmul.f32 %v12715_v29, %v7241_v26  ;;  %v15224_v17 = vld [vmem:[#allocation37_spill] sm:$0xff] }
 0x577   : > { %v5554_v5 = vpop.permute.xlu0 %5553  ;;  %v5552_v9 = vpop.permute.xlu1 %5551  ;;  %v7702_v26 = vld [vmem:[#allocation3 + $0x5bf] sm:$0xff] }
 0x578   : > { %5590 = vst.msk [vmem:[%s12951_s11 + $0x60] sm:$0xff] %vm5577_vm3, %v5554_v5  ;;  %5589 = vst.msk [vmem:[%s12951_s11 + $0x58] sm:$0xff] %vm5577_vm3, %v5552_v9  ;;  %v15216_v5 = vld [vmem:[#allocation33_spill] sm:$0xff] }
 0x579   : > { %7286 = vrot.lane.b32.xlu0 %v7248_v61, %s10233_s20  ;;  %7284 = vrot.lane.b32.xlu1 %v7247_v13, %s10233_s20  ;;  %v7706_v9 = vmul.f32 %v12711_v30, %v15216_v5  ;;  %v15217_v13 = vld [vmem:[#allocation32_spill] sm:$0xff]  ;;  %v7718_v5 = vmul.f32 %v12711_v30, %v7702_v26 }
 0x57b   : > { %v5558_v10 = vpop.permute.xlu0 %5557  ;;  %v5556_v20 = vpop.permute.xlu1 %5555 }
 0x57c   : > { %5592 = vst.msk [vmem:[%s12951_s11 + $0x70] sm:$0xff] %vm5577_vm3, %v5558_v10  ;;  %5591 = vst.msk [vmem:[%s12951_s11 + $0x68] sm:$0xff] %vm5577_vm3, %v5556_v20  ;;  %v7708_v10 = vmul.f32 %v12711_v30, %v15217_v13  ;;  %v7707_v20 = vmul.f32 %v12715_v29, %v12602_v36  ;;  %v15225_v13 = vld [vmem:[#allocation43_spill] sm:$0xff] }
 0x57d   : > { %7290 = vrot.lane.b32.xlu0 %v7250_v1, %s10233_s20  ;;  %7288 = vrot.lane.b32.xlu1 %v7249_v12, %s10233_s20  ;;  %v7710_v12 = vmul.f32 %v12711_v30, %v15218_v6  ;;  %v15227_v6 = vld [vmem:[#allocation46_spill] sm:$0xff] }
 0x57f   : > { %v5883_v54 = vpop.permute.xlu0 %5882  ;;  %v5560_v15 = vpop.permute.xlu1 %5559 }
 0x580   : > { %8782 = vst.msk [vmem:[%s12951_s11 + $0x180] sm:$0xff] %vm5577_vm3, %v5883_v54  ;;  %5593 = vst.msk [vmem:[%s12951_s11 + $0x78] sm:$0xff] %vm5577_vm3, %v5560_v15  ;;  %v15219_v54 = vld [vmem:[#allocation39_spill] sm:$0xff] }
 0x581   : > { %7294 = vrot.lane.b32.xlu0 %v7252_v60, %s10233_s20  ;;  %7292 = vrot.lane.b32.xlu1 %v7251_v32, %s10233_s20  ;;  %v7709_v15 = vmul.f32 %v12715_v29, %v15219_v54  ;;  %v15220_v60 = vld [vmem:[#allocation35_spill] sm:$0xff]  ;;  %v15221_v32 = vld [vmem:[#allocation40_spill] sm:$0xff] }
 0x582   : > { %v7712_v19 = vmul.f32 %v12711_v30, %v15220_v60  ;;  %v7711_v31 = vmul.f32 %v12715_v29, %v15221_v32  ;;  %v8156_v54 = vld [vmem:[#allocation3 + $0x4b1] sm:$0xff]  ;;  %v8158_v32 = vld [vmem:[#allocation3 + $0x4e1] sm:$0xff] }
 0x583   : > { %v5887_v56 = vpop.permute.xlu0 %5886  ;;  %v5885_v24 = vpop.permute.xlu1 %5884  ;;  %v15228_v60 = vld [vmem:[#allocation44_spill] sm:$0xff] }
 0x584   : > { %8784 = vst.msk [vmem:[%s12951_s11 + $0x190] sm:$0xff] %vm5577_vm3, %v5887_v56  ;;  %8783 = vst.msk [vmem:[%s12951_s11 + $0x188] sm:$0xff] %vm5577_vm3, %v5885_v24 }
 0x585   : > { %7298 = vrot.lane.b32.xlu0 %v7254_v18, %s10233_s20  ;;  %7296 = vrot.lane.b32.xlu1 %v7253_v53, %s10233_s20  ;;  %v7714_v18 = vmul.f32 %v12711_v30, %v15222_v34  ;;  %v15223_v53 = vld [vmem:[#allocation41_spill] sm:$0xff]  ;;  %v15229_v34 = vld [vmem:[#allocation42_spill] sm:$0xff] }
 0x586   : > { %v7713_v51 = vmul.f32 %v12715_v29, %v15223_v53  ;;  %v8160_v53 = vld [vmem:[#allocation3 + $0x511] sm:$0xff] }
 0x587   : > { %v5891_v3 = vpop.permute.xlu0 %5890  ;;  %v5889_v59 = vpop.permute.xlu1 %5888 }
 0x588   : > { %8786 = vst.msk [vmem:[%s12951_s11 + $0x1a0] sm:$0xff] %vm5577_vm3, %v5891_v3  ;;  %8785 = vst.msk [vmem:[%s12951_s11 + $0x198] sm:$0xff] %vm5577_vm3, %v5889_v59 }
 0x589   : > { %7302 = vrot.lane.b32.xlu0 %v7256_v11, %s10233_s20  ;;  %7300 = vrot.lane.b32.xlu1 %v7255_v41, %s10233_s20  ;;  %v7716_v11 = vmul.f32 %v12711_v30, %v15224_v17  ;;  %v7715_v41 = vmul.f32 %v12715_v29, %v12626_v27  ;;  %v7704_v27 = vld [vmem:[#allocation3 + $0x5ef] sm:$0xff]  ;;  %v15230_v17 = vld [vmem:[#allocation45_spill] sm:$0xff] }
 0x58b   : > { %v5895_v43 = vpop.permute.xlu0 %5894  ;;  %v5893_v62 = vpop.permute.xlu1 %5892 }
 0x58c   : > { %8788 = vst.msk [vmem:[%s12951_s11 + $0x1b0] sm:$0xff] %vm5577_vm3, %v5895_v43  ;;  %8787 = vst.msk [vmem:[%s12951_s11 + $0x1a8] sm:$0xff] %vm5577_vm3, %v5893_v62 }
 0x58d   : > { %7738 = vrot.lane.b32.xlu0 %v7706_v9, %s10233_s20  ;;  %7304 = vrot.lane.b32.xlu1 %v7257_v38, %s10233_s20  ;;  %v7717_v9 = vmul.f32 %v12715_v29, %v12638_v48 }
 0x58f   : > { %v5899_v61 = vpop.permute.xlu0 %5898  ;;  %v5897_v7 = vpop.permute.xlu1 %5896 }
 0x590   : > { %8790 = vst.msk [vmem:[%s12951_s11 + $0x1c0] sm:$0xff] %vm5577_vm3, %v5899_v61  ;;  %8789 = vst.msk [vmem:[%s12951_s11 + $0x1b8] sm:$0xff] %vm5577_vm3, %v5897_v7  ;;  %v7720_v7 = vmul.f32 %v12711_v30, %v7704_v27  ;;  %v8164_v27 = vld [vmem:[#allocation3 + $0x571] sm:$0xff] }
 0x591   : > { %7742 = vrot.lane.b32.xlu0 %v7708_v10, %s10233_s20  ;;  %7740 = vrot.lane.b32.xlu1 %v7707_v20, %s10233_s20  ;;  %v7719_v10 = vmul.f32 %v12715_v29, %v15225_v13  ;;  %v15232_v13 = vld [vmem:[#allocation48_spill] sm:$0xff] }
 0x593   : > { %v5903_v21 = vpop.permute.xlu0 %5902  ;;  %v5901_v1 = vpop.permute.xlu1 %5900 }
 0x594   : > { %8792 = vst.msk [vmem:[%s12951_s11 + $0x1d0] sm:$0xff] %vm5577_vm3, %v5903_v21  ;;  %8791 = vst.msk [vmem:[%s12951_s11 + $0x1c8] sm:$0xff] %vm5577_vm3, %v5901_v1  ;;  %v15226_v21 = vld [vmem:[#allocation38_spill] sm:$0xff] }
 0x595   : > { %7746 = vrot.lane.b32.xlu0 %v7710_v12, %s10233_s20  ;;  %7744 = vrot.lane.b32.xlu1 %v7709_v15, %s10233_s20  ;;  %v8170_v1 = vmul.f32 %v12711_v30, %v15226_v21  ;;  %v7721_v12 = vmul.f32 %v12715_v29, %v15227_v6  ;;  %v8181_v6 = vmul.f32 %v12715_v29, %v12683_v52  ;;  %v13201_v52 = vld [vmem:[#allocation3 + $0x190] sm:$0xff] }
 0x597   : > { %v5907_v36 = vpop.permute.xlu0 %5906  ;;  %v5905_v8 = vpop.permute.xlu1 %5904 }
 0x598   : > { %8794 = vst.msk [vmem:[%s12951_s11 + $0x1e0] sm:$0xff] %vm5577_vm3, %v5907_v36  ;;  %8793 = vst.msk [vmem:[%s12951_s11 + $0x1d8] sm:$0xff] %vm5577_vm3, %v5905_v8  ;;  %v8172_v8 = vmul.f32 %v12711_v30, %v8156_v54 }
 0x599   : > { %7750 = vrot.lane.b32.xlu0 %v7712_v19, %s10233_s20  ;;  %7748 = vrot.lane.b32.xlu1 %v7711_v31, %s10233_s20  ;;  %v8171_v19 = vmul.f32 %v12715_v29, %v15228_v60  ;;  %v8169_v60 = vld [vmem:[#allocation3 + $0x5d9] sm:$0xff] }
 0x59b   : > { %v5911_v56 = vpop.permute.xlu0 %5910  ;;  %v5909_v24 = vpop.permute.xlu1 %5908 }
 0x59c   : > { %8796 = vst.msk [vmem:[%s12951_s11 + $0x1f0] sm:$0xff] %vm5577_vm3, %v5911_v56  ;;  %8795 = vst.msk [vmem:[%s12951_s11 + $0x1e8] sm:$0xff] %vm5577_vm3, %v5909_v24  ;;  %v8174_v24 = vmul.f32 %v12711_v30, %v8158_v32 }
 0x59d   : > { %7754 = vrot.lane.b32.xlu0 %v7714_v18, %s10233_s20  ;;  %7752 = vrot.lane.b32.xlu1 %v7713_v51, %s10233_s20  ;;  %v8173_v18 = vmul.f32 %v12715_v29, %v15229_v34 }
 0x59f   : > { %v6347_v3 = vpop.permute.xlu0 %6346  ;;  %v5913_v59 = vpop.permute.xlu1 %5912 }
 0x5a0   : > { %8846 = vst.msk [vmem:[%s12951_s11 + $0x380] sm:$0xff] %vm5577_vm3, %v6347_v3  ;;  %8797 = vst.msk [vmem:[%s12951_s11 + $0x1f8] sm:$0xff] %vm5577_vm3, %v5913_v59  ;;  %v8176_v59 = vmul.f32 %v12711_v30, %v8160_v53  ;;  %v13226_v53 = vld [vmem:[#allocation3 + $0x1f0] sm:$0xff] }
 0x5a1   : > { %7758 = vrot.lane.b32.xlu0 %v7716_v11, %s10233_s20  ;;  %7756 = vrot.lane.b32.xlu1 %v7715_v41, %s10233_s20  ;;  %v8175_v11 = vmul.f32 %v12715_v29, %v15230_v17  ;;  %v8162_v41 = vld [vmem:[#allocation3 + $0x541] sm:$0xff]  ;;  %v5622_v17 = vmul.f32 %v12840_v45, %v13226_v53 }
 0x5a3   : > { %v6351_v43 = vpop.permute.xlu0 %6350  ;;  %v6349_v62 = vpop.permute.xlu1 %6348 }
 0x5a4   : > { %8848 = vst.msk [vmem:[%s12951_s11 + $0x390] sm:$0xff] %vm5577_vm3, %v6351_v43  ;;  %8847 = vst.msk [vmem:[%s12951_s11 + $0x388] sm:$0xff] %vm5577_vm3, %v6349_v62  ;;  %v8178_v62 = vmul.f32 %v12711_v30, %v8162_v41  ;;  %v13240_v41 = vld [vmem:[#allocation3 + $0x220] sm:$0xff] }
 0x5a5   : > { %7762 = vrot.lane.b32.xlu0 %v7718_v5, %s10233_s20  ;;  %7760 = vrot.lane.b32.xlu1 %v7717_v9, %s10233_s20  ;;  %v15231_v5 = vld [vmem:[#allocation47_spill] sm:$0xff] }
 0x5a6   : > { %v8177_v9 = vmul.f32 %v12715_v29, %v15231_v5  ;;  %v5624_v5 = vmul.f32 %v12840_v45, %v13240_v41 }
 0x5a7   : > { %v6355_v38 = vpop.permute.xlu0 %6354  ;;  %v6353_v61 = vpop.permute.xlu1 %6352 }
 0x5a8   : > { %8850 = vst.msk [vmem:[%s12951_s11 + $0x3a0] sm:$0xff] %vm5577_vm3, %v6355_v38  ;;  %8849 = vst.msk [vmem:[%s12951_s11 + $0x398] sm:$0xff] %vm5577_vm3, %v6353_v61 }
 0x5a9   : > { %7766 = vrot.lane.b32.xlu0 %v7720_v7, %s10233_s20  ;;  %7764 = vrot.lane.b32.xlu1 %v7719_v10, %s10233_s20  ;;  %v8180_v7 = vmul.f32 %v12711_v30, %v8164_v27  ;;  %v8179_v10 = vmul.f32 %v12715_v29, %v15232_v13  ;;  %v13254_v27 = vld [vmem:[#allocation3 + $0x250] sm:$0xff] }
 0x5aa   : > { %v5626_v13 = vmul.f32 %v12840_v45, %v13254_v27 }
 0x5ab   : > { %v6359_v48 = vpop.permute.xlu0 %6358  ;;  %v6357_v20 = vpop.permute.xlu1 %6356 }
 0x5ac   : > { %8852 = vst.msk [vmem:[%s12951_s11 + $0x3b0] sm:$0xff] %vm5577_vm3, %v6359_v48  ;;  %8851 = vst.msk [vmem:[%s12951_s11 + $0x3a8] sm:$0xff] %vm5577_vm3, %v6357_v20  ;;  %v8166_v48 = vld [vmem:[#allocation3 + $0x5a1] sm:$0xff] }
 0x5ad   : > { %8202 = vrot.lane.b32.xlu0 %v8170_v1, %s10233_s20  ;;  %7768 = vrot.lane.b32.xlu1 %v7721_v12, %s10233_s20  ;;  %v8182_v1 = vmul.f32 %v12711_v30, %v8166_v48  ;;  %v8168_v12 = vld [vmem:[#allocation3 + $0x5d1] sm:$0xff]  ;;  %v13268_v48 = vld [vmem:[#allocation3 + $0x280] sm:$0xff] }
 0x5af   : > { %v6363_v15 = vpop.permute.xlu0 %6362  ;;  %v6361_v36 = vpop.permute.xlu1 %6360 }
 0x5b0   : > { %8854 = vst.msk [vmem:[%s12951_s11 + $0x3c0] sm:$0xff] %vm5577_vm3, %v6363_v15  ;;  %8853 = vst.msk [vmem:[%s12951_s11 + $0x3b8] sm:$0xff] %vm5577_vm3, %v6361_v36  ;;  %v8184_v36 = vmul.f32 %v12711_v30, %v8168_v12  ;;  %v5618_v30 = vmul.f32 %v12840_v45, %v13201_v52 }
 0x5b1   : > { %8206 = vrot.lane.b32.xlu0 %v8172_v8, %s10233_s20  ;;  %8204 = vrot.lane.b32.xlu1 %v8171_v19, %s10233_s20  ;;  %v8183_v8 = vmul.f32 %v12715_v29, %v12691_v63  ;;  %v8185_v63 = vmul.f32 %v12715_v29, %v8169_v60 }
 0x5b3   : > { %v6367_v31 = vpop.permute.xlu0 %6366  ;;  %v6365_v56 = vpop.permute.xlu1 %6364 }
 0x5b4   : > { %8856 = vst.msk [vmem:[%s12951_s11 + $0x3d0] sm:$0xff] %vm5577_vm3, %v6367_v31  ;;  %8855 = vst.msk [vmem:[%s12951_s11 + $0x3c8] sm:$0xff] %vm5577_vm3, %v6365_v56  ;;  %v13212_v31 = vld [vmem:[#allocation3 + $0x1c0] sm:$0xff]  ;;  %v13214_v56 = vld [vmem:[#allocation3 + $0x198] sm:$0xff] }
 0x5b5   : > { %8210 = vrot.lane.b32.xlu0 %v8174_v24, %s10233_s20  ;;  %8208 = vrot.lane.b32.xlu1 %v8173_v18, %s10233_s20  ;;  %v5620_v29 = vmul.f32 %v12840_v45, %v13212_v31  ;;  %v5619_v18 = vmul.f32 %v12848_v16, %v13214_v56 }
 0x5b7   : > { %v6371_v51 = vpop.permute.xlu0 %6370  ;;  %v6369_v3 = vpop.permute.xlu1 %6368 }
 0x5b8   : > { %8858 = vst.msk [vmem:[%s12951_s11 + $0x3e0] sm:$0xff] %vm5577_vm3, %v6371_v51  ;;  %8857 = vst.msk [vmem:[%s12951_s11 + $0x3d8] sm:$0xff] %vm5577_vm3, %v6369_v3  ;;  %v13228_v51 = vld [vmem:[#allocation3 + $0x1c8] sm:$0xff] }
 0x5b9   : > { %8214 = vrot.lane.b32.xlu0 %v8176_v59, %s10233_s20  ;;  %8212 = vrot.lane.b32.xlu1 %v8175_v11, %s10233_s20  ;;  %v5621_v11 = vmul.f32 %v12848_v16, %v13228_v51 }
 0x5bb   : > { %v6375_v26 = vpop.permute.xlu0 %6374  ;;  %v6373_v43 = vpop.permute.xlu1 %6372 }
 0x5bc   : > { %8860 = vst.msk [vmem:[%s12951_s11 + $0x3f0] sm:$0xff] %vm5577_vm3, %v6375_v26  ;;  %8859 = vst.msk [vmem:[%s12951_s11 + $0x3e8] sm:$0xff] %vm5577_vm3, %v6373_v43  ;;  %v13242_v26 = vld [vmem:[#allocation3 + $0x1f8] sm:$0xff] }
 0x5bd   : > { %8218 = vrot.lane.b32.xlu0 %v8178_v62, %s10233_s20  ;;  %8216 = vrot.lane.b32.xlu1 %v8177_v9, %s10233_s20  ;;  %v5623_v9 = vmul.f32 %v12848_v16, %v13242_v26 }
 0x5bf   : > { %v6811_v38 = vpop.permute.xlu0 %6810  ;;  %v6377_v61 = vpop.permute.xlu1 %6376 }
 0x5c0   : > { %8910 = vst.msk [vmem:[%s12951_s11 + $0x580] sm:$0xff] %vm5577_vm3, %v6811_v38  ;;  %8861 = vst.msk [vmem:[%s12951_s11 + $0x3f8] sm:$0xff] %vm5577_vm3, %v6377_v61  ;;  %v13256_v38 = vld [vmem:[#allocation3 + $0x228] sm:$0xff] }
 0x5c1   : > { %8222 = vrot.lane.b32.xlu0 %v8180_v7, %s10233_s20  ;;  %8220 = vrot.lane.b32.xlu1 %v8179_v10, %s10233_s20  ;;  %v5625_v10 = vmul.f32 %v12848_v16, %v13256_v38 }
 0x5c3   : > { %v6815_v20 = vpop.permute.xlu0 %6814  ;;  %v6813_v21 = vpop.permute.xlu1 %6812 }
 0x5c4   : > { %8912 = vst.msk [vmem:[%s12951_s11 + $0x590] sm:$0xff] %vm5577_vm3, %v6815_v20  ;;  %8911 = vst.msk [vmem:[%s12951_s11 + $0x588] sm:$0xff] %vm5577_vm3, %v6813_v21  ;;  %v13270_v20 = vld [vmem:[#allocation3 + $0x258] sm:$0xff] }
 0x5c5   : > { %8226 = vrot.lane.b32.xlu0 %v8182_v1, %s10233_s20  ;;  %8224 = vrot.lane.b32.xlu1 %v8181_v6, %s10233_s20  ;;  %v5628_v6 = vmul.f32 %v12840_v45, %v13268_v48  ;;  %v5627_v12 = vmul.f32 %v12848_v16, %v13270_v20 }
 0x5c7   : > { %v6819_v54 = vpop.permute.xlu0 %6818  ;;  %v6817_v15 = vpop.permute.xlu1 %6816 }
 0x5c8   : > { %8914 = vst.msk [vmem:[%s12951_s11 + $0x5a0] sm:$0xff] %vm5577_vm3, %v6819_v54  ;;  %8913 = vst.msk [vmem:[%s12951_s11 + $0x598] sm:$0xff] %vm5577_vm3, %v6817_v15  ;;  %v13282_v54 = vld [vmem:[#allocation3 + $0x2b0] sm:$0xff]  ;;  %v13284_v15 = vld [vmem:[#allocation3 + $0x288] sm:$0xff] }
 0x5c9   : > { %8230 = vrot.lane.b32.xlu0 %v8184_v36, %s10233_s20  ;;  %8228 = vrot.lane.b32.xlu1 %v8183_v8, %s10233_s20  ;;  %v5630_v60 = vmul.f32 %v12840_v45, %v13282_v54 }
 0x5cb   : > { %v6823_v19 = vpop.permute.xlu0 %6822  ;;  %v6821_v32 = vpop.permute.xlu1 %6820 }
 0x5cc   : > { %8916 = vst.msk [vmem:[%s12951_s11 + $0x5b0] sm:$0xff] %vm5577_vm3, %v6823_v19  ;;  %8915 = vst.msk [vmem:[%s12951_s11 + $0x5a8] sm:$0xff] %vm5577_vm3, %v6821_v32  ;;  %v5629_v19 = vmul.f32 %v12848_v16, %v13284_v15  ;;  %v13296_v32 = vld [vmem:[#allocation3 + $0x2e0] sm:$0xff] }
 0x5cd   : > { %5650 = vrot.lane.b32.xlu0 %v5618_v30, %s10234_s6  ;;  %8232 = vrot.lane.b32.xlu1 %v8185_v63, %s10233_s20  ;;  %v13298_v30 = vld [vmem:[#allocation3 + $0x2b8] sm:$0xff] }
 0x5cf   : > { %v6827_v24 = vpop.permute.xlu0 %6826  ;;  %v6825_v34 = vpop.permute.xlu1 %6824 }
 0x5d0   : > { %8918 = vst.msk [vmem:[%s12951_s11 + $0x5c0] sm:$0xff] %vm5577_vm3, %v6827_v24  ;;  %8917 = vst.msk [vmem:[%s12951_s11 + $0x5b8] sm:$0xff] %vm5577_vm3, %v6825_v34  ;;  %v5632_v34 = vmul.f32 %v12840_v45, %v13296_v32 }
 0x5d1   : > { %5654 = vrot.lane.b32.xlu0 %v5620_v29, %s10234_s6  ;;  %5652 = vrot.lane.b32.xlu1 %v5619_v18, %s10234_s6  ;;  %v5631_v29 = vmul.f32 %v12848_v16, %v13298_v30  ;;  %v13310_v18 = vld [vmem:[#allocation3 + $0x194] sm:$0xff] }
 0x5d2   : > { %v5737_v45 = vmul.f32 %v12846_v55, %v13310_v18 }
 0x5d3   : > { %v6831_v3 = vpop.permute.xlu0 %6830  ;;  %v6829_v59 = vpop.permute.xlu1 %6828 }
 0x5d4   : > { %8920 = vst.msk [vmem:[%s12951_s11 + $0x5d0] sm:$0xff] %vm5577_vm3, %v6831_v3  ;;  %8919 = vst.msk [vmem:[%s12951_s11 + $0x5c8] sm:$0xff] %vm5577_vm3, %v6829_v59  ;;  %v13312_v3 = vld [vmem:[#allocation3 + $0x2e8] sm:$0xff] }
 0x5d5   : > { %5658 = vrot.lane.b32.xlu0 %v5622_v17, %s10234_s6  ;;  %5656 = vrot.lane.b32.xlu1 %v5621_v11, %s10234_s6  ;;  %v5633_v11 = vmul.f32 %v12848_v16, %v13312_v3 }
 0x5d7   : > { %v6835_v43 = vpop.permute.xlu0 %6834  ;;  %v6833_v62 = vpop.permute.xlu1 %6832 }
 0x5d8   : > { %8922 = vst.msk [vmem:[%s12951_s11 + $0x5e0] sm:$0xff] %vm5577_vm3, %v6835_v43  ;;  %8921 = vst.msk [vmem:[%s12951_s11 + $0x5d8] sm:$0xff] %vm5577_vm3, %v6833_v62  ;;  %v13324_v43 = vld [vmem:[#allocation3 + $0x1c4] sm:$0xff]  ;;  %v13326_v62 = vld [vmem:[#allocation3 + $0x19c] sm:$0xff] }
 0x5d9   : > { %5662 = vrot.lane.b32.xlu0 %v5624_v5, %s10234_s6  ;;  %5660 = vrot.lane.b32.xlu1 %v5623_v9, %s10234_s6  ;;  %v5739_v16 = vmul.f32 %v12846_v55, %v13324_v43 }
 0x5db   : > { %v6839_v61 = vpop.permute.xlu0 %6838  ;;  %v6837_v7 = vpop.permute.xlu1 %6836 }
 0x5dc   : > { %8924 = vst.msk [vmem:[%s12951_s11 + $0x5f0] sm:$0xff] %vm5577_vm3, %v6839_v61  ;;  %8923 = vst.msk [vmem:[%s12951_s11 + $0x5e8] sm:$0xff] %vm5577_vm3, %v6837_v7  ;;  %v5738_v61 = vmul.f32 %v12856_v47, %v13326_v62  ;;  %v13338_v7 = vld [vmem:[#allocation3 + $0x1f4] sm:$0xff] }
 0x5dd   : > { %5666 = vrot.lane.b32.xlu0 %v5626_v13, %s10234_s6  ;;  %5664 = vrot.lane.b32.xlu1 %v5625_v10, %s10234_s6  ;;  %v13340_v13 = vld [vmem:[#allocation3 + $0x1cc] sm:$0xff] }
 0x5df   : > { %v7275_v21 = vpop.permute.xlu0 %7274  ;;  %v6841_v1 = vpop.permute.xlu1 %6840 }
 0x5e0   : > { %8974 = vst.msk [vmem:[%s12951_s11 + $0x780] sm:$0xff] %vm5577_vm3, %v7275_v21  ;;  %8925 = vst.msk [vmem:[%s12951_s11 + $0x5f8] sm:$0xff] %vm5577_vm3, %v6841_v1  ;;  %v5741_v1 = vmul.f32 %v12846_v55, %v13338_v7 }
 0x5e1   : > { %5670 = vrot.lane.b32.xlu0 %v5628_v6, %s10234_s6  ;;  %5668 = vrot.lane.b32.xlu1 %v5627_v12, %s10234_s6  ;;  %v5740_v6 = vmul.f32 %v12856_v47, %v13340_v13  ;;  %v13352_v12 = vld [vmem:[#allocation3 + $0x224] sm:$0xff] }
 0x5e3   : > { %v7279_v36 = vpop.permute.xlu0 %7278  ;;  %v7277_v8 = vpop.permute.xlu1 %7276 }
 0x5e4   : > { %8976 = vst.msk [vmem:[%s12951_s11 + $0x790] sm:$0xff] %vm5577_vm3, %v7279_v36  ;;  %8975 = vst.msk [vmem:[%s12951_s11 + $0x788] sm:$0xff] %vm5577_vm3, %v7277_v8  ;;  %v13354_v36 = vld [vmem:[#allocation3 + $0x1fc] sm:$0xff] }
 0x5e5   : > { %5674 = vrot.lane.b32.xlu0 %v5630_v60, %s10234_s6  ;;  %5672 = vrot.lane.b32.xlu1 %v5629_v19, %s10234_s6  ;;  %v5743_v19 = vmul.f32 %v12846_v55, %v13352_v12 }
 0x5e7   : > { %v7283_v63 = vpop.permute.xlu0 %7282  ;;  %v7281_v24 = vpop.permute.xlu1 %7280 }
 0x5e8   : > { %8978 = vst.msk [vmem:[%s12951_s11 + $0x7a0] sm:$0xff] %vm5577_vm3, %v7283_v63  ;;  %8977 = vst.msk [vmem:[%s12951_s11 + $0x798] sm:$0xff] %vm5577_vm3, %v7281_v24  ;;  %v5742_v63 = vmul.f32 %v12856_v47, %v13354_v36  ;;  %v13366_v24 = vld [vmem:[#allocation3 + $0x254] sm:$0xff] }
 0x5e9   : > { %5678 = vrot.lane.b32.xlu0 %v5632_v34, %s10234_s6  ;;  %5676 = vrot.lane.b32.xlu1 %v5631_v29, %s10234_s6  ;;  %v13368_v34 = vld [vmem:[#allocation3 + $0x22c] sm:$0xff] }
 0x5eb   : > { %v7287_v59 = vpop.permute.xlu0 %7286  ;;  %v7285_v17 = vpop.permute.xlu1 %7284 }
 0x5ec   : > { %8980 = vst.msk [vmem:[%s12951_s11 + $0x7b0] sm:$0xff] %vm5577_vm3, %v7287_v59  ;;  %8979 = vst.msk [vmem:[%s12951_s11 + $0x7a8] sm:$0xff] %vm5577_vm3, %v7285_v17  ;;  %v5745_v17 = vmul.f32 %v12846_v55, %v13366_v24 }
 0x5ed   : > { %5769 = vrot.lane.b32.xlu0 %v5737_v45, %s10235_s26  ;;  %5680 = vrot.lane.b32.xlu1 %v5633_v11, %s10234_s6  ;;  %v5744_v45 = vmul.f32 %v12856_v47, %v13368_v34  ;;  %v13380_v11 = vld [vmem:[#allocation3 + $0x284] sm:$0xff]  ;;  %s10243_s6 = smov [#allocation10]  }
 0x5ef   : > { %v7291_v5 = vpop.permute.xlu0 %7290  ;;  %v7289_v9 = vpop.permute.xlu1 %7288 }
 0x5f0   : > { %8982 = vst.msk [vmem:[%s12951_s11 + $0x7c0] sm:$0xff] %vm5577_vm3, %v7291_v5  ;;  %8981 = vst.msk [vmem:[%s12951_s11 + $0x7b8] sm:$0xff] %vm5577_vm3, %v7289_v9  ;;  %v13382_v5 = vld [vmem:[#allocation3 + $0x25c] sm:$0xff] }
 0x5f1   : > { %5773 = vrot.lane.b32.xlu0 %v5739_v16, %s10235_s26  ;;  %5771 = vrot.lane.b32.xlu1 %v5738_v61, %s10235_s26  ;;  %v5747_v61 = vmul.f32 %v12846_v55, %v13380_v11 }
 0x5f3   : > { %v7295_v10 = vpop.permute.xlu0 %7294  ;;  %v7293_v21 = vpop.permute.xlu1 %7292 }
 0x5f4   : > { %8984 = vst.msk [vmem:[%s12951_s11 + $0x7d0] sm:$0xff] %vm5577_vm3, %v7295_v10  ;;  %8983 = vst.msk [vmem:[%s12951_s11 + $0x7c8] sm:$0xff] %vm5577_vm3, %v7293_v21  ;;  %v5746_v10 = vmul.f32 %v12856_v47, %v13382_v5  ;;  %v13394_v21 = vld [vmem:[#allocation3 + $0x2b4] sm:$0xff] }
 0x5f5   : > { %5777 = vrot.lane.b32.xlu0 %v5741_v1, %s10235_s26  ;;  %5775 = vrot.lane.b32.xlu1 %v5740_v6, %s10235_s26  ;;  %v13396_v1 = vld [vmem:[#allocation3 + $0x28c] sm:$0xff] }
 0x5f7   : > { %v7299_v8 = vpop.permute.xlu0 %7298  ;;  %v7297_v60 = vpop.permute.xlu1 %7296 }
 0x5f8   : > { %8986 = vst.msk [vmem:[%s12951_s11 + $0x7e0] sm:$0xff] %vm5577_vm3, %v7299_v8  ;;  %8985 = vst.msk [vmem:[%s12951_s11 + $0x7d8] sm:$0xff] %vm5577_vm3, %v7297_v60  ;;  %v5749_v60 = vmul.f32 %v12846_v55, %v13394_v21 }
 0x5f9   : > { %5781 = vrot.lane.b32.xlu0 %v5743_v19, %s10235_s26  ;;  %5779 = vrot.lane.b32.xlu1 %v5742_v63, %s10235_s26  ;;  %v5748_v19 = vmul.f32 %v12856_v47, %v13396_v1  ;;  %v13408_v63 = vld [vmem:[#allocation3 + $0x2e4] sm:$0xff] }
 0x5fb   : > { %v7303_v29 = vpop.permute.xlu0 %7302  ;;  %v7301_v59 = vpop.permute.xlu1 %7300 }
 0x5fc   : > { %8988 = vst.msk [vmem:[%s12951_s11 + $0x7f0] sm:$0xff] %vm5577_vm3, %v7303_v29  ;;  %8987 = vst.msk [vmem:[%s12951_s11 + $0x7e8] sm:$0xff] %vm5577_vm3, %v7301_v59  ;;  %v13410_v29 = vld [vmem:[#allocation3 + $0x2bc] sm:$0xff] }
 0x5fd   : > { %5785 = vrot.lane.b32.xlu0 %v5745_v17, %s10235_s26  ;;  %5783 = vrot.lane.b32.xlu1 %v5744_v45, %s10235_s26  ;;  %v5751_v45 = vmul.f32 %v12846_v55, %v13408_v63 }
 0x5ff   : > { %v7739_v9 = vpop.permute.xlu0 %7738  ;;  %v7305_v16 = vpop.permute.xlu1 %7304 }
 0x600   : > { %9038 = vst.msk [vmem:[%s12951_s11 + $0x980] sm:$0xff] %vm5577_vm3, %v7739_v9  ;;  %8989 = vst.msk [vmem:[%s12951_s11 + $0x7f8] sm:$0xff] %vm5577_vm3, %v7305_v16  ;;  %v5750_v9 = vmul.f32 %v12856_v47, %v13410_v29  ;;  %v13422_v16 = vld [vmem:[#allocation3 + $0x2ec] sm:$0xff] }
 0x601   : > { %5789 = vrot.lane.b32.xlu0 %v5747_v61, %s10235_s26  ;;  %5787 = vrot.lane.b32.xlu1 %v5746_v10, %s10235_s26 }
 0x603   : > { %v7743_v6 = vpop.permute.xlu0 %7742  ;;  %v7741_v8 = vpop.permute.xlu1 %7740 }
 0x604   : > { %9040 = vst.msk [vmem:[%s12951_s11 + $0x990] sm:$0xff] %vm5577_vm3, %v7743_v6  ;;  %9039 = vst.msk [vmem:[%s12951_s11 + $0x988] sm:$0xff] %vm5577_vm3, %v7741_v8  ;;  %v5969_v6 = vmul.f32 %v12854_v50, %v13310_v18  ;;  %v5752_v8 = vmul.f32 %v12856_v47, %v13422_v16 }
 0x605   : > { %5793 = vrot.lane.b32.xlu0 %v5749_v60, %s10235_s26  ;;  %5791 = vrot.lane.b32.xlu1 %v5748_v19, %s10235_s26 }
 0x607   : > { %v7747_v59 = vpop.permute.xlu0 %7746  ;;  %v7745_v17 = vpop.permute.xlu1 %7744 }
 0x608   : > { %9042 = vst.msk [vmem:[%s12951_s11 + $0x9a0] sm:$0xff] %vm5577_vm3, %v7747_v59  ;;  %9041 = vst.msk [vmem:[%s12951_s11 + $0x998] sm:$0xff] %vm5577_vm3, %v7745_v17  ;;  %v5971_v59 = vmul.f32 %v12854_v50, %v13324_v43  ;;  %v5970_v17 = vmul.f32 %v12864_v57, %v13326_v62 }
 0x609   : > { %5797 = vrot.lane.b32.xlu0 %v5751_v45, %s10235_s26  ;;  %5795 = vrot.lane.b32.xlu1 %v5750_v9, %s10235_s26 }
 0x60b   : > { %v7751_v61 = vpop.permute.xlu0 %7750  ;;  %v7749_v10 = vpop.permute.xlu1 %7748 }
 0x60c   : > { %9044 = vst.msk [vmem:[%s12951_s11 + $0x9b0] sm:$0xff] %vm5577_vm3, %v7751_v61  ;;  %9043 = vst.msk [vmem:[%s12951_s11 + $0x9a8] sm:$0xff] %vm5577_vm3, %v7749_v10  ;;  %v5973_v61 = vmul.f32 %v12854_v50, %v13338_v7  ;;  %v5972_v10 = vmul.f32 %v12864_v57, %v13340_v13 }
 0x60d   : > { %6001 = vrot.lane.b32.xlu0 %v5969_v6, %s10236_s30  ;;  %5799 = vrot.lane.b32.xlu1 %v5752_v8, %s10235_s26  ;;  %v5975_v8 = vmul.f32 %v12854_v50, %v13352_v12 }
 0x60f   : > { %v7755_v60 = vpop.permute.xlu0 %7754  ;;  %v7753_v19 = vpop.permute.xlu1 %7752 }
 0x610   : > { %9046 = vst.msk [vmem:[%s12951_s11 + $0x9c0] sm:$0xff] %vm5577_vm3, %v7755_v60  ;;  %9045 = vst.msk [vmem:[%s12951_s11 + $0x9b8] sm:$0xff] %vm5577_vm3, %v7753_v19  ;;  %v5974_v60 = vmul.f32 %v12864_v57, %v13354_v36 }
 0x611   : > { %6005 = vrot.lane.b32.xlu0 %v5971_v59, %s10236_s30  ;;  %6003 = vrot.lane.b32.xlu1 %v5970_v17, %s10236_s30  ;;  %v5977_v59 = vmul.f32 %v12854_v50, %v13366_v24  ;;  %v5976_v17 = vmul.f32 %v12864_v57, %v13368_v34 }
 0x613   : > { %v7759_v45 = vpop.permute.xlu0 %7758  ;;  %v7757_v9 = vpop.permute.xlu1 %7756 }
 0x614   : > { %9048 = vst.msk [vmem:[%s12951_s11 + $0x9d0] sm:$0xff] %vm5577_vm3, %v7759_v45  ;;  %9047 = vst.msk [vmem:[%s12951_s11 + $0x9c8] sm:$0xff] %vm5577_vm3, %v7757_v9  ;;  %v5979_v9 = vmul.f32 %v12854_v50, %v13380_v11 }
 0x615   : > { %6009 = vrot.lane.b32.xlu0 %v5973_v61, %s10236_s30  ;;  %6007 = vrot.lane.b32.xlu1 %v5972_v10, %s10236_s30  ;;  %v5978_v61 = vmul.f32 %v12864_v57, %v13382_v5 }
 0x617   : > { %v7763_v62 = vpop.permute.xlu0 %7762  ;;  %v7761_v6 = vpop.permute.xlu1 %7760 }
 0x618   : > { %9050 = vst.msk [vmem:[%s12951_s11 + $0x9e0] sm:$0xff] %vm5577_vm3, %v7763_v62  ;;  %9049 = vst.msk [vmem:[%s12951_s11 + $0x9d8] sm:$0xff] %vm5577_vm3, %v7761_v6  ;;  %v5981_v62 = vmul.f32 %v12854_v50, %v13394_v21  ;;  %v5980_v6 = vmul.f32 %v12864_v57, %v13396_v1 }
 0x619   : > { %6013 = vrot.lane.b32.xlu0 %v5975_v8, %s10236_s30  ;;  %6011 = vrot.lane.b32.xlu1 %v5974_v60, %s10236_s30  ;;  %v5983_v60 = vmul.f32 %v12854_v50, %v13408_v63 }
 0x61b   : > { %v7767_v13 = vpop.permute.xlu0 %7766  ;;  %v7765_v19 = vpop.permute.xlu1 %7764 }
 0x61c   : > { %9052 = vst.msk [vmem:[%s12951_s11 + $0x9f0] sm:$0xff] %vm5577_vm3, %v7767_v13  ;;  %9051 = vst.msk [vmem:[%s12951_s11 + $0x9e8] sm:$0xff] %vm5577_vm3, %v7765_v19  ;;  %v5982_v13 = vmul.f32 %v12864_v57, %v13410_v29 }
 0x61d   : > { %6017 = vrot.lane.b32.xlu0 %v5977_v59, %s10236_s30  ;;  %6015 = vrot.lane.b32.xlu1 %v5976_v17, %s10236_s30  ;;  %v6088_v59 = vmul.f32 %v12862_v40, %v13201_v52  ;;  %v5984_v17 = vmul.f32 %v12864_v57, %v13422_v16  ;;  %v6089_v52 = vmul.f32 %v12872_v39, %v13214_v56 }
 0x61f   : > { %v8203_v36 = vpop.permute.xlu0 %8202  ;;  %v7769_v45 = vpop.permute.xlu1 %7768 }
 0x620   : > { %9102 = vst.msk [vmem:[%s12951_s11 + $0xb80] sm:$0xff] %vm5577_vm3, %v8203_v36  ;;  %9053 = vst.msk [vmem:[%s12951_s11 + $0x9f8] sm:$0xff] %vm5577_vm3, %v7769_v45  ;;  %v6090_v45 = vmul.f32 %v12862_v40, %v13212_v31  ;;  %v6091_v31 = vmul.f32 %v12872_v39, %v13228_v51 }
 0x621   : > { %6021 = vrot.lane.b32.xlu0 %v5979_v9, %s10236_s30  ;;  %6019 = vrot.lane.b32.xlu1 %v5978_v61, %s10236_s30  ;;  %v6092_v61 = vmul.f32 %v12862_v40, %v13226_v53  ;;  %v6093_v53 = vmul.f32 %v12872_v39, %v13242_v26 }
 0x623   : > { %v8207_v34 = vpop.permute.xlu0 %8206  ;;  %v8205_v10 = vpop.permute.xlu1 %8204 }
 0x624   : > { %9104 = vst.msk [vmem:[%s12951_s11 + $0xb90] sm:$0xff] %vm5577_vm3, %v8207_v34  ;;  %9103 = vst.msk [vmem:[%s12951_s11 + $0xb88] sm:$0xff] %vm5577_vm3, %v8205_v10  ;;  %v6094_v10 = vmul.f32 %v12862_v40, %v13240_v41  ;;  %v6095_v41 = vmul.f32 %v12872_v39, %v13256_v38 }
 0x625   : > { %6025 = vrot.lane.b32.xlu0 %v5981_v62, %s10236_s30  ;;  %6023 = vrot.lane.b32.xlu1 %v5980_v6, %s10236_s30  ;;  %v6096_v6 = vmul.f32 %v12862_v40, %v13254_v27  ;;  %v6097_v27 = vmul.f32 %v12872_v39, %v13270_v20 }
 0x627   : > { %v8211_v5 = vpop.permute.xlu0 %8210  ;;  %v8209_v8 = vpop.permute.xlu1 %8208 }
 0x628   : > { %9106 = vst.msk [vmem:[%s12951_s11 + $0xba0] sm:$0xff] %vm5577_vm3, %v8211_v5  ;;  %9105 = vst.msk [vmem:[%s12951_s11 + $0xb98] sm:$0xff] %vm5577_vm3, %v8209_v8  ;;  %v6098_v8 = vmul.f32 %v12862_v40, %v13268_v48  ;;  %v6099_v48 = vmul.f32 %v12872_v39, %v13284_v15  ;;  %v13584_v15 = vld [vmem:[#allocation3 + $0x18c] sm:$0xff] }
 0x629   : > { %6029 = vrot.lane.b32.xlu0 %v5983_v60, %s10236_s30  ;;  %6027 = vrot.lane.b32.xlu1 %v5982_v13, %s10236_s30  ;;  %v6100_v13 = vmul.f32 %v12862_v40, %v13282_v54  ;;  %v6101_v54 = vmul.f32 %v12872_v39, %v13298_v30  ;;  %v13596_v30 = vld [vmem:[#allocation3 + $0x1bc] sm:$0xff] }
 0x62b   : > { %v8215_v1 = vpop.permute.xlu0 %8214  ;;  %v8213_v19 = vpop.permute.xlu1 %8212 }
 0x62c   : > { %9108 = vst.msk [vmem:[%s12951_s11 + $0xbb0] sm:$0xff] %vm5577_vm3, %v8215_v1  ;;  %9107 = vst.msk [vmem:[%s12951_s11 + $0xba8] sm:$0xff] %vm5577_vm3, %v8213_v19  ;;  %v6102_v19 = vmul.f32 %v12862_v40, %v13296_v32  ;;  %v6201_v40 = vmul.f32 %v13584_v15, %v12854_v50  ;;  %v6103_v32 = vmul.f32 %v12872_v39, %v13312_v3  ;;  %v13608_v3 = vld [vmem:[#allocation3 + $0x1ec] sm:$0xff] }
 0x62d   : > { %6120 = vrot.lane.b32.xlu0 %v6088_v59, %s10230_s28  ;;  %6031 = vrot.lane.b32.xlu1 %v5984_v17, %s10236_s30  ;;  %v6202_v39 = vmul.f32 %v12864_v57, %v13310_v18 }
 0x62f   : > { %v8219_v29 = vpop.permute.xlu0 %8218  ;;  %v8217_v36 = vpop.permute.xlu1 %8216 }
 0x630   : > { %9110 = vst.msk [vmem:[%s12951_s11 + $0xbc0] sm:$0xff] %vm5577_vm3, %v8219_v29  ;;  %9109 = vst.msk [vmem:[%s12951_s11 + $0xbb8] sm:$0xff] %vm5577_vm3, %v8217_v36 }
 0x631   : > { %6124 = vrot.lane.b32.xlu0 %v6090_v45, %s10230_s28  ;;  %6122 = vrot.lane.b32.xlu1 %v6089_v52, %s10230_s28  ;;  %v6203_v45 = vmul.f32 %v13596_v30, %v12854_v50 }
 0x633   : > { %v8223_v16 = vpop.permute.xlu0 %8222  ;;  %v8221_v9 = vpop.permute.xlu1 %8220 }
 0x634   : > { %9112 = vst.msk [vmem:[%s12951_s11 + $0xbd0] sm:$0xff] %vm5577_vm3, %v8223_v16  ;;  %9111 = vst.msk [vmem:[%s12951_s11 + $0xbc8] sm:$0xff] %vm5577_vm3, %v8221_v9  ;;  %v6205_v9 = vmul.f32 %v13608_v3, %v12854_v50 }
 0x635   : > { %6128 = vrot.lane.b32.xlu0 %v6092_v61, %s10230_s28  ;;  %6126 = vrot.lane.b32.xlu1 %v6091_v31, %s10230_s28  ;;  %v6204_v61 = vmul.f32 %v12864_v57, %v13324_v43  ;;  %v13620_v31 = vld [vmem:[#allocation3 + $0x21c] sm:$0xff] }
 0x637   : > { %v8227_v56 = vpop.permute.xlu0 %8226  ;;  %v8225_v34 = vpop.permute.xlu1 %8224 }
 0x638   : > { %9114 = vst.msk [vmem:[%s12951_s11 + $0xbe0] sm:$0xff] %vm5577_vm3, %v8227_v56  ;;  %9113 = vst.msk [vmem:[%s12951_s11 + $0xbd8] sm:$0xff] %vm5577_vm3, %v8225_v34 }
 0x639   : > { %6132 = vrot.lane.b32.xlu0 %v6094_v10, %s10230_s28  ;;  %6130 = vrot.lane.b32.xlu1 %v6093_v53, %s10230_s28  ;;  %v6207_v10 = vmul.f32 %v13620_v31, %v12854_v50  ;;  %v6206_v53 = vmul.f32 %v12864_v57, %v13338_v7 }
 0x63b   : > { %v8231_v51 = vpop.permute.xlu0 %8230  ;;  %v8229_v62 = vpop.permute.xlu1 %8228 }
 0x63c   : > { %9116 = vst.msk [vmem:[%s12951_s11 + $0xbf0] sm:$0xff] %vm5577_vm3, %v8231_v51  ;;  %9115 = vst.msk [vmem:[%s12951_s11 + $0xbe8] sm:$0xff] %vm5577_vm3, %v8229_v62  ;;  %v13632_v51 = vld [vmem:[#allocation3 + $0x24c] sm:$0xff] }
 0x63d   : > { %6136 = vrot.lane.b32.xlu0 %v6096_v6, %s10230_s28  ;;  %6134 = vrot.lane.b32.xlu1 %v6095_v41, %s10230_s28  ;;  %v6209_v41 = vmul.f32 %v13632_v51, %v12854_v50 }
 0x63f   : > { %v5651_v26 = vpop.permute.xlu0 %5650  ;;  %v8233_v5 = vpop.permute.xlu1 %8232 }
 0x640   : > { %8750 = vst.msk [vmem:[%s12951_s11 + $0x80] sm:$0xff] %vm5577_vm3, %v5651_v26  ;;  %9117 = vst.msk [vmem:[%s12951_s11 + $0xbf8] sm:$0xff] %vm5577_vm3, %v8233_v5  ;;  %v6208_v26 = vmul.f32 %v12864_v57, %v13352_v12  ;;  %v13644_v5 = vld [vmem:[#allocation3 + $0x27c] sm:$0xff] }
 0x641   : > { %6140 = vrot.lane.b32.xlu0 %v6098_v8, %s10230_s28  ;;  %6138 = vrot.lane.b32.xlu1 %v6097_v27, %s10230_s28 }
 0x643   : > { %v5655_v38 = vpop.permute.xlu0 %5654  ;;  %v5653_v60 = vpop.permute.xlu1 %5652 }
 0x644   : > { %8752 = vst.msk [vmem:[%s12951_s11 + $0x90] sm:$0xff] %vm5577_vm3, %v5655_v38  ;;  %8751 = vst.msk [vmem:[%s12951_s11 + $0x88] sm:$0xff] %vm5577_vm3, %v5653_v60  ;;  %v6211_v38 = vmul.f32 %v13644_v5, %v12854_v50  ;;  %v6210_v60 = vmul.f32 %v12864_v57, %v13366_v24 }
 0x645   : > { %6144 = vrot.lane.b32.xlu0 %v6100_v13, %s10230_s28  ;;  %6142 = vrot.lane.b32.xlu1 %v6099_v48, %s10230_s28  ;;  %v13656_v13 = vld [vmem:[#allocation3 + $0x2ac] sm:$0xff] }
 0x647   : > { %v5659_v20 = vpop.permute.xlu0 %5658  ;;  %v5657_v1 = vpop.permute.xlu1 %5656 }
 0x648   : > { %8754 = vst.msk [vmem:[%s12951_s11 + $0xa0] sm:$0xff] %vm5577_vm3, %v5659_v20  ;;  %8753 = vst.msk [vmem:[%s12951_s11 + $0x98] sm:$0xff] %vm5577_vm3, %v5657_v1  ;;  %v6213_v1 = vmul.f32 %v13656_v13, %v12854_v50 }
 0x649   : > { %6148 = vrot.lane.b32.xlu0 %v6102_v19, %s10230_s28  ;;  %6146 = vrot.lane.b32.xlu1 %v6101_v54, %s10230_s28  ;;  %v6212_v19 = vmul.f32 %v12864_v57, %v13380_v11  ;;  %v13668_v54 = vld [vmem:[#allocation3 + $0x2dc] sm:$0xff] }
 0x64b   : > { %v5663_v59 = vpop.permute.xlu0 %5662  ;;  %v5661_v17 = vpop.permute.xlu1 %5660 }
 0x64c   : > { %8756 = vst.msk [vmem:[%s12951_s11 + $0xb0] sm:$0xff] %vm5577_vm3, %v5663_v59  ;;  %8755 = vst.msk [vmem:[%s12951_s11 + $0xa8] sm:$0xff] %vm5577_vm3, %v5661_v17 }
 0x64d   : > { %6233 = vrot.lane.b32.xlu0 %v6201_v40, %s10236_s30  ;;  %6150 = vrot.lane.b32.xlu1 %v6103_v32, %s10230_s28  ;;  %v6215_v40 = vmul.f32 %v13668_v54, %v12854_v50  ;;  %v6214_v32 = vmul.f32 %v12864_v57, %v13394_v21  ;;  %v6216_v50 = vmul.f32 %v12864_v57, %v13408_v63  ;;  %s10242_s28 = smov 101  }
 0x64f   : > { %v5667_v29 = vpop.permute.xlu0 %5666  ;;  %v5665_v36 = vpop.permute.xlu1 %5664 }
 0x650   : > { %8758 = vst.msk [vmem:[%s12951_s11 + $0xc0] sm:$0xff] %vm5577_vm3, %v5667_v29  ;;  %8757 = vst.msk [vmem:[%s12951_s11 + $0xb8] sm:$0xff] %vm5577_vm3, %v5665_v36 }
 0x651   : > { %6237 = vrot.lane.b32.xlu0 %v6203_v45, %s10236_s30  ;;  %6235 = vrot.lane.b32.xlu1 %v6202_v39, %s10236_s30  ;;  %v6427_v45 = vmul.f32 %v13584_v15, %v12846_v55  ;;  %v6428_v15 = vmul.f32 %v12856_v47, %v13310_v18 }
 0x653   : > { %v5671_v52 = vpop.permute.xlu0 %5670  ;;  %v5669_v16 = vpop.permute.xlu1 %5668 }
 0x654   : > { %8760 = vst.msk [vmem:[%s12951_s11 + $0xd0] sm:$0xff] %vm5577_vm3, %v5671_v52  ;;  %8759 = vst.msk [vmem:[%s12951_s11 + $0xc8] sm:$0xff] %vm5577_vm3, %v5669_v16  ;;  %v6429_v16 = vmul.f32 %v13596_v30, %v12846_v55  ;;  %v6430_v30 = vmul.f32 %v12856_v47, %v13324_v43 }
 0x655   : > { %6241 = vrot.lane.b32.xlu0 %v6205_v9, %s10236_s30  ;;  %6239 = vrot.lane.b32.xlu1 %v6204_v61, %s10236_s30  ;;  %v6431_v61 = vmul.f32 %v13608_v3, %v12846_v55  ;;  %v6432_v3 = vmul.f32 %v12856_v47, %v13338_v7 }
 0x657   : > { %v5675_v56 = vpop.permute.xlu0 %5674  ;;  %v5673_v34 = vpop.permute.xlu1 %5672 }
 0x658   : > { %8762 = vst.msk [vmem:[%s12951_s11 + $0xe0] sm:$0xff] %vm5577_vm3, %v5675_v56  ;;  %8761 = vst.msk [vmem:[%s12951_s11 + $0xd8] sm:$0xff] %vm5577_vm3, %v5673_v34  ;;  %v6433_v34 = vmul.f32 %v13620_v31, %v12846_v55  ;;  %v6434_v31 = vmul.f32 %v12856_v47, %v13352_v12 }
 0x659   : > { %6245 = vrot.lane.b32.xlu0 %v6207_v10, %s10236_s30  ;;  %6243 = vrot.lane.b32.xlu1 %v6206_v53, %s10236_s30  ;;  %v6435_v53 = vmul.f32 %v13632_v51, %v12846_v55  ;;  %v6436_v51 = vmul.f32 %v12856_v47, %v13366_v24 }
 0x65b   : > { %v5679_v62 = vpop.permute.xlu0 %5678  ;;  %v5677_v6 = vpop.permute.xlu1 %5676 }
 0x65c   : > { %8764 = vst.msk [vmem:[%s12951_s11 + $0xf0] sm:$0xff] %vm5577_vm3, %v5679_v62  ;;  %8763 = vst.msk [vmem:[%s12951_s11 + $0xe8] sm:$0xff] %vm5577_vm3, %v5677_v6  ;;  %v6437_v6 = vmul.f32 %v13644_v5, %v12846_v55  ;;  %v6438_v5 = vmul.f32 %v12856_v47, %v13380_v11  ;;  %v13760_v11 = vld [vmem:[#allocation3 + $0x310] sm:$0xff] }
 0x65d   : > { %6249 = vrot.lane.b32.xlu0 %v6209_v41, %s10236_s30  ;;  %6247 = vrot.lane.b32.xlu1 %v6208_v26, %s10236_s30  ;;  %v6439_v26 = vmul.f32 %v13656_v13, %v12846_v55 }
 0x65f   : > { %v5770_v8 = vpop.permute.xlu0 %5769  ;;  %v5681_v27 = vpop.permute.xlu1 %5680 }
 0x660   : > { %8766 = vst.msk [vmem:[%s12951_s11 + $0x100] sm:$0xff] %vm5577_vm3, %v5770_v8  ;;  %8765 = vst.msk [vmem:[%s12951_s11 + $0xf8] sm:$0xff] %vm5577_vm3, %v5681_v27  ;;  %v6441_v27 = vmul.f32 %v13668_v54, %v12846_v55  ;;  %v6546_v55 = vmul.f32 %v12870_v46, %v13760_v11  ;;  %v13786_v54 = vld [vmem:[#allocation3 + $0x370] sm:$0xff] }
 0x661   : > { %6253 = vrot.lane.b32.xlu0 %v6211_v38, %s10236_s30  ;;  %6251 = vrot.lane.b32.xlu1 %v6210_v60, %s10236_s30  ;;  %v6440_v38 = vmul.f32 %v12856_v47, %v13394_v21  ;;  %v6442_v21 = vmul.f32 %v12856_v47, %v13408_v63 }
 0x663   : > { %v5774_v48 = vpop.permute.xlu0 %5773  ;;  %v5772_v20 = vpop.permute.xlu1 %5771 }
 0x664   : > { %8768 = vst.msk [vmem:[%s12951_s11 + $0x110] sm:$0xff] %vm5577_vm3, %v5774_v48  ;;  %8767 = vst.msk [vmem:[%s12951_s11 + $0x108] sm:$0xff] %vm5577_vm3, %v5772_v20  ;;  %v13772_v48 = vld [vmem:[#allocation3 + $0x340] sm:$0xff]  ;;  %v13774_v20 = vld [vmem:[#allocation3 + $0x318] sm:$0xff] }
 0x665   : > { %6257 = vrot.lane.b32.xlu0 %v6213_v1, %s10236_s30  ;;  %6255 = vrot.lane.b32.xlu1 %v6212_v19, %s10236_s30  ;;  %v6548_v47 = vmul.f32 %v12870_v46, %v13772_v48  ;;  %v6547_v63 = vmul.f32 %v12880_v2, %v13774_v20 }
 0x667   : > { %v5778_v59 = vpop.permute.xlu0 %5777  ;;  %v5776_v17 = vpop.permute.xlu1 %5775 }
 0x668   : > { %8770 = vst.msk [vmem:[%s12951_s11 + $0x120] sm:$0xff] %vm5577_vm3, %v5778_v59  ;;  %8769 = vst.msk [vmem:[%s12951_s11 + $0x118] sm:$0xff] %vm5577_vm3, %v5776_v17  ;;  %v13788_v59 = vld [vmem:[#allocation3 + $0x348] sm:$0xff] }
 0x669   : > { %6261 = vrot.lane.b32.xlu0 %v6215_v40, %s10236_s30  ;;  %6259 = vrot.lane.b32.xlu1 %v6214_v32, %s10236_s30  ;;  %v6550_v32 = vmul.f32 %v12870_v46, %v13786_v54 }
 0x66b   : > { %v5782_v29 = vpop.permute.xlu0 %5781  ;;  %v5780_v36 = vpop.permute.xlu1 %5779 }
 0x66c   : > { %8772 = vst.msk [vmem:[%s12951_s11 + $0x130] sm:$0xff] %vm5577_vm3, %v5782_v29  ;;  %8771 = vst.msk [vmem:[%s12951_s11 + $0x128] sm:$0xff] %vm5577_vm3, %v5780_v36  ;;  %v6549_v29 = vmul.f32 %v12880_v2, %v13788_v59  ;;  %v13800_v36 = vld [vmem:[#allocation3 + $0x3a0] sm:$0xff] }
 0x66d   : > { %6459 = vrot.lane.b32.xlu0 %v6427_v45, %s10235_s26  ;;  %6263 = vrot.lane.b32.xlu1 %v6216_v50, %s10236_s30  ;;  %v13802_v45 = vld [vmem:[#allocation3 + $0x378] sm:$0xff] }
 0x66f   : > { %v5786_v39 = vpop.permute.xlu0 %5785  ;;  %v5784_v52 = vpop.permute.xlu1 %5783 }
 0x670   : > { %8774 = vst.msk [vmem:[%s12951_s11 + $0x140] sm:$0xff] %vm5577_vm3, %v5786_v39  ;;  %8773 = vst.msk [vmem:[%s12951_s11 + $0x138] sm:$0xff] %vm5577_vm3, %v5784_v52  ;;  %v6552_v52 = vmul.f32 %v12870_v46, %v13800_v36 }
 0x671   : > { %6463 = vrot.lane.b32.xlu0 %v6429_v16, %s10235_s26  ;;  %6461 = vrot.lane.b32.xlu1 %v6428_v15, %s10235_s26  ;;  %v6551_v16 = vmul.f32 %v12880_v2, %v13802_v45  ;;  %v13814_v15 = vld [vmem:[#allocation3 + $0x3d0] sm:$0xff] }
 0x673   : > { %v5790_v57 = vpop.permute.xlu0 %5789  ;;  %v5788_v9 = vpop.permute.xlu1 %5787 }
 0x674   : > { %8776 = vst.msk [vmem:[%s12951_s11 + $0x150] sm:$0xff] %vm5577_vm3, %v5790_v57  ;;  %8775 = vst.msk [vmem:[%s12951_s11 + $0x148] sm:$0xff] %vm5577_vm3, %v5788_v9  ;;  %v13816_v57 = vld [vmem:[#allocation3 + $0x3a8] sm:$0xff] }
 0x675   : > { %6467 = vrot.lane.b32.xlu0 %v6431_v61, %s10235_s26  ;;  %6465 = vrot.lane.b32.xlu1 %v6430_v30, %s10235_s26  ;;  %v6554_v30 = vmul.f32 %v12870_v46, %v13814_v15 }
 0x677   : > { %v5794_v18 = vpop.permute.xlu0 %5793  ;;  %v5792_v56 = vpop.permute.xlu1 %5791 }
 0x678   : > { %8778 = vst.msk [vmem:[%s12951_s11 + $0x160] sm:$0xff] %vm5577_vm3, %v5794_v18  ;;  %8777 = vst.msk [vmem:[%s12951_s11 + $0x158] sm:$0xff] %vm5577_vm3, %v5792_v56  ;;  %v6553_v18 = vmul.f32 %v12880_v2, %v13816_v57  ;;  %v13828_v56 = vld [vmem:[#allocation3 + $0x400] sm:$0xff] }
 0x679   : > { %6471 = vrot.lane.b32.xlu0 %v6433_v34, %s10235_s26  ;;  %6469 = vrot.lane.b32.xlu1 %v6432_v3, %s10235_s26  ;;  %v13830_v34 = vld [vmem:[#allocation3 + $0x3d8] sm:$0xff] }
 0x67b   : > { %v5798_v43 = vpop.permute.xlu0 %5797  ;;  %v5796_v10 = vpop.permute.xlu1 %5795 }
 0x67c   : > { %8780 = vst.msk [vmem:[%s12951_s11 + $0x170] sm:$0xff] %vm5577_vm3, %v5798_v43  ;;  %8779 = vst.msk [vmem:[%s12951_s11 + $0x168] sm:$0xff] %vm5577_vm3, %v5796_v10  ;;  %v6556_v10 = vmul.f32 %v12870_v46, %v13828_v56 }
 0x67d   : > { %6475 = vrot.lane.b32.xlu0 %v6435_v53, %s10235_s26  ;;  %6473 = vrot.lane.b32.xlu1 %v6434_v31, %s10235_s26  ;;  %v6555_v53 = vmul.f32 %v12880_v2, %v13830_v34  ;;  %v13842_v31 = vld [vmem:[#allocation3 + $0x430] sm:$0xff] }
 0x67f   : > { %v6002_v7 = vpop.permute.xlu0 %6001  ;;  %v5800_v62 = vpop.permute.xlu1 %5799 }
 0x680   : > { %8798 = vst.msk [vmem:[%s12951_s11 + $0x200] sm:$0xff] %vm5577_vm3, %v6002_v7  ;;  %8781 = vst.msk [vmem:[%s12951_s11 + $0x178] sm:$0xff] %vm5577_vm3, %v5800_v62  ;;  %v13844_v7 = vld [vmem:[#allocation3 + $0x408] sm:$0xff] }
 0x681   : > { %6479 = vrot.lane.b32.xlu0 %v6437_v6, %s10235_s26  ;;  %6477 = vrot.lane.b32.xlu1 %v6436_v51, %s10235_s26  ;;  %v6558_v51 = vmul.f32 %v12870_v46, %v13842_v31 }
 0x683   : > { %v6006_v12 = vpop.permute.xlu0 %6005  ;;  %v6004_v41 = vpop.permute.xlu1 %6003 }
 0x684   : > { %8800 = vst.msk [vmem:[%s12951_s11 + $0x210] sm:$0xff] %vm5577_vm3, %v6006_v12  ;;  %8799 = vst.msk [vmem:[%s12951_s11 + $0x208] sm:$0xff] %vm5577_vm3, %v6004_v41  ;;  %v6557_v12 = vmul.f32 %v12880_v2, %v13844_v7  ;;  %v13856_v41 = vld [vmem:[#allocation3 + $0x460] sm:$0xff] }
 0x685   : > { %6483 = vrot.lane.b32.xlu0 %v6439_v26, %s10235_s26  ;;  %6481 = vrot.lane.b32.xlu1 %v6438_v5, %s10235_s26  ;;  %v13858_v26 = vld [vmem:[#allocation3 + $0x438] sm:$0xff] }
 0x687   : > { %v6010_v24 = vpop.permute.xlu0 %6009  ;;  %v6008_v8 = vpop.permute.xlu1 %6007 }
 0x688   : > { %8802 = vst.msk [vmem:[%s12951_s11 + $0x220] sm:$0xff] %vm5577_vm3, %v6010_v24  ;;  %8801 = vst.msk [vmem:[%s12951_s11 + $0x218] sm:$0xff] %vm5577_vm3, %v6008_v8  ;;  %v6560_v8 = vmul.f32 %v12870_v46, %v13856_v41 }
 0x689   : > { %6487 = vrot.lane.b32.xlu0 %v6441_v27, %s10235_s26  ;;  %6485 = vrot.lane.b32.xlu1 %v6440_v38, %s10235_s26  ;;  %v6559_v27 = vmul.f32 %v12880_v2, %v13858_v26  ;;  %v13870_v38 = vld [vmem:[#allocation3 + $0x317] sm:$0xff] }
 0x68a   : > { %v6665_v46 = vmul.f32 %v12878_v28, %v13870_v38 }
 0x68b   : > { %v6014_v60 = vpop.permute.xlu0 %6013  ;;  %v6012_v13 = vpop.permute.xlu1 %6011 }
 0x68c   : > { %8804 = vst.msk [vmem:[%s12951_s11 + $0x230] sm:$0xff] %vm5577_vm3, %v6014_v60  ;;  %8803 = vst.msk [vmem:[%s12951_s11 + $0x228] sm:$0xff] %vm5577_vm3, %v6012_v13  ;;  %v13872_v60 = vld [vmem:[#allocation3 + $0x468] sm:$0xff] }
 0x68d   : > { %6578 = vrot.lane.b32.xlu0 %v6546_v55, %s10237_s5  ;;  %6489 = vrot.lane.b32.xlu1 %v6442_v21, %s10235_s26  ;;  %v6561_v21 = vmul.f32 %v12880_v2, %v13872_v60  ;;  %s10126_s26 = sshll.u32 %s10243_s6, 4  ;;  %s10127_s26 = int_to_ptr.vmem [resolvable:$false] %s10126_s26 }
 0x68e   : > { %s10128_s30 = scalar_lea.vmem %s10127_s26, 102400 }
 0x68f   : > { %v6018_v1 = vpop.permute.xlu0 %6017  ;;  %v6016_v19 = vpop.permute.xlu1 %6015 }
 0x690   : > { %8806 = vst.msk [vmem:[%s12951_s11 + $0x240] sm:$0xff] %vm5577_vm3, %v6018_v1  ;;  %8805 = vst.msk [vmem:[%s12951_s11 + $0x238] sm:$0xff] %vm5577_vm3, %v6016_v19  ;;  %v13884_v1 = vld [vmem:[#allocation3 + $0x347] sm:$0xff]  ;;  %v13886_v19 = vld [vmem:[#allocation3 + $0x31f] sm:$0xff] }
 0x691   : > { %6582 = vrot.lane.b32.xlu0 %v6548_v47, %s10237_s5  ;;  %6580 = vrot.lane.b32.xlu1 %v6547_v63, %s10237_s5  ;;  %v6667_v2 = vmul.f32 %v12878_v28, %v13884_v1 }
 0x693   : > { %v6022_v17 = vpop.permute.xlu0 %6021  ;;  %v6020_v40 = vpop.permute.xlu1 %6019 }
 0x694   : > { %8808 = vst.msk [vmem:[%s12951_s11 + $0x250] sm:$0xff] %vm5577_vm3, %v6022_v17  ;;  %8807 = vst.msk [vmem:[%s12951_s11 + $0x248] sm:$0xff] %vm5577_vm3, %v6020_v40  ;;  %v6666_v17 = vmul.f32 %v12888_v58, %v13886_v19  ;;  %v13898_v40 = vld [vmem:[#allocation3 + $0x377] sm:$0xff] }
 0x695   : > { %6586 = vrot.lane.b32.xlu0 %v6550_v32, %s10237_s5  ;;  %6584 = vrot.lane.b32.xlu1 %v6549_v29, %s10237_s5  ;;  %v13900_v32 = vld [vmem:[#allocation3 + $0x34f] sm:$0xff] }
 0x697   : > { %v6026_v50 = vpop.permute.xlu0 %6025  ;;  %v6024_v39 = vpop.permute.xlu1 %6023 }
 0x698   : > { %8810 = vst.msk [vmem:[%s12951_s11 + $0x260] sm:$0xff] %vm5577_vm3, %v6026_v50  ;;  %8809 = vst.msk [vmem:[%s12951_s11 + $0x258] sm:$0xff] %vm5577_vm3, %v6024_v39  ;;  %v6669_v39 = vmul.f32 %v12878_v28, %v13898_v40 }
 0x699   : > { %6590 = vrot.lane.b32.xlu0 %v6552_v52, %s10237_s5  ;;  %6588 = vrot.lane.b32.xlu1 %v6551_v16, %s10237_s5  ;;  %v6668_v52 = vmul.f32 %v12888_v58, %v13900_v32  ;;  %v13912_v16 = vld [vmem:[#allocation3 + $0x3a7] sm:$0xff] }
 0x69b   : > { %v6030_v9 = vpop.permute.xlu0 %6029  ;;  %v6028_v61 = vpop.permute.xlu1 %6027 }
 0x69c   : > { %8812 = vst.msk [vmem:[%s12951_s11 + $0x270] sm:$0xff] %vm5577_vm3, %v6030_v9  ;;  %8811 = vst.msk [vmem:[%s12951_s11 + $0x268] sm:$0xff] %vm5577_vm3, %v6028_v61  ;;  %v13914_v9 = vld [vmem:[#allocation3 + $0x37f] sm:$0xff] }
 0x69d   : > { %6594 = vrot.lane.b32.xlu0 %v6554_v30, %s10237_s5  ;;  %6592 = vrot.lane.b32.xlu1 %v6553_v18, %s10237_s5  ;;  %v6671_v18 = vmul.f32 %v12878_v28, %v13912_v16 }
 0x69f   : > { %v6121_v3 = vpop.permute.xlu0 %6120  ;;  %v6032_v43 = vpop.permute.xlu1 %6031 }
 0x6a0   : > { %8814 = vst.msk [vmem:[%s12951_s11 + $0x280] sm:$0xff] %vm5577_vm3, %v6121_v3  ;;  %8813 = vst.msk [vmem:[%s12951_s11 + $0x278] sm:$0xff] %vm5577_vm3, %v6032_v43  ;;  %v6670_v3 = vmul.f32 %v12888_v58, %v13914_v9  ;;  %v13926_v43 = vld [vmem:[#allocation3 + $0x3d7] sm:$0xff] }
 0x6a1   : > { %6598 = vrot.lane.b32.xlu0 %v6556_v10, %s10237_s5  ;;  %6596 = vrot.lane.b32.xlu1 %v6555_v53, %s10237_s5  ;;  %v13928_v10 = vld [vmem:[#allocation3 + $0x3af] sm:$0xff] }
 0x6a3   : > { %v6125_v62 = vpop.permute.xlu0 %6124  ;;  %v6123_v6 = vpop.permute.xlu1 %6122 }
 0x6a4   : > { %8816 = vst.msk [vmem:[%s12951_s11 + $0x290] sm:$0xff] %vm5577_vm3, %v6125_v62  ;;  %8815 = vst.msk [vmem:[%s12951_s11 + $0x288] sm:$0xff] %vm5577_vm3, %v6123_v6  ;;  %v6673_v6 = vmul.f32 %v12878_v28, %v13926_v43 }
 0x6a5   : > { %6602 = vrot.lane.b32.xlu0 %v6558_v51, %s10237_s5  ;;  %6600 = vrot.lane.b32.xlu1 %v6557_v12, %s10237_s5  ;;  %v6672_v51 = vmul.f32 %v12888_v58, %v13928_v10  ;;  %v13940_v12 = vld [vmem:[#allocation3 + $0x407] sm:$0xff] }
 0x6a7   : > { %v6129_v5 = vpop.permute.xlu0 %6128  ;;  %v6127_v24 = vpop.permute.xlu1 %6126 }
 0x6a8   : > { %8818 = vst.msk [vmem:[%s12951_s11 + $0x2a0] sm:$0xff] %vm5577_vm3, %v6129_v5  ;;  %8817 = vst.msk [vmem:[%s12951_s11 + $0x298] sm:$0xff] %vm5577_vm3, %v6127_v24  ;;  %v13942_v5 = vld [vmem:[#allocation3 + $0x3df] sm:$0xff] }
 0x6a9   : > { %6606 = vrot.lane.b32.xlu0 %v6560_v8, %s10237_s5  ;;  %6604 = vrot.lane.b32.xlu1 %v6559_v27, %s10237_s5  ;;  %v6675_v27 = vmul.f32 %v12878_v28, %v13940_v12 }
 0x6ab   : > { %v6133_v13 = vpop.permute.xlu0 %6132  ;;  %v6131_v55 = vpop.permute.xlu1 %6130 }
 0x6ac   : > { %8820 = vst.msk [vmem:[%s12951_s11 + $0x2b0] sm:$0xff] %vm5577_vm3, %v6133_v13  ;;  %8819 = vst.msk [vmem:[%s12951_s11 + $0x2a8] sm:$0xff] %vm5577_vm3, %v6131_v55  ;;  %v6674_v13 = vmul.f32 %v12888_v58, %v13942_v5  ;;  %v13954_v55 = vld [vmem:[#allocation3 + $0x437] sm:$0xff] }
 0x6ad   : > { %6697 = vrot.lane.b32.xlu0 %v6665_v46, %s10238_s21  ;;  %6608 = vrot.lane.b32.xlu1 %v6561_v21, %s10237_s5  ;;  %v13956_v46 = vld [vmem:[#allocation3 + $0x40f] sm:$0xff] }
 0x6af   : > { %v6137_v47 = vpop.permute.xlu0 %6136  ;;  %v6135_v63 = vpop.permute.xlu1 %6134 }
 0x6b0   : > { %8822 = vst.msk [vmem:[%s12951_s11 + $0x2c0] sm:$0xff] %vm5577_vm3, %v6137_v47  ;;  %8821 = vst.msk [vmem:[%s12951_s11 + $0x2b8] sm:$0xff] %vm5577_vm3, %v6135_v63  ;;  %v6677_v63 = vmul.f32 %v12878_v28, %v13954_v55 }
 0x6b1   : > { %6701 = vrot.lane.b32.xlu0 %v6667_v2, %s10238_s21  ;;  %6699 = vrot.lane.b32.xlu1 %v6666_v17, %s10238_s21  ;;  %v6676_v2 = vmul.f32 %v12888_v58, %v13956_v46  ;;  %v13968_v17 = vld [vmem:[#allocation3 + $0x467] sm:$0xff] }
 0x6b3   : > { %v6141_v29 = vpop.permute.xlu0 %6140  ;;  %v6139_v50 = vpop.permute.xlu1 %6138 }
 0x6b4   : > { %8824 = vst.msk [vmem:[%s12951_s11 + $0x2d0] sm:$0xff] %vm5577_vm3, %v6141_v29  ;;  %8823 = vst.msk [vmem:[%s12951_s11 + $0x2c8] sm:$0xff] %vm5577_vm3, %v6139_v50  ;;  %v13970_v29 = vld [vmem:[#allocation3 + $0x43f] sm:$0xff] }
 0x6b5   : > { %6705 = vrot.lane.b32.xlu0 %v6669_v39, %s10238_s21  ;;  %6703 = vrot.lane.b32.xlu1 %v6668_v52, %s10238_s21  ;;  %v6679_v52 = vmul.f32 %v12878_v28, %v13968_v17 }
 0x6b7   : > { %v6145_v61 = vpop.permute.xlu0 %6144  ;;  %v6143_v30 = vpop.permute.xlu1 %6142 }
 0x6b8   : > { %8826 = vst.msk [vmem:[%s12951_s11 + $0x2e0] sm:$0xff] %vm5577_vm3, %v6145_v61  ;;  %8825 = vst.msk [vmem:[%s12951_s11 + $0x2d8] sm:$0xff] %vm5577_vm3, %v6143_v30  ;;  %v6678_v61 = vmul.f32 %v12888_v58, %v13970_v29  ;;  %v13982_v30 = vld [vmem:[#allocation3 + $0x46f] sm:$0xff] }
 0x6b9   : > { %6709 = vrot.lane.b32.xlu0 %v6671_v18, %s10238_s21  ;;  %6707 = vrot.lane.b32.xlu1 %v6670_v3, %s10238_s21 }
 0x6bb   : > { %v6149_v53 = vpop.permute.xlu0 %6148  ;;  %v6147_v62 = vpop.permute.xlu1 %6146 }
 0x6bc   : > { %8828 = vst.msk [vmem:[%s12951_s11 + $0x2f0] sm:$0xff] %vm5577_vm3, %v6149_v53  ;;  %8827 = vst.msk [vmem:[%s12951_s11 + $0x2e8] sm:$0xff] %vm5577_vm3, %v6147_v62  ;;  %v6897_v53 = vmul.f32 %v12886_v22, %v13870_v38  ;;  %v6680_v62 = vmul.f32 %v12888_v58, %v13982_v30  ;;  %v6898_v38 = vmul.f32 %v12897_v44, %v13886_v19 }
 0x6bd   : > { %6713 = vrot.lane.b32.xlu0 %v6673_v6, %s10238_s21  ;;  %6711 = vrot.lane.b32.xlu1 %v6672_v51, %s10238_s21 }
 0x6bf   : > { %v6234_v24 = vpop.permute.xlu0 %6233  ;;  %v6151_v8 = vpop.permute.xlu1 %6150 }
 0x6c0   : > { %8830 = vst.msk [vmem:[%s12951_s11 + $0x300] sm:$0xff] %vm5577_vm3, %v6234_v24  ;;  %8829 = vst.msk [vmem:[%s12951_s11 + $0x2f8] sm:$0xff] %vm5577_vm3, %v6151_v8  ;;  %v6899_v24 = vmul.f32 %v12886_v22, %v13884_v1  ;;  %v6900_v1 = vmul.f32 %v12897_v44, %v13900_v32 }
 0x6c1   : > { %6717 = vrot.lane.b32.xlu0 %v6675_v27, %s10238_s21  ;;  %6715 = vrot.lane.b32.xlu1 %v6674_v13, %s10238_s21  ;;  %v6901_v13 = vmul.f32 %v12886_v22, %v13898_v40  ;;  %v6902_v40 = vmul.f32 %v12897_v44, %v13914_v9 }
 0x6c3   : > { %v6238_v21 = vpop.permute.xlu0 %6237  ;;  %v6236_v47 = vpop.permute.xlu1 %6235 }
 0x6c4   : > { %8832 = vst.msk [vmem:[%s12951_s11 + $0x310] sm:$0xff] %vm5577_vm3, %v6238_v21  ;;  %8831 = vst.msk [vmem:[%s12951_s11 + $0x308] sm:$0xff] %vm5577_vm3, %v6236_v47  ;;  %v6903_v47 = vmul.f32 %v12886_v22, %v13912_v16  ;;  %v6904_v16 = vmul.f32 %v12897_v44, %v13928_v10 }
 0x6c5   : > { %6721 = vrot.lane.b32.xlu0 %v6677_v63, %s10238_s21  ;;  %6719 = vrot.lane.b32.xlu1 %v6676_v2, %s10238_s21  ;;  %v6905_v2 = vmul.f32 %v12886_v22, %v13926_v43  ;;  %v6906_v43 = vmul.f32 %v12897_v44, %v13942_v5 }
 0x6c7   : > { %v6242_v50 = vpop.permute.xlu0 %6241  ;;  %v6240_v39 = vpop.permute.xlu1 %6239 }
 0x6c8   : > { %8834 = vst.msk [vmem:[%s12951_s11 + $0x320] sm:$0xff] %vm5577_vm3, %v6242_v50  ;;  %8833 = vst.msk [vmem:[%s12951_s11 + $0x318] sm:$0xff] %vm5577_vm3, %v6240_v39  ;;  %v6907_v39 = vmul.f32 %v12886_v22, %v13940_v12  ;;  %v6908_v12 = vmul.f32 %v12897_v44, %v13956_v46 }
 0x6c9   : > { %6725 = vrot.lane.b32.xlu0 %v6679_v52, %s10238_s21  ;;  %6723 = vrot.lane.b32.xlu1 %v6678_v61, %s10238_s21  ;;  %v6909_v61 = vmul.f32 %v12886_v22, %v13954_v55  ;;  %v6910_v55 = vmul.f32 %v12897_v44, %v13970_v29 }
 0x6cb   : > { %v6246_v18 = vpop.permute.xlu0 %6245  ;;  %v6244_v3 = vpop.permute.xlu1 %6243 }
 0x6cc   : > { %8836 = vst.msk [vmem:[%s12951_s11 + $0x330] sm:$0xff] %vm5577_vm3, %v6246_v18  ;;  %8835 = vst.msk [vmem:[%s12951_s11 + $0x328] sm:$0xff] %vm5577_vm3, %v6244_v3  ;;  %v6911_v3 = vmul.f32 %v12886_v22, %v13968_v17  ;;  %v6912_v17 = vmul.f32 %v12897_v44, %v13982_v30 }
 0x6cd   : > { %6929 = vrot.lane.b32.xlu0 %v6897_v53, %s10239_s7  ;;  %6727 = vrot.lane.b32.xlu1 %v6680_v62, %s10238_s21  ;;  %v7016_v62 = vmul.f32 %v12895_v33, %v13760_v11  ;;  %v7017_v11 = vmul.f32 %v12907_v4, %v13774_v20 }
 0x6cf   : > { %v6250_v6 = vpop.permute.xlu0 %6249  ;;  %v6248_v51 = vpop.permute.xlu1 %6247 }
 0x6d0   : > { %8838 = vst.msk [vmem:[%s12951_s11 + $0x340] sm:$0xff] %vm5577_vm3, %v6250_v6  ;;  %8837 = vst.msk [vmem:[%s12951_s11 + $0x338] sm:$0xff] %vm5577_vm3, %v6248_v51  ;;  %v7018_v51 = vmul.f32 %v12895_v33, %v13772_v48  ;;  %v7019_v48 = vmul.f32 %v12907_v4, %v13788_v59 }
 0x6d1   : > { %6933 = vrot.lane.b32.xlu0 %v6899_v24, %s10239_s7  ;;  %6931 = vrot.lane.b32.xlu1 %v6898_v38, %s10239_s7  ;;  %v7020_v38 = vmul.f32 %v12895_v33, %v13786_v54  ;;  %v7021_v54 = vmul.f32 %v12907_v4, %v13802_v45 }
 0x6d3   : > { %v6254_v8 = vpop.permute.xlu0 %6253  ;;  %v6252_v27 = vpop.permute.xlu1 %6251 }
 0x6d4   : > { %8840 = vst.msk [vmem:[%s12951_s11 + $0x350] sm:$0xff] %vm5577_vm3, %v6254_v8  ;;  %8839 = vst.msk [vmem:[%s12951_s11 + $0x348] sm:$0xff] %vm5577_vm3, %v6252_v27  ;;  %v7022_v27 = vmul.f32 %v12895_v33, %v13800_v36  ;;  %v7023_v36 = vmul.f32 %v12907_v4, %v13816_v57 }
 0x6d5   : > { %6937 = vrot.lane.b32.xlu0 %v6901_v13, %s10239_s7  ;;  %6935 = vrot.lane.b32.xlu1 %v6900_v1, %s10239_s7  ;;  %v7024_v1 = vmul.f32 %v12895_v33, %v13814_v15  ;;  %v7025_v15 = vmul.f32 %v12907_v4, %v13830_v34 }
 0x6d7   : > { %v6258_v19 = vpop.permute.xlu0 %6257  ;;  %v6256_v21 = vpop.permute.xlu1 %6255 }
 0x6d8   : > { %8842 = vst.msk [vmem:[%s12951_s11 + $0x360] sm:$0xff] %vm5577_vm3, %v6258_v19  ;;  %8841 = vst.msk [vmem:[%s12951_s11 + $0x358] sm:$0xff] %vm5577_vm3, %v6256_v21  ;;  %v7026_v21 = vmul.f32 %v12895_v33, %v13828_v56  ;;  %v7027_v56 = vmul.f32 %v12907_v4, %v13844_v7  ;;  %v14144_v7 = vld [vmem:[#allocation3 + $0x309] sm:$0xff] }
 0x6d9   : > { %6941 = vrot.lane.b32.xlu0 %v6903_v47, %s10239_s7  ;;  %6939 = vrot.lane.b32.xlu1 %v6902_v40, %s10239_s7  ;;  %v7028_v40 = vmul.f32 %v12895_v33, %v13842_v31  ;;  %v7029_v31 = vmul.f32 %v12907_v4, %v13858_v26  ;;  %v14156_v26 = vld [vmem:[#allocation3 + $0x339] sm:$0xff] }
 0x6db   : > { %v6262_v32 = vpop.permute.xlu0 %6261  ;;  %v6260_v63 = vpop.permute.xlu1 %6259 }
 0x6dc   : > { %8844 = vst.msk [vmem:[%s12951_s11 + $0x370] sm:$0xff] %vm5577_vm3, %v6262_v32  ;;  %8843 = vst.msk [vmem:[%s12951_s11 + $0x368] sm:$0xff] %vm5577_vm3, %v6260_v63  ;;  %v7030_v63 = vmul.f32 %v12895_v33, %v13856_v41  ;;  %v7129_v33 = vmul.f32 %v14144_v7, %v12886_v22  ;;  %v7031_v41 = vmul.f32 %v12907_v4, %v13872_v60  ;;  %v14170_v60 = vld [vmem:[#allocation3 + $0x369] sm:$0xff] }
 0x6dd   : > { %6945 = vrot.lane.b32.xlu0 %v6905_v2, %s10239_s7  ;;  %6943 = vrot.lane.b32.xlu1 %v6904_v16, %s10239_s7 }
 0x6df   : > { %v6460_v9 = vpop.permute.xlu0 %6459  ;;  %v6264_v50 = vpop.permute.xlu1 %6263 }
 0x6e0   : > { %8862 = vst.msk [vmem:[%s12951_s11 + $0x400] sm:$0xff] %vm5577_vm3, %v6460_v9  ;;  %8845 = vst.msk [vmem:[%s12951_s11 + $0x378] sm:$0xff] %vm5577_vm3, %v6264_v50  ;;  %v14158_v9 = vld [vmem:[#allocation3 + $0x311] sm:$0xff] }
 0x6e1   : > { %6949 = vrot.lane.b32.xlu0 %v6907_v39, %s10239_s7  ;;  %6947 = vrot.lane.b32.xlu1 %v6906_v43, %s10239_s7  ;;  %v7131_v43 = vmul.f32 %v14156_v26, %v12886_v22  ;;  %v7130_v4 = vmul.f32 %v14158_v9, %v12897_v44 }
 0x6e3   : > { %v6464_v10 = vpop.permute.xlu0 %6463  ;;  %v6462_v52 = vpop.permute.xlu1 %6461 }
 0x6e4   : > { %8864 = vst.msk [vmem:[%s12951_s11 + $0x410] sm:$0xff] %vm5577_vm3, %v6464_v10  ;;  %8863 = vst.msk [vmem:[%s12951_s11 + $0x408] sm:$0xff] %vm5577_vm3, %v6462_v52  ;;  %v14172_v10 = vld [vmem:[#allocation3 + $0x341] sm:$0xff] }
 0x6e5   : > { %6953 = vrot.lane.b32.xlu0 %v6909_v61, %s10239_s7  ;;  %6951 = vrot.lane.b32.xlu1 %v6908_v12, %s10239_s7  ;;  %v7133_v12 = vmul.f32 %v14170_v60, %v12886_v22 }
 0x6e7   : > { %v6468_v5 = vpop.permute.xlu0 %6467  ;;  %v6466_v18 = vpop.permute.xlu1 %6465 }
 0x6e8   : > { %8866 = vst.msk [vmem:[%s12951_s11 + $0x420] sm:$0xff] %vm5577_vm3, %v6468_v5  ;;  %8865 = vst.msk [vmem:[%s12951_s11 + $0x418] sm:$0xff] %vm5577_vm3, %v6466_v18  ;;  %v7132_v5 = vmul.f32 %v14172_v10, %v12897_v44  ;;  %v14184_v18 = vld [vmem:[#allocation3 + $0x399] sm:$0xff] }
 0x6e9   : > { %6957 = vrot.lane.b32.xlu0 %v6911_v3, %s10239_s7  ;;  %6955 = vrot.lane.b32.xlu1 %v6910_v55, %s10239_s7  ;;  %v14186_v3 = vld [vmem:[#allocation3 + $0x371] sm:$0xff] }
 0x6eb   : > { %v6472_v46 = vpop.permute.xlu0 %6471  ;;  %v6470_v53 = vpop.permute.xlu1 %6469 }
 0x6ec   : > { %8868 = vst.msk [vmem:[%s12951_s11 + $0x430] sm:$0xff] %vm5577_vm3, %v6472_v46  ;;  %8867 = vst.msk [vmem:[%s12951_s11 + $0x428] sm:$0xff] %vm5577_vm3, %v6470_v53  ;;  %v7135_v53 = vmul.f32 %v14184_v18, %v12886_v22 }
 0x6ed   : > { %7048 = vrot.lane.b32.xlu0 %v7016_v62, %s10240_s9  ;;  %6959 = vrot.lane.b32.xlu1 %v6912_v17, %s10239_s7  ;;  %v7134_v62 = vmul.f32 %v14186_v3, %v12897_v44  ;;  %v14198_v17 = vld [vmem:[#allocation3 + $0x3c9] sm:$0xff] }
 0x6ef   : > { %v6476_v29 = vpop.permute.xlu0 %6475  ;;  %v6474_v6 = vpop.permute.xlu1 %6473 }
 0x6f0   : > { %8870 = vst.msk [vmem:[%s12951_s11 + $0x440] sm:$0xff] %vm5577_vm3, %v6476_v29  ;;  %8869 = vst.msk [vmem:[%s12951_s11 + $0x438] sm:$0xff] %vm5577_vm3, %v6474_v6  ;;  %v14200_v29 = vld [vmem:[#allocation3 + $0x3a1] sm:$0xff] }
 0x6f1   : > { %7052 = vrot.lane.b32.xlu0 %v7018_v51, %s10240_s9  ;;  %7050 = vrot.lane.b32.xlu1 %v7017_v11, %s10240_s9  ;;  %v7137_v11 = vmul.f32 %v14198_v17, %v12886_v22 }
 0x6f3   : > { %v6480_v30 = vpop.permute.xlu0 %6479  ;;  %v6478_v24 = vpop.permute.xlu1 %6477 }
 0x6f4   : > { %8872 = vst.msk [vmem:[%s12951_s11 + $0x450] sm:$0xff] %vm5577_vm3, %v6480_v30  ;;  %8871 = vst.msk [vmem:[%s12951_s11 + $0x448] sm:$0xff] %vm5577_vm3, %v6478_v24  ;;  %v7136_v30 = vmul.f32 %v14200_v29, %v12897_v44  ;;  %v14212_v24 = vld [vmem:[#allocation3 + $0x3f9] sm:$0xff] }
 0x6f5   : > { %7056 = vrot.lane.b32.xlu0 %v7020_v38, %s10240_s9  ;;  %7054 = vrot.lane.b32.xlu1 %v7019_v48, %s10240_s9  ;;  %v14214_v38 = vld [vmem:[#allocation3 + $0x3d1] sm:$0xff] }
 0x6f7   : > { %v6484_v20 = vpop.permute.xlu0 %6483  ;;  %v6482_v8 = vpop.permute.xlu1 %6481 }
 0x6f8   : > { %8874 = vst.msk [vmem:[%s12951_s11 + $0x460] sm:$0xff] %vm5577_vm3, %v6484_v20  ;;  %8873 = vst.msk [vmem:[%s12951_s11 + $0x458] sm:$0xff] %vm5577_vm3, %v6482_v8  ;;  %v7139_v8 = vmul.f32 %v14212_v24, %v12886_v22 }
 0x6f9   : > { %7060 = vrot.lane.b32.xlu0 %v7022_v27, %s10240_s9  ;;  %7058 = vrot.lane.b32.xlu1 %v7021_v54, %s10240_s9  ;;  %v7138_v27 = vmul.f32 %v14214_v38, %v12897_v44  ;;  %v14226_v54 = vld [vmem:[#allocation3 + $0x429] sm:$0xff] }
 0x6fb   : > { %v6488_v59 = vpop.permute.xlu0 %6487  ;;  %v6486_v13 = vpop.permute.xlu1 %6485 }
 0x6fc   : > { %8876 = vst.msk [vmem:[%s12951_s11 + $0x470] sm:$0xff] %vm5577_vm3, %v6488_v59  ;;  %8875 = vst.msk [vmem:[%s12951_s11 + $0x468] sm:$0xff] %vm5577_vm3, %v6486_v13  ;;  %v14228_v59 = vld [vmem:[#allocation3 + $0x401] sm:$0xff] }
 0x6fd   : > { %7064 = vrot.lane.b32.xlu0 %v7024_v1, %s10240_s9  ;;  %7062 = vrot.lane.b32.xlu1 %v7023_v36, %s10240_s9  ;;  %v7141_v36 = vmul.f32 %v14226_v54, %v12886_v22 }
 0x6ff   : > { %v6579_v45 = vpop.permute.xlu0 %6578  ;;  %v6490_v19 = vpop.permute.xlu1 %6489 }
 0x700   : > { %8878 = vst.msk [vmem:[%s12951_s11 + $0x480] sm:$0xff] %vm5577_vm3, %v6579_v45  ;;  %8877 = vst.msk [vmem:[%s12951_s11 + $0x478] sm:$0xff] %vm5577_vm3, %v6490_v19  ;;  %v7140_v45 = vmul.f32 %v14228_v59, %v12897_v44  ;;  %v14240_v19 = vld [vmem:[#allocation3 + $0x459] sm:$0xff] }
 0x701   : > { %7068 = vrot.lane.b32.xlu0 %v7026_v21, %s10240_s9  ;;  %7066 = vrot.lane.b32.xlu1 %v7025_v15, %s10240_s9  ;;  %v14242_v21 = vld [vmem:[#allocation3 + $0x431] sm:$0xff] }
 0x703   : > { %v6583_v57 = vpop.permute.xlu0 %6582  ;;  %v6581_v47 = vpop.permute.xlu1 %6580 }
 0x704   : > { %8880 = vst.msk [vmem:[%s12951_s11 + $0x490] sm:$0xff] %vm5577_vm3, %v6583_v57  ;;  %8879 = vst.msk [vmem:[%s12951_s11 + $0x488] sm:$0xff] %vm5577_vm3, %v6581_v47  ;;  %v7143_v47 = vmul.f32 %v14240_v19, %v12886_v22  ;;  %v7355_v22 = vmul.f32 %v14144_v7, %v12878_v28  ;;  %v7356_v7 = vmul.f32 %v14158_v9, %v12888_v58 }
 0x705   : > { %7072 = vrot.lane.b32.xlu0 %v7028_v40, %s10240_s9  ;;  %7070 = vrot.lane.b32.xlu1 %v7027_v56, %s10240_s9  ;;  %v7142_v40 = vmul.f32 %v14242_v21, %v12897_v44  ;;  %v14254_v56 = vld [vmem:[#allocation3 + $0x461] sm:$0xff] }
 0x707   : > { %v6587_v34 = vpop.permute.xlu0 %6586  ;;  %v6585_v32 = vpop.permute.xlu1 %6584 }
 0x708   : > { %8882 = vst.msk [vmem:[%s12951_s11 + $0x4a0] sm:$0xff] %vm5577_vm3, %v6587_v34  ;;  %8881 = vst.msk [vmem:[%s12951_s11 + $0x498] sm:$0xff] %vm5577_vm3, %v6585_v32 }
 0x709   : > { %7076 = vrot.lane.b32.xlu0 %v7030_v63, %s10240_s9  ;;  %7074 = vrot.lane.b32.xlu1 %v7029_v31, %s10240_s9  ;;  %v7144_v63 = vmul.f32 %v14254_v56, %v12897_v44 }
 0x70b   : > { %v6591_v2 = vpop.permute.xlu0 %6590  ;;  %v6589_v16 = vpop.permute.xlu1 %6588 }
 0x70c   : > { %8884 = vst.msk [vmem:[%s12951_s11 + $0x4b0] sm:$0xff] %vm5577_vm3, %v6591_v2  ;;  %8883 = vst.msk [vmem:[%s12951_s11 + $0x4a8] sm:$0xff] %vm5577_vm3, %v6589_v16  ;;  %v7357_v16 = vmul.f32 %v14156_v26, %v12878_v28  ;;  %v7358_v26 = vmul.f32 %v14172_v10, %v12888_v58  ;;  %v7363_v10 = vmul.f32 %v14198_v17, %v12878_v28 }
 0x70d   : > { %7161 = vrot.lane.b32.xlu0 %v7129_v33, %s10239_s7  ;;  %7078 = vrot.lane.b32.xlu1 %v7031_v41, %s10240_s9  ;;  %v7359_v41 = vmul.f32 %v14170_v60, %v12878_v28 }
 0x70f   : > { %v6595_v50 = vpop.permute.xlu0 %6594  ;;  %v6593_v39 = vpop.permute.xlu1 %6592 }
 0x710   : > { %8886 = vst.msk [vmem:[%s12951_s11 + $0x4c0] sm:$0xff] %vm5577_vm3, %v6595_v50  ;;  %8885 = vst.msk [vmem:[%s12951_s11 + $0x4b8] sm:$0xff] %vm5577_vm3, %v6593_v39  ;;  %v7361_v39 = vmul.f32 %v14184_v18, %v12878_v28  ;;  %v7364_v18 = vmul.f32 %v14214_v38, %v12888_v58  ;;  %v14348_v38 = vld [vmem:[#allocation3 + $0x4c0] sm:$0xff] }
 0x711   : > { %7165 = vrot.lane.b32.xlu0 %v7131_v43, %s10239_s7  ;;  %7163 = vrot.lane.b32.xlu1 %v7130_v4, %s10239_s7  ;;  %v7360_v43 = vmul.f32 %v14186_v3, %v12888_v58 }
 0x713   : > { %v6599_v52 = vpop.permute.xlu0 %6598  ;;  %v6597_v61 = vpop.permute.xlu1 %6596 }
 0x714   : > { %8888 = vst.msk [vmem:[%s12951_s11 + $0x4d0] sm:$0xff] %vm5577_vm3, %v6599_v52  ;;  %8887 = vst.msk [vmem:[%s12951_s11 + $0x4c8] sm:$0xff] %vm5577_vm3, %v6597_v61  ;;  %v7362_v52 = vmul.f32 %v14200_v29, %v12888_v58  ;;  %v7369_v29 = vmul.f32 %v14240_v19, %v12878_v28  ;;  %v14376_v19 = vld [vmem:[#allocation3 + $0x520] sm:$0xff] }
 0x715   : > { %7169 = vrot.lane.b32.xlu0 %v7133_v12, %s10239_s7  ;;  %7167 = vrot.lane.b32.xlu1 %v7132_v5, %s10239_s7  ;;  %v7365_v5 = vmul.f32 %v14212_v24, %v12878_v28  ;;  %v7370_v24 = vmul.f32 %v14254_v56, %v12888_v58  ;;  %v14390_v56 = vld [vmem:[#allocation3 + $0x550] sm:$0xff] }
 0x717   : > { %v6603_v55 = vpop.permute.xlu0 %6602  ;;  %v6601_v46 = vpop.permute.xlu1 %6600 }
 0x718   : > { %8890 = vst.msk [vmem:[%s12951_s11 + $0x4e0] sm:$0xff] %vm5577_vm3, %v6603_v55  ;;  %8889 = vst.msk [vmem:[%s12951_s11 + $0x4d8] sm:$0xff] %vm5577_vm3, %v6601_v46  ;;  %v7367_v46 = vmul.f32 %v14226_v54, %v12878_v28  ;;  %v14362_v54 = vld [vmem:[#allocation3 + $0x4f0] sm:$0xff] }
 0x719   : > { %7173 = vrot.lane.b32.xlu0 %v7135_v53, %s10239_s7  ;;  %7171 = vrot.lane.b32.xlu1 %v7134_v62, %s10239_s7  ;;  %v7366_v53 = vmul.f32 %v14228_v59, %v12888_v58  ;;  %v14364_v59 = vld [vmem:[#allocation3 + $0x4c8] sm:$0xff] }
 0x71b   : > { %v6607_v6 = vpop.permute.xlu0 %6606  ;;  %v6605_v51 = vpop.permute.xlu1 %6604 }
 0x71c   : > { %8892 = vst.msk [vmem:[%s12951_s11 + $0x4f0] sm:$0xff] %vm5577_vm3, %v6607_v6  ;;  %8891 = vst.msk [vmem:[%s12951_s11 + $0x4e8] sm:$0xff] %vm5577_vm3, %v6605_v51  ;;  %v7368_v6 = vmul.f32 %v14242_v21, %v12888_v58  ;;  %v14336_v51 = vld [vmem:[#allocation3 + $0x490] sm:$0xff]  ;;  %v7476_v58 = vmul.f32 %v12905_v35, %v14348_v38  ;;  %v14378_v21 = vld [vmem:[#allocation3 + $0x4f8] sm:$0xff] }
 0x71d   : > { %7177 = vrot.lane.b32.xlu0 %v7137_v11, %s10239_s7  ;;  %7175 = vrot.lane.b32.xlu1 %v7136_v30, %s10239_s7  ;;  %v7474_v28 = vmul.f32 %v12905_v35, %v14336_v51 }
 0x71f   : > { %v6698_v48 = vpop.permute.xlu0 %6697  ;;  %v6609_v20 = vpop.permute.xlu1 %6608 }
 0x720   : > { %8894 = vst.msk [vmem:[%s12951_s11 + $0x500] sm:$0xff] %vm5577_vm3, %v6698_v48  ;;  %8893 = vst.msk [vmem:[%s12951_s11 + $0x4f8] sm:$0xff] %vm5577_vm3, %v6609_v20  ;;  %v14350_v48 = vld [vmem:[#allocation3 + $0x498] sm:$0xff] }
 0x721   : > { %7181 = vrot.lane.b32.xlu0 %v7139_v8, %s10239_s7  ;;  %7179 = vrot.lane.b32.xlu1 %v7138_v27, %s10239_s7  ;;  %v7475_v27 = vmul.f32 %v12917_v23, %v14350_v48 }
 0x723   : > { %v6702_v13 = vpop.permute.xlu0 %6701  ;;  %v6700_v1 = vpop.permute.xlu1 %6699 }
 0x724   : > { %8896 = vst.msk [vmem:[%s12951_s11 + $0x510] sm:$0xff] %vm5577_vm3, %v6702_v13  ;;  %8895 = vst.msk [vmem:[%s12951_s11 + $0x508] sm:$0xff] %vm5577_vm3, %v6700_v1 }
 0x725   : > { %7185 = vrot.lane.b32.xlu0 %v7141_v36, %s10239_s7  ;;  %7183 = vrot.lane.b32.xlu1 %v7140_v45, %s10239_s7  ;;  %v7478_v36 = vmul.f32 %v12905_v35, %v14362_v54  ;;  %v7477_v45 = vmul.f32 %v12917_v23, %v14364_v59 }
 0x727   : > { %v6706_v15 = vpop.permute.xlu0 %6705  ;;  %v6704_v57 = vpop.permute.xlu1 %6703 }
 0x728   : > { %8898 = vst.msk [vmem:[%s12951_s11 + $0x520] sm:$0xff] %vm5577_vm3, %v6706_v15  ;;  %8897 = vst.msk [vmem:[%s12951_s11 + $0x518] sm:$0xff] %vm5577_vm3, %v6704_v57 }
 0x729   : > { %7189 = vrot.lane.b32.xlu0 %v7143_v47, %s10239_s7  ;;  %7187 = vrot.lane.b32.xlu1 %v7142_v40, %s10239_s7  ;;  %v7480_v47 = vmul.f32 %v12905_v35, %v14376_v19  ;;  %v7479_v40 = vmul.f32 %v12917_v23, %v14378_v21 }
 0x72b   : > { %v6710_v34 = vpop.permute.xlu0 %6709  ;;  %v6708_v32 = vpop.permute.xlu1 %6707 }
 0x72c   : > { %8900 = vst.msk [vmem:[%s12951_s11 + $0x530] sm:$0xff] %vm5577_vm3, %v6710_v34  ;;  %8899 = vst.msk [vmem:[%s12951_s11 + $0x528] sm:$0xff] %vm5577_vm3, %v6708_v32  ;;  %v14392_v34 = vld [vmem:[#allocation3 + $0x528] sm:$0xff] }
 0x72d   : > { %7387 = vrot.lane.b32.xlu0 %v7355_v22, %s10238_s21  ;;  %7191 = vrot.lane.b32.xlu1 %v7144_v63, %s10239_s7  ;;  %v7482_v63 = vmul.f32 %v12905_v35, %v14390_v56 }
 0x72f   : > { %v6714_v31 = vpop.permute.xlu0 %6713  ;;  %v6712_v2 = vpop.permute.xlu1 %6711 }
 0x730   : > { %8902 = vst.msk [vmem:[%s12951_s11 + $0x540] sm:$0xff] %vm5577_vm3, %v6714_v31  ;;  %8901 = vst.msk [vmem:[%s12951_s11 + $0x538] sm:$0xff] %vm5577_vm3, %v6712_v2  ;;  %v7481_v31 = vmul.f32 %v12917_v23, %v14392_v34  ;;  %v14404_v2 = vld [vmem:[#allocation3 + $0x580] sm:$0xff] }
 0x731   : > { %7391 = vrot.lane.b32.xlu0 %v7357_v16, %s10238_s21  ;;  %7389 = vrot.lane.b32.xlu1 %v7356_v7, %s10238_s21  ;;  %v14406_v16 = vld [vmem:[#allocation3 + $0x558] sm:$0xff] }
 0x733   : > { %v6718_v44 = vpop.permute.xlu0 %6717  ;;  %v6716_v33 = vpop.permute.xlu1 %6715 }
 0x734   : > { %8904 = vst.msk [vmem:[%s12951_s11 + $0x550] sm:$0xff] %vm5577_vm3, %v6718_v44  ;;  %8903 = vst.msk [vmem:[%s12951_s11 + $0x548] sm:$0xff] %vm5577_vm3, %v6716_v33  ;;  %v7484_v33 = vmul.f32 %v12905_v35, %v14404_v2 }
 0x735   : > { %7395 = vrot.lane.b32.xlu0 %v7359_v41, %s10238_s21  ;;  %7393 = vrot.lane.b32.xlu1 %v7358_v26, %s10238_s21  ;;  %v7483_v41 = vmul.f32 %v12917_v23, %v14406_v16  ;;  %v14418_v26 = vld [vmem:[#allocation3 + $0x5b0] sm:$0xff] }
 0x737   : > { %v6722_v9 = vpop.permute.xlu0 %6721  ;;  %v6720_v50 = vpop.permute.xlu1 %6719 }
 0x738   : > { %8906 = vst.msk [vmem:[%s12951_s11 + $0x560] sm:$0xff] %vm5577_vm3, %v6722_v9  ;;  %8905 = vst.msk [vmem:[%s12951_s11 + $0x558] sm:$0xff] %vm5577_vm3, %v6720_v50  ;;  %v14420_v9 = vld [vmem:[#allocation3 + $0x588] sm:$0xff] }
 0x739   : > { %7399 = vrot.lane.b32.xlu0 %v7361_v39, %s10238_s21  ;;  %7397 = vrot.lane.b32.xlu1 %v7360_v43, %s10238_s21  ;;  %v7486_v43 = vmul.f32 %v12905_v35, %v14418_v26 }
 0x73b   : > { %v6726_v4 = vpop.permute.xlu0 %6725  ;;  %v6724_v60 = vpop.permute.xlu1 %6723 }
 0x73c   : > { %8908 = vst.msk [vmem:[%s12951_s11 + $0x570] sm:$0xff] %vm5577_vm3, %v6726_v4  ;;  %8907 = vst.msk [vmem:[%s12951_s11 + $0x568] sm:$0xff] %vm5577_vm3, %v6724_v60  ;;  %v7485_v4 = vmul.f32 %v12917_v23, %v14420_v9  ;;  %v14432_v60 = vld [vmem:[#allocation3 + $0x5e0] sm:$0xff] }
 0x73d   : > { %7403 = vrot.lane.b32.xlu0 %v7363_v10, %s10238_s21  ;;  %7401 = vrot.lane.b32.xlu1 %v7362_v52, %s10238_s21  ;;  %v14434_v10 = vld [vmem:[#allocation3 + $0x5b8] sm:$0xff] }
 0x73f   : > { %v6930_v61 = vpop.permute.xlu0 %6929  ;;  %v6728_v12 = vpop.permute.xlu1 %6727 }
 0x740   : > { %8926 = vst.msk [vmem:[%s12951_s11 + $0x600] sm:$0xff] %vm5577_vm3, %v6930_v61  ;;  %8909 = vst.msk [vmem:[%s12951_s11 + $0x578] sm:$0xff] %vm5577_vm3, %v6728_v12  ;;  %v7488_v12 = vmul.f32 %v12905_v35, %v14432_v60 }
 0x741   : > { %7407 = vrot.lane.b32.xlu0 %v7365_v5, %s10238_s21  ;;  %7405 = vrot.lane.b32.xlu1 %v7364_v18, %s10238_s21  ;;  %v7487_v5 = vmul.f32 %v12917_v23, %v14434_v10  ;;  %v14446_v18 = vld [vmem:[#allocation3 + $0x49b] sm:$0xff] }
 0x742   : > { %v7593_v35 = vmul.f32 %v12915_v0, %v14446_v18 }
 0x743   : > { %v6934_v3 = vpop.permute.xlu0 %6933  ;;  %v6932_v55 = vpop.permute.xlu1 %6931 }
 0x744   : > { %8928 = vst.msk [vmem:[%s12951_s11 + $0x610] sm:$0xff] %vm5577_vm3, %v6934_v3  ;;  %8927 = vst.msk [vmem:[%s12951_s11 + $0x608] sm:$0xff] %vm5577_vm3, %v6932_v55  ;;  %v14448_v3 = vld [vmem:[#allocation3 + $0x5e8] sm:$0xff] }
 0x745   : > { %7411 = vrot.lane.b32.xlu0 %v7367_v46, %s10238_s21  ;;  %7409 = vrot.lane.b32.xlu1 %v7366_v53, %s10238_s21  ;;  %v7489_v53 = vmul.f32 %v12917_v23, %v14448_v3 }
 0x747   : > { %v6938_v62 = vpop.permute.xlu0 %6937  ;;  %v6936_v17 = vpop.permute.xlu1 %6935 }
 0x748   : > { %8930 = vst.msk [vmem:[%s12951_s11 + $0x620] sm:$0xff] %vm5577_vm3, %v6938_v62  ;;  %8929 = vst.msk [vmem:[%s12951_s11 + $0x618] sm:$0xff] %vm5577_vm3, %v6936_v17  ;;  %v14460_v62 = vld [vmem:[#allocation3 + $0x4cb] sm:$0xff]  ;;  %v14462_v17 = vld [vmem:[#allocation3 + $0x4a3] sm:$0xff] }
 0x749   : > { %7415 = vrot.lane.b32.xlu0 %v7369_v29, %s10238_s21  ;;  %7413 = vrot.lane.b32.xlu1 %v7368_v6, %s10238_s21  ;;  %v7595_v23 = vmul.f32 %v12915_v0, %v14460_v62 }
 0x74b   : > { %v6942_v11 = vpop.permute.xlu0 %6941  ;;  %v6940_v30 = vpop.permute.xlu1 %6939 }
 0x74c   : > { %8932 = vst.msk [vmem:[%s12951_s11 + $0x630] sm:$0xff] %vm5577_vm3, %v6942_v11  ;;  %8931 = vst.msk [vmem:[%s12951_s11 + $0x628] sm:$0xff] %vm5577_vm3, %v6940_v30  ;;  %v7594_v11 = vmul.f32 %v12926_v25, %v14462_v17  ;;  %v14474_v30 = vld [vmem:[#allocation3 + $0x4fb] sm:$0xff] }
 0x74d   : > { %7506 = vrot.lane.b32.xlu0 %v7474_v28, %s10241_s10  ;;  %7417 = vrot.lane.b32.xlu1 %v7370_v24, %s10238_s21  ;;  %v14476_v28 = vld [vmem:[#allocation3 + $0x4d3] sm:$0xff] }
 0x74f   : > { %v6946_v20 = vpop.permute.xlu0 %6945  ;;  %v6944_v8 = vpop.permute.xlu1 %6943 }
 0x750   : > { %8934 = vst.msk [vmem:[%s12951_s11 + $0x640] sm:$0xff] %vm5577_vm3, %v6946_v20  ;;  %8933 = vst.msk [vmem:[%s12951_s11 + $0x638] sm:$0xff] %vm5577_vm3, %v6944_v8  ;;  %v7597_v8 = vmul.f32 %v12915_v0, %v14474_v30 }
 0x751   : > { %7510 = vrot.lane.b32.xlu0 %v7476_v58, %s10241_s10  ;;  %7508 = vrot.lane.b32.xlu1 %v7475_v27, %s10241_s10  ;;  %v7596_v58 = vmul.f32 %v12926_v25, %v14476_v28  ;;  %v14488_v27 = vld [vmem:[#allocation3 + $0x52b] sm:$0xff] }
 0x753   : > { %v6950_v13 = vpop.permute.xlu0 %6949  ;;  %v6948_v1 = vpop.permute.xlu1 %6947 }
 0x754   : > { %8936 = vst.msk [vmem:[%s12951_s11 + $0x650] sm:$0xff] %vm5577_vm3, %v6950_v13  ;;  %8935 = vst.msk [vmem:[%s12951_s11 + $0x648] sm:$0xff] %vm5577_vm3, %v6948_v1  ;;  %v14490_v13 = vld [vmem:[#allocation3 + $0x503] sm:$0xff] }
 0x755   : > { %7514 = vrot.lane.b32.xlu0 %v7478_v36, %s10241_s10  ;;  %7512 = vrot.lane.b32.xlu1 %v7477_v45, %s10241_s10  ;;  %v7599_v45 = vmul.f32 %v12915_v0, %v14488_v27 }
 0x757   : > { %v6954_v15 = vpop.permute.xlu0 %6953  ;;  %v6952_v57 = vpop.permute.xlu1 %6951 }
 0x758   : > { %8938 = vst.msk [vmem:[%s12951_s11 + $0x660] sm:$0xff] %vm5577_vm3, %v6954_v15  ;;  %8937 = vst.msk [vmem:[%s12951_s11 + $0x658] sm:$0xff] %vm5577_vm3, %v6952_v57  ;;  %v7598_v15 = vmul.f32 %v12926_v25, %v14490_v13  ;;  %v14502_v57 = vld [vmem:[#allocation3 + $0x55b] sm:$0xff] }
 0x759   : > { %7518 = vrot.lane.b32.xlu0 %v7480_v47, %s10241_s10  ;;  %7516 = vrot.lane.b32.xlu1 %v7479_v40, %s10241_s10  ;;  %v14504_v47 = vld [vmem:[#allocation3 + $0x533] sm:$0xff] }
 0x75b   : > { %v6958_v32 = vpop.permute.xlu0 %6957  ;;  %v6956_v22 = vpop.permute.xlu1 %6955 }
 0x75c   : > { %8940 = vst.msk [vmem:[%s12951_s11 + $0x670] sm:$0xff] %vm5577_vm3, %v6958_v32  ;;  %8939 = vst.msk [vmem:[%s12951_s11 + $0x668] sm:$0xff] %vm5577_vm3, %v6956_v22  ;;  %v7601_v22 = vmul.f32 %v12915_v0, %v14502_v57 }
 0x75d   : > { %7522 = vrot.lane.b32.xlu0 %v7482_v63, %s10241_s10  ;;  %7520 = vrot.lane.b32.xlu1 %v7481_v31, %s10241_s10  ;;  %v7600_v63 = vmul.f32 %v12926_v25, %v14504_v47  ;;  %v14516_v31 = vld [vmem:[#allocation3 + $0x58b] sm:$0xff] }
 0x75f   : > { %v7049_v7 = vpop.permute.xlu0 %7048  ;;  %v6960_v44 = vpop.permute.xlu1 %6959 }
 0x760   : > { %8942 = vst.msk [vmem:[%s12951_s11 + $0x680] sm:$0xff] %vm5577_vm3, %v7049_v7  ;;  %8941 = vst.msk [vmem:[%s12951_s11 + $0x678] sm:$0xff] %vm5577_vm3, %v6960_v44  ;;  %v14518_v7 = vld [vmem:[#allocation3 + $0x563] sm:$0xff] }
 0x761   : > { %7526 = vrot.lane.b32.xlu0 %v7484_v33, %s10241_s10  ;;  %7524 = vrot.lane.b32.xlu1 %v7483_v41, %s10241_s10  ;;  %v7603_v41 = vmul.f32 %v12915_v0, %v14516_v31 }
 0x763   : > { %v7053_v50 = vpop.permute.xlu0 %7052  ;;  %v7051_v39 = vpop.permute.xlu1 %7050 }
 0x764   : > { %8944 = vst.msk [vmem:[%s12951_s11 + $0x690] sm:$0xff] %vm5577_vm3, %v7053_v50  ;;  %8943 = vst.msk [vmem:[%s12951_s11 + $0x688] sm:$0xff] %vm5577_vm3, %v7051_v39  ;;  %v7602_v50 = vmul.f32 %v12926_v25, %v14518_v7  ;;  %v14530_v39 = vld [vmem:[#allocation3 + $0x5bb] sm:$0xff] }
 0x765   : > { %7530 = vrot.lane.b32.xlu0 %v7486_v43, %s10241_s10  ;;  %7528 = vrot.lane.b32.xlu1 %v7485_v4, %s10241_s10  ;;  %v14532_v43 = vld [vmem:[#allocation3 + $0x593] sm:$0xff] }
 0x767   : > { %v7057_v52 = vpop.permute.xlu0 %7056  ;;  %v7055_v61 = vpop.permute.xlu1 %7054 }
 0x768   : > { %8946 = vst.msk [vmem:[%s12951_s11 + $0x6a0] sm:$0xff] %vm5577_vm3, %v7057_v52  ;;  %8945 = vst.msk [vmem:[%s12951_s11 + $0x698] sm:$0xff] %vm5577_vm3, %v7055_v61  ;;  %v7605_v61 = vmul.f32 %v12915_v0, %v14530_v39 }
 0x769   : > { %7534 = vrot.lane.b32.xlu0 %v7488_v12, %s10241_s10  ;;  %7532 = vrot.lane.b32.xlu1 %v7487_v5, %s10241_s10  ;;  %v7604_v12 = vmul.f32 %v12926_v25, %v14532_v43  ;;  %v14544_v5 = vld [vmem:[#allocation3 + $0x5eb] sm:$0xff] }
 0x76b   : > { %v7061_v55 = vpop.permute.xlu0 %7060  ;;  %v7059_v46 = vpop.permute.xlu1 %7058 }
 0x76c   : > { %8948 = vst.msk [vmem:[%s12951_s11 + $0x6b0] sm:$0xff] %vm5577_vm3, %v7061_v55  ;;  %8947 = vst.msk [vmem:[%s12951_s11 + $0x6a8] sm:$0xff] %vm5577_vm3, %v7059_v46  ;;  %v14546_v55 = vld [vmem:[#allocation3 + $0x5c3] sm:$0xff] }
 0x76d   : > { %7625 = vrot.lane.b32.xlu0 %v7593_v35, %s10242_s28  ;;  %7536 = vrot.lane.b32.xlu1 %v7489_v53, %s10241_s10  ;;  %v7607_v53 = vmul.f32 %v12915_v0, %v14544_v5 }
 0x76f   : > { %v7065_v29 = vpop.permute.xlu0 %7064  ;;  %v7063_v6 = vpop.permute.xlu1 %7062 }
 0x770   : > { %8950 = vst.msk [vmem:[%s12951_s11 + $0x6c0] sm:$0xff] %vm5577_vm3, %v7065_v29  ;;  %8949 = vst.msk [vmem:[%s12951_s11 + $0x6b8] sm:$0xff] %vm5577_vm3, %v7063_v6  ;;  %v7606_v29 = vmul.f32 %v12926_v25, %v14546_v55  ;;  %v14558_v6 = vld [vmem:[#allocation3 + $0x5f3] sm:$0xff] }
 0x771   : > { %7629 = vrot.lane.b32.xlu0 %v7595_v23, %s10242_s28  ;;  %7627 = vrot.lane.b32.xlu1 %v7594_v11, %s10242_s28 }
 0x773   : > { %v7069_v24 = vpop.permute.xlu0 %7068  ;;  %v7067_v20 = vpop.permute.xlu1 %7066 }
 0x774   : > { %8952 = vst.msk [vmem:[%s12951_s11 + $0x6d0] sm:$0xff] %vm5577_vm3, %v7069_v24  ;;  %8951 = vst.msk [vmem:[%s12951_s11 + $0x6c8] sm:$0xff] %vm5577_vm3, %v7067_v20  ;;  %v7825_v24 = vmul.f32 %v12924_v42, %v14446_v18  ;;  %v7608_v20 = vmul.f32 %v12926_v25, %v14558_v6  ;;  %v7826_v18 = vmul.f32 %v12937_v49, %v14462_v17 }
 0x775   : > { %7633 = vrot.lane.b32.xlu0 %v7597_v8, %s10242_s28  ;;  %7631 = vrot.lane.b32.xlu1 %v7596_v58, %s10242_s28 }
 0x777   : > { %v7073_v1 = vpop.permute.xlu0 %7072  ;;  %v7071_v36 = vpop.permute.xlu1 %7070 }
 0x778   : > { %8954 = vst.msk [vmem:[%s12951_s11 + $0x6e0] sm:$0xff] %vm5577_vm3, %v7073_v1  ;;  %8953 = vst.msk [vmem:[%s12951_s11 + $0x6d8] sm:$0xff] %vm5577_vm3, %v7071_v36  ;;  %v7827_v1 = vmul.f32 %v12924_v42, %v14460_v62  ;;  %v7828_v62 = vmul.f32 %v12937_v49, %v14476_v28 }
 0x779   : > { %7637 = vrot.lane.b32.xlu0 %v7599_v45, %s10242_s28  ;;  %7635 = vrot.lane.b32.xlu1 %v7598_v15, %s10242_s28  ;;  %v7829_v15 = vmul.f32 %v12924_v42, %v14474_v30  ;;  %v7830_v30 = vmul.f32 %v12937_v49, %v14490_v13 }
 0x77b   : > { %v7077_v40 = vpop.permute.xlu0 %7076  ;;  %v7075_v32 = vpop.permute.xlu1 %7074 }
 0x77c   : > { %8956 = vst.msk [vmem:[%s12951_s11 + $0x6f0] sm:$0xff] %vm5577_vm3, %v7077_v40  ;;  %8955 = vst.msk [vmem:[%s12951_s11 + $0x6e8] sm:$0xff] %vm5577_vm3, %v7075_v32  ;;  %v7831_v32 = vmul.f32 %v12924_v42, %v14488_v27  ;;  %v7832_v27 = vmul.f32 %v12937_v49, %v14504_v47 }
 0x77d   : > { %7641 = vrot.lane.b32.xlu0 %v7601_v22, %s10242_s28  ;;  %7639 = vrot.lane.b32.xlu1 %v7600_v63, %s10242_s28  ;;  %v7833_v63 = vmul.f32 %v12924_v42, %v14502_v57  ;;  %v7834_v57 = vmul.f32 %v12937_v49, %v14518_v7 }
 0x77f   : > { %v7162_v44 = vpop.permute.xlu0 %7161  ;;  %v7079_v33 = vpop.permute.xlu1 %7078 }
 0x780   : > { %8958 = vst.msk [vmem:[%s12951_s11 + $0x700] sm:$0xff] %vm5577_vm3, %v7162_v44  ;;  %8957 = vst.msk [vmem:[%s12951_s11 + $0x6f8] sm:$0xff] %vm5577_vm3, %v7079_v33  ;;  %v7835_v33 = vmul.f32 %v12924_v42, %v14516_v31  ;;  %v7836_v31 = vmul.f32 %v12937_v49, %v14532_v43 }
 0x781   : > { %7645 = vrot.lane.b32.xlu0 %v7603_v41, %s10242_s28  ;;  %7643 = vrot.lane.b32.xlu1 %v7602_v50, %s10242_s28  ;;  %v7837_v50 = vmul.f32 %v12924_v42, %v14530_v39  ;;  %v7838_v39 = vmul.f32 %v12937_v49, %v14546_v55 }
 0x783   : > { %v7166_v4 = vpop.permute.xlu0 %7165  ;;  %v7164_v52 = vpop.permute.xlu1 %7163 }
 0x784   : > { %8960 = vst.msk [vmem:[%s12951_s11 + $0x710] sm:$0xff] %vm5577_vm3, %v7166_v4  ;;  %8959 = vst.msk [vmem:[%s12951_s11 + $0x708] sm:$0xff] %vm5577_vm3, %v7164_v52  ;;  %v7839_v52 = vmul.f32 %v12924_v42, %v14544_v5  ;;  %v7840_v5 = vmul.f32 %v12937_v49, %v14558_v6  ;;  %v7948_v6 = vmul.f32 %v12935_v37, %v14362_v54 }
 0x785   : > { %7649 = vrot.lane.b32.xlu0 %v7605_v61, %s10242_s28  ;;  %7647 = vrot.lane.b32.xlu1 %v7604_v12, %s10242_s28  ;;  %v7944_v12 = vmul.f32 %v12935_v37, %v14336_v51  ;;  %v7945_v51 = vmul.f32 %v12945_v14, %v14350_v48  ;;  %v7949_v54 = vmul.f32 %v12945_v14, %v14378_v21 }
 0x787   : > { %v7170_v46 = vpop.permute.xlu0 %7169  ;;  %v7168_v35 = vpop.permute.xlu1 %7167 }
 0x788   : > { %8962 = vst.msk [vmem:[%s12951_s11 + $0x720] sm:$0xff] %vm5577_vm3, %v7170_v46  ;;  %8961 = vst.msk [vmem:[%s12951_s11 + $0x718] sm:$0xff] %vm5577_vm3, %v7168_v35  ;;  %v7946_v35 = vmul.f32 %v12935_v37, %v14348_v38  ;;  %v7947_v38 = vmul.f32 %v12945_v14, %v14364_v59 }
 0x789   : > { %7653 = vrot.lane.b32.xlu0 %v7607_v53, %s10242_s28  ;;  %7651 = vrot.lane.b32.xlu1 %v7606_v29, %s10242_s28 }
 0x78b   : > { %v7174_v23 = vpop.permute.xlu0 %7173  ;;  %v7172_v11 = vpop.permute.xlu1 %7171 }
 0x78c   : > { %8964 = vst.msk [vmem:[%s12951_s11 + $0x730] sm:$0xff] %vm5577_vm3, %v7174_v23  ;;  %8963 = vst.msk [vmem:[%s12951_s11 + $0x728] sm:$0xff] %vm5577_vm3, %v7172_v11  ;;  %v7950_v11 = vmul.f32 %v12935_v37, %v14376_v19  ;;  %v7951_v19 = vmul.f32 %v12945_v14, %v14392_v34 }
 0x78d   : > { %7857 = vrot.lane.b32.xlu0 %v7825_v24, %s10222_s8  ;;  %7655 = vrot.lane.b32.xlu1 %v7608_v20, %s10242_s28  ;;  %v7952_v20 = vmul.f32 %v12935_v37, %v14390_v56  ;;  %v7953_v56 = vmul.f32 %v12945_v14, %v14406_v16 }
 0x78f   : > { %v7178_v8 = vpop.permute.xlu0 %7177  ;;  %v7176_v58 = vpop.permute.xlu1 %7175 }
 0x790   : > { %8966 = vst.msk [vmem:[%s12951_s11 + $0x740] sm:$0xff] %vm5577_vm3, %v7178_v8  ;;  %8965 = vst.msk [vmem:[%s12951_s11 + $0x738] sm:$0xff] %vm5577_vm3, %v7176_v58  ;;  %v7954_v58 = vmul.f32 %v12935_v37, %v14404_v2  ;;  %v7955_v2 = vmul.f32 %v12945_v14, %v14420_v9  ;;  %v14720_v9 = vld [vmem:[#allocation3 + $0x485] sm:$0xff] }
 0x791   : > { %7861 = vrot.lane.b32.xlu0 %v7827_v1, %s10222_s8  ;;  %7859 = vrot.lane.b32.xlu1 %v7826_v18, %s10222_s8  ;;  %v7956_v18 = vmul.f32 %v12935_v37, %v14418_v26  ;;  %v7957_v26 = vmul.f32 %v12945_v14, %v14434_v10  ;;  %v14732_v10 = vld [vmem:[#allocation3 + $0x4b5] sm:$0xff] }
 0x793   : > { %v7182_v36 = vpop.permute.xlu0 %7181  ;;  %v7180_v45 = vpop.permute.xlu1 %7179 }
 0x794   : > { %8968 = vst.msk [vmem:[%s12951_s11 + $0x750] sm:$0xff] %vm5577_vm3, %v7182_v36  ;;  %8967 = vst.msk [vmem:[%s12951_s11 + $0x748] sm:$0xff] %vm5577_vm3, %v7180_v45  ;;  %v7958_v45 = vmul.f32 %v12935_v37, %v14432_v60  ;;  %v8057_v37 = vmul.f32 %v14720_v9, %v12924_v42  ;;  %v7959_v60 = vmul.f32 %v12945_v14, %v14448_v3  ;;  %v14746_v3 = vld [vmem:[#allocation3 + $0x4e5] sm:$0xff] }
 0x795   : > { %7865 = vrot.lane.b32.xlu0 %v7829_v15, %s10222_s8  ;;  %7863 = vrot.lane.b32.xlu1 %v7828_v62, %s10222_s8 }
 0x797   : > { %v7186_v17 = vpop.permute.xlu0 %7185  ;;  %v7184_v40 = vpop.permute.xlu1 %7183 }
 0x798   : > { %8970 = vst.msk [vmem:[%s12951_s11 + $0x760] sm:$0xff] %vm5577_vm3, %v7186_v17  ;;  %8969 = vst.msk [vmem:[%s12951_s11 + $0x758] sm:$0xff] %vm5577_vm3, %v7184_v40  ;;  %v14734_v17 = vld [vmem:[#allocation3 + $0x48d] sm:$0xff] }
 0x799   : > { %7869 = vrot.lane.b32.xlu0 %v7831_v32, %s10222_s8  ;;  %7867 = vrot.lane.b32.xlu1 %v7830_v30, %s10222_s8  ;;  %v8059_v30 = vmul.f32 %v14732_v10, %v12924_v42  ;;  %v8058_v14 = vmul.f32 %v14734_v17, %v12937_v49 }
 0x79b   : > { %v7190_v28 = vpop.permute.xlu0 %7189  ;;  %v7188_v22 = vpop.permute.xlu1 %7187 }
 0x79c   : > { %8972 = vst.msk [vmem:[%s12951_s11 + $0x770] sm:$0xff] %vm5577_vm3, %v7190_v28  ;;  %8971 = vst.msk [vmem:[%s12951_s11 + $0x768] sm:$0xff] %vm5577_vm3, %v7188_v22  ;;  %v14748_v28 = vld [vmem:[#allocation3 + $0x4bd] sm:$0xff] }
 0x79d   : > { %7873 = vrot.lane.b32.xlu0 %v7833_v63, %s10222_s8  ;;  %7871 = vrot.lane.b32.xlu1 %v7832_v27, %s10222_s8  ;;  %v8061_v27 = vmul.f32 %v14746_v3, %v12924_v42 }
 0x79f   : > { %v7388_v13 = vpop.permute.xlu0 %7387  ;;  %v7192_v44 = vpop.permute.xlu1 %7191 }
 0x7a0   : > { %8990 = vst.msk [vmem:[%s12951_s11 + $0x800] sm:$0xff] %vm5577_vm3, %v7388_v13  ;;  %8973 = vst.msk [vmem:[%s12951_s11 + $0x778] sm:$0xff] %vm5577_vm3, %v7192_v44  ;;  %v8060_v13 = vmul.f32 %v14748_v28, %v12937_v49  ;;  %v14760_v44 = vld [vmem:[#allocation3 + $0x515] sm:$0xff] }
 0x7a1   : > { %7877 = vrot.lane.b32.xlu0 %v7835_v33, %s10222_s8  ;;  %7875 = vrot.lane.b32.xlu1 %v7834_v57, %s10222_s8  ;;  %v14762_v33 = vld [vmem:[#allocation3 + $0x4ed] sm:$0xff] }
 0x7a3   : > { %v7392_v47 = vpop.permute.xlu0 %7391  ;;  %v7390_v41 = vpop.permute.xlu1 %7389 }
 0x7a4   : > { %8992 = vst.msk [vmem:[%s12951_s11 + $0x810] sm:$0xff] %vm5577_vm3, %v7392_v47  ;;  %8991 = vst.msk [vmem:[%s12951_s11 + $0x808] sm:$0xff] %vm5577_vm3, %v7390_v41  ;;  %v8063_v41 = vmul.f32 %v14760_v44, %v12924_v42 }
 0x7a5   : > { %7881 = vrot.lane.b32.xlu0 %v7837_v50, %s10222_s8  ;;  %7879 = vrot.lane.b32.xlu1 %v7836_v31, %s10222_s8  ;;  %v8062_v50 = vmul.f32 %v14762_v33, %v12937_v49  ;;  %v14774_v31 = vld [vmem:[#allocation3 + $0x545] sm:$0xff] }
 0x7a7   : > { %v7396_v7 = vpop.permute.xlu0 %7395  ;;  %v7394_v4 = vpop.permute.xlu1 %7393 }
 0x7a8   : > { %8994 = vst.msk [vmem:[%s12951_s11 + $0x820] sm:$0xff] %vm5577_vm3, %v7396_v7  ;;  %8993 = vst.msk [vmem:[%s12951_s11 + $0x818] sm:$0xff] %vm5577_vm3, %v7394_v4  ;;  %v14776_v7 = vld [vmem:[#allocation3 + $0x51d] sm:$0xff] }
 0x7a9   : > { %7885 = vrot.lane.b32.xlu0 %v7839_v52, %s10222_s8  ;;  %7883 = vrot.lane.b32.xlu1 %v7838_v39, %s10222_s8  ;;  %v8065_v39 = vmul.f32 %v14774_v31, %v12924_v42 }
 0x7ab   : > { %v7400_v43 = vpop.permute.xlu0 %7399  ;;  %v7398_v61 = vpop.permute.xlu1 %7397 }
 0x7ac   : > { %8996 = vst.msk [vmem:[%s12951_s11 + $0x830] sm:$0xff] %vm5577_vm3, %v7400_v43  ;;  %8995 = vst.msk [vmem:[%s12951_s11 + $0x828] sm:$0xff] %vm5577_vm3, %v7398_v61  ;;  %v8064_v43 = vmul.f32 %v14776_v7, %v12937_v49  ;;  %v14788_v61 = vld [vmem:[#allocation3 + $0x575] sm:$0xff] }
 0x7ad   : > { %7976 = vrot.lane.b32.xlu0 %v7944_v12, %s10218_s22  ;;  %7887 = vrot.lane.b32.xlu1 %v7840_v5, %s10222_s8  ;;  %v14790_v12 = vld [vmem:[#allocation3 + $0x54d] sm:$0xff] }
 0x7af   : > { %v7404_v55 = vpop.permute.xlu0 %7403  ;;  %v7402_v46 = vpop.permute.xlu1 %7401 }
 0x7b0   : > { %8998 = vst.msk [vmem:[%s12951_s11 + $0x840] sm:$0xff] %vm5577_vm3, %v7404_v55  ;;  %8997 = vst.msk [vmem:[%s12951_s11 + $0x838] sm:$0xff] %vm5577_vm3, %v7402_v46  ;;  %v8067_v46 = vmul.f32 %v14788_v61, %v12924_v42 }
 0x7b1   : > { %7980 = vrot.lane.b32.xlu0 %v7946_v35, %s10218_s22  ;;  %7978 = vrot.lane.b32.xlu1 %v7945_v51, %s10218_s22  ;;  %v8066_v35 = vmul.f32 %v14790_v12, %v12937_v49  ;;  %v14802_v51 = vld [vmem:[#allocation3 + $0x5a5] sm:$0xff] }
 0x7b3   : > { %v7408_v53 = vpop.permute.xlu0 %7407  ;;  %v7406_v29 = vpop.permute.xlu1 %7405 }
 0x7b4   : > { %9000 = vst.msk [vmem:[%s12951_s11 + $0x850] sm:$0xff] %vm5577_vm3, %v7408_v53  ;;  %8999 = vst.msk [vmem:[%s12951_s11 + $0x848] sm:$0xff] %vm5577_vm3, %v7406_v29  ;;  %v14804_v53 = vld [vmem:[#allocation3 + $0x57d] sm:$0xff] }
 0x7b5   : > { %7984 = vrot.lane.b32.xlu0 %v7948_v6, %s10218_s22  ;;  %7982 = vrot.lane.b32.xlu1 %v7947_v38, %s10218_s22  ;;  %v8069_v38 = vmul.f32 %v14802_v51, %v12924_v42 }
 0x7b7   : > { %v7412_v48 = vpop.permute.xlu0 %7411  ;;  %v7410_v23 = vpop.permute.xlu1 %7409 }
 0x7b8   : > { %9002 = vst.msk [vmem:[%s12951_s11 + $0x860] sm:$0xff] %vm5577_vm3, %v7412_v48  ;;  %9001 = vst.msk [vmem:[%s12951_s11 + $0x858] sm:$0xff] %vm5577_vm3, %v7410_v23  ;;  %v8068_v48 = vmul.f32 %v14804_v53, %v12937_v49  ;;  %v14816_v23 = vld [vmem:[#allocation3 + $0x5d5] sm:$0xff] }
 0x7b9   : > { %7988 = vrot.lane.b32.xlu0 %v7950_v11, %s10218_s22  ;;  %7986 = vrot.lane.b32.xlu1 %v7949_v54, %s10218_s22  ;;  %v14818_v11 = vld [vmem:[#allocation3 + $0x5ad] sm:$0xff] }
 0x7bb   : > { %v7416_v59 = vpop.permute.xlu0 %7415  ;;  %v7414_v24 = vpop.permute.xlu1 %7413 }
 0x7bc   : > { %9004 = vst.msk [vmem:[%s12951_s11 + $0x870] sm:$0xff] %vm5577_vm3, %v7416_v59  ;;  %9003 = vst.msk [vmem:[%s12951_s11 + $0x868] sm:$0xff] %vm5577_vm3, %v7414_v24  ;;  %v8071_v24 = vmul.f32 %v14816_v23, %v12924_v42  ;;  %v8283_v42 = vmul.f32 %v14720_v9, %v12915_v0  ;;  %v8289_v9 = vmul.f32 %v14760_v44, %v12915_v0 }
 0x7bd   : > { %7992 = vrot.lane.b32.xlu0 %v7952_v20, %s10218_s22  ;;  %7990 = vrot.lane.b32.xlu1 %v7951_v19, %s10218_s22  ;;  %v8070_v20 = vmul.f32 %v14818_v11, %v12937_v49  ;;  %v14830_v19 = vld [vmem:[#allocation3 + $0x5dd] sm:$0xff]  ;;  %v8296_v44 = vmul.f32 %v14818_v11, %v12926_v25 }
 0x7bf   : > { %v7507_v21 = vpop.permute.xlu0 %7506  ;;  %v7418_v8 = vpop.permute.xlu1 %7417 }
 0x7c0   : > { %9006 = vst.msk [vmem:[%s12951_s11 + $0x880] sm:$0xff] %vm5577_vm3, %v7507_v21  ;;  %9005 = vst.msk [vmem:[%s12951_s11 + $0x878] sm:$0xff] %vm5577_vm3, %v7418_v8 }
 0x7c1   : > { %7996 = vrot.lane.b32.xlu0 %v7954_v58, %s10218_s22  ;;  %7994 = vrot.lane.b32.xlu1 %v7953_v56, %s10218_s22  ;;  %v8072_v58 = vmul.f32 %v14830_v19, %v12937_v49 }
 0x7c3   : > { %v7511_v34 = vpop.permute.xlu0 %7510  ;;  %v7509_v1 = vpop.permute.xlu1 %7508 }
 0x7c4   : > { %9008 = vst.msk [vmem:[%s12951_s11 + $0x890] sm:$0xff] %vm5577_vm3, %v7511_v34  ;;  %9007 = vst.msk [vmem:[%s12951_s11 + $0x888] sm:$0xff] %vm5577_vm3, %v7509_v1  ;;  %v8285_v1 = vmul.f32 %v14732_v10, %v12915_v0  ;;  %v8290_v10 = vmul.f32 %v14776_v7, %v12926_v25 }
 0x7c5   : > { %8000 = vrot.lane.b32.xlu0 %v7956_v18, %s10218_s22  ;;  %7998 = vrot.lane.b32.xlu1 %v7955_v2, %s10218_s22  ;;  %v8284_v18 = vmul.f32 %v14734_v17, %v12926_v25 }
 0x7c7   : > { %v7515_v16 = vpop.permute.xlu0 %7514  ;;  %v7513_v36 = vpop.permute.xlu1 %7512 }
 0x7c8   : > { %9010 = vst.msk [vmem:[%s12951_s11 + $0x8a0] sm:$0xff] %vm5577_vm3, %v7515_v16  ;;  %9009 = vst.msk [vmem:[%s12951_s11 + $0x898] sm:$0xff] %vm5577_vm3, %v7513_v36  ;;  %v8287_v16 = vmul.f32 %v14746_v3, %v12915_v0  ;;  %v8286_v36 = vmul.f32 %v14748_v28, %v12926_v25  ;;  %v8295_v28 = vmul.f32 %v14802_v51, %v12915_v0 }
 0x7c9   : > { %8004 = vrot.lane.b32.xlu0 %v7958_v45, %s10218_s22  ;;  %8002 = vrot.lane.b32.xlu1 %v7957_v26, %s10218_s22 }
 0x7cb   : > { %v7519_v15 = vpop.permute.xlu0 %7518  ;;  %v7517_v62 = vpop.permute.xlu1 %7516 }
 0x7cc   : > { %9012 = vst.msk [vmem:[%s12951_s11 + $0x8b0] sm:$0xff] %vm5577_vm3, %v7519_v15  ;;  %9011 = vst.msk [vmem:[%s12951_s11 + $0x8a8] sm:$0xff] %vm5577_vm3, %v7517_v62  ;;  %v8288_v15 = vmul.f32 %v14762_v33, %v12926_v25 }
 0x7cd   : > { %8089 = vrot.lane.b32.xlu0 %v8057_v37, %s10222_s8  ;;  %8006 = vrot.lane.b32.xlu1 %v7959_v60, %s10218_s22  ;;  %v8291_v60 = vmul.f32 %v14774_v31, %v12915_v0  ;;  %s9861_s22 = smul.u32 51200, %s10200_s15  ;;  %s8381_s15 = scalar_lea.sflag [#allocation6], %s10452_s25 }
 0x7cf   : > { %v7523_v40 = vpop.permute.xlu0 %7522  ;;  %v7521_v32 = vpop.permute.xlu1 %7520  ;;  %s15036_s20 = scalar_lea.hbm %s15092_s3, %s9861_s22 }
 0x7d0   : > { %9014 = vst.msk [vmem:[%s12951_s11 + $0x8c0] sm:$0xff] %vm5577_vm3, %v7523_v40  ;;  %9013 = vst.msk [vmem:[%s12951_s11 + $0x8b8] sm:$0xff] %vm5577_vm3, %v7521_v32  ;;  %v8293_v32 = vmul.f32 %v14788_v61, %v12915_v0 }
 0x7d1   : > { %8093 = vrot.lane.b32.xlu0 %v8059_v30, %s10222_s8  ;;  %8091 = vrot.lane.b32.xlu1 %v8058_v14, %s10222_s8  ;;  %v8292_v30 = vmul.f32 %v14790_v12, %v12926_v25 }
 0x7d3   : > { %v7527_v22 = vpop.permute.xlu0 %7526  ;;  %v7525_v63 = vpop.permute.xlu1 %7524 }
 0x7d4   : > { %9016 = vst.msk [vmem:[%s12951_s11 + $0x8d0] sm:$0xff] %vm5577_vm3, %v7527_v22  ;;  %9015 = vst.msk [vmem:[%s12951_s11 + $0x8c8] sm:$0xff] %vm5577_vm3, %v7525_v63  ;;  %v8294_v22 = vmul.f32 %v14804_v53, %v12926_v25 }
 0x7d5   : > { %8097 = vrot.lane.b32.xlu0 %v8061_v27, %s10222_s8  ;;  %8095 = vrot.lane.b32.xlu1 %v8060_v13, %s10222_s8  ;;  %v8297_v13 = vmul.f32 %v14816_v23, %v12915_v0  ;;  %v8298_v0 = vmul.f32 %v14830_v19, %v12926_v25 }
 0x7d7   : > { %v7531_v57 = vpop.permute.xlu0 %7530  ;;  %v7529_v47 = vpop.permute.xlu1 %7528 }
 0x7d8   : > { %9018 = vst.msk [vmem:[%s12951_s11 + $0x8e0] sm:$0xff] %vm5577_vm3, %v7531_v57  ;;  %9017 = vst.msk [vmem:[%s12951_s11 + $0x8d8] sm:$0xff] %vm5577_vm3, %v7529_v47 }
 0x7d9   : > { %8101 = vrot.lane.b32.xlu0 %v8063_v41, %s10222_s8  ;;  %8099 = vrot.lane.b32.xlu1 %v8062_v50, %s10222_s8 }
 0x7db   : > { %v7535_v4 = vpop.permute.xlu0 %7534  ;;  %v7533_v52 = vpop.permute.xlu1 %7532 }
 0x7dc   : > { %9020 = vst.msk [vmem:[%s12951_s11 + $0x8f0] sm:$0xff] %vm5577_vm3, %v7535_v4  ;;  %9019 = vst.msk [vmem:[%s12951_s11 + $0x8e8] sm:$0xff] %vm5577_vm3, %v7533_v52 }
 0x7dd   : > { %8105 = vrot.lane.b32.xlu0 %v8065_v39, %s10222_s8  ;;  %8103 = vrot.lane.b32.xlu1 %v8064_v43, %s10222_s8 }
 0x7df   : > { %v7626_v5 = vpop.permute.xlu0 %7625  ;;  %v7537_v55 = vpop.permute.xlu1 %7536 }
 0x7e0   : > { %9022 = vst.msk [vmem:[%s12951_s11 + $0x900] sm:$0xff] %vm5577_vm3, %v7626_v5  ;;  %9021 = vst.msk [vmem:[%s12951_s11 + $0x8f8] sm:$0xff] %vm5577_vm3, %v7537_v55 }
 0x7e1   : > { %8109 = vrot.lane.b32.xlu0 %v8067_v46, %s10222_s8  ;;  %8107 = vrot.lane.b32.xlu1 %v8066_v35, %s10222_s8 }
 0x7e3   : > { %v7630_v29 = vpop.permute.xlu0 %7629  ;;  %v7628_v6 = vpop.permute.xlu1 %7627 }
 0x7e4   : > { %9024 = vst.msk [vmem:[%s12951_s11 + $0x910] sm:$0xff] %vm5577_vm3, %v7630_v29  ;;  %9023 = vst.msk [vmem:[%s12951_s11 + $0x908] sm:$0xff] %vm5577_vm3, %v7628_v6 }
 0x7e5   : > { %8113 = vrot.lane.b32.xlu0 %v8069_v38, %s10222_s8  ;;  %8111 = vrot.lane.b32.xlu1 %v8068_v48, %s10222_s8 }
 0x7e7   : > { %v7634_v54 = vpop.permute.xlu0 %7633  ;;  %v7632_v59 = vpop.permute.xlu1 %7631 }
 0x7e8   : > { %9026 = vst.msk [vmem:[%s12951_s11 + $0x920] sm:$0xff] %vm5577_vm3, %v7634_v54  ;;  %9025 = vst.msk [vmem:[%s12951_s11 + $0x918] sm:$0xff] %vm5577_vm3, %v7632_v59 }
 0x7e9   : > { %8117 = vrot.lane.b32.xlu0 %v8071_v24, %s10222_s8  ;;  %8115 = vrot.lane.b32.xlu1 %v8070_v20, %s10222_s8 }
 0x7eb   : > { %v7638_v21 = vpop.permute.xlu0 %7637  ;;  %v7636_v8 = vpop.permute.xlu1 %7635 }
 0x7ec   : > { %9028 = vst.msk [vmem:[%s12951_s11 + $0x930] sm:$0xff] %vm5577_vm3, %v7638_v21  ;;  %9027 = vst.msk [vmem:[%s12951_s11 + $0x928] sm:$0xff] %vm5577_vm3, %v7636_v8 }
 0x7ed   : > { %8315 = vrot.lane.b32.xlu0 %v8283_v42, %s10242_s28  ;;  %8119 = vrot.lane.b32.xlu1 %v8072_v58, %s10222_s8  ;;  %s8397_s8 = sshll.u32 %s12951_s11, 4  ;;  %s15038_s8 = int_to_ptr.vmem [resolvable:$true] %s8397_s8 }
 0x7ee   : > { %s10122_s24 = scalar_lea.vmem %s15038_s8, 51200  ;;  %p10129_p3 = scmp.lt.s32.totalorder %s15038_s8, %s10127_s26 }
 0x7ef   : > { %v7642_v56 = vpop.permute.xlu0 %7641  ;;  %v7640_v34 = vpop.permute.xlu1 %7639  ;;  %p10123_p8 = scmp.ne.s32.totalorder %s15038_s8, %s10122_s24  ;;  %p10130_p5 = scmp.lt.s32.totalorder %s10128_s30, %s10122_s24 }
 0x7f0   : > { %9030 = vst.msk [vmem:[%s12951_s11 + $0x940] sm:$0xff] %vm5577_vm3, %v7642_v56  ;;  %9029 = vst.msk [vmem:[%s12951_s11 + $0x938] sm:$0xff] %vm5577_vm3, %v7640_v34 }
 0x7f1   : > { %8319 = vrot.lane.b32.xlu0 %v8285_v1, %s10242_s28  ;;  %8317 = vrot.lane.b32.xlu1 %v8284_v18, %s10242_s28  ;;  %p10124_p1 = pnand %p10123_p8, %p15233_p12  ;;  %p10131_p9 = por %p10130_p5, %p10129_p3 }
 0x7f3   : > { %v7646_v49 = vpop.permute.xlu0 %7645  ;;  %v7644_v2 = vpop.permute.xlu1 %7643  ;;  %p10125_p10 = pneg %p10124_p1 }
 0x7f4   : > { %9032 = vst.msk [vmem:[%s12951_s11 + $0x950] sm:$0xff] %vm5577_vm3, %v7646_v49  ;;  %9031 = vst.msk [vmem:[%s12951_s11 + $0x948] sm:$0xff] %vm5577_vm3, %v7644_v2 }
 0x7f5   : > { %8323 = vrot.lane.b32.xlu0 %v8287_v16, %s10242_s28  ;;  %8321 = vrot.lane.b32.xlu1 %v8286_v36, %s10242_s28  ;;  %p10132_p2 = pnand %p10131_p9, %p10125_p10 }
 0x7f7   : > { %v7650_v45 = vpop.permute.xlu0 %7649  ;;  %v7648_v26 = vpop.permute.xlu1 %7647 }
 0x7f8   : > { %9034 = vst.msk [vmem:[%s12951_s11 + $0x960] sm:$0xff] %vm5577_vm3, %v7650_v45  ;;  %9033 = vst.msk [vmem:[%s12951_s11 + $0x958] sm:$0xff] %vm5577_vm3, %v7648_v26 }
 0x7f9   : > { %8327 = vrot.lane.b32.xlu0 %v8289_v9, %s10242_s28  ;;  %8325 = vrot.lane.b32.xlu1 %v8288_v15, %s10242_s28 }
 0x7fb   : > { %v7654_v62 = vpop.permute.xlu0 %7653  ;;  %v7652_v37 = vpop.permute.xlu1 %7651 }
 0x7fc   : > { %9036 = vst.msk [vmem:[%s12951_s11 + $0x970] sm:$0xff] %vm5577_vm3, %v7654_v62  ;;  %9035 = vst.msk [vmem:[%s12951_s11 + $0x968] sm:$0xff] %vm5577_vm3, %v7652_v37 }
 0x7fd   : > { %8331 = vrot.lane.b32.xlu0 %v8291_v60, %s10242_s28  ;;  %8329 = vrot.lane.b32.xlu1 %v8290_v10, %s10242_s28 }
 0x7ff   : > { %v7858_v17 = vpop.permute.xlu0 %7857  ;;  %v7656_v40 = vpop.permute.xlu1 %7655 }
 0x800   : > { %9054 = vst.msk [vmem:[%s12951_s11 + $0xa00] sm:$0xff] %vm5577_vm3, %v7858_v17  ;;  %9037 = vst.msk [vmem:[%s12951_s11 + $0x978] sm:$0xff] %vm5577_vm3, %v7656_v40 }
 0x801   : > { %8335 = vrot.lane.b32.xlu0 %v8293_v32, %s10242_s28  ;;  %8333 = vrot.lane.b32.xlu1 %v8292_v30, %s10242_s28 }
 0x803   : > { %v7862_v14 = vpop.permute.xlu0 %7861  ;;  %v7860_v3 = vpop.permute.xlu1 %7859 }
 0x804   : > { %9056 = vst.msk [vmem:[%s12951_s11 + $0xa10] sm:$0xff] %vm5577_vm3, %v7862_v14  ;;  %9055 = vst.msk [vmem:[%s12951_s11 + $0xa08] sm:$0xff] %vm5577_vm3, %v7860_v3 }
 0x805   : > { %8339 = vrot.lane.b32.xlu0 %v8295_v28, %s10242_s28  ;;  %8337 = vrot.lane.b32.xlu1 %v8294_v22, %s10242_s28 }
 0x807   : > { %v7866_v63 = vpop.permute.xlu0 %7865  ;;  %v7864_v27 = vpop.permute.xlu1 %7863 }
 0x808   : > { %9058 = vst.msk [vmem:[%s12951_s11 + $0xa20] sm:$0xff] %vm5577_vm3, %v7866_v63  ;;  %9057 = vst.msk [vmem:[%s12951_s11 + $0xa18] sm:$0xff] %vm5577_vm3, %v7864_v27 }
 0x809   : > { %8343 = vrot.lane.b32.xlu0 %v8297_v13, %s10242_s28  ;;  %8341 = vrot.lane.b32.xlu1 %v8296_v44, %s10242_s28 }
 0x80b   : > { %v7870_v33 = vpop.permute.xlu0 %7869  ;;  %v7868_v57 = vpop.permute.xlu1 %7867 }
 0x80c   : > { %9060 = vst.msk [vmem:[%s12951_s11 + $0xa30] sm:$0xff] %vm5577_vm3, %v7870_v33  ;;  %9059 = vst.msk [vmem:[%s12951_s11 + $0xa28] sm:$0xff] %vm5577_vm3, %v7868_v57 }
 0x80d   : > { %8345 = vrot.lane.b32.xlu1 %v8298_v0, %s10242_s28 }
 0x80f   : > { %v7874_v47 = vpop.permute.xlu0 %7873  ;;  %v7872_v41 = vpop.permute.xlu1 %7871 }
 0x810   : > { %9062 = vst.msk [vmem:[%s12951_s11 + $0xa40] sm:$0xff] %vm5577_vm3, %v7874_v47  ;;  %9061 = vst.msk [vmem:[%s12951_s11 + $0xa38] sm:$0xff] %vm5577_vm3, %v7872_v41 }
 0x813   : > { %v7878_v50 = vpop.permute.xlu0 %7877  ;;  %v7876_v31 = vpop.permute.xlu1 %7875 }
 0x814   : > { %9064 = vst.msk [vmem:[%s12951_s11 + $0xa50] sm:$0xff] %vm5577_vm3, %v7878_v50  ;;  %9063 = vst.msk [vmem:[%s12951_s11 + $0xa48] sm:$0xff] %vm5577_vm3, %v7876_v31 }
 0x817   : > { %v7882_v25 = vpop.permute.xlu0 %7881  ;;  %v7880_v7 = vpop.permute.xlu1 %7879 }
 0x818   : > { %9066 = vst.msk [vmem:[%s12951_s11 + $0xa60] sm:$0xff] %vm5577_vm3, %v7882_v25  ;;  %9065 = vst.msk [vmem:[%s12951_s11 + $0xa58] sm:$0xff] %vm5577_vm3, %v7880_v7 }
 0x81b   : > { %v7886_v4 = vpop.permute.xlu0 %7885  ;;  %v7884_v52 = vpop.permute.xlu1 %7883 }
 0x81c   : > { %9068 = vst.msk [vmem:[%s12951_s11 + $0xa70] sm:$0xff] %vm5577_vm3, %v7886_v4  ;;  %9067 = vst.msk [vmem:[%s12951_s11 + $0xa68] sm:$0xff] %vm5577_vm3, %v7884_v52 }
 0x81f   : > { %v7977_v39 = vpop.permute.xlu0 %7976  ;;  %v7888_v43 = vpop.permute.xlu1 %7887 }
 0x820   : > { %9070 = vst.msk [vmem:[%s12951_s11 + $0xa80] sm:$0xff] %vm5577_vm3, %v7977_v39  ;;  %9069 = vst.msk [vmem:[%s12951_s11 + $0xa78] sm:$0xff] %vm5577_vm3, %v7888_v43 }
 0x823   : > { %v7981_v61 = vpop.permute.xlu0 %7980  ;;  %v7979_v12 = vpop.permute.xlu1 %7978 }
 0x824   : > { %9072 = vst.msk [vmem:[%s12951_s11 + $0xa90] sm:$0xff] %vm5577_vm3, %v7981_v61  ;;  %9071 = vst.msk [vmem:[%s12951_s11 + $0xa88] sm:$0xff] %vm5577_vm3, %v7979_v12 }
 0x827   : > { %v7985_v5 = vpop.permute.xlu0 %7984  ;;  %v7983_v55 = vpop.permute.xlu1 %7982 }
 0x828   : > { %9074 = vst.msk [vmem:[%s12951_s11 + $0xaa0] sm:$0xff] %vm5577_vm3, %v7985_v5  ;;  %9073 = vst.msk [vmem:[%s12951_s11 + $0xa98] sm:$0xff] %vm5577_vm3, %v7983_v55 }
 0x82b   : > { %v7989_v46 = vpop.permute.xlu0 %7988  ;;  %v7987_v35 = vpop.permute.xlu1 %7986 }
 0x82c   : > { %9076 = vst.msk [vmem:[%s12951_s11 + $0xab0] sm:$0xff] %vm5577_vm3, %v7989_v46  ;;  %9075 = vst.msk [vmem:[%s12951_s11 + $0xaa8] sm:$0xff] %vm5577_vm3, %v7987_v35 }
 0x82f   : > { %v7993_v51 = vpop.permute.xlu0 %7992  ;;  %v7991_v53 = vpop.permute.xlu1 %7990 }
 0x830   : > { %9078 = vst.msk [vmem:[%s12951_s11 + $0xac0] sm:$0xff] %vm5577_vm3, %v7993_v51  ;;  %9077 = vst.msk [vmem:[%s12951_s11 + $0xab8] sm:$0xff] %vm5577_vm3, %v7991_v53 }
 0x833   : > { %v7997_v29 = vpop.permute.xlu0 %7996  ;;  %v7995_v6 = vpop.permute.xlu1 %7994 }
 0x834   : > { %9080 = vst.msk [vmem:[%s12951_s11 + $0xad0] sm:$0xff] %vm5577_vm3, %v7997_v29  ;;  %9079 = vst.msk [vmem:[%s12951_s11 + $0xac8] sm:$0xff] %vm5577_vm3, %v7995_v6 }
 0x837   : > { %v8001_v38 = vpop.permute.xlu0 %8000  ;;  %v7999_v48 = vpop.permute.xlu1 %7998 }
 0x838   : > { %9082 = vst.msk [vmem:[%s12951_s11 + $0xae0] sm:$0xff] %vm5577_vm3, %v8001_v38  ;;  %9081 = vst.msk [vmem:[%s12951_s11 + $0xad8] sm:$0xff] %vm5577_vm3, %v7999_v48 }
 0x83b   : > { %v8005_v23 = vpop.permute.xlu0 %8004  ;;  %v8003_v11 = vpop.permute.xlu1 %8002 }
 0x83c   : > { %9084 = vst.msk [vmem:[%s12951_s11 + $0xaf0] sm:$0xff] %vm5577_vm3, %v8005_v23  ;;  %9083 = vst.msk [vmem:[%s12951_s11 + $0xae8] sm:$0xff] %vm5577_vm3, %v8003_v11 }
 0x83f   : > { %v8090_v54 = vpop.permute.xlu0 %8089  ;;  %v8007_v59 = vpop.permute.xlu1 %8006 }
 0x840   : > { %9086 = vst.msk [vmem:[%s12951_s11 + $0xb00] sm:$0xff] %vm5577_vm3, %v8090_v54  ;;  %9085 = vst.msk [vmem:[%s12951_s11 + $0xaf8] sm:$0xff] %vm5577_vm3, %v8007_v59 }
 0x843   : > { %v8094_v24 = vpop.permute.xlu0 %8093  ;;  %v8092_v20 = vpop.permute.xlu1 %8091 }
 0x844   : > { %9088 = vst.msk [vmem:[%s12951_s11 + $0xb10] sm:$0xff] %vm5577_vm3, %v8094_v24  ;;  %9087 = vst.msk [vmem:[%s12951_s11 + $0xb08] sm:$0xff] %vm5577_vm3, %v8092_v20 }
 0x847   : > { %v8098_v19 = vpop.permute.xlu0 %8097  ;;  %v8096_v21 = vpop.permute.xlu1 %8095 }
 0x848   : > { %9090 = vst.msk [vmem:[%s12951_s11 + $0xb20] sm:$0xff] %vm5577_vm3, %v8098_v19  ;;  %9089 = vst.msk [vmem:[%s12951_s11 + $0xb18] sm:$0xff] %vm5577_vm3, %v8096_v21 }
 0x84b   : > { %v8102_v8 = vpop.permute.xlu0 %8101  ;;  %v8100_v42 = vpop.permute.xlu1 %8099 }
 0x84c   : > { %9092 = vst.msk [vmem:[%s12951_s11 + $0xb30] sm:$0xff] %vm5577_vm3, %v8102_v8  ;;  %9091 = vst.msk [vmem:[%s12951_s11 + $0xb28] sm:$0xff] %vm5577_vm3, %v8100_v42 }
 0x84f   : > { %v8106_v58 = vpop.permute.xlu0 %8105  ;;  %v8104_v56 = vpop.permute.xlu1 %8103 }
 0x850   : > { %9094 = vst.msk [vmem:[%s12951_s11 + $0xb40] sm:$0xff] %vm5577_vm3, %v8106_v58  ;;  %9093 = vst.msk [vmem:[%s12951_s11 + $0xb38] sm:$0xff] %vm5577_vm3, %v8104_v56 }
 0x853   : > { %v8110_v34 = vpop.permute.xlu0 %8109  ;;  %v8108_v1 = vpop.permute.xlu1 %8107 }
 0x854   : > { %9096 = vst.msk [vmem:[%s12951_s11 + $0xb50] sm:$0xff] %vm5577_vm3, %v8110_v34  ;;  %9095 = vst.msk [vmem:[%s12951_s11 + $0xb48] sm:$0xff] %vm5577_vm3, %v8108_v1 }
 0x857   : > { %v8114_v18 = vpop.permute.xlu0 %8113  ;;  %v8112_v49 = vpop.permute.xlu1 %8111 }
 0x858   : > { %9098 = vst.msk [vmem:[%s12951_s11 + $0xb60] sm:$0xff] %vm5577_vm3, %v8114_v18  ;;  %9097 = vst.msk [vmem:[%s12951_s11 + $0xb58] sm:$0xff] %vm5577_vm3, %v8112_v49 }
 0x85b   : > { %v8118_v2 = vpop.permute.xlu0 %8117  ;;  %v8116_v16 = vpop.permute.xlu1 %8115 }
 0x85c   : > { %9100 = vst.msk [vmem:[%s12951_s11 + $0xb70] sm:$0xff] %vm5577_vm3, %v8118_v2  ;;  %9099 = vst.msk [vmem:[%s12951_s11 + $0xb68] sm:$0xff] %vm5577_vm3, %v8116_v16 }
 0x85f   : > { %v8316_v36 = vpop.permute.xlu0 %8315  ;;  %v8120_v45 = vpop.permute.xlu1 %8119 }
 0x860   : > { %9118 = vst.msk [vmem:[%s12951_s11 + $0xc00] sm:$0xff] %vm5577_vm3, %v8316_v36  ;;  %9101 = vst.msk [vmem:[%s12951_s11 + $0xb78] sm:$0xff] %vm5577_vm3, %v8120_v45 }
 0x863   : > { %v8320_v26 = vpop.permute.xlu0 %8319  ;;  %v8318_v9 = vpop.permute.xlu1 %8317 }
 0x864   : > { %9120 = vst.msk [vmem:[%s12951_s11 + $0xc10] sm:$0xff] %vm5577_vm3, %v8320_v26  ;;  %9119 = vst.msk [vmem:[%s12951_s11 + $0xc08] sm:$0xff] %vm5577_vm3, %v8318_v9 }
 0x867   : > { %v8324_v15 = vpop.permute.xlu0 %8323  ;;  %v8322_v62 = vpop.permute.xlu1 %8321 }
 0x868   : > { %9122 = vst.msk [vmem:[%s12951_s11 + $0xc20] sm:$0xff] %vm5577_vm3, %v8324_v15  ;;  %9121 = vst.msk [vmem:[%s12951_s11 + $0xc18] sm:$0xff] %vm5577_vm3, %v8322_v62 }
 0x86b   : > { %v8328_v37 = vpop.permute.xlu0 %8327  ;;  %v8326_v60 = vpop.permute.xlu1 %8325 }
 0x86c   : > { %9124 = vst.msk [vmem:[%s12951_s11 + $0xc30] sm:$0xff] %vm5577_vm3, %v8328_v37  ;;  %9123 = vst.msk [vmem:[%s12951_s11 + $0xc28] sm:$0xff] %vm5577_vm3, %v8326_v60 }
 0x86f   : > { %v8332_v10 = vpop.permute.xlu0 %8331  ;;  %v8330_v17 = vpop.permute.xlu1 %8329 }
 0x870   : > { %9126 = vst.msk [vmem:[%s12951_s11 + $0xc40] sm:$0xff] %vm5577_vm3, %v8332_v10  ;;  %9125 = vst.msk [vmem:[%s12951_s11 + $0xc38] sm:$0xff] %vm5577_vm3, %v8330_v17 }
 0x873   : > { %v8336_v40 = vpop.permute.xlu0 %8335  ;;  %v8334_v32 = vpop.permute.xlu1 %8333 }
 0x874   : > { %9128 = vst.msk [vmem:[%s12951_s11 + $0xc50] sm:$0xff] %vm5577_vm3, %v8336_v40  ;;  %9127 = vst.msk [vmem:[%s12951_s11 + $0xc48] sm:$0xff] %vm5577_vm3, %v8334_v32 }
 0x877   : > { %v8340_v30 = vpop.permute.xlu0 %8339  ;;  %v8338_v14 = vpop.permute.xlu1 %8337 }
 0x878   : > { %9130 = vst.msk [vmem:[%s12951_s11 + $0xc60] sm:$0xff] %vm5577_vm3, %v8340_v30  ;;  %9129 = vst.msk [vmem:[%s12951_s11 + $0xc58] sm:$0xff] %vm5577_vm3, %v8338_v14 }
 0x87b   : > { %v8344_v3 = vpop.permute.xlu0 %8343  ;;  %v8342_v28 = vpop.permute.xlu1 %8341 }
 0x87c   : > { %9132 = vst.msk [vmem:[%s12951_s11 + $0xc70] sm:$0xff] %vm5577_vm3, %v8344_v3  ;;  %9131 = vst.msk [vmem:[%s12951_s11 + $0xc68] sm:$0xff] %vm5577_vm3, %v8342_v28 }
 0x87f   : > { %v8346_v22 = vpop.permute.xlu1 %8345 }
 0x880   : > { %9133 = vst.msk [vmem:[%s12951_s11 + $0xc78] sm:$0xff] %vm5577_vm3, %v8346_v22 }
 0x881   : > { %10135 = shalt.err (!%p10132_p2)
}
 0x882   : > { %s10136_s11 = scalar_lea.hbm %s15036_s20, 51200  ;;  %s10140_s7 = scalar_lea.hbm %s15092_s3, 102400 }
 0x883   : > { %p10137_p0 = scmp.ne.s32.totalorder %s15036_s20, %s10136_s11  ;;  %p10141_p6 = scmp.lt.u32.totalorder %s15036_s20, %s15092_s3 }
 0x884   : > { %p10142_p7 = scmp.lt.u32.totalorder %s10140_s7, %s10136_s11  ;;  %p10144_p8 = scmp.lt.u32.totalorder %s10136_s11, %s15036_s20 }
 0x885   : > { %p10138_p4 = pnand %p10137_p0, %p15233_p12 }
 0x886   : > { %p10143_p11 = por %p10142_p7, %p10141_p6 }
 0x887   : > { %p10139_p13 = pneg %p10138_p4 }
 0x888   : > { %p10145_p1 = por %p10144_p8, %p10143_p11 }
 0x88a   : > { %p10146_p10 = pnand %p10145_p1, %p10139_p13 }
 0x88c   : > { %10149 = shalt.err (!%p10146_p10)
}
 0x88d   : > { %s10244_s28 = smov 128   ;;  %s10245_s22 = smov 8  }
 0x88e   : > { %9872 = dma.vmem_to_hbm [thread:$0]  (%p15233_p12), %s15038_s8, 51200, %s15036_s20, %s8381_s15, %s10244_s28, %s10244_s28, %s10245_s22  }
 0x88f PF: > { %s8412_s29 = sand.u32 1, %s10188_s12   ;;  %p15234_p3 = scmp.ne.s32.totalorder %s15142_s23, 0 }
 0x890   : > { %p15235_p5 = scmp.ge.s32.totalorder %s10208_s17, 2  ;;  %s8413_s4 = scalar_lea.sflag [#allocation6], %s8412_s29 }
 0x892   : > { %p9886_p9 = pnand %p15235_p5, %p15234_p3 }
 0x894   : > { %10183 = dma.done.wait (!%p9886_p9), %s8413_s4, 51200  }
 0x895   : > { %10185 = vsyncadd (!%p9886_p9), %s8413_s4, 4294916096  ;;  %s20_s17 = sadd.s32 1, %s10208_s17   ;;  %s15236_s12 = smov %s10192_s13 }
 0x896   : > { %p17_p2 = scmp.ge.s32.totalorder %s20_s17, 4   ;;  %s15237_s13 = smov %s10196_s14 }
 0x897   : > { %s15238_s14 = smov %s10411_s18  ;;  %s15239_s15 = smov %s10204_s16 }
 0x898   : > { %s15240_s16 = smov %s15242_s19  ;;  %19 = sbr.rel (!%p17_p2) target bundleno = 7 (0x7), region = 148 }
 0x89f   :  { %8418 = vsyncpa [#allocation5], 1 }
 0x8a0   :  { %8420 = vsyncpa [#allocation5 + $0x1], 1 }
 0x8a1   :  { %8421 = vsyncpa [#allocation8], 1 }
 0x8a2   :  { %8422 = vsyncpa [#allocation6], 1 }
 0x8a3   :  { %8424 = vsyncpa [#allocation6 + $0x1], 1 }

</bundles_post_ra>
